<compile_context>
chip_gen: v7x
topology: tpu7x:2x2x1
jax: 0.10.0
libtpu: 0.0.40
codegen_flags: <defaults>
</compile_context>

<pallas_src>
import jax
import jax.numpy as jnp
from jax.experimental import pallas as pl
from jax.experimental.pallas import tpu as pltpu

LANES = 128
H_IN = W_IN = 32
CH1, CW1 = 30, 30          # conv1 output spatial
PH1, PW1 = 15, 15          # pool1 output spatial
CH2, CW2 = 13, 13          # conv2 output spatial
PH2, PW2 = 6, 6            # pool2 output spatial (floor 13 -> 6)
C2_PACK = 8                # conv2 per-tap channel block (6 real + 2 zero)
K2 = 9 * C2_PACK           # 72 packed K for conv2
KFC1 = PH2 * PW2 * 16      # 576 packed K for fc1


# ------------------------------ fused kernel -------------------------------

def _lenet_kernel(x_ref, w1_ref, b1_ref, w2_ref, b2_ref,
                  fc1w_ref, fc1b_ref, fc2w_ref, fc2b_ref, fc3w_ref, fc3b_ref,
                  out_ref,
                  xb_scr, h1_scr, t1_scr, h1p_scr, h2_scr, t2_scr):
    f32 = jnp.float32
    bf16 = jnp.bfloat16

    # ---- conv1 (1->6 ch, 3x3 valid): broadcast once + 9 shifted slab FMAs ---
    xb_scr[...] = jnp.broadcast_to(x_ref[0, :, :, :], (H_IN, W_IN, LANES))
    acc = None
    for i in range(3):
        for j in range(3):
            term = xb_scr[pl.ds(i, CH1), pl.ds(j, CW1), :] * w1_ref[3 * i + j]
            acc = term if acc is None else acc + term
    h1_scr[...] = acc                                            # (30,30,128)

    # ---- 2x2/2 max-pool, then bias + ReLU (commute with max) ----------------
    t1_scr[...] = jnp.maximum(h1_scr[:, pl.ds(0, PW1, 2), :],
                              h1_scr[:, pl.ds(1, PW1, 2), :])    # (30,15,128)
    pooled1 = jnp.maximum(t1_scr[pl.ds(0, PH1, 2), :, :],
                          t1_scr[pl.ds(1, PH1, 2), :, :])        # (15,15,128)
    h1p_scr[...] = jnp.maximum(pooled1 + b1_ref[...], 0.0)

    # ---- conv2 (6->16 ch): packed-K im2col + ONE (169,72)@(72,128) matmul ---
    # lane index of the packed LHS: tap*8 + c  (tap = 3i+j, c = input channel)
    pieces = []
    for i in range(3):
        for j in range(3):
            win = h1p_scr[pl.ds(i, CH2), pl.ds(j, CW2), :]       # (13,13,128)
            pieces.append(win[:, :, :C2_PACK])                    # (13,13,8)
    lhs = jnp.concatenate(pieces, axis=-1)                        # (13,13,72)
    lhs2 = lhs.reshape(CH2 * CW2, K2).astype(bf16)                # (169,72)
    out2 = jnp.dot(lhs2, w2_ref[...], preferred_element_type=f32)  # (169,128)
    h2_scr[...] = out2.reshape(CH2, CW2, LANES)

    # ---- 2x2/2 max-pool (floor 13->6), bias + ReLU ---------------------------
    t2_scr[...] = jnp.maximum(h2_scr[:, pl.ds(0, PW2, 2), :],
                              h2_scr[:, pl.ds(1, PW2, 2), :])     # (13,6,128)
    pooled2 = jnp.maximum(t2_scr[pl.ds(0, PH2, 2), :, :],
                          t2_scr[pl.ds(1, PH2, 2), :, :])         # (6,6,128)
    p2 = jnp.maximum(pooled2 + b2_ref[...], 0.0)                  # (6,6,128)

    # ---- flatten to a lane-dense (1,576) row; q = (h*6+w)*16 + c ------------
    # (the PyTorch NCHW .view(-1,576) ordering is baked into fc1w's rows)
    flat = jnp.concatenate(
        [p2[h, w:w + 1, :16] for h in range(PH2) for w in range(PW2)], axis=-1)

    # ---- fc1 -> fc2 -> fc3: single MXU matmul each, f32 accumulation --------
    a1 = jnp.maximum(jnp.dot(flat.astype(bf16), fc1w_ref[...],
                             preferred_element_type=f32) + fc1b_ref[...], 0.0)
    a2 = jnp.maximum(jnp.dot(a1.astype(bf16), fc2w_ref[...],
                             preferred_element_type=f32) + fc2b_ref[...], 0.0)
    logits = jnp.dot(a2.astype(bf16), fc3w_ref[...],
                     preferred_element_type=f32) + fc3b_ref[...]
    out_ref[...] = logits.reshape(1, 1, LANES).astype(out_ref.dtype)


# ------------------------------ host wrappers -------------------------------

def net_forward(x, fp):
    """x: (N, 1, 32, 32) f32 NCHW; fp: prepared (packed / padded) params."""
    N, C, H, W = x.shape
    assert C == 1 and H == H_IN and W == W_IN, "Net expects (N, 1, 32, 32)"

    xcl = jnp.transpose(x.astype(jnp.float32), (0, 2, 3, 1))  # NHWC (C=1)
    inputs = (xcl, fp["w1"], fp["b1"], fp["w2"], fp["b2"],
              fp["fc1w"], fp["fc1b"], fp["fc2w"], fp["fc2b"],
              fp["fc3w"], fp["fc3b"])

    def const_spec(shape):
        nd = len(shape)
        return pl.BlockSpec(shape, lambda n, _nd=nd: (0,) * _nd)

    in_specs = [pl.BlockSpec((1, H_IN, W_IN, 1), lambda n: (n, 0, 0, 0))]
    in_specs += [const_spec(a.shape) for a in inputs[1:]]

    out = pl.pallas_call(
        _lenet_kernel,
        out_shape=jax.ShapeDtypeStruct((N, 1, LANES), jnp.float32),
        grid=(N,),
        in_specs=in_specs,
        out_specs=pl.BlockSpec((1, 1, LANES), lambda n: (n, 0, 0)),
        scratch_shapes=[
            pltpu.VMEM((H_IN, W_IN, LANES), jnp.float32),   # broadcast input
            pltpu.VMEM((CH1, CW1, LANES), jnp.float32),     # conv1 pre-pool
            pltpu.VMEM((CH1, PW1, LANES), jnp.float32),     # pool1 W-stage
            pltpu.VMEM((PH1, PW1, LANES), jnp.float32),     # pool1 result
            pltpu.VMEM((CH2, CW2, LANES), jnp.float32),     # conv2 pre-pool
            pltpu.VMEM((CH2, PW2, LANES), jnp.float32),     # pool2 W-stage
        ],
        compiler_params=pltpu.CompilerParams(
            dimension_semantics=("parallel",)),
    )(*inputs)
    return out[:, 0, :10]


def init_params(key):
    ks = jax.random.split(key, 10)

    def uniform(k, shape, fan_in):
        bound = 1.0 / jnp.sqrt(float(fan_in))
        return jax.random.uniform(k, shape, jnp.float32, -bound, bound)

    p = {}
    p["w1"] = uniform(ks[0], (6, 1, 3, 3), 1 * 3 * 3)            # Conv2d(1, 6, 3)
    p["b1"] = uniform(ks[1], (6,), 1 * 3 * 3)
    p["w2"] = uniform(ks[2], (16, 6, 3, 3), 6 * 3 * 3)           # Conv2d(6, 16, 3)
    p["b2"] = uniform(ks[3], (16,), 6 * 3 * 3)
    p["fc1_w"] = uniform(ks[4], (16 * 6 * 6, 120), 16 * 6 * 6)   # stored (in, out)
    p["fc1_b"] = uniform(ks[5], (120,), 16 * 6 * 6)
    p["fc2_w"] = uniform(ks[6], (120, 84), 120)
    p["fc2_b"] = uniform(ks[7], (84,), 120)
    p["fc3_w"] = uniform(ks[8], (84, 10), 84)
    p["fc3_b"] = uniform(ks[9], (10,), 84)
    return p


def prepare_params(p):
    """One-time weight repack: tap-major conv1 rows (f32, VPU path); conv2
    packed to a single K=72 matrix; fc1 rows permuted to the kernel's
    (h*6+w)*16+c flatten order; MXU weights in bf16, everything else f32."""
    f32, bf16 = jnp.float32, jnp.bfloat16

    def pad2(a, rows, cols, dtype):
        z = jnp.zeros((rows, cols), f32)
        z = z.at[:a.shape[0], :a.shape[1]].set(a.astype(f32))
        return z.astype(dtype)

    # conv1: row 3i+j holds the 6 output-channel weights for tap (i,j).
    w1t = p["w1"].reshape(6, 9).T                                    # (9, 6)
    # conv2: packed row tap*8 + c  (channels 6,7 of each tap are zero pad).
    w2t = jnp.transpose(p["w2"], (2, 3, 1, 0)).reshape(9, 6, 16)     # [tap,c,o]
    w2pk = jnp.zeros((9, C2_PACK, 16), f32).at[:, :6, :].set(w2t.astype(f32))
    w2pk = w2pk.reshape(K2, 16)
    # fc1: row (h*6+w)*16 + c  <-  PyTorch flatten index c*36 + h*6 + w.
    fc1t = (p["fc1_w"].reshape(16, PH2, PW2, 120)
            .transpose(1, 2, 0, 3).reshape(KFC1, 120))
    return dict(
        w1=pad2(w1t, 9, LANES, f32),
        b1=pad2(p["b1"].reshape(1, 6), 1, LANES, f32),
        w2=pad2(w2pk, K2, LANES, bf16),
        b2=pad2(p["b2"].reshape(1, 16), 1, LANES, f32),
        fc1w=pad2(fc1t, KFC1, LANES, bf16),
        fc1b=pad2(p["fc1_b"].reshape(1, 120), 1, LANES, f32),
        fc2w=pad2(p["fc2_w"], LANES, LANES, bf16),
        fc2b=pad2(p["fc2_b"].reshape(1, 84), 1, LANES, f32),
        fc3w=pad2(p["fc3_w"], LANES, LANES, bf16),
        fc3b=pad2(p["fc3_b"].reshape(1, 10), 1, LANES, f32),
    )


def net_forward_reference(x, p):
    """Plain-JAX f32 reference of the PyTorch module (sanity cross-check)."""
    def conv(v, w, b):
        y = jax.lax.conv_general_dilated(
            v, w, (1, 1), "VALID", dimension_numbers=("NCHW", "OIHW", "NCHW"))
        return y + b[None, :, None, None]

    def pool(v):
        n, c, h, w = v.shape
        ho, wo = h // 2, w // 2
        return v[:, :, :2 * ho, :2 * wo].reshape(n, c, ho, 2, wo, 2).max((3, 5))

    h = pool(jax.nn.relu(conv(x, p["w1"], p["b1"])))
    h = pool(jax.nn.relu(conv(h, p["w2"], p["b2"])))
    h = h.reshape(h.shape[0], -1)
    h = jax.nn.relu(h @ p["fc1_w"] + p["fc1_b"])
    h = jax.nn.relu(h @ p["fc2_w"] + p["fc2_b"])
    return h @ p["fc3_w"] + p["fc3_b"]


if __name__ == "__main__":
    key = jax.random.PRNGKey(0)
    pkey, xkey = jax.random.split(key)
    params = init_params(pkey)
    fused_params = prepare_params(params)

    # fc1 expects 16*6*6 features -> spatial input must be 32x32, 1 channel.
    x = jax.random.normal(xkey, (2, 1, 32, 32), dtype=jnp.float32)

    out = jax.jit(net_forward)(x, fused_params)
    out = jax.block_until_ready(out)
    assert out.shape == (2, 10) and out.dtype == jnp.float32

    ref = net_forward_reference(x, params)
    max_err = float(jnp.max(jnp.abs(out - ref)))
    # MXU path runs in bf16 with f32 accumulation -> small, bounded deviation.
    assert max_err < 2e-2, f"kernel deviates from reference: max|err|={max_err}"
    print("KERNEL_OK")
</pallas_src>

<mosaic_0001>
module attributes {stable_mosaic.version = 11 : i64} {
  func.func @_lenet_kernel(%arg0: i32, %arg1: memref<1x32x32x1xf32, #tpu.memory_space<vmem>>, %arg2: memref<9x128xf32, #tpu.memory_space<vmem>>, %arg3: memref<1x128xf32, #tpu.memory_space<vmem>>, %arg4: memref<72x128xbf16, #tpu.memory_space<vmem>>, %arg5: memref<1x128xf32, #tpu.memory_space<vmem>>, %arg6: memref<576x128xbf16, #tpu.memory_space<vmem>>, %arg7: memref<1x128xf32, #tpu.memory_space<vmem>>, %arg8: memref<128x128xbf16, #tpu.memory_space<vmem>>, %arg9: memref<1x128xf32, #tpu.memory_space<vmem>>, %arg10: memref<128x128xbf16, #tpu.memory_space<vmem>>, %arg11: memref<1x128xf32, #tpu.memory_space<vmem>>, %arg12: memref<1x1x128xf32, #tpu.memory_space<vmem>>, %arg13: memref<32x32x128xf32, #tpu.memory_space<vmem>>, %arg14: memref<30x30x128xf32, #tpu.memory_space<vmem>>, %arg15: memref<30x15x128xf32, #tpu.memory_space<vmem>>, %arg16: memref<15x15x128xf32, #tpu.memory_space<vmem>>, %arg17: memref<13x13x128xf32, #tpu.memory_space<vmem>>, %arg18: memref<13x6x128xf32, #tpu.memory_space<vmem>>) attributes {dimension_semantics = [#tpu.dimension_semantics<parallel>], iteration_bounds = array<i64: 2>, scalar_prefetch = 0 : i64, scratch_operands = 6 : i64, tpu.core_type = #tpu.core_type<tc>, window_params = [{transform_indices = @transform_0, window_bounds = array<i64: 1, 32, 32, 1>}, {pipeline_mode = #tpu.pipeline_mode<synchronous>, transform_indices = @transform_1, window_bounds = array<i64: 9, 128>}, {pipeline_mode = #tpu.pipeline_mode<synchronous>, transform_indices = @transform_2, window_bounds = array<i64: 1, 128>}, {pipeline_mode = #tpu.pipeline_mode<synchronous>, transform_indices = @transform_3, window_bounds = array<i64: 72, 128>}, {pipeline_mode = #tpu.pipeline_mode<synchronous>, transform_indices = @transform_4, window_bounds = array<i64: 1, 128>}, {pipeline_mode = #tpu.pipeline_mode<synchronous>, transform_indices = @transform_5, window_bounds = array<i64: 576, 128>}, {pipeline_mode = #tpu.pipeline_mode<synchronous>, transform_indices = @transform_6, window_bounds = array<i64: 1, 128>}, {pipeline_mode = #tpu.pipeline_mode<synchronous>, transform_indices = @transform_7, window_bounds = array<i64: 128, 128>}, {pipeline_mode = #tpu.pipeline_mode<synchronous>, transform_indices = @transform_8, window_bounds = array<i64: 1, 128>}, {pipeline_mode = #tpu.pipeline_mode<synchronous>, transform_indices = @transform_9, window_bounds = array<i64: 128, 128>}, {pipeline_mode = #tpu.pipeline_mode<synchronous>, transform_indices = @transform_10, window_bounds = array<i64: 1, 128>}, {transform_indices = @transform_11, window_bounds = array<i64: 1, 1, 128>}]} {
    %c0 = arith.constant 0 : index
    %c0_0 = arith.constant 0 : index
    %c0_1 = arith.constant 0 : index
    %c0_2 = arith.constant 0 : index
    %0 = vector.load %arg1[%c0, %c0_0, %c0_1, %c0_2] : memref<1x32x32x1xf32, #tpu.memory_space<vmem>>, vector<1x32x32x1xf32>
    %1 = vector.shape_cast %0 : vector<1x32x32x1xf32> to vector<32x32x1xf32>
    %2 = vector.shape_cast %1 : vector<32x32x1xf32> to vector<32x32x1xf32>
    %3 = vector.broadcast %2 : vector<32x32x1xf32> to vector<32x32x128xf32>
    %c0_3 = arith.constant 0 : index
    %c0_4 = arith.constant 0 : index
    %c0_5 = arith.constant 0 : index
    %4 = vector.load %arg13[%c0_3, %c0_4, %c0_5] : memref<32x32x128xf32, #tpu.memory_space<vmem>>, vector<32x32x128xf32>
    tpu.vector_store %arg13[%c0_3, %c0_4, %c0_5], %3 {strides = array<i32>} : memref<32x32x128xf32, #tpu.memory_space<vmem>>, vector<32x32x128xf32>,
    %c0_6 = arith.constant 0 : index
    %c0_7 = arith.constant 0 : index
    %c0_8 = arith.constant 0 : index
    %5 = vector.load %arg13[%c0_6, %c0_7, %c0_8] : memref<32x32x128xf32, #tpu.memory_space<vmem>>, vector<30x30x128xf32>
    %c0_9 = arith.constant 0 : index
    %c0_10 = arith.constant 0 : index
    %6 = vector.load %arg2[%c0_9, %c0_10] : memref<9x128xf32, #tpu.memory_space<vmem>>, vector<1x128xf32>
    %7 = vector.shape_cast %6 : vector<1x128xf32> to vector<128xf32>
    %8 = vector.shape_cast %7 : vector<128xf32> to vector<1x1x128xf32>
    %9 = vector.broadcast %8 : vector<1x1x128xf32> to vector<30x30x128xf32>
    %10 = arith.mulf %5, %9 : vector<30x30x128xf32>
    %c0_11 = arith.constant 0 : index
    %c1 = arith.constant 1 : index
    %c0_12 = arith.constant 0 : index
    %11 = vector.load %arg13[%c0_11, %c1, %c0_12] : memref<32x32x128xf32, #tpu.memory_space<vmem>>, vector<30x30x128xf32>
    %c1_13 = arith.constant 1 : index
    %c0_14 = arith.constant 0 : index
    %12 = vector.load %arg2[%c1_13, %c0_14] : memref<9x128xf32, #tpu.memory_space<vmem>>, vector<1x128xf32>
    %13 = vector.shape_cast %12 : vector<1x128xf32> to vector<128xf32>
    %14 = vector.shape_cast %13 : vector<128xf32> to vector<1x1x128xf32>
    %15 = vector.broadcast %14 : vector<1x1x128xf32> to vector<30x30x128xf32>
    %16 = arith.mulf %11, %15 : vector<30x30x128xf32>
    %17 = arith.addf %10, %16 : vector<30x30x128xf32>
    %c0_15 = arith.constant 0 : index
    %c2 = arith.constant 2 : index
    %c0_16 = arith.constant 0 : index
    %18 = vector.load %arg13[%c0_15, %c2, %c0_16] : memref<32x32x128xf32, #tpu.memory_space<vmem>>, vector<30x30x128xf32>
    %c2_17 = arith.constant 2 : index
    %c0_18 = arith.constant 0 : index
    %19 = vector.load %arg2[%c2_17, %c0_18] : memref<9x128xf32, #tpu.memory_space<vmem>>, vector<1x128xf32>
    %20 = vector.shape_cast %19 : vector<1x128xf32> to vector<128xf32>
    %21 = vector.shape_cast %20 : vector<128xf32> to vector<1x1x128xf32>
    %22 = vector.broadcast %21 : vector<1x1x128xf32> to vector<30x30x128xf32>
    %23 = arith.mulf %18, %22 : vector<30x30x128xf32>
    %24 = arith.addf %17, %23 : vector<30x30x128xf32>
    %c1_19 = arith.constant 1 : index
    %c0_20 = arith.constant 0 : index
    %c0_21 = arith.constant 0 : index
    %25 = vector.load %arg13[%c1_19, %c0_20, %c0_21] : memref<32x32x128xf32, #tpu.memory_space<vmem>>, vector<30x30x128xf32>
    %c3 = arith.constant 3 : index
    %c0_22 = arith.constant 0 : index
    %26 = vector.load %arg2[%c3, %c0_22] : memref<9x128xf32, #tpu.memory_space<vmem>>, vector<1x128xf32>
    %27 = vector.shape_cast %26 : vector<1x128xf32> to vector<128xf32>
    %28 = vector.shape_cast %27 : vector<128xf32> to vector<1x1x128xf32>
    %29 = vector.broadcast %28 : vector<1x1x128xf32> to vector<30x30x128xf32>
    %30 = arith.mulf %25, %29 : vector<30x30x128xf32>
    %31 = arith.addf %24, %30 : vector<30x30x128xf32>
    %c1_23 = arith.constant 1 : index
    %c1_24 = arith.constant 1 : index
    %c0_25 = arith.constant 0 : index
    %32 = vector.load %arg13[%c1_23, %c1_24, %c0_25] : memref<32x32x128xf32, #tpu.memory_space<vmem>>, vector<30x30x128xf32>
    %c4 = arith.constant 4 : index
    %c0_26 = arith.constant 0 : index
    %33 = vector.load %arg2[%c4, %c0_26] : memref<9x128xf32, #tpu.memory_space<vmem>>, vector<1x128xf32>
    %34 = vector.shape_cast %33 : vector<1x128xf32> to vector<128xf32>
    %35 = vector.shape_cast %34 : vector<128xf32> to vector<1x1x128xf32>
    %36 = vector.broadcast %35 : vector<1x1x128xf32> to vector<30x30x128xf32>
    %37 = arith.mulf %32, %36 : vector<30x30x128xf32>
    %38 = arith.addf %31, %37 : vector<30x30x128xf32>
    %c1_27 = arith.constant 1 : index
    %c2_28 = arith.constant 2 : index
    %c0_29 = arith.constant 0 : index
    %39 = vector.load %arg13[%c1_27, %c2_28, %c0_29] : memref<32x32x128xf32, #tpu.memory_space<vmem>>, vector<30x30x128xf32>
    %c5 = arith.constant 5 : index
    %c0_30 = arith.constant 0 : index
    %40 = vector.load %arg2[%c5, %c0_30] : memref<9x128xf32, #tpu.memory_space<vmem>>, vector<1x128xf32>
    %41 = vector.shape_cast %40 : vector<1x128xf32> to vector<128xf32>
    %42 = vector.shape_cast %41 : vector<128xf32> to vector<1x1x128xf32>
    %43 = vector.broadcast %42 : vector<1x1x128xf32> to vector<30x30x128xf32>
    %44 = arith.mulf %39, %43 : vector<30x30x128xf32>
    %45 = arith.addf %38, %44 : vector<30x30x128xf32>
    %c2_31 = arith.constant 2 : index
    %c0_32 = arith.constant 0 : index
    %c0_33 = arith.constant 0 : index
    %46 = vector.load %arg13[%c2_31, %c0_32, %c0_33] : memref<32x32x128xf32, #tpu.memory_space<vmem>>, vector<30x30x128xf32>
    %c6 = arith.constant 6 : index
    %c0_34 = arith.constant 0 : index
    %47 = vector.load %arg2[%c6, %c0_34] : memref<9x128xf32, #tpu.memory_space<vmem>>, vector<1x128xf32>
    %48 = vector.shape_cast %47 : vector<1x128xf32> to vector<128xf32>
    %49 = vector.shape_cast %48 : vector<128xf32> to vector<1x1x128xf32>
    %50 = vector.broadcast %49 : vector<1x1x128xf32> to vector<30x30x128xf32>
    %51 = arith.mulf %46, %50 : vector<30x30x128xf32>
    %52 = arith.addf %45, %51 : vector<30x30x128xf32>
    %c2_35 = arith.constant 2 : index
    %c1_36 = arith.constant 1 : index
    %c0_37 = arith.constant 0 : index
    %53 = vector.load %arg13[%c2_35, %c1_36, %c0_37] : memref<32x32x128xf32, #tpu.memory_space<vmem>>, vector<30x30x128xf32>
    %c7 = arith.constant 7 : index
    %c0_38 = arith.constant 0 : index
    %54 = vector.load %arg2[%c7, %c0_38] : memref<9x128xf32, #tpu.memory_space<vmem>>, vector<1x128xf32>
    %55 = vector.shape_cast %54 : vector<1x128xf32> to vector<128xf32>
    %56 = vector.shape_cast %55 : vector<128xf32> to vector<1x1x128xf32>
    %57 = vector.broadcast %56 : vector<1x1x128xf32> to vector<30x30x128xf32>
    %58 = arith.mulf %53, %57 : vector<30x30x128xf32>
    %59 = arith.addf %52, %58 : vector<30x30x128xf32>
    %c2_39 = arith.constant 2 : index
    %c2_40 = arith.constant 2 : index
    %c0_41 = arith.constant 0 : index
    %60 = vector.load %arg13[%c2_39, %c2_40, %c0_41] : memref<32x32x128xf32, #tpu.memory_space<vmem>>, vector<30x30x128xf32>
    %c8 = arith.constant 8 : index
    %c0_42 = arith.constant 0 : index
    %61 = vector.load %arg2[%c8, %c0_42] : memref<9x128xf32, #tpu.memory_space<vmem>>, vector<1x128xf32>
    %62 = vector.shape_cast %61 : vector<1x128xf32> to vector<128xf32>
    %63 = vector.shape_cast %62 : vector<128xf32> to vector<1x1x128xf32>
    %64 = vector.broadcast %63 : vector<1x1x128xf32> to vector<30x30x128xf32>
    %65 = arith.mulf %60, %64 : vector<30x30x128xf32>
    %66 = arith.addf %59, %65 : vector<30x30x128xf32>
    %c0_43 = arith.constant 0 : index
    %c0_44 = arith.constant 0 : index
    %c0_45 = arith.constant 0 : index
    %67 = vector.load %arg14[%c0_43, %c0_44, %c0_45] : memref<30x30x128xf32, #tpu.memory_space<vmem>>, vector<30x30x128xf32>
    tpu.vector_store %arg14[%c0_43, %c0_44, %c0_45], %66 {strides = array<i32>} : memref<30x30x128xf32, #tpu.memory_space<vmem>>, vector<30x30x128xf32>,
    %c0_46 = arith.constant 0 : index
    %c0_47 = arith.constant 0 : index
    %c0_48 = arith.constant 0 : index
    %68 = tpu.strided_load %arg14[%c0_46, %c0_47, %c0_48] {strides = array<i32: 1, 2, 1>} : memref<30x30x128xf32, #tpu.memory_space<vmem>>, vector<30x15x128xf32>
    %c0_49 = arith.constant 0 : index
    %c1_50 = arith.constant 1 : index
    %c0_51 = arith.constant 0 : index
    %69 = tpu.strided_load %arg14[%c0_49, %c1_50, %c0_51] {strides = array<i32: 1, 2, 1>} : memref<30x30x128xf32, #tpu.memory_space<vmem>>, vector<30x15x128xf32>
    %70 = arith.maximumf %68, %69 : vector<30x15x128xf32>
    %c0_52 = arith.constant 0 : index
    %c0_53 = arith.constant 0 : index
    %c0_54 = arith.constant 0 : index
    %71 = vector.load %arg15[%c0_52, %c0_53, %c0_54] : memref<30x15x128xf32, #tpu.memory_space<vmem>>, vector<30x15x128xf32>
    tpu.vector_store %arg15[%c0_52, %c0_53, %c0_54], %70 {strides = array<i32>} : memref<30x15x128xf32, #tpu.memory_space<vmem>>, vector<30x15x128xf32>,
    %c0_55 = arith.constant 0 : index
    %c0_56 = arith.constant 0 : index
    %c0_57 = arith.constant 0 : index
    %72 = tpu.strided_load %arg15[%c0_55, %c0_56, %c0_57] {strides = array<i32: 2, 1, 1>} : memref<30x15x128xf32, #tpu.memory_space<vmem>>, vector<15x15x128xf32>
    %c1_58 = arith.constant 1 : index
    %c0_59 = arith.constant 0 : index
    %c0_60 = arith.constant 0 : index
    %73 = tpu.strided_load %arg15[%c1_58, %c0_59, %c0_60] {strides = array<i32: 2, 1, 1>} : memref<30x15x128xf32, #tpu.memory_space<vmem>>, vector<15x15x128xf32>
    %74 = arith.maximumf %72, %73 : vector<15x15x128xf32>
    %c0_61 = arith.constant 0 : index
    %c0_62 = arith.constant 0 : index
    %75 = vector.load %arg3[%c0_61, %c0_62] : memref<1x128xf32, #tpu.memory_space<vmem>>, vector<1x128xf32>
    %76 = vector.shape_cast %75 : vector<1x128xf32> to vector<1x1x128xf32>
    %77 = vector.broadcast %76 : vector<1x1x128xf32> to vector<15x15x128xf32>
    %78 = arith.addf %74, %77 : vector<15x15x128xf32>
    %cst = arith.constant 0.000000e+00 : f32
    %79 = vector.broadcast %cst : f32 to vector<15x15x128xf32>
    %80 = arith.maximumf %78, %79 : vector<15x15x128xf32>
    %c0_63 = arith.constant 0 : index
    %c0_64 = arith.constant 0 : index
    %c0_65 = arith.constant 0 : index
    %81 = vector.load %arg16[%c0_63, %c0_64, %c0_65] : memref<15x15x128xf32, #tpu.memory_space<vmem>>, vector<15x15x128xf32>
    tpu.vector_store %arg16[%c0_63, %c0_64, %c0_65], %80 {strides = array<i32>} : memref<15x15x128xf32, #tpu.memory_space<vmem>>, vector<15x15x128xf32>,
    %c0_66 = arith.constant 0 : index
    %c0_67 = arith.constant 0 : index
    %c0_68 = arith.constant 0 : index
    %82 = vector.load %arg16[%c0_66, %c0_67, %c0_68] : memref<15x15x128xf32, #tpu.memory_space<vmem>>, vector<13x13x128xf32>
    %83 = vector.extract_strided_slice %82 {offsets = [0, 0, 0], sizes = [13, 13, 8], strides = [1, 1, 1]} : vector<13x13x128xf32> to vector<13x13x8xf32>
    %c0_69 = arith.constant 0 : index
    %c1_70 = arith.constant 1 : index
    %c0_71 = arith.constant 0 : index
    %84 = vector.load %arg16[%c0_69, %c1_70, %c0_71] : memref<15x15x128xf32, #tpu.memory_space<vmem>>, vector<13x13x128xf32>
    %85 = vector.extract_strided_slice %84 {offsets = [0, 0, 0], sizes = [13, 13, 8], strides = [1, 1, 1]} : vector<13x13x128xf32> to vector<13x13x8xf32>
    %c0_72 = arith.constant 0 : index
    %c2_73 = arith.constant 2 : index
    %c0_74 = arith.constant 0 : index
    %86 = vector.load %arg16[%c0_72, %c2_73, %c0_74] : memref<15x15x128xf32, #tpu.memory_space<vmem>>, vector<13x13x128xf32>
    %87 = vector.extract_strided_slice %86 {offsets = [0, 0, 0], sizes = [13, 13, 8], strides = [1, 1, 1]} : vector<13x13x128xf32> to vector<13x13x8xf32>
    %c1_75 = arith.constant 1 : index
    %c0_76 = arith.constant 0 : index
    %c0_77 = arith.constant 0 : index
    %88 = vector.load %arg16[%c1_75, %c0_76, %c0_77] : memref<15x15x128xf32, #tpu.memory_space<vmem>>, vector<13x13x128xf32>
    %89 = vector.extract_strided_slice %88 {offsets = [0, 0, 0], sizes = [13, 13, 8], strides = [1, 1, 1]} : vector<13x13x128xf32> to vector<13x13x8xf32>
    %c1_78 = arith.constant 1 : index
    %c1_79 = arith.constant 1 : index
    %c0_80 = arith.constant 0 : index
    %90 = vector.load %arg16[%c1_78, %c1_79, %c0_80] : memref<15x15x128xf32, #tpu.memory_space<vmem>>, vector<13x13x128xf32>
    %91 = vector.extract_strided_slice %90 {offsets = [0, 0, 0], sizes = [13, 13, 8], strides = [1, 1, 1]} : vector<13x13x128xf32> to vector<13x13x8xf32>
    %c1_81 = arith.constant 1 : index
    %c2_82 = arith.constant 2 : index
    %c0_83 = arith.constant 0 : index
    %92 = vector.load %arg16[%c1_81, %c2_82, %c0_83] : memref<15x15x128xf32, #tpu.memory_space<vmem>>, vector<13x13x128xf32>
    %93 = vector.extract_strided_slice %92 {offsets = [0, 0, 0], sizes = [13, 13, 8], strides = [1, 1, 1]} : vector<13x13x128xf32> to vector<13x13x8xf32>
    %c2_84 = arith.constant 2 : index
    %c0_85 = arith.constant 0 : index
    %c0_86 = arith.constant 0 : index
    %94 = vector.load %arg16[%c2_84, %c0_85, %c0_86] : memref<15x15x128xf32, #tpu.memory_space<vmem>>, vector<13x13x128xf32>
    %95 = vector.extract_strided_slice %94 {offsets = [0, 0, 0], sizes = [13, 13, 8], strides = [1, 1, 1]} : vector<13x13x128xf32> to vector<13x13x8xf32>
    %c2_87 = arith.constant 2 : index
    %c1_88 = arith.constant 1 : index
    %c0_89 = arith.constant 0 : index
    %96 = vector.load %arg16[%c2_87, %c1_88, %c0_89] : memref<15x15x128xf32, #tpu.memory_space<vmem>>, vector<13x13x128xf32>
    %97 = vector.extract_strided_slice %96 {offsets = [0, 0, 0], sizes = [13, 13, 8], strides = [1, 1, 1]} : vector<13x13x128xf32> to vector<13x13x8xf32>
    %c2_90 = arith.constant 2 : index
    %c2_91 = arith.constant 2 : index
    %c0_92 = arith.constant 0 : index
    %98 = vector.load %arg16[%c2_90, %c2_91, %c0_92] : memref<15x15x128xf32, #tpu.memory_space<vmem>>, vector<13x13x128xf32>
    %99 = vector.extract_strided_slice %98 {offsets = [0, 0, 0], sizes = [13, 13, 8], strides = [1, 1, 1]} : vector<13x13x128xf32> to vector<13x13x8xf32>
    %100 = tpu.concatenate %83, %85, %87, %89, %91, %93, %95, %97, %99 in 2 : vector<13x13x8xf32>, vector<13x13x8xf32>, vector<13x13x8xf32>, vector<13x13x8xf32>, vector<13x13x8xf32>, vector<13x13x8xf32>, vector<13x13x8xf32>, vector<13x13x8xf32>, vector<13x13x8xf32> -> vector<13x13x72xf32>
    %101 = vector.shape_cast %100 : vector<13x13x72xf32> to vector<169x72xf32>
    %102 = arith.truncf %101 : vector<169x72xf32> to vector<169x72xbf16>
    %c0_93 = arith.constant 0 : index
    %c0_94 = arith.constant 0 : index
    %103 = vector.load %arg4[%c0_93, %c0_94] : memref<72x128xbf16, #tpu.memory_space<vmem>>, vector<72x128xbf16>
    %cst_95 = arith.constant dense<0.000000e+00> : vector<169x128xf32>
    %104 = tpu.matmul %102, %103, %cst_95 {dimension_numbers = #tpu.dot_dimension_numbers<[1], [0], [0], [1], [0, 0, 1, 1], [], []>} : vector<169x72xbf16>, vector<72x128xbf16>, vector<169x128xf32> -> vector<169x128xf32>
    %105 = vector.shape_cast %104 : vector<169x128xf32> to vector<13x13x128xf32>
    %c0_96 = arith.constant 0 : index
    %c0_97 = arith.constant 0 : index
    %c0_98 = arith.constant 0 : index
    %106 = vector.load %arg17[%c0_96, %c0_97, %c0_98] : memref<13x13x128xf32, #tpu.memory_space<vmem>>, vector<13x13x128xf32>
    tpu.vector_store %arg17[%c0_96, %c0_97, %c0_98], %105 {strides = array<i32>} : memref<13x13x128xf32, #tpu.memory_space<vmem>>, vector<13x13x128xf32>,
    %c0_99 = arith.constant 0 : index
    %c0_100 = arith.constant 0 : index
    %c0_101 = arith.constant 0 : index
    %107 = tpu.strided_load %arg17[%c0_99, %c0_100, %c0_101] {strides = array<i32: 1, 2, 1>} : memref<13x13x128xf32, #tpu.memory_space<vmem>>, vector<13x6x128xf32>
    %c0_102 = arith.constant 0 : index
    %c1_103 = arith.constant 1 : index
    %c0_104 = arith.constant 0 : index
    %108 = tpu.strided_load %arg17[%c0_102, %c1_103, %c0_104] {strides = array<i32: 1, 2, 1>} : memref<13x13x128xf32, #tpu.memory_space<vmem>>, vector<13x6x128xf32>
    %109 = arith.maximumf %107, %108 : vector<13x6x128xf32>
    %c0_105 = arith.constant 0 : index
    %c0_106 = arith.constant 0 : index
    %c0_107 = arith.constant 0 : index
    %110 = vector.load %arg18[%c0_105, %c0_106, %c0_107] : memref<13x6x128xf32, #tpu.memory_space<vmem>>, vector<13x6x128xf32>
    tpu.vector_store %arg18[%c0_105, %c0_106, %c0_107], %109 {strides = array<i32>} : memref<13x6x128xf32, #tpu.memory_space<vmem>>, vector<13x6x128xf32>,
    %c0_108 = arith.constant 0 : index
    %c0_109 = arith.constant 0 : index
    %c0_110 = arith.constant 0 : index
    %111 = tpu.strided_load %arg18[%c0_108, %c0_109, %c0_110] {strides = array<i32: 2, 1, 1>} : memref<13x6x128xf32, #tpu.memory_space<vmem>>, vector<6x6x128xf32>
    %c1_111 = arith.constant 1 : index
    %c0_112 = arith.constant 0 : index
    %c0_113 = arith.constant 0 : index
    %112 = tpu.strided_load %arg18[%c1_111, %c0_112, %c0_113] {strides = array<i32: 2, 1, 1>} : memref<13x6x128xf32, #tpu.memory_space<vmem>>, vector<6x6x128xf32>
    %113 = arith.maximumf %111, %112 : vector<6x6x128xf32>
    %c0_114 = arith.constant 0 : index
    %c0_115 = arith.constant 0 : index
    %114 = vector.load %arg5[%c0_114, %c0_115] : memref<1x128xf32, #tpu.memory_space<vmem>>, vector<1x128xf32>
    %115 = vector.shape_cast %114 : vector<1x128xf32> to vector<1x1x128xf32>
    %116 = vector.broadcast %115 : vector<1x1x128xf32> to vector<6x6x128xf32>
    %117 = arith.addf %113, %116 : vector<6x6x128xf32>
    %cst_116 = arith.constant 0.000000e+00 : f32
    %118 = vector.broadcast %cst_116 : f32 to vector<6x6x128xf32>
    %119 = arith.maximumf %117, %118 : vector<6x6x128xf32>
    %120 = vector.extract_strided_slice %119 {offsets = [0, 0, 0], sizes = [1, 1, 16], strides = [1, 1, 1]} : vector<6x6x128xf32> to vector<1x1x16xf32>
    %121 = vector.shape_cast %120 : vector<1x1x16xf32> to vector<1x16xf32>
    %122 = vector.extract_strided_slice %119 {offsets = [0, 1, 0], sizes = [1, 1, 16], strides = [1, 1, 1]} : vector<6x6x128xf32> to vector<1x1x16xf32>
    %123 = vector.shape_cast %122 : vector<1x1x16xf32> to vector<1x16xf32>
    %124 = vector.extract_strided_slice %119 {offsets = [0, 2, 0], sizes = [1, 1, 16], strides = [1, 1, 1]} : vector<6x6x128xf32> to vector<1x1x16xf32>
    %125 = vector.shape_cast %124 : vector<1x1x16xf32> to vector<1x16xf32>
    %126 = vector.extract_strided_slice %119 {offsets = [0, 3, 0], sizes = [1, 1, 16], strides = [1, 1, 1]} : vector<6x6x128xf32> to vector<1x1x16xf32>
    %127 = vector.shape_cast %126 : vector<1x1x16xf32> to vector<1x16xf32>
    %128 = vector.extract_strided_slice %119 {offsets = [0, 4, 0], sizes = [1, 1, 16], strides = [1, 1, 1]} : vector<6x6x128xf32> to vector<1x1x16xf32>
    %129 = vector.shape_cast %128 : vector<1x1x16xf32> to vector<1x16xf32>
    %130 = vector.extract_strided_slice %119 {offsets = [0, 5, 0], sizes = [1, 1, 16], strides = [1, 1, 1]} : vector<6x6x128xf32> to vector<1x1x16xf32>
    %131 = vector.shape_cast %130 : vector<1x1x16xf32> to vector<1x16xf32>
    %132 = vector.extract_strided_slice %119 {offsets = [1, 0, 0], sizes = [1, 1, 16], strides = [1, 1, 1]} : vector<6x6x128xf32> to vector<1x1x16xf32>
    %133 = vector.shape_cast %132 : vector<1x1x16xf32> to vector<1x16xf32>
    %134 = vector.extract_strided_slice %119 {offsets = [1, 1, 0], sizes = [1, 1, 16], strides = [1, 1, 1]} : vector<6x6x128xf32> to vector<1x1x16xf32>
    %135 = vector.shape_cast %134 : vector<1x1x16xf32> to vector<1x16xf32>
    %136 = vector.extract_strided_slice %119 {offsets = [1, 2, 0], sizes = [1, 1, 16], strides = [1, 1, 1]} : vector<6x6x128xf32> to vector<1x1x16xf32>
    %137 = vector.shape_cast %136 : vector<1x1x16xf32> to vector<1x16xf32>
    %138 = vector.extract_strided_slice %119 {offsets = [1, 3, 0], sizes = [1, 1, 16], strides = [1, 1, 1]} : vector<6x6x128xf32> to vector<1x1x16xf32>
    %139 = vector.shape_cast %138 : vector<1x1x16xf32> to vector<1x16xf32>
    %140 = vector.extract_strided_slice %119 {offsets = [1, 4, 0], sizes = [1, 1, 16], strides = [1, 1, 1]} : vector<6x6x128xf32> to vector<1x1x16xf32>
    %141 = vector.shape_cast %140 : vector<1x1x16xf32> to vector<1x16xf32>
    %142 = vector.extract_strided_slice %119 {offsets = [1, 5, 0], sizes = [1, 1, 16], strides = [1, 1, 1]} : vector<6x6x128xf32> to vector<1x1x16xf32>
    %143 = vector.shape_cast %142 : vector<1x1x16xf32> to vector<1x16xf32>
    %144 = vector.extract_strided_slice %119 {offsets = [2, 0, 0], sizes = [1, 1, 16], strides = [1, 1, 1]} : vector<6x6x128xf32> to vector<1x1x16xf32>
    %145 = vector.shape_cast %144 : vector<1x1x16xf32> to vector<1x16xf32>
    %146 = vector.extract_strided_slice %119 {offsets = [2, 1, 0], sizes = [1, 1, 16], strides = [1, 1, 1]} : vector<6x6x128xf32> to vector<1x1x16xf32>
    %147 = vector.shape_cast %146 : vector<1x1x16xf32> to vector<1x16xf32>
    %148 = vector.extract_strided_slice %119 {offsets = [2, 2, 0], sizes = [1, 1, 16], strides = [1, 1, 1]} : vector<6x6x128xf32> to vector<1x1x16xf32>
    %149 = vector.shape_cast %148 : vector<1x1x16xf32> to vector<1x16xf32>
    %150 = vector.extract_strided_slice %119 {offsets = [2, 3, 0], sizes = [1, 1, 16], strides = [1, 1, 1]} : vector<6x6x128xf32> to vector<1x1x16xf32>
    %151 = vector.shape_cast %150 : vector<1x1x16xf32> to vector<1x16xf32>
    %152 = vector.extract_strided_slice %119 {offsets = [2, 4, 0], sizes = [1, 1, 16], strides = [1, 1, 1]} : vector<6x6x128xf32> to vector<1x1x16xf32>
    %153 = vector.shape_cast %152 : vector<1x1x16xf32> to vector<1x16xf32>
    %154 = vector.extract_strided_slice %119 {offsets = [2, 5, 0], sizes = [1, 1, 16], strides = [1, 1, 1]} : vector<6x6x128xf32> to vector<1x1x16xf32>
    %155 = vector.shape_cast %154 : vector<1x1x16xf32> to vector<1x16xf32>
    %156 = vector.extract_strided_slice %119 {offsets = [3, 0, 0], sizes = [1, 1, 16], strides = [1, 1, 1]} : vector<6x6x128xf32> to vector<1x1x16xf32>
    %157 = vector.shape_cast %156 : vector<1x1x16xf32> to vector<1x16xf32>
    %158 = vector.extract_strided_slice %119 {offsets = [3, 1, 0], sizes = [1, 1, 16], strides = [1, 1, 1]} : vector<6x6x128xf32> to vector<1x1x16xf32>
    %159 = vector.shape_cast %158 : vector<1x1x16xf32> to vector<1x16xf32>
    %160 = vector.extract_strided_slice %119 {offsets = [3, 2, 0], sizes = [1, 1, 16], strides = [1, 1, 1]} : vector<6x6x128xf32> to vector<1x1x16xf32>
    %161 = vector.shape_cast %160 : vector<1x1x16xf32> to vector<1x16xf32>
    %162 = vector.extract_strided_slice %119 {offsets = [3, 3, 0], sizes = [1, 1, 16], strides = [1, 1, 1]} : vector<6x6x128xf32> to vector<1x1x16xf32>
    %163 = vector.shape_cast %162 : vector<1x1x16xf32> to vector<1x16xf32>
    %164 = vector.extract_strided_slice %119 {offsets = [3, 4, 0], sizes = [1, 1, 16], strides = [1, 1, 1]} : vector<6x6x128xf32> to vector<1x1x16xf32>
    %165 = vector.shape_cast %164 : vector<1x1x16xf32> to vector<1x16xf32>
    %166 = vector.extract_strided_slice %119 {offsets = [3, 5, 0], sizes = [1, 1, 16], strides = [1, 1, 1]} : vector<6x6x128xf32> to vector<1x1x16xf32>
    %167 = vector.shape_cast %166 : vector<1x1x16xf32> to vector<1x16xf32>
    %168 = vector.extract_strided_slice %119 {offsets = [4, 0, 0], sizes = [1, 1, 16], strides = [1, 1, 1]} : vector<6x6x128xf32> to vector<1x1x16xf32>
    %169 = vector.shape_cast %168 : vector<1x1x16xf32> to vector<1x16xf32>
    %170 = vector.extract_strided_slice %119 {offsets = [4, 1, 0], sizes = [1, 1, 16], strides = [1, 1, 1]} : vector<6x6x128xf32> to vector<1x1x16xf32>
    %171 = vector.shape_cast %170 : vector<1x1x16xf32> to vector<1x16xf32>
    %172 = vector.extract_strided_slice %119 {offsets = [4, 2, 0], sizes = [1, 1, 16], strides = [1, 1, 1]} : vector<6x6x128xf32> to vector<1x1x16xf32>
    %173 = vector.shape_cast %172 : vector<1x1x16xf32> to vector<1x16xf32>
    %174 = vector.extract_strided_slice %119 {offsets = [4, 3, 0], sizes = [1, 1, 16], strides = [1, 1, 1]} : vector<6x6x128xf32> to vector<1x1x16xf32>
    %175 = vector.shape_cast %174 : vector<1x1x16xf32> to vector<1x16xf32>
    %176 = vector.extract_strided_slice %119 {offsets = [4, 4, 0], sizes = [1, 1, 16], strides = [1, 1, 1]} : vector<6x6x128xf32> to vector<1x1x16xf32>
    %177 = vector.shape_cast %176 : vector<1x1x16xf32> to vector<1x16xf32>
    %178 = vector.extract_strided_slice %119 {offsets = [4, 5, 0], sizes = [1, 1, 16], strides = [1, 1, 1]} : vector<6x6x128xf32> to vector<1x1x16xf32>
    %179 = vector.shape_cast %178 : vector<1x1x16xf32> to vector<1x16xf32>
    %180 = vector.extract_strided_slice %119 {offsets = [5, 0, 0], sizes = [1, 1, 16], strides = [1, 1, 1]} : vector<6x6x128xf32> to vector<1x1x16xf32>
    %181 = vector.shape_cast %180 : vector<1x1x16xf32> to vector<1x16xf32>
    %182 = vector.extract_strided_slice %119 {offsets = [5, 1, 0], sizes = [1, 1, 16], strides = [1, 1, 1]} : vector<6x6x128xf32> to vector<1x1x16xf32>
    %183 = vector.shape_cast %182 : vector<1x1x16xf32> to vector<1x16xf32>
    %184 = vector.extract_strided_slice %119 {offsets = [5, 2, 0], sizes = [1, 1, 16], strides = [1, 1, 1]} : vector<6x6x128xf32> to vector<1x1x16xf32>
    %185 = vector.shape_cast %184 : vector<1x1x16xf32> to vector<1x16xf32>
    %186 = vector.extract_strided_slice %119 {offsets = [5, 3, 0], sizes = [1, 1, 16], strides = [1, 1, 1]} : vector<6x6x128xf32> to vector<1x1x16xf32>
    %187 = vector.shape_cast %186 : vector<1x1x16xf32> to vector<1x16xf32>
    %188 = vector.extract_strided_slice %119 {offsets = [5, 4, 0], sizes = [1, 1, 16], strides = [1, 1, 1]} : vector<6x6x128xf32> to vector<1x1x16xf32>
    %189 = vector.shape_cast %188 : vector<1x1x16xf32> to vector<1x16xf32>
    %190 = vector.extract_strided_slice %119 {offsets = [5, 5, 0], sizes = [1, 1, 16], strides = [1, 1, 1]} : vector<6x6x128xf32> to vector<1x1x16xf32>
    %191 = vector.shape_cast %190 : vector<1x1x16xf32> to vector<1x16xf32>
    %192 = tpu.concatenate %121, %123, %125, %127, %129, %131, %133, %135, %137, %139, %141, %143, %145, %147, %149, %151 in 1 : vector<1x16xf32>, vector<1x16xf32>, vector<1x16xf32>, vector<1x16xf32>, vector<1x16xf32>, vector<1x16xf32>, vector<1x16xf32>, vector<1x16xf32>, vector<1x16xf32>, vector<1x16xf32>, vector<1x16xf32>, vector<1x16xf32>, vector<1x16xf32>, vector<1x16xf32>, vector<1x16xf32>, vector<1x16xf32> -> vector<1x256xf32>
    %193 = tpu.concatenate %153, %155, %157, %159, %161, %163, %165, %167, %169, %171, %173, %175, %177, %179, %181, %183 in 1 : vector<1x16xf32>, vector<1x16xf32>, vector<1x16xf32>, vector<1x16xf32>, vector<1x16xf32>, vector<1x16xf32>, vector<1x16xf32>, vector<1x16xf32>, vector<1x16xf32>, vector<1x16xf32>, vector<1x16xf32>, vector<1x16xf32>, vector<1x16xf32>, vector<1x16xf32>, vector<1x16xf32>, vector<1x16xf32> -> vector<1x256xf32>
    %194 = tpu.concatenate %185, %187, %189, %191 in 1 : vector<1x16xf32>, vector<1x16xf32>, vector<1x16xf32>, vector<1x16xf32> -> vector<1x64xf32>
    %195 = tpu.concatenate %192, %193, %194 in 1 : vector<1x256xf32>, vector<1x256xf32>, vector<1x64xf32> -> vector<1x576xf32>
    %196 = arith.truncf %195 : vector<1x576xf32> to vector<1x576xbf16>
    %c0_117 = arith.constant 0 : index
    %c0_118 = arith.constant 0 : index
    %197 = vector.load %arg6[%c0_117, %c0_118] : memref<576x128xbf16, #tpu.memory_space<vmem>>, vector<576x128xbf16>
    %cst_119 = arith.constant dense<0.000000e+00> : vector<1x128xf32>
    %198 = tpu.matmul %196, %197, %cst_119 {dimension_numbers = #tpu.dot_dimension_numbers<[1], [0], [0], [1], [0, 0, 1, 1], [], []>} : vector<1x576xbf16>, vector<576x128xbf16>, vector<1x128xf32> -> vector<1x128xf32>
    %c0_120 = arith.constant 0 : index
    %c0_121 = arith.constant 0 : index
    %199 = vector.load %arg7[%c0_120, %c0_121] : memref<1x128xf32, #tpu.memory_space<vmem>>, vector<1x128xf32>
    %200 = arith.addf %198, %199 : vector<1x128xf32>
    %cst_122 = arith.constant 0.000000e+00 : f32
    %201 = vector.broadcast %cst_122 : f32 to vector<1x128xf32>
    %202 = arith.maximumf %200, %201 : vector<1x128xf32>
    %203 = arith.truncf %202 : vector<1x128xf32> to vector<1x128xbf16>
    %c0_123 = arith.constant 0 : index
    %c0_124 = arith.constant 0 : index
    %204 = vector.load %arg8[%c0_123, %c0_124] : memref<128x128xbf16, #tpu.memory_space<vmem>>, vector<128x128xbf16>
    %cst_125 = arith.constant dense<0.000000e+00> : vector<1x128xf32>
    %205 = tpu.matmul %203, %204, %cst_125 {dimension_numbers = #tpu.dot_dimension_numbers<[1], [0], [0], [1], [0, 0, 1, 1], [], []>} : vector<1x128xbf16>, vector<128x128xbf16>, vector<1x128xf32> -> vector<1x128xf32>
    %c0_126 = arith.constant 0 : index
    %c0_127 = arith.constant 0 : index
    %206 = vector.load %arg9[%c0_126, %c0_127] : memref<1x128xf32, #tpu.memory_space<vmem>>, vector<1x128xf32>
    %207 = arith.addf %205, %206 : vector<1x128xf32>
    %cst_128 = arith.constant 0.000000e+00 : f32
    %208 = vector.broadcast %cst_128 : f32 to vector<1x128xf32>
    %209 = arith.maximumf %207, %208 : vector<1x128xf32>
    %210 = arith.truncf %209 : vector<1x128xf32> to vector<1x128xbf16>
    %c0_129 = arith.constant 0 : index
    %c0_130 = arith.constant 0 : index
    %211 = vector.load %arg10[%c0_129, %c0_130] : memref<128x128xbf16, #tpu.memory_space<vmem>>, vector<128x128xbf16>
    %cst_131 = arith.constant dense<0.000000e+00> : vector<1x128xf32>
    %212 = tpu.matmul %210, %211, %cst_131 {dimension_numbers = #tpu.dot_dimension_numbers<[1], [0], [0], [1], [0, 0, 1, 1], [], []>} : vector<1x128xbf16>, vector<128x128xbf16>, vector<1x128xf32> -> vector<1x128xf32>
    %c0_132 = arith.constant 0 : index
    %c0_133 = arith.constant 0 : index
    %213 = vector.load %arg11[%c0_132, %c0_133] : memref<1x128xf32, #tpu.memory_space<vmem>>, vector<1x128xf32>
    %214 = arith.addf %212, %213 : vector<1x128xf32>
    %215 = vector.shape_cast %214 : vector<1x128xf32> to vector<1x1x128xf32>
    %c0_134 = arith.constant 0 : index
    %c0_135 = arith.constant 0 : index
    %c0_136 = arith.constant 0 : index
    %216 = vector.load %arg12[%c0_134, %c0_135, %c0_136] : memref<1x1x128xf32, #tpu.memory_space<vmem>>, vector<1x1x128xf32>
    tpu.vector_store %arg12[%c0_134, %c0_135, %c0_136], %215 {strides = array<i32>} : memref<1x1x128xf32, #tpu.memory_space<vmem>>, vector<1x1x128xf32>,
    return
  }
  func.func @transform_0(%arg0: i32) -> (i32, i32, i32, i32) {
    %c0_i32 = arith.constant 0 : i32
    %c0_i32_0 = arith.constant 0 : i32
    %c0_i32_1 = arith.constant 0 : i32
    %c0_i32_2 = arith.constant 0 : i32
    return %arg0, %c0_i32, %c0_i32_0, %c0_i32_1 : i32, i32, i32, i32
  }
  func.func @transform_1(%arg0: i32) -> (i32, i32) {
    %c0_i32 = arith.constant 0 : i32
    %c0_i32_0 = arith.constant 0 : i32
    %c0_i32_1 = arith.constant 0 : i32
    return %c0_i32, %c0_i32_0 : i32, i32
  }
  func.func @transform_2(%arg0: i32) -> (i32, i32) {
    %c0_i32 = arith.constant 0 : i32
    %c0_i32_0 = arith.constant 0 : i32
    %c0_i32_1 = arith.constant 0 : i32
    return %c0_i32, %c0_i32_0 : i32, i32
  }
  func.func @transform_3(%arg0: i32) -> (i32, i32) {
    %c0_i32 = arith.constant 0 : i32
    %c0_i32_0 = arith.constant 0 : i32
    %c0_i32_1 = arith.constant 0 : i32
    return %c0_i32, %c0_i32_0 : i32, i32
  }
  func.func @transform_4(%arg0: i32) -> (i32, i32) {
    %c0_i32 = arith.constant 0 : i32
    %c0_i32_0 = arith.constant 0 : i32
    %c0_i32_1 = arith.constant 0 : i32
    return %c0_i32, %c0_i32_0 : i32, i32
  }
  func.func @transform_5(%arg0: i32) -> (i32, i32) {
    %c0_i32 = arith.constant 0 : i32
    %c0_i32_0 = arith.constant 0 : i32
    %c0_i32_1 = arith.constant 0 : i32
    return %c0_i32, %c0_i32_0 : i32, i32
  }
  func.func @transform_6(%arg0: i32) -> (i32, i32) {
    %c0_i32 = arith.constant 0 : i32
    %c0_i32_0 = arith.constant 0 : i32
    %c0_i32_1 = arith.constant 0 : i32
    return %c0_i32, %c0_i32_0 : i32, i32
  }
  func.func @transform_7(%arg0: i32) -> (i32, i32) {
    %c0_i32 = arith.constant 0 : i32
    %c0_i32_0 = arith.constant 0 : i32
    %c0_i32_1 = arith.constant 0 : i32
    return %c0_i32, %c0_i32_0 : i32, i32
  }
  func.func @transform_8(%arg0: i32) -> (i32, i32) {
    %c0_i32 = arith.constant 0 : i32
    %c0_i32_0 = arith.constant 0 : i32
    %c0_i32_1 = arith.constant 0 : i32
    return %c0_i32, %c0_i32_0 : i32, i32
  }
  func.func @transform_9(%arg0: i32) -> (i32, i32) {
    %c0_i32 = arith.constant 0 : i32
    %c0_i32_0 = arith.constant 0 : i32
    %c0_i32_1 = arith.constant 0 : i32
    return %c0_i32, %c0_i32_0 : i32, i32
  }
  func.func @transform_10(%arg0: i32) -> (i32, i32) {
    %c0_i32 = arith.constant 0 : i32
    %c0_i32_0 = arith.constant 0 : i32
    %c0_i32_1 = arith.constant 0 : i32
    return %c0_i32, %c0_i32_0 : i32, i32
  }
  func.func @transform_11(%arg0: i32) -> (i32, i32, i32) {
    %c0_i32 = arith.constant 0 : i32
    %c0_i32_0 = arith.constant 0 : i32
    %c0_i32_1 = arith.constant 0 : i32
    return %arg0, %c0_i32, %c0_i32_0 : i32, i32, i32
  }
}

</mosaic_0001>

<bundles_post_ra>
// kernel: net_forward.1
= control target key start
LH: loop header
LB: loop body
LE: loop exit
PB: predicated region body
PF: predicated region fallthrough
CT: control target
= control target key end

     0   :  { %s17495_s0 = inlined_call_operand.vmem [shape: f32[2,32,32,1], index: 0, kind: input, shape index: {}]   ;;  %s17496_s1 = inlined_call_operand.vmem [shape: f32[9,128], index: 1, kind: input, shape index: {}]   ;;  %s17497_s2 = inlined_call_operand.vmem [shape: f32[1,128], index: 2, kind: input, shape index: {}]   ;;  %s17498_s3 = inlined_call_operand.vmem [shape: bf16[72,128], index: 3, kind: input, shape index: {}]   ;;  %s17499_s4 = inlined_call_operand.vmem [shape: f32[1,128], index: 4, kind: input, shape index: {}]   ;;  %s17500_s5 = inlined_call_operand.vmem [shape: bf16[576,128], index: 5, kind: input, shape index: {}]   ;;  %s17501_s6 = inlined_call_operand.vmem [shape: f32[1,128], index: 6, kind: input, shape index: {}]   ;;  %s17502_s7 = inlined_call_operand.vmem [shape: bf16[128,128], index: 7, kind: input, shape index: {}]   ;;  %s17503_s8 = inlined_call_operand.vmem [shape: f32[1,128], index: 8, kind: input, shape index: {}]   ;;  %s17504_s9 = inlined_call_operand.vmem [shape: bf16[128,128], index: 9, kind: input, shape index: {}]   ;;  %s17505_s10 = inlined_call_operand.vmem [shape: f32[1,128], index: 10, kind: input, shape index: {}]   ;;  %s17506_s11 = inlined_call_operand.hbm [shape: f32[2,1,128], index: 11, kind: output, shape index: {}]  }
   0x1   :  { %17534 = sst [smem:[#allocation19_spill]] %s17495_s0 }
   0x2   :  { %17535 = sst [smem:[#allocation20_spill]] %s17496_s1 }
   0x3   :  { %17536 = sst [smem:[#allocation21_spill]] %s17497_s2 }
   0x4   :  { %17537 = sst [smem:[#allocation22_spill]] %s17498_s3 }
   0x5   :  { %16 = vsyncpa [#allocation9], 0 }
   0x6   :  { %18 = vsyncpa [#allocation9 + $0x1], 0  ;;  %s12862_s17 = smov 0   ;;  %s12864_s18 = smov 0  }
   0x7   :  { %s12866_s19 = smov 0   ;;  %s12868_s20 = smov 0  }
   0x8 LB: > { %17538 = sst [smem:[#allocation11_spill]] %s12780_s19  ;;  %s12883_s21 = sadd.s32 4294967295, %s12784_s20   ;;  %s12784_s20 = sphi %s12868_s20, %s17571_s20   ;;  %s12780_s19 = sphi %s12866_s19, %s17573_s19   ;;  %s12776_s18 = sphi %s12864_s18, %s17575_s18   ;;  %s12772_s17 = sphi %s12862_s17, %s17574_s17  }
   0x9   : > { %s12088_s22 = sadd.s32 4294967294, %s12784_s20   ;;  %s12887_s23 = sadd.s32 1, %s12784_s20  }
   0xa   : > { %17539 = sst [smem:[#allocation12_spill]] %s12887_s23  ;;  %s267_s24 = sadd.s32 1, %s12780_s19 }
   0xb   : > { %s264_s25 = ssub.s32 %s12784_s20, %s12887_s23  ;;  %p277_p0 = scmp.ne.s32.totalorder %s12780_s19, %s12776_s18 }
   0xc   : > { %p265_p1 = scmp.eq.s32.totalorder %s264_s25, 0  ;;  %p278_p2 = scmp.eq.s32.totalorder %s12883_s21, 1 }
   0xd   : > { %p283_p3 = scmp.ne.s32.totalorder %s12776_s18, %s12772_s17  ;;  %p284_p4 = scmp.eq.s32.totalorder %s12088_s22, 1 }
   0xe   : > { %s12898_s26 = scalar_select %p265_p1, %s12780_s19, %s267_s24  }
   0xf   : > { %p12900_p5 = por %p278_p2, %p277_p0  ;;  %p12904_p6 = por %p284_p4, %p283_p3 }
  0x10   : > { %17540 = sst [smem:[#allocation13_spill]] %s12898_s26  ;;  %p12091_p7 = scmp.ge.s32.totalorder %s12784_s20, 1 }
  0x11   : > { %s17542_s28 = scalar_select %p12904_p6, 1, 0 }
  0x12   : > { %p340_p8 = scmp.lt.s32.totalorder %s12784_s20, 3 }
  0x13   : > { %17543 = sst [smem:[#allocation14_spill]] %s17542_s28 }
  0x14   : > { %p341_p9 = pnand %p12091_p7, %p340_p8 }
  0x16   : > { %344 = sbr.rel (%p341_p9) target bundleno = 2195 (0x893), region = 64 }
  0x1d   : > { %p379_p10 = scmp.lt.s32.totalorder %s12883_s21, 1  ;;  %v12786_v0 = vmov 0   ;;  %s17544_s0 = sld [smem:[#allocation19_spill]]  ;;  %vm6183_vm0 = vcmask 64512   ;;  %vm6210_vm1 = vcmask 130048   ;;  %vm6237_vm2 = vcmask 195584  }
  0x1e   : > { %12464 = vset.pattern.permute.xlu1 %v12786_v0  ;;  %12463 = vset.pattern.permute.xlu0 %v12786_v0  ;;  %s17545_s1 = sld [smem:[#allocation20_spill]]  ;;  %s17554_s2 = sld [smem:[#allocation21_spill]]  ;;  %vm6264_vm3 = vcmask 261120   ;;  %vm6291_vm4 = vcmask 326656   ;;  %vm6318_vm5 = vcmask 392192   ;;  %vm6345_vm6 = vcmask 457728  }
  0x1f   : > { %s380_s29 = scalar_select %p379_p10, %s12883_s21, 1  ;;  %vm6372_vm7 = vcmask 523264   ;;  %vm8715_vm8 = vcmask 1043456   ;;  %vm12797_vm9 = vmmov 0   ;;  %vm8681_vm10 = vcmask 588800  }
  0x20   : > { %s17520_s12 = smov 16   ;;  %s17512_s13 = smov 8   ;;  %vm11279_vm11 = vcmask 654336   ;;  %vm11281_vm12 = vcmask 785408   ;;  %vm11283_vm13 = vcmask 916480  }
  0x21   : > { %s12219_s30 = sshll.u32 %s380_s29, 10  ;;  %s17518_s15 = smov 32  }
  0x22   : > { %s17514_s16 = smov 40   ;;  %s17522_s25 = smov 48  }
  0x23   : > { %s12915_s14 = scalar_lea.vmem %s17544_s0, %s12219_s30  ;;  %s17526_s29 = smov 56  }
  0x24   : > { %v387_v1 = vld [vmem:[%s12915_s14 + $0x10] sm:$0xff]  ;;  %v385_v2 = vld [vmem:[%s12915_s14] sm:$0xff]  ;;  %v388_v3 = vld [vmem:[%s12915_s14 + $0x18] sm:$0xff]  ;;  %s17524_s30 = smov 64   ;;  %s17564_s24 = smov 16  }
  0x25   : > { %525 = vperm.xlu1 %12464, %v387_v1   ;;  %515 = vperm.xlu0 %12463, %v385_v2   ;;  %v386_v4 = vld [vmem:[%s12915_s14 + $0x8] sm:$0xff]  ;;  %v389_v6 = vld [vmem:[%s12915_s14 + $0x20] sm:$0xff]  ;;  %v392_v7 = vld [vmem:[%s12915_s14 + $0x38] sm:$0xff]  ;;  %s17567_s3 = sld [smem:[#allocation22_spill]]  ;;  %s17531_s22 = smov 96  }
  0x26   : > { %v390_v5 = vld [vmem:[%s12915_s14 + $0x28] sm:$0xff]  ;;  %v391_v8 = vld [vmem:[%s12915_s14 + $0x30] sm:$0xff]  ;;  %v393_v10 = vld [vmem:[%s12915_s14 + $0x40] sm:$0xff]  ;;  %s17569_s0 = smov 96   ;;  %s12216_s23 = sshll.u32 %s12883_s21, 4 }
  0x27   : > { %v394_v9 = vld [vmem:[%s12915_s14 + $0x48] sm:$0xff]  ;;  %v396_v11 = vld [vmem:[%s12915_s14 + $0x58] sm:$0xff]  ;;  %v395_v12 = vld [vmem:[%s12915_s14 + $0x50] sm:$0xff]  ;;  %s12801_s28 = smov [#allocation8]  }
  0x28   : > { %v398_v13 = vld [vmem:[%s12915_s14 + $0x68] sm:$0xff]  ;;  %v397_v14 = vld [vmem:[%s12915_s14 + $0x60] sm:$0xff]  ;;  %v400_v15 = vld [vmem:[%s12915_s14 + $0x78] sm:$0xff] }
  0x29   : > { %530 = vperm.xlu1 %12464, %v388_v3   ;;  %520 = vperm.xlu0 %12463, %v386_v4   ;;  %v399_v16 = vld [vmem:[%s12915_s14 + $0x70] sm:$0xff]  ;;  %v402_v17 = vld [vmem:[%s12915_s14 + $0x88] sm:$0xff]  ;;  %v401_v18 = vld [vmem:[%s12915_s14 + $0x80] sm:$0xff] }
  0x2a   : > { %v405_v19 = vld [vmem:[%s12915_s14 + $0xa0] sm:$0xff]  ;;  %v403_v20 = vld [vmem:[%s12915_s14 + $0x90] sm:$0xff]  ;;  %v406_v22 = vld [vmem:[%s12915_s14 + $0xa8] sm:$0xff] }
  0x2b   : > { %v407_v21 = vld [vmem:[%s12915_s14 + $0xb0] sm:$0xff]  ;;  %v408_v23 = vld [vmem:[%s12915_s14 + $0xb8] sm:$0xff]  ;;  %v410_v25 = vld [vmem:[%s12915_s14 + $0xc8] sm:$0xff] }
  0x2c   : > { %v404_v24 = vld [vmem:[%s12915_s14 + $0x98] sm:$0xff]  ;;  %v409_v26 = vld [vmem:[%s12915_s14 + $0xc0] sm:$0xff]  ;;  %v411_v28 = vld [vmem:[%s12915_s14 + $0xd0] sm:$0xff] }
  0x2d   : > { %540 = vperm.xlu1 %12464, %v390_v5   ;;  %535 = vperm.xlu0 %12463, %v389_v6   ;;  %v413_v27 = vld [vmem:[%s12915_s14 + $0xe0] sm:$0xff]  ;;  %v415_v29 = vld [vmem:[%s12915_s14 + $0xf0] sm:$0xff]  ;;  %v414_v30 = vld [vmem:[%s12915_s14 + $0xe8] sm:$0xff] }
  0x2e   : > { %v416_v31 = vld [vmem:[%s12915_s14 + $0xf8] sm:$0xff]  ;;  %v418_v33 = vld [vmem:[%s12915_s14 + $0x108] sm:$0xff]  ;;  %v417_v34 = vld [vmem:[%s12915_s14 + $0x100] sm:$0xff] }
  0x2f   : > { %v412_v32 = vld [vmem:[%s12915_s14 + $0xd8] sm:$0xff]  ;;  %v419_v36 = vld [vmem:[%s12915_s14 + $0x110] sm:$0xff]  ;;  %v422_v37 = vld [vmem:[%s12915_s14 + $0x128] sm:$0xff] }
  0x30   : > { %v420_v35 = vld [vmem:[%s12915_s14 + $0x118] sm:$0xff]  ;;  %v421_v38 = vld [vmem:[%s12915_s14 + $0x120] sm:$0xff]  ;;  %v423_v40 = vld [vmem:[%s12915_s14 + $0x130] sm:$0xff] }
  0x31   : > { %550 = vperm.xlu1 %12464, %v392_v7   ;;  %545 = vperm.xlu0 %12463, %v391_v8   ;;  %v424_v39 = vld [vmem:[%s12915_s14 + $0x138] sm:$0xff]  ;;  %v426_v41 = vld [vmem:[%s12915_s14 + $0x148] sm:$0xff]  ;;  %v425_v42 = vld [vmem:[%s12915_s14 + $0x140] sm:$0xff] }
  0x32   : > { %v428_v43 = vld [vmem:[%s12915_s14 + $0x158] sm:$0xff]  ;;  %v427_v44 = vld [vmem:[%s12915_s14 + $0x150] sm:$0xff]  ;;  %v430_v45 = vld [vmem:[%s12915_s14 + $0x168] sm:$0xff] }
  0x33   : > { %v429_v46 = vld [vmem:[%s12915_s14 + $0x160] sm:$0xff]  ;;  %v432_v47 = vld [vmem:[%s12915_s14 + $0x178] sm:$0xff]  ;;  %v431_v48 = vld [vmem:[%s12915_s14 + $0x170] sm:$0xff] }
  0x34   : > { %v434_v49 = vld [vmem:[%s12915_s14 + $0x188] sm:$0xff]  ;;  %v433_v50 = vld [vmem:[%s12915_s14 + $0x180] sm:$0xff]  ;;  %v436_v51 = vld [vmem:[%s12915_s14 + $0x198] sm:$0xff] }
  0x35   : > { %560 = vperm.xlu1 %12464, %v394_v9   ;;  %555 = vperm.xlu0 %12463, %v393_v10   ;;  %v435_v52 = vld [vmem:[%s12915_s14 + $0x190] sm:$0xff]  ;;  %v438_v53 = vld [vmem:[%s12915_s14 + $0x1a8] sm:$0xff]  ;;  %v437_v54 = vld [vmem:[%s12915_s14 + $0x1a0] sm:$0xff] }
  0x36   : > { %v440_v55 = vld [vmem:[%s12915_s14 + $0x1b8] sm:$0xff]  ;;  %v439_v56 = vld [vmem:[%s12915_s14 + $0x1b0] sm:$0xff]  ;;  %v442_v57 = vld [vmem:[%s12915_s14 + $0x1c8] sm:$0xff] }
  0x37   : > { %v441_v58 = vld [vmem:[%s12915_s14 + $0x1c0] sm:$0xff]  ;;  %v444_v59 = vld [vmem:[%s12915_s14 + $0x1d8] sm:$0xff]  ;;  %v443_v60 = vld [vmem:[%s12915_s14 + $0x1d0] sm:$0xff] }
  0x38   : > { %v446_v61 = vld [vmem:[%s12915_s14 + $0x1e8] sm:$0xff]  ;;  %v445_v62 = vld [vmem:[%s12915_s14 + $0x1e0] sm:$0xff]  ;;  %v448_v63 = vld [vmem:[%s12915_s14 + $0x1f8] sm:$0xff] }
  0x39   : > { %570 = vperm.xlu1 %12464, %v396_v11   ;;  %565 = vperm.xlu0 %12463, %v395_v12   ;;  %v447_v0 = vld [vmem:[%s12915_s14 + $0x1f0] sm:$0xff]  ;;  %v450_v1 = vld [vmem:[%s12915_s14 + $0x208] sm:$0xff]  ;;  %v449_v2 = vld [vmem:[%s12915_s14 + $0x200] sm:$0xff] }
  0x3a   : > { %v453_v5 = vld [vmem:[%s12915_s14 + $0x220] sm:$0xff]  ;;  %v451_v6 = vld [vmem:[%s12915_s14 + $0x210] sm:$0xff]  ;;  %v454_v10 = vld [vmem:[%s12915_s14 + $0x228] sm:$0xff] }
  0x3b   : > { %v455_v9 = vld [vmem:[%s12915_s14 + $0x230] sm:$0xff] }
  0x3d   : > { %580 = vperm.xlu1 %12464, %v398_v13   ;;  %575 = vperm.xlu0 %12463, %v397_v14   ;;  %v12990_v13 = vld [vmem:[%s17545_s1] ss:$0 sm:$0xff]  ;;  %v12995_v14 = vld [vmem:[%s17545_s1 + $0x1] ss:$0 sm:$0xff] }
  0x41   : > { %590 = vperm.xlu1 %12464, %v400_v15   ;;  %585 = vperm.xlu0 %12463, %v399_v16   ;;  %v13000_v15 = vld [vmem:[%s17545_s1 + $0x3] ss:$0 sm:$0xff]  ;;  %v456_v16 = vld [vmem:[%s12915_s14 + $0x238] sm:$0xff] }
  0x45   : > { %600 = vperm.xlu1 %12464, %v402_v17   ;;  %595 = vperm.xlu0 %12463, %v401_v18   ;;  %v13006_v17 = vld [vmem:[%s17545_s1 + $0x2] ss:$0 sm:$0xff]  ;;  %v452_v18 = vld [vmem:[%s12915_s14 + $0x218] sm:$0xff] }
  0x49   : > { %615 = vperm.xlu1 %12464, %v405_v19   ;;  %605 = vperm.xlu0 %12463, %v403_v20  }
  0x4d   : > { %625 = vperm.xlu1 %12464, %v407_v21   ;;  %620 = vperm.xlu0 %12463, %v406_v22  }
  0x51   : > { %630 = vperm.xlu1 %12464, %v408_v23   ;;  %610 = vperm.xlu0 %12463, %v404_v24  }
  0x55   : > { %640 = vperm.xlu1 %12464, %v410_v25   ;;  %635 = vperm.xlu0 %12463, %v409_v26  }
  0x59   : > { %655 = vperm.xlu1 %12464, %v413_v27   ;;  %645 = vperm.xlu0 %12463, %v411_v28   ;;  %v458_v28 = vld [vmem:[%s12915_s14 + $0x248] sm:$0xff] }
  0x5d   : > { %665 = vperm.xlu1 %12464, %v415_v29   ;;  %660 = vperm.xlu0 %12463, %v414_v30  }
  0x61   : > { %670 = vperm.xlu1 %12464, %v416_v31   ;;  %650 = vperm.xlu0 %12463, %v412_v32  }
  0x65   : > { %680 = vperm.xlu1 %12464, %v418_v33   ;;  %675 = vperm.xlu0 %12463, %v417_v34  }
  0x69   : > { %690 = vperm.xlu1 %12464, %v420_v35   ;;  %685 = vperm.xlu0 %12463, %v419_v36  }
  0x6d   : > { %700 = vperm.xlu1 %12464, %v422_v37   ;;  %695 = vperm.xlu0 %12463, %v421_v38  }
  0x71   : > { %710 = vperm.xlu1 %12464, %v424_v39   ;;  %705 = vperm.xlu0 %12463, %v423_v40  }
  0x75   : > { %720 = vperm.xlu1 %12464, %v426_v41   ;;  %715 = vperm.xlu0 %12463, %v425_v42  }
  0x79   : > { %730 = vperm.xlu1 %12464, %v428_v43   ;;  %725 = vperm.xlu0 %12463, %v427_v44  }
  0x7d   : > { %740 = vperm.xlu1 %12464, %v430_v45   ;;  %735 = vperm.xlu0 %12463, %v429_v46  }
  0x81   : > { %750 = vperm.xlu1 %12464, %v432_v47   ;;  %745 = vperm.xlu0 %12463, %v431_v48   ;;  %v13031_v47 = vld [vmem:[%s17545_s1 + $0x4] ss:$0 sm:$0xff] }
  0x82   : > { %v457_v48 = vld [vmem:[%s12915_s14 + $0x240] sm:$0xff] }
  0x85   : > { %760 = vperm.xlu1 %12464, %v434_v49   ;;  %755 = vperm.xlu0 %12463, %v433_v50  }
  0x89   : > { %770 = vperm.xlu1 %12464, %v436_v51   ;;  %765 = vperm.xlu0 %12463, %v435_v52   ;;  %v13039_v52 = vld [vmem:[%s17545_s1 + $0x5] ss:$0 sm:$0xff] }
  0x8d   : > { %780 = vperm.xlu1 %12464, %v438_v53   ;;  %775 = vperm.xlu0 %12463, %v437_v54  }
  0x91   : > { %790 = vperm.xlu1 %12464, %v440_v55   ;;  %785 = vperm.xlu0 %12463, %v439_v56  }
  0x95   : > { %800 = vperm.xlu1 %12464, %v442_v57   ;;  %795 = vperm.xlu0 %12463, %v441_v58  }
  0x99   : > { %810 = vperm.xlu1 %12464, %v444_v59   ;;  %805 = vperm.xlu0 %12463, %v443_v60  }
  0x9d   : > { %820 = vperm.xlu1 %12464, %v446_v61   ;;  %815 = vperm.xlu0 %12463, %v445_v62   ;;  %v13049_v62 = vld [vmem:[%s17545_s1 + $0x6] ss:$0 sm:$0xff] }
  0xa1   : > { %830 = vperm.xlu1 %12464, %v448_v63   ;;  %825 = vperm.xlu0 %12463, %v447_v0  }
  0xa4   : > { %v526_v3 = vpop.permute.xlu1 %525  ;;  %v516_v4 = vpop.permute.xlu0 %515 }
  0xa5   : > { %1155 = vst [vmem:[#allocation2 + $0x10] sm:$0xff] %v526_v3  ;;  %1153 = vst [vmem:[#allocation2] sm:$0xff] %v516_v4  ;;  %840 = vperm.xlu1 %12464, %v450_v1   ;;  %835 = vperm.xlu0 %12463, %v449_v2   ;;  %v1408_v19 = vmul.f32 %v12990_v13, %v526_v3  ;;  %v1406_v20 = vmul.f32 %v12990_v13, %v516_v4  ;;  %v460_v3 = vld [vmem:[%s12915_s14 + $0x258] sm:$0xff] }
  0xa8   : > { %v531_v7 = vpop.permute.xlu1 %530  ;;  %v521_v8 = vpop.permute.xlu0 %520 }
  0xa9   : > { %1156 = vst [vmem:[#allocation2 + $0x18] sm:$0xff] %v531_v7  ;;  %1154 = vst [vmem:[#allocation2 + $0x8] sm:$0xff] %v521_v8  ;;  %855 = vperm.xlu1 %12464, %v453_v5   ;;  %845 = vperm.xlu0 %12463, %v451_v6   ;;  %v1407_v24 = vmul.f32 %v12990_v13, %v521_v8  ;;  %v459_v8 = vld [vmem:[%s12915_s14 + $0x250] sm:$0xff] }
  0xac   : > { %v541_v11 = vpop.permute.xlu1 %540  ;;  %v536_v12 = vpop.permute.xlu0 %535 }
  0xad   : > { %1158 = vst [vmem:[#allocation2 + $0x28] sm:$0xff] %v541_v11  ;;  %1157 = vst [vmem:[#allocation2 + $0x20] sm:$0xff] %v536_v12  ;;  %865 = vperm.xlu1 %12464, %v455_v9   ;;  %860 = vperm.xlu0 %12463, %v454_v10   ;;  %v13013_v25 = vmul.f32 %v12990_v13, %v541_v11  ;;  %v2383_v35 = vmul.f32 %v13000_v15, %v541_v11 }
  0xae   : > { %v1410_v40 = vmul.f32 %v12990_v13, %v536_v12  ;;  %v2382_v41 = vmul.f32 %v13000_v15, %v536_v12 }
  0xb0   : > { %v1284_v21 = vld [vmem:[#allocation2 + $0x18] sm:$0x3f]  ;;  %v551_v26 = vpop.permute.xlu1 %550  ;;  %v546_v27 = vpop.permute.xlu0 %545  ;;  %v1526_v34 = vld [vmem:[#allocation2 + $0x1] sm:$0xff]  ;;  %v1527_v36 = vld [vmem:[#allocation2 + $0x9] sm:$0xff] }
  0xb1   : > { %v1528_v22 = vld [vmem:[#allocation2 + $0x11] sm:$0xff]  ;;  %v1529_v23 = vld [vmem:[#allocation2 + $0x19] sm:$0x3f]  ;;  %v1409_v29 = vmul.f32 %v12990_v13, %v1284_v21  ;;  %1160 = vst [vmem:[#allocation2 + $0x38] sm:$0xff] %v551_v26  ;;  %1159 = vst [vmem:[#allocation2 + $0x30] sm:$0xff] %v546_v27  ;;  %870 = vperm.xlu1 %12464, %v456_v16   ;;  %v1651_v37 = vmul.f32 %v12995_v14, %v1526_v34  ;;  %v13024_v42 = vmul.f32 %v12990_v13, %v546_v27 }
  0xb2   : > { %v1653_v30 = vmul.f32 %v12995_v14, %v1528_v22  ;;  %v1654_v31 = vmul.f32 %v12995_v14, %v1529_v23  ;;  %v1893_v32 = vld [vmem:[#allocation2 + $0x12] sm:$0xff]  ;;  %v1894_v33 = vld [vmem:[#allocation2 + $0x1a] sm:$0x3f]  ;;  %v1891_v38 = vld [vmem:[#allocation2 + $0x2] sm:$0xff]  ;;  %850 = vperm.xlu0 %12463, %v452_v18   ;;  %v1652_v46 = vmul.f32 %v12995_v14, %v1527_v36  ;;  %v2384_v55 = vmul.f32 %v13000_v15, %v546_v27 }
  0xb3   : > { %v1892_v39 = vld [vmem:[#allocation2 + $0xa] sm:$0xff]  ;;  %v2018_v45 = vmul.f32 %v13006_v17, %v1893_v32  ;;  %v2019_v49 = vmul.f32 %v13006_v17, %v1894_v33  ;;  %v1771_v50 = vadd.f32 %v1651_v37, %v1406_v20  ;;  %v2016_v51 = vmul.f32 %v13006_v17, %v1891_v38 }
  0xb4   : > { %v1773_v43 = vadd.f32 %v1653_v30, %v1408_v19  ;;  %v1774_v44 = vadd.f32 %v1654_v31, %v1409_v29  ;;  %v1530_v53 = vld [vmem:[#allocation2 + $0x21] sm:$0xff]  ;;  %v561_v56 = vpop.permute.xlu1 %560  ;;  %v13042_v57 = vpop.permute.xlu0 %555  ;;  %v1772_v59 = vadd.f32 %v1652_v46, %v1407_v24  ;;  %v2017_v60 = vmul.f32 %v13006_v17, %v1892_v39 }
  0xb5   : > { %v1895_v54 = vld [vmem:[#allocation2 + $0x22] sm:$0xff]  ;;  %v1655_v61 = vmul.f32 %v12995_v14, %v1530_v53  ;;  %1162 = vst [vmem:[#allocation2 + $0x48] sm:$0xff] %v561_v56  ;;  %1161 = vst [vmem:[#allocation2 + $0x40] sm:$0xff] %v13042_v57  ;;  %880 = vperm.xlu1 %12464, %v458_v28   ;;  %v2136_v0 = vadd.f32 %v2016_v51, %v1771_v50  ;;  %v2747_v2 = vmul.f32 %v13031_v47, %v1530_v53 }
  0xb6   : > { %v2138_v58 = vadd.f32 %v2018_v45, %v1773_v43  ;;  %v2139_v63 = vadd.f32 %v2019_v49, %v1774_v44  ;;  %v2020_v1 = vmul.f32 %v13006_v17, %v1895_v54  ;;  %875 = vperm.xlu0 %12463, %v457_v48   ;;  %v2137_v4 = vadd.f32 %v2017_v60, %v1772_v59  ;;  %v462_v22 = vld [vmem:[%s12915_s14 + $0x268] sm:$0xff]  ;;  %v461_v44 = vld [vmem:[%s12915_s14 + $0x260] sm:$0xff] }
  0xb7   : > { %v1775_v5 = vadd.f32 %v1655_v61, %v1410_v40  ;;  %v3112_v6 = vmul.f32 %v13039_v52, %v1895_v54  ;;  %v2502_v9 = vadd.f32 %v2382_v41, %v2136_v0  ;;  %v13060_v16 = vmul.f32 %v12990_v13, %v561_v56 }
  0xb8   : > { %v13056_v7 = vadd.f32 %v2384_v55, %v2138_v58  ;;  %v1288_v10 = vld [vmem:[#allocation2 + $0x38] sm:$0x3f]  ;;  %v13063_v18 = vmul.f32 %v13000_v15, %v561_v56  ;;  %v13066_v19 = vmul.f32 %v13049_v62, %v561_v56  ;;  %v571_v20 = vpop.permute.xlu1 %570  ;;  %v13068_v21 = vpop.permute.xlu0 %565  ;;  %v2503_v23 = vadd.f32 %v2383_v35, %v2137_v4  ;;  %v1531_v35 = vld [vmem:[#allocation2 + $0x29] sm:$0xff] }
  0xb9   : > { %v1533_v11 = vld [vmem:[#allocation2 + $0x39] sm:$0x3f]  ;;  %v1413_v24 = vmul.f32 %v12990_v13, %v1288_v10  ;;  %v1414_v30 = vmul.f32 %v12990_v13, %v13042_v57  ;;  %1164 = vst [vmem:[#allocation2 + $0x58] sm:$0xff] %v571_v20  ;;  %1163 = vst [vmem:[#allocation2 + $0x50] sm:$0xff] %v13068_v21  ;;  %890 = vperm.xlu1 %12464, %v460_v3   ;;  %v2140_v31 = vadd.f32 %v2020_v1, %v1775_v5  ;;  %v1532_v36 = vld [vmem:[#allocation2 + $0x31] sm:$0xff] }
  0xba   : > { %v1898_v12 = vld [vmem:[#allocation2 + $0x3a] sm:$0x3f]  ;;  %v1658_v26 = vmul.f32 %v12995_v14, %v1533_v11  ;;  %v2867_v32 = vadd.f32 %v2747_v2, %v2502_v9  ;;  %v1896_v37 = vld [vmem:[#allocation2 + $0x2a] sm:$0xff]  ;;  %885 = vperm.xlu0 %12463, %v459_v8   ;;  %v1656_v40 = vmul.f32 %v12995_v14, %v1531_v35  ;;  %v1657_v41 = vmul.f32 %v12995_v14, %v1532_v36  ;;  %v1897_v43 = vld [vmem:[#allocation2 + $0x32] sm:$0xff] }
  0xbb   : > { %v2260_v27 = vld [vmem:[#allocation2 + $0x38] sm:$0x3f]  ;;  %v2023_v33 = vmul.f32 %v13006_v17, %v1898_v12  ;;  %v2021_v49 = vmul.f32 %v13006_v17, %v1896_v37  ;;  %v2022_v56 = vmul.f32 %v13006_v17, %v1897_v43  ;;  %v2748_v58 = vmul.f32 %v13031_v47, %v1531_v35  ;;  %v463_v4 = vld [vmem:[%s12915_s14 + $0x270] sm:$0xff]  ;;  %v13110_v9 = vld [vmem:[%s17545_s1 + $0x7] ss:$0 sm:$0xff] }
  0xbc   : > { %v2625_v28 = vld [vmem:[#allocation2 + $0x39] sm:$0x3f]  ;;  %v2385_v34 = vmul.f32 %v13000_v15, %v2260_v27  ;;  %v1778_v38 = vadd.f32 %v1658_v26, %v1413_v24  ;;  %v3232_v45 = vadd.f32 %v3112_v6, %v2867_v32  ;;  %v1534_v50 = vld [vmem:[#allocation2 + $0x41] sm:$0xff]  ;;  %v13084_v51 = vpop.permute.xlu1 %580  ;;  %v13086_v53 = vpop.permute.xlu0 %575  ;;  %v1776_v54 = vadd.f32 %v1656_v40, %v13013_v25 }
  0xbd   : > { %v2990_v29 = vld [vmem:[#allocation2 + $0x3a] sm:$0x3f]  ;;  %v2750_v39 = vmul.f32 %v13031_v47, %v2625_v28  ;;  %v1777_v55 = vadd.f32 %v1657_v41, %v13024_v42  ;;  %1166 = vst [vmem:[#allocation2 + $0x68] sm:$0xff] %v13084_v51  ;;  %1165 = vst [vmem:[#allocation2 + $0x60] sm:$0xff] %v13086_v53  ;;  %900 = vperm.xlu1 %12464, %v462_v22   ;;  %v2749_v61 = vmul.f32 %v13031_v47, %v1532_v36  ;;  %v1899_v25 = vld [vmem:[#allocation2 + $0x42] sm:$0xff] }
  0xbe   : > { %v2505_v46 = vadd.f32 %v2385_v34, %v2139_v63  ;;  %v3115_v48 = vmul.f32 %v13039_v52, %v2990_v29  ;;  %v13094_v59 = vadd.f32 %v2023_v33, %v1778_v38  ;;  %v3113_v63 = vmul.f32 %v13039_v52, %v1896_v37  ;;  %895 = vperm.xlu0 %12463, %v461_v44   ;;  %v464_v42 = vld [vmem:[%s12915_s14 + $0x278] sm:$0xff]  ;;  %v13115_v10 = vld [vmem:[%s17545_s1 + $0x8] ss:$0 sm:$0xff] }
  0xbf   : > { %v2141_v0 = vadd.f32 %v2021_v49, %v1776_v54  ;;  %v2868_v1 = vadd.f32 %v2748_v58, %v2503_v23  ;;  %v3114_v2 = vmul.f32 %v13039_v52, %v1897_v43  ;;  %v1659_v3 = vmul.f32 %v12995_v14, %v1534_v50  ;;  %v466_v28 = vld [vmem:[%s12915_s14 + $0x288] sm:$0xff]  ;;  %v465_v43 = vld [vmem:[%s12915_s14 + $0x280] sm:$0xff] }
  0xc0   : > { %v2870_v60 = vadd.f32 %v2750_v39, %v2505_v46  ;;  %v13104_v6 = vadd.f32 %v2022_v56, %v1777_v55  ;;  %v2869_v8 = vadd.f32 %v2749_v61, %v13056_v7  ;;  %v2386_v11 = vmul.f32 %v13000_v15, %v13042_v57  ;;  %v591_v12 = vpop.permute.xlu1 %590  ;;  %v13119_v20 = vpop.permute.xlu0 %585  ;;  %v1292_v26 = vld [vmem:[#allocation2 + $0x58] sm:$0x3f] }
  0xc1   : > { %v3233_v22 = vadd.f32 %v3113_v63, %v2868_v1  ;;  %v1779_v23 = vadd.f32 %v1659_v3, %v1414_v30  ;;  %v2024_v7 = vmul.f32 %v13006_v17, %v1899_v25  ;;  %v2751_v24 = vmul.f32 %v13031_v47, %v1534_v50  ;;  %v1537_v27 = vld [vmem:[#allocation2 + $0x59] sm:$0x3f]  ;;  %1168 = vst [vmem:[#allocation2 + $0x78] sm:$0xff] %v591_v12 }
  0xc2   : > { %v13102_v5 = vadd.f32 %v3115_v48, %v2870_v60  ;;  %1167 = vst [vmem:[#allocation2 + $0x70] sm:$0xff] %v13119_v20  ;;  %910 = vperm.xlu1 %12464, %v464_v42   ;;  %v13125_v29 = vadd.f32 %v3114_v2, %v2869_v8  ;;  %v13128_v32 = vadd.f32 %v13063_v18, %v2141_v0  ;;  %v1902_v34 = vld [vmem:[#allocation2 + $0x5a] sm:$0x3f]  ;;  %v1900_v0 = vld [vmem:[#allocation2 + $0x4a] sm:$0xff] }
  0xc3   : > { %v2506_v33 = vadd.f32 %v2386_v11, %v2140_v31  ;;  %v3478_v30 = vmul.f32 %v13049_v62, %v13042_v57  ;;  %v2264_v35 = vld [vmem:[#allocation2 + $0x58] sm:$0x3f]  ;;  %905 = vperm.xlu0 %12463, %v463_v4   ;;  %v13133_v37 = vadd.f32 %v13066_v19, %v3233_v22  ;;  %v13135_v38 = vadd.f32 %v2024_v7, %v1779_v23  ;;  %v467_v11 = vld [vmem:[%s12915_s14 + $0x290] sm:$0xff] }
  0xc4   : > { %v2629_v36 = vld [vmem:[#allocation2 + $0x59] sm:$0x3f]  ;;  %v3116_v39 = vmul.f32 %v13039_v52, %v1899_v25  ;;  %v3843_v40 = vmul.f32 %v13110_v9, %v1534_v50  ;;  %v1417_v57 = vmul.f32 %v12990_v13, %v1292_v26  ;;  %v1662_v46 = vmul.f32 %v12995_v14, %v1537_v27  ;;  %v13142_v54 = vpop.permute.xlu1 %600  ;;  %v13144_v19 = vpop.permute.xlu0 %595 }
  0xc5   : > { %v2994_v41 = vld [vmem:[#allocation2 + $0x5a] sm:$0x3f]  ;;  %v2871_v31 = vadd.f32 %v2751_v24, %v2506_v33  ;;  %v3598_v44 = vadd.f32 %v3478_v30, %v3232_v45  ;;  %v4208_v55 = vmul.f32 %v13115_v10, %v1899_v25  ;;  %v2027_v50 = vmul.f32 %v13006_v17, %v1902_v34  ;;  %v1535_v45 = vld [vmem:[#allocation2 + $0x49] sm:$0xff]  ;;  %1170 = vst [vmem:[#allocation2 + $0x88] sm:$0xff] %v13142_v54  ;;  %v1536_v25 = vld [vmem:[#allocation2 + $0x51] sm:$0xff] }
  0xc6   : > { %v3356_v18 = vld [vmem:[#allocation2 + $0x58] sm:$0x3f]  ;;  %v2389_v56 = vmul.f32 %v13000_v15, %v2264_v35  ;;  %v2754_v58 = vmul.f32 %v13031_v47, %v2629_v36  ;;  %1169 = vst [vmem:[#allocation2 + $0x80] sm:$0xff] %v13144_v19  ;;  %920 = vperm.xlu1 %12464, %v466_v28   ;;  %v1782_v61 = vadd.f32 %v1662_v46, %v1417_v57 }
  0xc7   : > { %v3721_v48 = vld [vmem:[#allocation2 + $0x59] sm:$0x3f]  ;;  %v3963_v60 = vadd.f32 %v3843_v40, %v3598_v44  ;;  %v3119_v63 = vmul.f32 %v13039_v52, %v2994_v41  ;;  %v3481_v42 = vmul.f32 %v13049_v62, %v3356_v18  ;;  %915 = vperm.xlu0 %12463, %v465_v43   ;;  %v13155_v2 = vadd.f32 %v3116_v39, %v2871_v31  ;;  %v470_v39 = vld [vmem:[%s12915_s14 + $0x2a8] sm:$0xff]  ;;  %v469_v31 = vld [vmem:[%s12915_s14 + $0x2a0] sm:$0xff] }
  0xc8   : > { %v4086_v49 = vld [vmem:[#allocation2 + $0x5a] sm:$0x3f]  ;;  %v2509_v3 = vadd.f32 %v2389_v56, %v13094_v59  ;;  %v3846_v4 = vmul.f32 %v13110_v9, %v3721_v48  ;;  %v1416_v23 = vmul.f32 %v12990_v13, %v13068_v21  ;;  %v1660_v7 = vmul.f32 %v12995_v14, %v1535_v45  ;;  %v1901_v24 = vld [vmem:[#allocation2 + $0x52] sm:$0xff]  ;;  %v13165_v26 = vpop.permute.xlu1 %615  ;;  %v13167_v27 = vpop.permute.xlu0 %605 }
  0xc9   : > { %v468_v1 = vld [vmem:[%s12915_s14 + $0x298] sm:$0xff]  ;;  %v4211_v8 = vmul.f32 %v13115_v10, %v4086_v49  ;;  %v4328_v12 = vadd.f32 %v4208_v55, %v3963_v60  ;;  %v3601_v22 = vadd.f32 %v3481_v42, %v13102_v5  ;;  %v13169_v59 = vadd.f32 %v2027_v50, %v1782_v61  ;;  %1173 = vst [vmem:[#allocation2 + $0xa0] sm:$0xff] %v13165_v26 }
  0xca   : > { %v2874_v28 = vadd.f32 %v2754_v58, %v2509_v3  ;;  %v1661_v33 = vmul.f32 %v12995_v14, %v1536_v25  ;;  %v2025_v30 = vmul.f32 %v13006_v17, %v1900_v0  ;;  %1171 = vst [vmem:[#allocation2 + $0x90] sm:$0xff] %v13167_v27  ;;  %930 = vperm.xlu1 %12464, %v468_v1   ;;  %v472_v42 = vld [vmem:[%s12915_s14 + $0x2b8] sm:$0xff] }
  0xcb   : > { %4448 = vst [vmem:[#allocation3] sm:$0xff] %v4328_v12  ;;  %v3966_v5 = vadd.f32 %v3846_v4, %v3601_v22  ;;  %v1780_v34 = vadd.f32 %v1660_v7, %v13060_v16  ;;  %v2388_v35 = vmul.f32 %v13000_v15, %v13068_v21  ;;  %v2752_v36 = vmul.f32 %v13031_v47, %v1535_v45  ;;  %v1903_v4 = vld [vmem:[#allocation2 + $0x62] sm:$0xff] }
  0xcc   : > { %925 = vperm.xlu0 %12463, %v467_v11   ;;  %v13180_v40 = vadd.f32 %v3119_v63, %v2874_v28  ;;  %v1781_v41 = vadd.f32 %v1661_v33, %v1416_v23  ;;  %v2026_v18 = vmul.f32 %v13006_v17, %v1901_v24  ;;  %v2753_v43 = vmul.f32 %v13031_v47, %v1536_v25  ;;  %v13188_v48 = vpop.permute.xlu1 %625  ;;  %v13190_v49 = vpop.permute.xlu0 %620  ;;  %v1538_v63 = vld [vmem:[#allocation2 + $0x61] sm:$0xff]  ;;  %v1296_v28 = vld [vmem:[#allocation2 + $0x78] sm:$0x3f] }
  0xcd   : > { %v4331_v44 = vadd.f32 %v4211_v8, %v3966_v5  ;;  %v2508_v57 = vadd.f32 %v2388_v35, %v13104_v6  ;;  %v2872_v16 = vadd.f32 %v2752_v36, %v13128_v32  ;;  %v3117_v46 = vmul.f32 %v13039_v52, %v1900_v0  ;;  %1175 = vst [vmem:[#allocation2 + $0xb0] sm:$0xff] %v13188_v48  ;;  %v471_v8 = vld [vmem:[%s12915_s14 + $0x2b0] sm:$0xff]  ;;  %v474_v35 = vld [vmem:[%s12915_s14 + $0x2c8] sm:$0xff]  ;;  %v473_v36 = vld [vmem:[%s12915_s14 + $0x2c0] sm:$0xff] }
  0xce   : > { %v2145_v55 = vadd.f32 %v2025_v30, %v1780_v34  ;;  %v13192_v50 = vadd.f32 %v2026_v18, %v1781_v41  ;;  %v3480_v56 = vmul.f32 %v13049_v62, %v13068_v21  ;;  %v3844_v58 = vmul.f32 %v13110_v9, %v1535_v45  ;;  %1174 = vst [vmem:[#allocation2 + $0xa8] sm:$0xff] %v13190_v49  ;;  %v1541_v34 = vld [vmem:[#allocation2 + $0x79] sm:$0x3f] }
  0xcf   : > { %940 = vperm.xlu1 %12464, %v470_v39   ;;  %4451 = vst [vmem:[#allocation3 + $0x18] sm:$0x3f] %v4331_v44  ;;  %v2873_v6 = vadd.f32 %v2753_v43, %v2508_v57  ;;  %v3118_v32 = vmul.f32 %v13039_v52, %v1901_v24  ;;  %v3237_v60 = vadd.f32 %v3117_v46, %v2872_v16  ;;  %v2268_v44 = vld [vmem:[#allocation2 + $0x78] sm:$0x3f] }
  0xd0   : > { %v3845_v61 = vmul.f32 %v13110_v9, %v1536_v25  ;;  %935 = vperm.xlu0 %12463, %v469_v31   ;;  %v3600_v21 = vadd.f32 %v3480_v56, %v13125_v29  ;;  %v3964_v45 = vadd.f32 %v3844_v58, %v13133_v37  ;;  %v4209_v1 = vmul.f32 %v13115_v10, %v1900_v0  ;;  %v631_v22 = vpop.permute.xlu1 %630  ;;  %v611_v37 = vpop.permute.xlu0 %610  ;;  %v1906_v31 = vld [vmem:[#allocation2 + $0x7a] sm:$0x3f] }
  0xd1   : > { %v4210_v3 = vmul.f32 %v13115_v10, %v1901_v24  ;;  %v13207_v11 = vadd.f32 %v3118_v32, %v2873_v6  ;;  %v13211_v12 = vmul.f32 %v12990_v13, %v13084_v51  ;;  %v2391_v25 = vmul.f32 %v13000_v15, %v13084_v51  ;;  %1176 = vst [vmem:[#allocation2 + $0xb8] sm:$0xff] %v631_v22  ;;  %v2633_v57 = vld [vmem:[#allocation2 + $0x79] sm:$0x3f] }
  0xd2   : > { %v3483_v29 = vmul.f32 %v13049_v62, %v13084_v51  ;;  %v3965_v0 = vadd.f32 %v3845_v61, %v3600_v21  ;;  %v4329_v23 = vadd.f32 %v4209_v1, %v3964_v45  ;;  %v1418_v7 = vmul.f32 %v12990_v13, %v13086_v53  ;;  %1172 = vst [vmem:[#allocation2 + $0x98] sm:$0xff] %v611_v37  ;;  %v2998_v58 = vld [vmem:[#allocation2 + $0x7a] sm:$0x3f] }
  0xd3   : > { %v1663_v24 = vmul.f32 %v12995_v14, %v1538_v63  ;;  %950 = vperm.xlu1 %12464, %v472_v42   ;;  %v13220_v33 = vadd.f32 %v2391_v25, %v2145_v55  ;;  %v2028_v30 = vmul.f32 %v13006_v17, %v1903_v4  ;;  %v2390_v51 = vmul.f32 %v13000_v15, %v13086_v53  ;;  %v3360_v6 = vld [vmem:[#allocation2 + $0x78] sm:$0x3f] }
  0xd4   : > { %v2755_v5 = vmul.f32 %v13031_v47, %v1538_v63  ;;  %945 = vperm.xlu0 %12463, %v471_v8   ;;  %v4330_v39 = vadd.f32 %v4210_v3, %v3965_v0  ;;  %4449 = vst [vmem:[#allocation3 + $0x8] sm:$0xff] %v4329_v23  ;;  %v13228_v41 = vadd.f32 %v3483_v29, %v3237_v60  ;;  %v13236_v32 = vpop.permute.xlu1 %640  ;;  %v13238_v60 = vpop.permute.xlu0 %635  ;;  %v3725_v21 = vld [vmem:[#allocation2 + $0x79] sm:$0x3f]  ;;  %v1540_v0 = vld [vmem:[#allocation2 + $0x71] sm:$0xff] }
  0xd5   : > { %v1783_v18 = vadd.f32 %v1663_v24, %v1418_v7  ;;  %v3482_v43 = vmul.f32 %v13049_v62, %v13086_v53  ;;  %v2510_v16 = vadd.f32 %v2390_v51, %v13135_v38  ;;  %v3120_v46 = vmul.f32 %v13039_v52, %v1903_v4  ;;  %1178 = vst [vmem:[#allocation2 + $0xc8] sm:$0xff] %v13236_v32  ;;  %v1904_v23 = vld [vmem:[#allocation2 + $0x6a] sm:$0xff] }
  0xd6   : > { %v3847_v55 = vmul.f32 %v13110_v9, %v1538_v63  ;;  %v1421_v56 = vmul.f32 %v12990_v13, %v1296_v28  ;;  %4450 = vst [vmem:[#allocation3 + $0x10] sm:$0xff] %v4330_v39  ;;  %v4212_v38 = vmul.f32 %v13115_v10, %v1903_v4  ;;  %v1666_v42 = vmul.f32 %v12995_v14, %v1541_v34  ;;  %v4090_v63 = vld [vmem:[#allocation2 + $0x7a] sm:$0x3f]  ;;  %v475_v7 = vld [vmem:[%s12915_s14 + $0x2d0] sm:$0xff] }
  0xd7   : > { %v13240_v53 = vadd.f32 %v2028_v30, %v1783_v18  ;;  %v3602_v61 = vadd.f32 %v3482_v43, %v13155_v2  ;;  %1177 = vst [vmem:[#allocation2 + $0xc0] sm:$0xff] %v13238_v60  ;;  %960 = vperm.xlu1 %12464, %v474_v35   ;;  %v2875_v45 = vadd.f32 %v2755_v5, %v2510_v16  ;;  %v13250_v2 = vld [vmem:[#allocation2 + $0x69] sm:$0xff]  ;;  %v476_v4 = vld [vmem:[%s12915_s14 + $0x2d8] sm:$0xff] }
  0xd8   : > { %v2031_v1 = vmul.f32 %v13006_v17, %v1906_v31  ;;  %v2393_v3 = vmul.f32 %v13000_v15, %v2268_v44  ;;  %v2758_v8 = vmul.f32 %v13031_v47, %v2633_v57  ;;  %955 = vperm.xlu0 %12463, %v473_v36   ;;  %v1786_v29 = vadd.f32 %v1666_v42, %v1421_v56  ;;  %v13261_v5 = vpop.permute.xlu1 %655  ;;  %v13263_v34 = vpop.permute.xlu0 %645  ;;  %v1905_v43 = vld [vmem:[#allocation2 + $0x72] sm:$0xff] }
  0xd9   : > { %v3967_v25 = vadd.f32 %v3847_v55, %v3602_v61  ;;  %v3123_v22 = vmul.f32 %v13039_v52, %v2998_v58  ;;  %v3485_v37 = vmul.f32 %v13049_v62, %v3360_v6  ;;  %v13256_v24 = vadd.f32 %v3120_v46, %v2875_v45  ;;  %1181 = vst [vmem:[#allocation2 + $0xe0] sm:$0xff] %v13261_v5  ;;  %v478_v46 = vld [vmem:[%s12915_s14 + $0x2e8] sm:$0xff]  ;;  %v477_v61 = vld [vmem:[%s12915_s14 + $0x2e0] sm:$0xff] }
  0xda   : > { %v2513_v28 = vadd.f32 %v2393_v3, %v13169_v59  ;;  %v3850_v30 = vmul.f32 %v13110_v9, %v3725_v21  ;;  %v4215_v51 = vmul.f32 %v13115_v10, %v4090_v63  ;;  %v1420_v39 = vmul.f32 %v12990_v13, %v13119_v20  ;;  %1179 = vst [vmem:[#allocation2 + $0xd0] sm:$0xff] %v13263_v34 }
  0xdb   : > { %v4332_v35 = vadd.f32 %v4212_v38, %v3967_v25  ;;  %v3605_v36 = vadd.f32 %v3485_v37, %v13180_v40  ;;  %v1664_v18 = vmul.f32 %v12995_v14, %v13250_v2  ;;  %970 = vperm.xlu1 %12464, %v476_v4   ;;  %v4568_v59 = vld [vmem:[#allocation3] ss:$2 sm:$0xff]  ;;  %v4688_v31 = vld [vmem:[#allocation3 + $0x1] ss:$2 sm:$0xff]  ;;  %v13272_v44 = vadd.f32 %v2031_v1, %v1786_v29 }
  0xdc   : > { %v2878_v57 = vadd.f32 %v2758_v8, %v2513_v28  ;;  %v1665_v40 = vmul.f32 %v12995_v14, %v1540_v0  ;;  %v2029_v16 = vmul.f32 %v13006_v17, %v1904_v23  ;;  %965 = vperm.xlu0 %12463, %v475_v7   ;;  %v4807_v55 = vmax.f32 %v4568_v59, %v4688_v31  ;;  %v13285_v3 = vpop.permute.xlu1 %665  ;;  %v13287_v8 = vpop.permute.xlu0 %660 }
  0xdd   : > { %4452 = vst [vmem:[#allocation3 + $0x20] sm:$0xff] %v4332_v35  ;;  %v3970_v56 = vadd.f32 %v3850_v30, %v3605_v36  ;;  %v1784_v58 = vadd.f32 %v1664_v18, %v13211_v12  ;;  %v2392_v6 = vmul.f32 %v13000_v15, %v13119_v20  ;;  %v4570_v38 = vld [vmem:[#allocation3 + $0x10] ss:$2 sm:$0x7f]  ;;  %v2030_v63 = vmul.f32 %v13006_v17, %v1905_v43 }
  0xde   : > { %v4690_v42 = vld [vmem:[#allocation3 + $0x11] ss:$2 sm:$0x7f]  ;;  %v1785_v21 = vadd.f32 %v1665_v40, %v1420_v39  ;;  %v2756_v45 = vmul.f32 %v13031_v47, %v13250_v2  ;;  %v2757_v1 = vmul.f32 %v13031_v47, %v1540_v0  ;;  %4867 = vst [vmem:[#allocation4] sm:$0xff] %v4807_v55  ;;  %v13289_v4 = vadd.f32 %v3123_v22, %v2878_v57  ;;  %v1542_v39 = vld [vmem:[#allocation2 + $0x81] sm:$0xff] }
  0xdf   : > { %v4808_v12 = vmax.f32 %v4570_v38, %v4690_v42  ;;  %v4335_v25 = vadd.f32 %v4215_v51, %v3970_v56  ;;  %v2512_v29 = vadd.f32 %v2392_v6, %v13192_v50  ;;  %1183 = vst [vmem:[#allocation2 + $0xf0] sm:$0xff] %v13285_v3  ;;  %1182 = vst [vmem:[#allocation2 + $0xe8] sm:$0xff] %v13287_v8  ;;  %980 = vperm.xlu1 %12464, %v478_v46   ;;  %v480_v35 = vld [vmem:[%s12915_s14 + $0x2f8] sm:$0xff]  ;;  %v479_v18 = vld [vmem:[%s12915_s14 + $0x2f0] sm:$0xff] }
  0xe0   : > { %v2149_v37 = vadd.f32 %v2029_v16, %v1784_v58  ;;  %v2876_v7 = vadd.f32 %v2756_v45, %v13220_v33  ;;  %v3121_v28 = vmul.f32 %v13039_v52, %v1904_v23  ;;  %v3122_v30 = vmul.f32 %v13039_v52, %v1905_v43  ;;  %975 = vperm.xlu0 %12463, %v477_v61   ;;  %v1907_v40 = vld [vmem:[#allocation2 + $0x82] sm:$0xff]  ;;  %v671_v16 = vpop.permute.xlu1 %670  ;;  %v651_v46 = vpop.permute.xlu0 %650 }
  0xe1   : > { %4868 = vst [vmem:[#allocation4 + $0x8] sm:$0x7f] %v4808_v12  ;;  %4455 = vst [vmem:[#allocation3 + $0x38] sm:$0x3f] %v4335_v25  ;;  %v2877_v22 = vadd.f32 %v2757_v1, %v2512_v29  ;;  %v3484_v50 = vmul.f32 %v13049_v62, %v13119_v20  ;;  %v3848_v51 = vmul.f32 %v13110_v9, %v13250_v2  ;;  %v482_v58 = vld [vmem:[%s12915_s14 + $0x308] sm:$0xff]  ;;  %v481_v42 = vld [vmem:[%s12915_s14 + $0x300] sm:$0xff] }
  0xe2   : > { %v3849_v36 = vmul.f32 %v13110_v9, %v1540_v0  ;;  %v13304_v33 = vadd.f32 %v2030_v63, %v1785_v21  ;;  %v3241_v59 = vadd.f32 %v3121_v28, %v2876_v7  ;;  %v4213_v31 = vmul.f32 %v13115_v10, %v1904_v23  ;;  %1184 = vst [vmem:[#allocation2 + $0xf8] sm:$0xff] %v671_v16 }
  0xe3   : > { %v4214_v57 = vmul.f32 %v13115_v10, %v1905_v43  ;;  %v13308_v55 = vadd.f32 %v3122_v30, %v2877_v22  ;;  %v3604_v20 = vadd.f32 %v3484_v50, %v13207_v11  ;;  %v3968_v2 = vadd.f32 %v3848_v51, %v13228_v41  ;;  %1180 = vst [vmem:[#allocation2 + $0xd8] sm:$0xff] %v651_v46  ;;  %v1543_v30 = vld [vmem:[#allocation2 + $0x89] sm:$0xff] }
  0xe4   : > { %v1423_v0 = vmul.f32 %v12990_v13, %v13142_v54  ;;  %990 = vperm.xlu1 %12464, %v480_v35   ;;  %v2395_v23 = vmul.f32 %v13000_v15, %v13142_v54  ;;  %v3487_v43 = vmul.f32 %v13049_v62, %v13142_v54  ;;  %v1422_v56 = vmul.f32 %v12990_v13, %v13144_v19  ;;  %v13327_v1 = vpop.permute.xlu1 %680  ;;  %v13329_v12 = vpop.permute.xlu0 %675 }
  0xe5   : > { %v1667_v11 = vmul.f32 %v12995_v14, %v1542_v39  ;;  %985 = vperm.xlu0 %12463, %v479_v18   ;;  %v3969_v41 = vadd.f32 %v3849_v36, %v3604_v20  ;;  %v4333_v6 = vadd.f32 %v4213_v31, %v3968_v2  ;;  %v2032_v61 = vmul.f32 %v13006_v17, %v1907_v40 }
  0xe6   : > { %v2394_v38 = vmul.f32 %v13000_v15, %v13144_v19  ;;  %v2515_v21 = vadd.f32 %v2395_v23, %v2149_v37  ;;  %v3607_v63 = vadd.f32 %v3487_v43, %v3241_v59  ;;  %v2759_v54 = vmul.f32 %v13031_v47, %v1542_v39  ;;  %17546 = vst [vmem:[#allocation15_spill] sm:$0xff] %v13327_v1  ;;  %v1908_v37 = vld [vmem:[#allocation2 + $0x8a] sm:$0xff] }
  0xe7   : > { %v1787_v45 = vadd.f32 %v1667_v11, %v1422_v56  ;;  %17547 = vst [vmem:[#allocation16_spill] sm:$0xff] %v13329_v12  ;;  %v4334_v25 = vadd.f32 %v4214_v57, %v3969_v41  ;;  %4453 = vst [vmem:[#allocation3 + $0x28] sm:$0xff] %v4333_v6  ;;  %v3486_v7 = vmul.f32 %v13049_v62, %v13144_v19  ;;  %v484_v19 = vld [vmem:[%s12915_s14 + $0x318] sm:$0xff]  ;;  %v483_v59 = vld [vmem:[%s12915_s14 + $0x310] sm:$0xff] }
  0xe8   : > { %v2514_v29 = vadd.f32 %v2394_v38, %v13240_v53  ;;  %v3851_v28 = vmul.f32 %v13110_v9, %v1542_v39  ;;  %1186 = vst [vmem:[#allocation2 + $0x108] sm:$0xff] %v13327_v1  ;;  %1185 = vst [vmem:[#allocation2 + $0x100] sm:$0xff] %v13329_v12  ;;  %1000 = vperm.xlu1 %12464, %v482_v58   ;;  %v3124_v22 = vmul.f32 %v13039_v52, %v1907_v40  ;;  %v691_v46 = vpop.permute.xlu1 %690  ;;  %v486_v41 = vld [vmem:[%s12915_s14 + $0x328] sm:$0xff] }
  0xe9   : > { %v2152_v35 = vadd.f32 %v2032_v61, %v1787_v45  ;;  %v4216_v50 = vmul.f32 %v13115_v10, %v1907_v40  ;;  %v2398_v53 = vmul.f32 %v13000_v15, %v13165_v26  ;;  %995 = vperm.xlu0 %12463, %v481_v42   ;;  %4454 = vst [vmem:[#allocation3 + $0x30] sm:$0xff] %v4334_v25  ;;  %1188 = vst [vmem:[#allocation2 + $0x118] sm:$0xff] %v691_v46  ;;  %v1546_v45 = vld [vmem:[#allocation2 + $0xa1] sm:$0xff] }
  0xea   : > { %v2879_v51 = vadd.f32 %v2759_v54, %v2514_v29  ;;  %v3606_v36 = vadd.f32 %v3486_v7, %v13256_v24  ;;  %v1426_v39 = vmul.f32 %v12990_v13, %v13165_v26  ;;  %v3490_v18 = vmul.f32 %v13049_v62, %v13165_v26  ;;  %v13356_v24 = vpop.permute.xlu0 %685  ;;  %v1547_v54 = vld [vmem:[#allocation2 + $0xa9] sm:$0xff]  ;;  %v485_v25 = vld [vmem:[%s12915_s14 + $0x320] sm:$0xff] }
  0xeb   : > { %v13348_v31 = vadd.f32 %v2398_v53, %v2152_v35  ;;  %v13352_v57 = vmul.f32 %v12990_v13, %v13167_v27  ;;  %v1668_v40 = vmul.f32 %v12995_v14, %v1543_v30  ;;  %v2033_v16 = vmul.f32 %v13006_v17, %v1908_v37  ;;  %17548 = vst [vmem:[#allocation17_spill] sm:$0xff] %v13356_v24  ;;  %v1911_v35 = vld [vmem:[#allocation2 + $0xa2] sm:$0xff] }
  0xec   : > { %v3244_v20 = vadd.f32 %v3124_v22, %v2879_v51  ;;  %v3971_v2 = vadd.f32 %v3851_v28, %v3606_v36  ;;  %v2396_v26 = vmul.f32 %v13000_v15, %v13167_v27  ;;  %v2760_v23 = vmul.f32 %v13031_v47, %v1543_v30  ;;  %1187 = vst [vmem:[#allocation2 + $0x110] sm:$0xff] %v13356_v24  ;;  %v701_v22 = vpop.permute.xlu1 %700  ;;  %v1912_v51 = vld [vmem:[#allocation2 + $0xaa] sm:$0xff] }
  0xed   : > { %1010 = vperm.xlu1 %12464, %v484_v19   ;;  %v1788_v43 = vadd.f32 %v1668_v40, %v1423_v0  ;;  %v3125_v56 = vmul.f32 %v13039_v52, %v1908_v37  ;;  %v3488_v11 = vmul.f32 %v13049_v62, %v13167_v27  ;;  %v3852_v58 = vmul.f32 %v13110_v9, %v1543_v30 }
  0xee   : > { %1005 = vperm.xlu0 %12463, %v483_v59   ;;  %v4336_v6 = vadd.f32 %v4216_v50, %v3971_v2  ;;  %v13367_v61 = vadd.f32 %v3490_v18, %v3244_v20  ;;  %v13370_v38 = vadd.f32 %v2396_v26, %v13304_v33  ;;  %v2880_v42 = vadd.f32 %v2760_v23, %v2515_v21  ;;  %v4572_v0 = vld [vmem:[#allocation3 + $0x20] ss:$2 sm:$0xff]  ;;  %v4692_v29 = vld [vmem:[#allocation3 + $0x21] ss:$2 sm:$0xff]  ;;  %v696_v50 = vpop.permute.xlu0 %695  ;;  %v487_v26 = vld [vmem:[%s12915_s14 + $0x330] sm:$0xff] }
  0xef   : > { %v2153_v7 = vadd.f32 %v2033_v16, %v1788_v43  ;;  %v13374_v27 = vadd.f32 %v3488_v11, %v13308_v55  ;;  %v3972_v28 = vadd.f32 %v3852_v58, %v3607_v63  ;;  %v4217_v30 = vmul.f32 %v13115_v10, %v1908_v37  ;;  %1190 = vst [vmem:[#allocation2 + $0x128] sm:$0xff] %v701_v22  ;;  %v488_v55 = vld [vmem:[%s12915_s14 + $0x338] sm:$0xff] }
  0xf0   : > { %v4809_v53 = vmax.f32 %v4572_v0, %v4692_v29  ;;  %4456 = vst [vmem:[#allocation3 + $0x40] sm:$0xff] %v4336_v6  ;;  %v3245_v33 = vadd.f32 %v3125_v56, %v2880_v42  ;;  %v13379_v21 = vmul.f32 %v12990_v13, %v13188_v48  ;;  %v13383_v19 = vmul.f32 %v13000_v15, %v13188_v48  ;;  %v4574_v63 = vld [vmem:[#allocation3 + $0x30] ss:$2 sm:$0x7f]  ;;  %v711_v56 = vpop.permute.xlu1 %710 }
  0xf1   : > { %1189 = vst [vmem:[#allocation2 + $0x120] sm:$0xff] %v696_v50  ;;  %1020 = vperm.xlu1 %12464, %v486_v41   ;;  %v4694_v37 = vld [vmem:[#allocation3 + $0x31] ss:$2 sm:$0x7f]  ;;  %v4337_v36 = vadd.f32 %v4217_v30, %v3972_v28  ;;  %v1427_v18 = vmul.f32 %v12990_v13, %v13190_v49  ;;  %v1671_v59 = vmul.f32 %v12995_v14, %v1546_v45  ;;  %1192 = vst [vmem:[#allocation2 + $0x138] sm:$0xff] %v711_v56 }
  0xf2   : > { %v1672_v40 = vmul.f32 %v12995_v14, %v1547_v54  ;;  %1015 = vperm.xlu0 %12463, %v485_v25   ;;  %v4810_v16 = vmax.f32 %v4574_v63, %v4694_v37  ;;  %4869 = vst [vmem:[#allocation4 + $0x10] sm:$0xff] %v4809_v53  ;;  %v13392_v46 = vmul.f32 %v13049_v62, %v13188_v48  ;;  %v706_v11 = vpop.permute.xlu0 %705  ;;  %v1304_v6 = vld [vmem:[#allocation2 + $0xb8] sm:$0x3f]  ;;  %v13425_v37 = vld [vmem:[%s17545_s1] ss:$0 sm:$0xff] }
  0xf3   : > { %v2036_v20 = vmul.f32 %v13006_v17, %v1911_v35  ;;  %v2399_v2 = vmul.f32 %v13000_v15, %v13190_v49  ;;  %4457 = vst [vmem:[#allocation3 + $0x48] sm:$0xff] %v4337_v36  ;;  %v1791_v23 = vadd.f32 %v1671_v59, %v1426_v39  ;;  %v2037_v43 = vmul.f32 %v13006_v17, %v1912_v51  ;;  %v13409_v0 = vld [vmem:[#allocation2 + $0xb1] sm:$0xff]  ;;  %v1549_v29 = vld [vmem:[#allocation2 + $0xb9] sm:$0x3f] }
  0xf4   : > { %v1792_v13 = vadd.f32 %v1672_v40, %v1427_v18  ;;  %v2763_v14 = vmul.f32 %v13031_v47, %v1546_v45  ;;  %4870 = vst [vmem:[#allocation4 + $0x18] sm:$0x7f] %v4810_v16  ;;  %v2764_v48 = vmul.f32 %v13031_v47, %v1547_v54  ;;  %v3128_v41 = vmul.f32 %v13039_v52, %v1911_v35  ;;  %v13415_v50 = vld [vmem:[#allocation2 + $0xb2] sm:$0xff]  ;;  %v1914_v53 = vld [vmem:[#allocation2 + $0xba] sm:$0x3f] }
  0xf5   : > { %v2519_v58 = vadd.f32 %v2399_v2, %v2153_v7  ;;  %v3491_v15 = vmul.f32 %v13049_v62, %v13190_v49  ;;  %1191 = vst [vmem:[#allocation2 + $0x130] sm:$0xff] %v706_v11  ;;  %1030 = vperm.xlu1 %12464, %v488_v55   ;;  %v13404_v17 = vadd.f32 %v2036_v20, %v1791_v23  ;;  %v490_v7 = vld [vmem:[%s12915_s14 + $0x348] sm:$0xff]  ;;  %v489_v55 = vld [vmem:[%s12915_s14 + $0x340] sm:$0xff]  ;;  %v2641_v18 = vld [vmem:[#allocation2 + $0xb9] sm:$0x3f] }
  0xf6   : > { %v2883_v39 = vadd.f32 %v2763_v14, %v13348_v31  ;;  %v3129_v42 = vmul.f32 %v13039_v52, %v1912_v51  ;;  %v3855_v25 = vmul.f32 %v13110_v9, %v1546_v45  ;;  %1025 = vperm.xlu0 %12463, %v487_v26   ;;  %v13412_v28 = vadd.f32 %v2037_v43, %v1792_v13  ;;  %v716_v59 = vpop.permute.xlu0 %715  ;;  %v3006_v2 = vld [vmem:[#allocation2 + $0xba] sm:$0x3f]  ;;  %v13442_v43 = vld [vmem:[%s17545_s1 + $0x2] ss:$0 sm:$0xff] }
  0xf7   : > { %v2884_v49 = vadd.f32 %v2764_v48, %v2519_v58  ;;  %v3611_v30 = vadd.f32 %v3491_v15, %v3245_v33  ;;  %v3856_v22 = vmul.f32 %v13110_v9, %v1547_v54  ;;  %v4220_v45 = vmul.f32 %v13115_v10, %v1911_v35  ;;  %v2276_v33 = vld [vmem:[#allocation2 + $0xb8] sm:$0x3f]  ;;  %v721_v54 = vpop.permute.xlu1 %720  ;;  %1193 = vst [vmem:[#allocation2 + $0x140] sm:$0xff] %v716_v59  ;;  %v493_v48 = vld [vmem:[%s12915_s14 + $0x360] sm:$0xff] }
  0xf8   : > { %v13418_v31 = vadd.f32 %v3128_v41, %v2883_v39  ;;  %v3975_v63 = vadd.f32 %v3855_v25, %v13367_v61  ;;  %v1429_v36 = vmul.f32 %v13425_v37, %v1304_v6  ;;  %v4221_v16 = vmul.f32 %v13115_v10, %v1912_v51  ;;  %v13432_v61 = vld [vmem:[%s17545_s1 + $0x1] ss:$0 sm:$0xff]  ;;  %v3368_v26 = vld [vmem:[#allocation2 + $0xb8] sm:$0x3f]  ;;  %1194 = vst [vmem:[#allocation2 + $0x148] sm:$0xff] %v721_v54 }
  0xf9   : > { %v3976_v40 = vadd.f32 %v3856_v22, %v3611_v30  ;;  %v1673_v35 = vmul.f32 %v13432_v61, %v13409_v0  ;;  %v1674_v20 = vmul.f32 %v13432_v61, %v1549_v29  ;;  %v3733_v23 = vld [vmem:[#allocation2 + $0xb9] sm:$0x3f]  ;;  %1040 = vperm.xlu1 %12464, %v490_v7   ;;  %v13437_v13 = vadd.f32 %v3129_v42, %v2884_v49  ;;  %v13452_v25 = vld [vmem:[%s17545_s1 + $0x3] ss:$0 sm:$0xff]  ;;  %v491_v7 = vld [vmem:[%s12915_s14 + $0x350] sm:$0xff] }
  0xfa   : > { %v4340_v51 = vadd.f32 %v4220_v45, %v3975_v63  ;;  %v2038_v14 = vmul.f32 %v13442_v43, %v13415_v50  ;;  %v2039_v56 = vmul.f32 %v13442_v43, %v1914_v53  ;;  %v4098_v11 = vld [vmem:[#allocation2 + $0xba] sm:$0x3f]  ;;  %1035 = vperm.xlu0 %12463, %v489_v55   ;;  %v4576_v41 = vld [vmem:[#allocation3 + $0x40] ss:$2 sm:$0xff]  ;;  %v4696_v15 = vld [vmem:[#allocation3 + $0x41] ss:$2 sm:$0xff]  ;;  %v13455_v29 = vmul.f32 %v13452_v25, %v2276_v33 }
  0xfb   : > { %v1300_v58 = vld [vmem:[#allocation2 + $0x98] sm:$0x3f]  ;;  %v4341_v6 = vadd.f32 %v4221_v16, %v3976_v40  ;;  %v1793_v39 = vadd.f32 %v1673_v35, %v13379_v21  ;;  %v1794_v42 = vadd.f32 %v1674_v20, %v1429_v36  ;;  %v4811_v49 = vmax.f32 %v4576_v41, %v4696_v15  ;;  %v731_v45 = vpop.permute.xlu1 %730  ;;  %v726_v36 = vpop.permute.xlu0 %725 }
  0xfc   : > { %4460 = vst [vmem:[#allocation3 + $0x60] sm:$0xff] %v4340_v51  ;;  %v13460_v30 = vmul.f32 %v13031_v47, %v13409_v0  ;;  %v13463_v22 = vmul.f32 %v13031_v47, %v2641_v18  ;;  %v13467_v21 = vmul.f32 %v13039_v52, %v13415_v50  ;;  %v1544_v53 = vld [vmem:[#allocation2 + $0x91] sm:$0xff]  ;;  %v1545_v55 = vld [vmem:[#allocation2 + $0x99] sm:$0x3f]  ;;  %v13474_v59 = vmul.f32 %v13039_v52, %v3006_v2 }
  0xfd   : > { %v1909_v63 = vld [vmem:[#allocation2 + $0x92] sm:$0xff]  ;;  %4461 = vst [vmem:[#allocation3 + $0x68] sm:$0xff] %v4341_v6  ;;  %v13469_v33 = vadd.f32 %v2038_v14, %v1793_v39  ;;  %v13471_v54 = vadd.f32 %v2039_v56, %v1794_v42  ;;  %v13477_v47 = vmul.f32 %v13049_v62, %v3368_v26  ;;  %v1910_v18 = vld [vmem:[#allocation2 + $0x9a] sm:$0x3f]  ;;  %1196 = vst [vmem:[#allocation2 + $0x158] sm:$0xff] %v731_v45  ;;  %1055 = vperm.xlu1 %12464, %v493_v48  }
  0xfe   : > { %v2272_v40 = vld [vmem:[#allocation2 + $0x98] sm:$0x3f]  ;;  %1195 = vst [vmem:[#allocation2 + $0x150] sm:$0xff] %v726_v36  ;;  %4871 = vst [vmem:[#allocation4 + $0x20] sm:$0xff] %v4811_v49  ;;  %v13481_v35 = vmul.f32 %v13110_v9, %v13409_v0  ;;  %v13484_v20 = vmul.f32 %v13110_v9, %v3733_v23  ;;  %v13488_v52 = vmul.f32 %v13115_v10, %v13415_v50  ;;  %1045 = vperm.xlu0 %12463, %v491_v7   ;;  %v495_v26 = vld [vmem:[%s12915_s14 + $0x370] sm:$0xff] }
  0xff   : > { %17549 = vst [vmem:[#allocation18_spill] sm:$0xff] %v13471_v54  ;;  %v2637_v16 = vld [vmem:[#allocation2 + $0x99] sm:$0x3f]  ;;  %v1425_v62 = vmul.f32 %v13425_v37, %v1300_v58  ;;  %v13493_v51 = vmul.f32 %v13115_v10, %v4098_v11  ;;  %v1669_v14 = vmul.f32 %v13432_v61, %v1544_v53  ;;  %v1670_v0 = vmul.f32 %v13432_v61, %v1545_v55  ;;  %v494_v48 = vld [vmem:[%s12915_s14 + $0x368] sm:$0xff]  ;;  %v13504_v58 = vld [vmem:[%s17545_s1 + $0x4] ss:$0 sm:$0xff]  ;;  %v741_v39 = vpop.permute.xlu1 %740  ;;  %v736_v42 = vpop.permute.xlu0 %735 }
 0x100   : > { %v3364_v2 = vld [vmem:[#allocation2 + $0x98] sm:$0x3f]  ;;  %v2034_v56 = vmul.f32 %v13442_v43, %v1909_v63  ;;  %v2035_v41 = vmul.f32 %v13442_v43, %v1910_v18  ;;  %v2397_v50 = vmul.f32 %v13452_v25, %v2272_v40  ;;  %v2761_v11 = vmul.f32 %v13504_v58, %v1544_v53  ;;  %v13512_v55 = vld [vmem:[%s17545_s1 + $0x5] ss:$0 sm:$0xff]  ;;  %v13518_v36 = vld [vmem:[%s17545_s1 + $0x6] ss:$0 sm:$0xff] }
 0x101   : > { %v3002_v23 = vld [vmem:[#allocation2 + $0x9a] sm:$0x3f]  ;;  %v2762_v15 = vmul.f32 %v13504_v58, %v2637_v16  ;;  %v1789_v7 = vadd.f32 %v1669_v14, %v13352_v57  ;;  %v1790_v49 = vadd.f32 %v1670_v0, %v1425_v62  ;;  %v3126_v45 = vmul.f32 %v13512_v55, %v1909_v63  ;;  %1198 = vst [vmem:[#allocation2 + $0x168] sm:$0xff] %v741_v39 }
 0x102   : > { %v3729_v6 = vld [vmem:[#allocation2 + $0x99] sm:$0x3f]  ;;  %v3489_v18 = vmul.f32 %v13518_v36, %v3364_v2  ;;  %1197 = vst [vmem:[#allocation2 + $0x160] sm:$0xff] %v736_v42  ;;  %1065 = vperm.xlu1 %12464, %v495_v26   ;;  %v2517_v57 = vadd.f32 %v2397_v50, %v13272_v44  ;;  %v2881_v40 = vadd.f32 %v2761_v11, %v13370_v38  ;;  %v1550_v11 = vld [vmem:[#allocation2 + $0xc1] sm:$0xff] }
 0x103   : > { %v3127_v16 = vmul.f32 %v13512_v55, %v3002_v23  ;;  %v3853_v62 = vmul.f32 %v13110_v9, %v1544_v53  ;;  %v4094_v14 = vld [vmem:[#allocation2 + $0x9a] sm:$0x3f]  ;;  %1060 = vperm.xlu0 %12463, %v494_v48   ;;  %v2154_v24 = vadd.f32 %v2034_v56, %v1789_v7  ;;  %v2155_v12 = vadd.f32 %v2035_v41, %v1790_v49  ;;  %v751_v50 = vpop.permute.xlu1 %750  ;;  %v746_v53 = vpop.permute.xlu0 %745  ;;  %v498_v7 = vld [vmem:[%s12915_s14 + $0x388] sm:$0xff] }
 0x104   : > { %v496_v0 = vld [vmem:[%s12915_s14 + $0x378] sm:$0xff]  ;;  %v3609_v1 = vadd.f32 %v3489_v18, %v13289_v4  ;;  %v3854_v2 = vmul.f32 %v13110_v9, %v3729_v6  ;;  %v4580_v42 = vld [vmem:[#allocation3 + $0x60] ss:$2 sm:$0xff]  ;;  %v4700_v26 = vld [vmem:[#allocation3 + $0x61] ss:$2 sm:$0xff]  ;;  %v2882_v54 = vadd.f32 %v2762_v15, %v2517_v57  ;;  %v3246_v44 = vadd.f32 %v3126_v45, %v2881_v40  ;;  %1200 = vst [vmem:[#allocation2 + $0x178] sm:$0xff] %v751_v50 }
 0x105   : > { %v492_v39 = vld [vmem:[%s12915_s14 + $0x358] sm:$0xff]  ;;  %v3973_v38 = vadd.f32 %v3853_v62, %v13374_v27  ;;  %v4218_v23 = vmul.f32 %v13115_v10, %v1909_v63  ;;  %v4813_v48 = vmax.f32 %v4580_v42, %v4700_v26  ;;  %v2520_v56 = vadd.f32 %v13383_v19, %v2154_v24  ;;  %1199 = vst [vmem:[#allocation2 + $0x170] sm:$0xff] %v746_v53  ;;  %v1915_v6 = vld [vmem:[#allocation2 + $0xc2] sm:$0xff] }
 0x106   : > { %v3974_v41 = vadd.f32 %v3854_v2, %v3609_v1  ;;  %v4219_v4 = vmul.f32 %v13115_v10, %v4094_v14  ;;  %1070 = vperm.xlu1 %12464, %v496_v0   ;;  %v13534_v9 = vadd.f32 %v13455_v29, %v2155_v12  ;;  %v3247_v27 = vadd.f32 %v3127_v16, %v2882_v54  ;;  %v497_v12 = vld [vmem:[%s12915_s14 + $0x380] sm:$0xff]  ;;  %v500_v14 = vld [vmem:[%s12915_s14 + $0x398] sm:$0xff] }
 0x107   : > { %v3612_v63 = vadd.f32 %v13392_v46, %v3246_v44  ;;  %v4338_v15 = vadd.f32 %v4218_v23, %v3973_v38  ;;  %1050 = vperm.xlu0 %12463, %v492_v39   ;;  %4873 = vst [vmem:[#allocation4 + $0x30] sm:$0xff] %v4813_v48  ;;  %v1431_v10 = vmul.f32 %v13425_v37, %v13236_v32  ;;  %v761_v45 = vpop.permute.xlu1 %760  ;;  %v756_v18 = vpop.permute.xlu0 %755  ;;  %v13570_v42 = vld [vmem:[%s17545_s1 + $0x7] ss:$0 sm:$0xff]  ;;  %v1916_v23 = vld [vmem:[#allocation2 + $0xca] sm:$0xff] }
 0x108   : > { %v4339_v24 = vadd.f32 %v4219_v4, %v3974_v41  ;;  %v2403_v1 = vmul.f32 %v13452_v25, %v13236_v32  ;;  %v3495_v19 = vmul.f32 %v13518_v36, %v13236_v32  ;;  %v3613_v29 = vadd.f32 %v13477_v47, %v3247_v27  ;;  %1202 = vst [vmem:[#allocation2 + $0x188] sm:$0xff] %v761_v45 }
 0x109   : > { %v3977_v46 = vadd.f32 %v13481_v35, %v3612_v63  ;;  %4458 = vst [vmem:[#allocation3 + $0x50] sm:$0xff] %v4338_v15  ;;  %v1430_v54 = vmul.f32 %v13425_v37, %v13238_v60  ;;  %v1675_v49 = vmul.f32 %v13432_v61, %v1550_v11  ;;  %v2040_v32 = vmul.f32 %v13442_v43, %v1915_v6  ;;  %v502_v15 = vld [vmem:[%s12915_s14 + $0x3a8] sm:$0xff] }
 0x10a   : > { %4459 = vst [vmem:[#allocation3 + $0x58] sm:$0x3f] %v4339_v24  ;;  %v13551_v57 = vadd.f32 %v2403_v1, %v13412_v28  ;;  %v2402_v47 = vmul.f32 %v13452_v25, %v13238_v60  ;;  %v2767_v35 = vmul.f32 %v13504_v58, %v1550_v11  ;;  %1201 = vst [vmem:[#allocation2 + $0x180] sm:$0xff] %v756_v18  ;;  %1080 = vperm.xlu1 %12464, %v498_v7   ;;  %v501_v24 = vld [vmem:[%s12915_s14 + $0x3a0] sm:$0xff] }
 0x10b   : > { %v3978_v40 = vadd.f32 %v13484_v20, %v3613_v29  ;;  %v4342_v16 = vadd.f32 %v13488_v52, %v3977_v46  ;;  %v13560_v62 = vadd.f32 %v3495_v19, %v13437_v13  ;;  %v1795_v28 = vadd.f32 %v1675_v49, %v1430_v54  ;;  %1075 = vperm.xlu0 %12463, %v497_v12   ;;  %v1551_v52 = vld [vmem:[#allocation2 + $0xc9] sm:$0xff]  ;;  %v771_v50 = vpop.permute.xlu1 %770  ;;  %v766_v53 = vpop.permute.xlu0 %765 }
 0x10c   : > { %v2522_v0 = vadd.f32 %v2402_v47, %v13404_v17  ;;  %v3132_v2 = vmul.f32 %v13512_v55, %v1915_v6  ;;  %v3494_v39 = vmul.f32 %v13518_v36, %v13238_v60  ;;  %v3859_v20 = vmul.f32 %v13570_v42, %v1550_v11  ;;  %v499_v13 = vld [vmem:[%s12915_s14 + $0x390] sm:$0xff]  ;;  %v13578_v17 = vld [vmem:[%s17545_s1 + $0x8] ss:$0 sm:$0xff]  ;;  %1204 = vst [vmem:[#allocation2 + $0x198] sm:$0xff] %v771_v50 }
 0x10d   : > { %v4343_v26 = vadd.f32 %v13493_v51, %v3978_v40  ;;  %4462 = vst [vmem:[#allocation3 + $0x70] sm:$0xff] %v4342_v16  ;;  %v2160_v44 = vadd.f32 %v2040_v32, %v1795_v28  ;;  %v4224_v60 = vmul.f32 %v13578_v17, %v1915_v6  ;;  %v2406_v38 = vmul.f32 %v13452_v25, %v13261_v5  ;;  %v1554_v47 = vld [vmem:[#allocation2 + $0xe1] sm:$0xff]  ;;  %v1555_v28 = vld [vmem:[#allocation2 + $0xe9] sm:$0xff] }
 0x10e   : > { %v2887_v48 = vadd.f32 %v2767_v35, %v2522_v0  ;;  %v3614_v41 = vadd.f32 %v3494_v39, %v13418_v31  ;;  %v13586_v51 = vmul.f32 %v13425_v37, %v13261_v5  ;;  %v2885_v4 = vadd.f32 %v13460_v30, %v2520_v56  ;;  %1203 = vst [vmem:[#allocation2 + $0x190] sm:$0xff] %v766_v53  ;;  %v504_v0 = vld [vmem:[%s12915_s14 + $0x3b8] sm:$0xff] }
 0x10f   : > { %1090 = vperm.xlu1 %12464, %v500_v14   ;;  %4463 = vst [vmem:[#allocation3 + $0x78] sm:$0x3f] %v4343_v26  ;;  %v13589_v11 = vadd.f32 %v2406_v38, %v2160_v44  ;;  %v3498_v27 = vmul.f32 %v13518_v36, %v13261_v5  ;;  %v13595_v63 = vmul.f32 %v13425_v37, %v13263_v34  ;;  %v781_v54 = vpop.permute.xlu1 %780  ;;  %v776_v49 = vpop.permute.xlu0 %775  ;;  %v1919_v14 = vld [vmem:[#allocation2 + $0xe2] sm:$0xff] }
 0x110   : > { %v1676_v31 = vmul.f32 %v13432_v61, %v1551_v52  ;;  %1085 = vperm.xlu0 %12463, %v499_v13   ;;  %v3252_v6 = vadd.f32 %v3132_v2, %v2887_v48  ;;  %v3979_v7 = vadd.f32 %v3859_v20, %v3614_v41  ;;  %v3250_v30 = vadd.f32 %v13467_v21, %v2885_v4  ;;  %v503_v20 = vld [vmem:[%s12915_s14 + $0x3b0] sm:$0xff] }
 0x111   : > { %v2041_v56 = vmul.f32 %v13442_v43, %v1916_v23  ;;  %v4578_v1 = vld [vmem:[#allocation3 + $0x50] ss:$2 sm:$0x7f]  ;;  %v4698_v19 = vld [vmem:[#allocation3 + $0x51] ss:$2 sm:$0x7f]  ;;  %v2404_v5 = vmul.f32 %v13452_v25, %v13263_v34  ;;  %v2768_v29 = vmul.f32 %v13504_v58, %v1551_v52  ;;  %v3133_v46 = vmul.f32 %v13512_v55, %v1916_v23 }
 0x112   : > { %v1796_v12 = vadd.f32 %v1676_v31, %v1431_v10  ;;  %v4812_v45 = vmax.f32 %v4578_v1, %v4698_v19  ;;  %v4344_v18 = vadd.f32 %v4224_v60, %v3979_v7  ;;  %v13606_v32 = vadd.f32 %v3498_v27, %v3252_v6  ;;  %1206 = vst [vmem:[#allocation2 + $0x1a8] sm:$0xff] %v781_v54  ;;  %v1556_v1 = vld [vmem:[#allocation2 + $0xf1] sm:$0xff]  ;;  %v1557_v19 = vld [vmem:[#allocation2 + $0xf9] sm:$0x3f] }
 0x113   : > { %v3496_v21 = vmul.f32 %v13518_v36, %v13263_v34  ;;  %1205 = vst [vmem:[#allocation2 + $0x1a0] sm:$0xff] %v776_v49  ;;  %1100 = vperm.xlu1 %12464, %v502_v15   ;;  %v13611_v35 = vadd.f32 %v2404_v5, %v13469_v33  ;;  %v2888_v40 = vadd.f32 %v2768_v29, %v13551_v57  ;;  %v1920_v57 = vld [vmem:[#allocation2 + $0xea] sm:$0xff]  ;;  %v791_v60 = vpop.permute.xlu1 %790  ;;  %v786_v38 = vpop.permute.xlu0 %785  ;;  %v1921_v49 = vld [vmem:[#allocation2 + $0xf2] sm:$0xff] }
 0x114   : > { %v2161_v10 = vadd.f32 %v2041_v56, %v1796_v12  ;;  %v3860_v16 = vmul.f32 %v13570_v42, %v1551_v52  ;;  %1095 = vperm.xlu0 %12463, %v501_v24   ;;  %4872 = vst [vmem:[#allocation4 + $0x28] sm:$0x7f] %v4812_v45  ;;  %4464 = vst [vmem:[#allocation3 + $0x80] sm:$0xff] %v4344_v18  ;;  %v4225_v2 = vmul.f32 %v13578_v17, %v1916_v23  ;;  %v1312_v24 = vld [vmem:[#allocation2 + $0xf8] sm:$0x3f]  ;;  %v506_v45 = vld [vmem:[%s12915_s14 + $0x3c8] sm:$0xff] }
 0x115   : > { %v13616_v34 = vadd.f32 %v3496_v21, %v3250_v30  ;;  %v13621_v39 = vmul.f32 %v13425_v37, %v13285_v3  ;;  %v13625_v33 = vmul.f32 %v13452_v25, %v13285_v3  ;;  %v3253_v52 = vadd.f32 %v3133_v46, %v2888_v40  ;;  %1208 = vst [vmem:[#allocation2 + $0x1b8] sm:$0xff] %v791_v60  ;;  %v505_v18 = vld [vmem:[%s12915_s14 + $0x3c0] sm:$0xff]  ;;  %v1922_v40 = vld [vmem:[#allocation2 + $0xfa] sm:$0x3f] }
 0x116   : > { %v3980_v13 = vadd.f32 %v3860_v16, %v13560_v62  ;;  %v13631_v26 = vmul.f32 %v13518_v36, %v13285_v3  ;;  %v1679_v44 = vmul.f32 %v13432_v61, %v1554_v47  ;;  %v1435_v23 = vmul.f32 %v13425_v37, %v13287_v8  ;;  %1207 = vst [vmem:[#allocation2 + $0x1b0] sm:$0xff] %v786_v38  ;;  %v2284_v16 = vld [vmem:[#allocation2 + $0xf8] sm:$0x3f] }
 0x117   : > { %v1680_v50 = vmul.f32 %v13432_v61, %v1555_v28  ;;  %v2044_v53 = vmul.f32 %v13442_v43, %v1919_v14  ;;  %v2407_v48 = vmul.f32 %v13452_v25, %v13287_v8  ;;  %1110 = vperm.xlu1 %12464, %v504_v0   ;;  %v2045_v41 = vmul.f32 %v13442_v43, %v1920_v57  ;;  %v801_v12 = vpop.permute.xlu1 %800  ;;  %v796_v5 = vpop.permute.xlu0 %795  ;;  %v3376_v38 = vld [vmem:[#allocation2 + $0xf8] sm:$0x3f] }
 0x118   : > { %v4345_v62 = vadd.f32 %v4225_v2, %v3980_v13  ;;  %v1799_v3 = vadd.f32 %v1679_v44, %v13586_v51  ;;  %v2771_v4 = vmul.f32 %v13504_v58, %v1554_v47  ;;  %1105 = vperm.xlu0 %12463, %v503_v20   ;;  %v2772_v15 = vmul.f32 %v13504_v58, %v1555_v28  ;;  %v2649_v13 = vld [vmem:[#allocation2 + $0xf9] sm:$0x3f] }
 0x119   : > { %v1800_v27 = vadd.f32 %v1680_v50, %v1435_v23  ;;  %v2527_v31 = vadd.f32 %v2407_v48, %v2161_v10  ;;  %v3136_v6 = vmul.f32 %v13512_v55, %v1919_v14  ;;  %v3137_v30 = vmul.f32 %v13512_v55, %v1920_v57  ;;  %1210 = vst [vmem:[#allocation2 + $0x1c8] sm:$0xff] %v801_v12 }
 0x11a   : > { %4465 = vst [vmem:[#allocation3 + $0x88] sm:$0xff] %v4345_v62  ;;  %v2891_v7 = vadd.f32 %v2771_v4, %v13589_v11  ;;  %v3499_v51 = vmul.f32 %v13518_v36, %v13287_v8  ;;  %v3863_v56 = vmul.f32 %v13570_v42, %v1554_v47  ;;  %v13650_v29 = vadd.f32 %v2044_v53, %v1799_v3  ;;  %v3741_v3 = vld [vmem:[#allocation2 + $0xf9] sm:$0x3f] }
 0x11b   : > { %v13652_v46 = vadd.f32 %v2045_v41, %v1800_v27  ;;  %v2892_v54 = vadd.f32 %v2772_v15, %v2527_v31  ;;  %v3864_v11 = vmul.f32 %v13570_v42, %v1555_v28  ;;  %1209 = vst [vmem:[#allocation2 + $0x1c0] sm:$0xff] %v796_v5  ;;  %v4228_v10 = vmul.f32 %v13578_v17, %v1919_v14  ;;  %v3014_v14 = vld [vmem:[#allocation2 + $0xfa] sm:$0x3f]  ;;  %v811_v23 = vpop.permute.xlu1 %810  ;;  %v806_v50 = vpop.permute.xlu0 %805 }
 0x11c   : > { %v13657_v8 = vadd.f32 %v3136_v6, %v2891_v7  ;;  %v3619_v21 = vadd.f32 %v3499_v51, %v3253_v52  ;;  %v3983_v47 = vadd.f32 %v3863_v56, %v13606_v32  ;;  %1120 = vperm.xlu1 %12464, %v506_v45   ;;  %v4229_v0 = vmul.f32 %v13578_v17, %v1920_v57  ;;  %v4106_v41 = vld [vmem:[#allocation2 + $0xfa] sm:$0x3f]  ;;  %v1552_v6 = vld [vmem:[#allocation2 + $0xd1] sm:$0xff] }
 0x11d   : > { %v1437_v2 = vmul.f32 %v13425_v37, %v1312_v24  ;;  %v1681_v28 = vmul.f32 %v13432_v61, %v1556_v1  ;;  %v1682_v20 = vmul.f32 %v13432_v61, %v1557_v19  ;;  %1115 = vperm.xlu0 %12463, %v505_v18   ;;  %v13665_v44 = vadd.f32 %v3137_v30, %v2892_v54  ;;  %v1308_v4 = vld [vmem:[#allocation2 + $0xd8] sm:$0x3f] }
 0x11e   : > { %v3984_v52 = vadd.f32 %v3864_v11, %v3619_v21  ;;  %v4348_v60 = vadd.f32 %v4228_v10, %v3983_v47  ;;  %v2046_v32 = vmul.f32 %v13442_v43, %v1921_v49  ;;  %v2047_v48 = vmul.f32 %v13442_v43, %v1922_v40  ;;  %1212 = vst [vmem:[#allocation2 + $0x1d8] sm:$0xff] %v811_v23  ;;  %v1553_v7 = vld [vmem:[#allocation2 + $0xd9] sm:$0x3f] }
 0x11f   : > { %v1801_v57 = vadd.f32 %v1681_v28, %v13621_v39  ;;  %v1802_v53 = vadd.f32 %v1682_v20, %v1437_v2  ;;  %v13671_v62 = vmul.f32 %v13452_v25, %v2284_v16  ;;  %1211 = vst [vmem:[#allocation2 + $0x1d0] sm:$0xff] %v806_v50  ;;  %v13674_v31 = vmul.f32 %v13504_v58, %v1556_v1  ;;  %v1917_v30 = vld [vmem:[#allocation2 + $0xd2] sm:$0xff]  ;;  %v1918_v47 = vld [vmem:[#allocation2 + $0xda] sm:$0x3f]  ;;  %v17550_v50 = vld [vmem:[#allocation18_spill] sm:$0xff] }
 0x120   : > { %v4349_v27 = vadd.f32 %v4229_v0, %v3984_v52  ;;  %4468 = vst [vmem:[#allocation3 + $0xa0] sm:$0xff] %v4348_v60  ;;  %v13677_v15 = vmul.f32 %v13504_v58, %v2649_v13  ;;  %v13680_v39 = vmul.f32 %v13512_v55, %v1921_v49  ;;  %v13687_v12 = vmul.f32 %v13512_v55, %v3014_v14  ;;  %v2280_v54 = vld [vmem:[#allocation2 + $0xd8] sm:$0x3f] }
 0x121   : > { %v4584_v51 = vld [vmem:[#allocation3 + $0x80] ss:$2 sm:$0xff]  ;;  %v4704_v56 = vld [vmem:[#allocation3 + $0x81] ss:$2 sm:$0xff]  ;;  %v13682_v24 = vadd.f32 %v2046_v32, %v1801_v57  ;;  %v13684_v19 = vadd.f32 %v2047_v48, %v1802_v53  ;;  %v13690_v5 = vmul.f32 %v13518_v36, %v3376_v38  ;;  %v3865_v45 = vmul.f32 %v13570_v42, %v1556_v1  ;;  %v2645_v2 = vld [vmem:[#allocation2 + $0xd9] sm:$0x3f] }
 0x122   : > { %v4815_v11 = vmax.f32 %v4584_v51, %v4704_v56  ;;  %4469 = vst [vmem:[#allocation3 + $0xa8] sm:$0xff] %v4349_v27  ;;  %v13694_v18 = vmul.f32 %v13570_v42, %v3741_v3  ;;  %v13697_v21 = vmul.f32 %v13578_v17, %v1921_v49  ;;  %v2886_v10 = vadd.f32 %v13463_v22, %v13534_v9  ;;  %v3372_v13 = vld [vmem:[#allocation2 + $0xd8] sm:$0x3f]  ;;  %v507_v22 = vld [vmem:[%s12915_s14 + $0x3d0] sm:$0xff] }
 0x123   : > { %v1433_v40 = vmul.f32 %v13425_v37, %v1308_v4  ;;  %v1677_v16 = vmul.f32 %v13432_v61, %v1552_v6  ;;  %v1678_v0 = vmul.f32 %v13432_v61, %v1553_v7  ;;  %v13705_v1 = vmul.f32 %v13578_v17, %v4106_v41  ;;  %v508_v52 = vld [vmem:[%s12915_s14 + $0x3d8] sm:$0xff]  ;;  %1125 = vperm.xlu0 %12463, %v507_v22  }
 0x124   : > { %4875 = vst [vmem:[#allocation4 + $0x40] sm:$0xff] %v4815_v11  ;;  %v2042_v28 = vmul.f32 %v13442_v43, %v1917_v30  ;;  %v2405_v49 = vmul.f32 %v13452_v25, %v2280_v54  ;;  %v2769_v20 = vmul.f32 %v13504_v58, %v1552_v6  ;;  %v3251_v9 = vadd.f32 %v13474_v59, %v2886_v10  ;;  %v3010_v38 = vld [vmem:[#allocation2 + $0xda] sm:$0x3f]  ;;  %v821_v11 = vpop.permute.xlu1 %820 }
 0x125   : > { %v1797_v60 = vadd.f32 %v1677_v16, %v13595_v63  ;;  %v1798_v32 = vadd.f32 %v1678_v0, %v1433_v40  ;;  %v2043_v14 = vmul.f32 %v13442_v43, %v1918_v47  ;;  %v3737_v23 = vld [vmem:[#allocation2 + $0xd9] sm:$0x3f]  ;;  %1130 = vperm.xlu1 %12464, %v508_v52   ;;  %v2770_v53 = vmul.f32 %v13504_v58, %v2645_v2  ;;  %v816_v47 = vpop.permute.xlu0 %815 }
 0x126   : > { %v2525_v57 = vadd.f32 %v2405_v49, %v17550_v50  ;;  %v2889_v48 = vadd.f32 %v2769_v20, %v13611_v35  ;;  %v3134_v3 = vmul.f32 %v13512_v55, %v1917_v30  ;;  %v3497_v59 = vmul.f32 %v13518_v36, %v3372_v13  ;;  %v4102_v54 = vld [vmem:[#allocation2 + $0xda] sm:$0x3f]  ;;  %1214 = vst [vmem:[#allocation2 + $0x1e8] sm:$0xff] %v821_v11  ;;  %v1558_v13 = vld [vmem:[#allocation2 + $0x101] sm:$0xff] }
 0x127   : > { %v2162_v41 = vadd.f32 %v2042_v28, %v1797_v60  ;;  %v2163_v4 = vadd.f32 %v2043_v14, %v1798_v32  ;;  %v3861_v63 = vmul.f32 %v13570_v42, %v1552_v6  ;;  %v3135_v7 = vmul.f32 %v13512_v55, %v3010_v38  ;;  %1213 = vst [vmem:[#allocation2 + $0x1e0] sm:$0xff] %v816_v47  ;;  %v17551_v60 = vld [vmem:[#allocation15_spill] sm:$0xff]  ;;  %v1923_v32 = vld [vmem:[#allocation2 + $0x102] sm:$0xff] }
 0x128   : > { %v2890_v27 = vadd.f32 %v2770_v53, %v2525_v57  ;;  %v3254_v51 = vadd.f32 %v3134_v3, %v2889_v48  ;;  %v3862_v56 = vmul.f32 %v13570_v42, %v3737_v23  ;;  %v3617_v16 = vadd.f32 %v3497_v59, %v3251_v9  ;;  %v509_v14 = vld [vmem:[%s12915_s14 + $0x3e0] sm:$0xff]  ;;  %v17552_v57 = vld [vmem:[#allocation16_spill] sm:$0xff] }
 0x129   : > { %v4588_v10 = vld [vmem:[#allocation3 + $0xa0] ss:$2 sm:$0xff]  ;;  %v4708_v35 = vld [vmem:[#allocation3 + $0xa1] ss:$2 sm:$0xff]  ;;  %v13724_v40 = vadd.f32 %v13625_v33, %v2162_v41  ;;  %v3981_v0 = vadd.f32 %v3861_v63, %v13616_v34  ;;  %v4226_v6 = vmul.f32 %v13578_v17, %v1917_v30  ;;  %v2529_v28 = vadd.f32 %v13671_v62, %v2163_v4  ;;  %1135 = vperm.xlu0 %12463, %v509_v14   ;;  %v1316_v4 = vld [vmem:[#allocation2 + $0x118] sm:$0x3f]  ;;  %v831_v63 = vpop.permute.xlu1 %830 }
 0x12a   : > { %v4817_v2 = vmax.f32 %v4588_v10, %v4708_v35  ;;  %v3255_v49 = vadd.f32 %v3135_v7, %v2890_v27  ;;  %v3620_v20 = vadd.f32 %v13631_v26, %v3254_v51  ;;  %v3982_v52 = vadd.f32 %v3862_v56, %v3617_v16  ;;  %v510_v34 = vld [vmem:[%s12915_s14 + $0x3e8] sm:$0xff]  ;;  %v1561_v59 = vld [vmem:[#allocation2 + $0x119] sm:$0x3f]  ;;  %1216 = vst [vmem:[#allocation2 + $0x1f8] sm:$0xff] %v831_v63 }
 0x12b   : > { %v4227_v33 = vmul.f32 %v13578_v17, %v4102_v54  ;;  %v4346_v22 = vadd.f32 %v4226_v6, %v3981_v0  ;;  %v2411_v9 = vmul.f32 %v13452_v25, %v17551_v60  ;;  %v13738_v62 = vmul.f32 %v13425_v37, %v17551_v60  ;;  %1140 = vperm.xlu1 %12464, %v510_v34   ;;  %v2288_v56 = vld [vmem:[#allocation2 + $0x118] sm:$0x3f] }
 0x12c   : > { %4877 = vst [vmem:[#allocation4 + $0x50] sm:$0xff] %v4817_v2  ;;  %v3621_v30 = vadd.f32 %v13690_v5, %v3255_v49  ;;  %v3985_v38 = vadd.f32 %v3865_v45, %v3620_v20  ;;  %v3503_v26 = vmul.f32 %v13518_v36, %v17551_v60  ;;  %v1438_v53 = vmul.f32 %v13425_v37, %v17552_v57  ;;  %v2653_v10 = vld [vmem:[#allocation2 + $0x119] sm:$0x3f] }
 0x12d   : > { %v4347_v23 = vadd.f32 %v4227_v33, %v3982_v52  ;;  %4466 = vst [vmem:[#allocation3 + $0x90] sm:$0xff] %v4346_v22  ;;  %v13743_v50 = vadd.f32 %v2411_v9, %v13652_v46  ;;  %v1683_v48 = vmul.f32 %v13432_v61, %v1558_v13  ;;  %v2048_v3 = vmul.f32 %v13442_v43, %v1923_v32  ;;  %v826_v46 = vpop.permute.xlu0 %825  ;;  %v3018_v2 = vld [vmem:[#allocation2 + $0x11a] sm:$0x3f] }
 0x12e   : > { %v3986_v5 = vadd.f32 %v13694_v18, %v3621_v30  ;;  %v4350_v45 = vadd.f32 %v13697_v21, %v3985_v38  ;;  %v2410_v41 = vmul.f32 %v13452_v25, %v17552_v57  ;;  %v13754_v27 = vadd.f32 %v3503_v26, %v13665_v44  ;;  %v1926_v21 = vld [vmem:[#allocation2 + $0x11a] sm:$0x3f]  ;;  %1215 = vst [vmem:[#allocation2 + $0x1f0] sm:$0xff] %v826_v46  ;;  %v1560_v26 = vld [vmem:[#allocation2 + $0x111] sm:$0xff] }
 0x12f   : > { %4467 = vst [vmem:[#allocation3 + $0x98] sm:$0x3f] %v4347_v23  ;;  %v1803_v7 = vadd.f32 %v1683_v48, %v1438_v53  ;;  %v2775_v51 = vmul.f32 %v13504_v58, %v1558_v13  ;;  %v3502_v18 = vmul.f32 %v13518_v36, %v17552_v57  ;;  %v3140_v47 = vmul.f32 %v13512_v55, %v1923_v32  ;;  %v3380_v49 = vld [vmem:[#allocation2 + $0x118] sm:$0x3f] }
 0x130   : > { %v4351_v54 = vadd.f32 %v13705_v1, %v3986_v5  ;;  %4470 = vst [vmem:[#allocation3 + $0xb0] sm:$0xff] %v4350_v45  ;;  %v2530_v11 = vadd.f32 %v2410_v41, %v13650_v29  ;;  %v3867_v44 = vmul.f32 %v13570_v42, %v1558_v13  ;;  %v4232_v16 = vmul.f32 %v13578_v17, %v1923_v32  ;;  %v3745_v13 = vld [vmem:[#allocation2 + $0x119] sm:$0x3f]  ;;  %v1559_v32 = vld [vmem:[#allocation2 + $0x109] sm:$0xff] }
 0x131   : > { %v3622_v35 = vadd.f32 %v3502_v18, %v13657_v8  ;;  %v1441_v0 = vmul.f32 %v13425_v37, %v1316_v4  ;;  %v1686_v6 = vmul.f32 %v13432_v61, %v1561_v59  ;;  %v13767_v1 = vadd.f32 %v2048_v3, %v1803_v7  ;;  %v4110_v9 = vld [vmem:[#allocation2 + $0x11a] sm:$0x3f]  ;;  %v1924_v5 = vld [vmem:[#allocation2 + $0x10a] sm:$0xff]  ;;  %v1925_v18 = vld [vmem:[#allocation2 + $0x112] sm:$0xff] }
 0x132   : > { %4471 = vst [vmem:[#allocation3 + $0xb8] sm:$0x3f] %v4351_v54  ;;  %v2895_v20 = vadd.f32 %v2775_v51, %v2530_v11  ;;  %v2051_v29 = vmul.f32 %v13442_v43, %v1926_v21  ;;  %v2413_v52 = vmul.f32 %v13452_v25, %v2288_v56  ;;  %v2778_v22 = vmul.f32 %v13504_v58, %v2653_v10 }
 0x133   : > { %v3987_v33 = vadd.f32 %v3867_v44, %v3622_v35  ;;  %v1806_v8 = vadd.f32 %v1686_v6, %v1441_v0  ;;  %v2894_v60 = vadd.f32 %v13677_v15, %v2529_v28  ;;  %v3143_v30 = vmul.f32 %v13512_v55, %v3018_v2  ;;  %v512_v15 = vld [vmem:[%s12915_s14 + $0x3f8] sm:$0xff]  ;;  %v511_v28 = vld [vmem:[%s12915_s14 + $0x3f0] sm:$0xff]  ;;  %v841_v35 = vpop.permute.xlu1 %840  ;;  %s17516_s14 = smov 24  }
 0x134   : > { %v13773_v34 = vadd.f32 %v3140_v47, %v2895_v20  ;;  %v2533_v14 = vadd.f32 %v2413_v52, %v13684_v19  ;;  %v3505_v38 = vmul.f32 %v13518_v36, %v3380_v49  ;;  %v3870_v48 = vmul.f32 %v13570_v42, %v3745_v13  ;;  %1150 = vperm.xlu1 %12464, %v512_v15   ;;  %v12601_v47 = vld [vmem:[#allocation2 + $0x110] sm:$0xff]  ;;  %v12603_v15 = vld [vmem:[#allocation2 + $0x120] sm:$0xff] }
 0x135   : > { %v4352_v23 = vadd.f32 %v4232_v16, %v3987_v33  ;;  %v13778_v57 = vadd.f32 %v2051_v29, %v1806_v8  ;;  %v3259_v53 = vadd.f32 %v13687_v12, %v2894_v60  ;;  %v4235_v19 = vmul.f32 %v13578_v17, %v4110_v9  ;;  %v17553_v12 = vld [vmem:[#allocation17_spill] sm:$0xff]  ;;  %1145 = vperm.xlu0 %12463, %v511_v28   ;;  %v836_v16 = vpop.permute.xlu0 %835 }
 0x136   : > { %v4586_v45 = vld [vmem:[#allocation3 + $0x90] ss:$2 sm:$0x7f]  ;;  %v4706_v3 = vld [vmem:[#allocation3 + $0x91] ss:$2 sm:$0x7f]  ;;  %v2898_v41 = vadd.f32 %v2778_v22, %v2533_v14  ;;  %v2893_v4 = vadd.f32 %v13674_v31, %v13724_v40  ;;  %v1684_v59 = vmul.f32 %v13432_v61, %v1559_v32  ;;  %v1440_v7 = vmul.f32 %v13425_v37, %v17553_v12 }
 0x137   : > { %v4816_v63 = vmax.f32 %v4586_v45, %v4706_v3  ;;  %4472 = vst [vmem:[#allocation3 + $0xc0] sm:$0xff] %v4352_v23  ;;  %v3625_v46 = vadd.f32 %v3505_v38, %v3259_v53  ;;  %v1685_v51 = vmul.f32 %v13432_v61, %v1560_v26  ;;  %v2049_v31 = vmul.f32 %v13442_v43, %v1924_v5  ;;  %v1562_v22 = vld [vmem:[#allocation2 + $0x121] sm:$0xff] }
 0x138   : > { %v13791_v21 = vadd.f32 %v3143_v30, %v2898_v41  ;;  %v3258_v56 = vadd.f32 %v13680_v39, %v2893_v4  ;;  %v1804_v54 = vadd.f32 %v1684_v59, %v13738_v62  ;;  %v2412_v44 = vmul.f32 %v12601_v47, %v13452_v25  ;;  %1218 = vst [vmem:[#allocation2 + $0x208] sm:$0xff] %v841_v35  ;;  %v1927_v30 = vld [vmem:[#allocation2 + $0x122] sm:$0xff]  ;;  %v1565_v4 = vld [vmem:[#allocation2 + $0x139] sm:$0x3f] }
 0x139   : > { %4876 = vst [vmem:[#allocation4 + $0x48] sm:$0x7f] %v4816_v63  ;;  %v3990_v40 = vadd.f32 %v3870_v48, %v3625_v46  ;;  %v1805_v11 = vadd.f32 %v1685_v51, %v1440_v7  ;;  %v2776_v10 = vmul.f32 %v13504_v58, %v1559_v32  ;;  %v2050_v0 = vmul.f32 %v13442_v43, %v1925_v18  ;;  %v12602_v23 = vld [vmem:[#allocation2 + $0x128] sm:$0xff]  ;;  %v1930_v7 = vld [vmem:[#allocation2 + $0x13a] sm:$0x3f] }
 0x13a   : > { %v2169_v6 = vadd.f32 %v2049_v31, %v1804_v54  ;;  %v2777_v2 = vmul.f32 %v13504_v58, %v1560_v26  ;;  %v3141_v39 = vmul.f32 %v13512_v55, %v1924_v5  ;;  %1217 = vst [vmem:[#allocation2 + $0x200] sm:$0xff] %v836_v16  ;;  %v2532_v49 = vadd.f32 %v2412_v44, %v13682_v24  ;;  %v2292_v51 = vld [vmem:[#allocation2 + $0x138] sm:$0x3f] }
 0x13b   : > { %v4355_v62 = vadd.f32 %v4235_v19, %v3990_v40  ;;  %v2896_v20 = vadd.f32 %v2776_v10, %v13743_v50  ;;  %v3142_v29 = vmul.f32 %v13512_v55, %v1925_v18  ;;  %v13804_v52 = vadd.f32 %v2050_v0, %v1805_v11  ;;  %v1320_v19 = vld [vmem:[#allocation2 + $0x138] sm:$0x3f] }
 0x13c   : > { %v3504_v13 = vmul.f32 %v12601_v47, %v13518_v36  ;;  %v3868_v33 = vmul.f32 %v13570_v42, %v1559_v32  ;;  %v3869_v8 = vmul.f32 %v13570_v42, %v1560_v26  ;;  %v2897_v60 = vadd.f32 %v2777_v2, %v2532_v49  ;;  %v2657_v40 = vld [vmem:[#allocation2 + $0x139] sm:$0x3f] }
 0x13d   : > { %4475 = vst [vmem:[#allocation3 + $0xd8] sm:$0x3f] %v4355_v62  ;;  %v3261_v9 = vadd.f32 %v3141_v39, %v2896_v20  ;;  %v4233_v14 = vmul.f32 %v13578_v17, %v1924_v5  ;;  %v4234_v24 = vmul.f32 %v13578_v17, %v1925_v18  ;;  %v13813_v53 = vmul.f32 %v12602_v23, %v13425_v37  ;;  %v3384_v11 = vld [vmem:[#allocation2 + $0x138] sm:$0x3f] }
 0x13e   : > { %v3624_v50 = vadd.f32 %v3504_v13, %v3258_v56  ;;  %v3988_v38 = vadd.f32 %v3868_v33, %v13754_v27  ;;  %v2415_v32 = vmul.f32 %v12602_v23, %v13452_v25  ;;  %v13816_v48 = vadd.f32 %v3142_v29, %v2897_v60  ;;  %v3022_v16 = vld [vmem:[#allocation2 + $0x13a] sm:$0x3f]  ;;  %v1563_v13 = vld [vmem:[#allocation2 + $0x129] sm:$0xff] }
 0x13f   : > { %v3507_v26 = vmul.f32 %v12602_v23, %v13518_v36  ;;  %v1442_v28 = vmul.f32 %v12603_v15, %v13425_v37  ;;  %v1687_v5 = vmul.f32 %v13432_v61, %v1562_v22  ;;  %v2052_v27 = vmul.f32 %v13442_v43, %v1927_v30  ;;  %v3749_v0 = vld [vmem:[#allocation2 + $0x139] sm:$0x3f]  ;;  %v1928_v60 = vld [vmem:[#allocation2 + $0x12a] sm:$0xff] }
 0x140   : > { %v3989_v45 = vadd.f32 %v3869_v8, %v3624_v50  ;;  %v4353_v3 = vadd.f32 %v4233_v14, %v3988_v38  ;;  %v13821_v41 = vadd.f32 %v2415_v32, %v2169_v6  ;;  %v2414_v46 = vmul.f32 %v12603_v15, %v13452_v25  ;;  %v4114_v49 = vld [vmem:[#allocation2 + $0x13a] sm:$0x3f]  ;;  %v12605_v50 = vld [vmem:[#allocation2 + $0x130] sm:$0xff] }
 0x141   : > { %v13824_v59 = vadd.f32 %v3507_v26, %v3261_v9  ;;  %v1807_v63 = vadd.f32 %v1687_v5, %v1442_v28  ;;  %v2779_v12 = vmul.f32 %v13504_v58, %v1562_v22  ;;  %v3144_v56 = vmul.f32 %v13512_v55, %v1927_v30  ;;  %v13858_v26 = vld [vmem:[%s17545_s1 + $0x1] ss:$0 sm:$0xff] }
 0x142   : > { %v4354_v18 = vadd.f32 %v4234_v24, %v3989_v45  ;;  %4473 = vst [vmem:[#allocation3 + $0xc8] sm:$0xff] %v4353_v3  ;;  %v3506_v54 = vmul.f32 %v12603_v15, %v13518_v36  ;;  %v3871_v31 = vmul.f32 %v13570_v42, %v1562_v22  ;;  %v2534_v47 = vadd.f32 %v2414_v46, %v13767_v1 }
 0x143   : > { %v4236_v44 = vmul.f32 %v13578_v17, %v1927_v30  ;;  %v1445_v10 = vmul.f32 %v13425_v37, %v1320_v19  ;;  %v1690_v35 = vmul.f32 %v13432_v61, %v1565_v4  ;;  %v13835_v6 = vadd.f32 %v2052_v27, %v1807_v63  ;;  %v1564_v61 = vld [vmem:[#allocation2 + $0x131] sm:$0xff]  ;;  %v13852_v30 = vld [vmem:[%s17545_s1] ss:$0 sm:$0xff] }
 0x144   : > { %4474 = vst [vmem:[#allocation3 + $0xd0] sm:$0xff] %v4354_v18  ;;  %v3626_v2 = vadd.f32 %v3506_v54, %v13773_v34  ;;  %v2055_v39 = vmul.f32 %v13442_v43, %v1930_v7  ;;  %v2417_v62 = vmul.f32 %v13452_v25, %v2292_v51  ;;  %v2899_v20 = vadd.f32 %v2779_v12, %v2534_v47  ;;  %v13870_v12 = vld [vmem:[%s17545_s1 + $0x2] ss:$0 sm:$0xff]  ;;  %v856_v47 = vpop.permute.xlu1 %855 }
 0x145   : > { %v1810_v1 = vadd.f32 %v1690_v35, %v1445_v10  ;;  %v2782_v29 = vmul.f32 %v13504_v58, %v2657_v40  ;;  %v3509_v37 = vmul.f32 %v13518_v36, %v3384_v11  ;;  %v3147_v22 = vmul.f32 %v13512_v55, %v3022_v16  ;;  %1221 = vst [vmem:[#allocation2 + $0x220] sm:$0xff] %v856_v47 }
 0x146   : > { %v3991_v33 = vadd.f32 %v3871_v31, %v3626_v2  ;;  %v2537_v8 = vadd.f32 %v2417_v62, %v13778_v57  ;;  %v3874_v34 = vmul.f32 %v13570_v42, %v3749_v0  ;;  %v13845_v9 = vadd.f32 %v3144_v56, %v2899_v20  ;;  %v1929_v57 = vld [vmem:[#allocation2 + $0x132] sm:$0xff] }
 0x147   : > { %v3629_v14 = vadd.f32 %v3509_v37, %v13791_v21  ;;  %v4239_v24 = vmul.f32 %v13578_v17, %v4114_v49  ;;  %v1444_v38 = vmul.f32 %v12605_v50, %v13852_v30  ;;  %v1688_v21 = vmul.f32 %v13858_v26, %v1563_v13  ;;  %v1566_v49 = vld [vmem:[#allocation2 + $0x141] sm:$0xff] }
 0x148   : > { %v4356_v23 = vadd.f32 %v4236_v44, %v3991_v33  ;;  %v2902_v32 = vadd.f32 %v2782_v29, %v2537_v8  ;;  %v1689_v15 = vmul.f32 %v13858_v26, %v1564_v61  ;;  %v13862_v45 = vadd.f32 %v2055_v39, %v1810_v1  ;;  %v846_v44 = vpop.permute.xlu0 %845  ;;  %v1931_v29 = vld [vmem:[#allocation2 + $0x142] sm:$0xff] }
 0x149   : > { %v4592_v28 = vld [vmem:[#allocation3 + $0xc0] ss:$2 sm:$0xff]  ;;  %v4712_v5 = vld [vmem:[#allocation3 + $0xc1] ss:$2 sm:$0xff]  ;;  %v3994_v3 = vadd.f32 %v3874_v34, %v3629_v14  ;;  %v2053_v27 = vmul.f32 %v13442_v43, %v1928_v60  ;;  %v2416_v19 = vmul.f32 %v12605_v50, %v13452_v25  ;;  %v1808_v63 = vadd.f32 %v1688_v21, %v13813_v53  ;;  %1219 = vst [vmem:[#allocation2 + $0x210] sm:$0xff] %v846_v44 }
 0x14a   : > { %v4819_v4 = vmax.f32 %v4592_v28, %v4712_v5  ;;  %4476 = vst [vmem:[#allocation3 + $0xe0] sm:$0xff] %v4356_v23  ;;  %v1809_v46 = vadd.f32 %v1689_v15, %v1444_v38  ;;  %v2054_v7 = vmul.f32 %v13870_v12, %v1929_v57  ;;  %v2780_v43 = vmul.f32 %v13504_v58, %v1563_v13  ;;  %v12608_v33 = vld [vmem:[#allocation2 + $0x148] sm:$0xff]  ;;  %v1934_v5 = vld [vmem:[#allocation2 + $0x15a] sm:$0x3f]  ;;  %v13936_v44 = vld [vmem:[%s17545_s1 + $0x4] ss:$0 sm:$0xff] }
 0x14b   : > { %v4594_v51 = vld [vmem:[#allocation3 + $0xd0] ss:$2 sm:$0x7f]  ;;  %v4714_v18 = vld [vmem:[#allocation3 + $0xd1] ss:$2 sm:$0x7f]  ;;  %v4359_v56 = vadd.f32 %v4239_v24, %v3994_v3  ;;  %v2536_v54 = vadd.f32 %v2416_v19, %v13804_v52  ;;  %v2781_v25 = vmul.f32 %v13504_v58, %v1564_v61  ;;  %v13876_v53 = vadd.f32 %v3147_v22, %v2902_v32 }
 0x14c   : > { %v4820_v31 = vmax.f32 %v4594_v51, %v4714_v18  ;;  %4879 = vst [vmem:[#allocation4 + $0x60] sm:$0xff] %v4819_v4  ;;  %v2173_v40 = vadd.f32 %v2053_v27, %v1808_v63  ;;  %v3145_v11 = vmul.f32 %v13512_v55, %v1928_v60  ;;  %v2900_v10 = vadd.f32 %v2780_v43, %v13821_v41  ;;  %v1324_v24 = vld [vmem:[#allocation2 + $0x158] sm:$0x3f]  ;;  %v13915_v19 = vld [vmem:[%s17545_s1 + $0x5] ss:$0 sm:$0xff] }
 0x14d   : > { %4479 = vst [vmem:[#allocation3 + $0xf8] sm:$0x3f] %v4359_v56  ;;  %v2901_v35 = vadd.f32 %v2781_v25, %v2536_v54  ;;  %v3146_v16 = vmul.f32 %v13512_v55, %v1929_v57  ;;  %v3508_v52 = vmul.f32 %v12605_v50, %v13518_v36  ;;  %v13882_v0 = vadd.f32 %v2054_v7, %v1809_v46  ;;  %v1569_v32 = vld [vmem:[#allocation2 + $0x159] sm:$0x3f] }
 0x14e   : > { %4880 = vst [vmem:[#allocation4 + $0x68] sm:$0x7f] %v4820_v31  ;;  %v3872_v2 = vmul.f32 %v13570_v42, %v1563_v13  ;;  %v3873_v39 = vmul.f32 %v13570_v42, %v1564_v61  ;;  %v4237_v62 = vmul.f32 %v13578_v17, %v1928_v60  ;;  %v3265_v20 = vadd.f32 %v3145_v11, %v2900_v10  ;;  %v13898_v13 = vld [vmem:[%s17545_s1 + $0x3] ss:$0 sm:$0xff]  ;;  %v2296_v3 = vld [vmem:[#allocation2 + $0x158] sm:$0x3f] }
 0x14f   : > { %v13887_v1 = vadd.f32 %v3146_v16, %v2901_v35  ;;  %v3628_v41 = vadd.f32 %v3508_v52, %v13816_v48  ;;  %v4238_v55 = vmul.f32 %v13578_v17, %v1929_v57  ;;  %v13893_v8 = vmul.f32 %v12608_v33, %v13852_v30  ;;  %v12610_v48 = vld [vmem:[#allocation2 + $0x140] sm:$0xff]  ;;  %v2661_v27 = vld [vmem:[#allocation2 + $0x159] sm:$0x3f]  ;;  %v1567_v35 = vld [vmem:[#allocation2 + $0x149] sm:$0xff] }
 0x150   : > { %v3992_v37 = vadd.f32 %v3872_v2, %v13824_v59  ;;  %v2419_v61 = vmul.f32 %v13898_v13, %v12608_v33  ;;  %v3511_v22 = vmul.f32 %v12608_v33, %v13518_v36  ;;  %v1446_v60 = vmul.f32 %v12610_v48, %v13852_v30  ;;  %v3026_v7 = vld [vmem:[#allocation2 + $0x15a] sm:$0x3f]  ;;  %v1568_v16 = vld [vmem:[#allocation2 + $0x151] sm:$0xff] }
 0x151   : > { %v3993_v34 = vadd.f32 %v3873_v39, %v3628_v41  ;;  %v1691_v14 = vmul.f32 %v13858_v26, %v1566_v49  ;;  %v2418_v59 = vmul.f32 %v12610_v48, %v13898_v13  ;;  %v2056_v57 = vmul.f32 %v13870_v12, %v1931_v29  ;;  %v3388_v51 = vld [vmem:[#allocation2 + $0x158] sm:$0x3f]  ;;  %v12614_v33 = vld [vmem:[#allocation2 + $0x150] sm:$0xff] }
 0x152   : > { %v4357_v50 = vadd.f32 %v4237_v62, %v3992_v37  ;;  %v13905_v38 = vadd.f32 %v2419_v61, %v2173_v40  ;;  %v2783_v23 = vmul.f32 %v13504_v58, %v1566_v49  ;;  %v13909_v15 = vadd.f32 %v3511_v22, %v3265_v20  ;;  %v13921_v58 = vld [vmem:[%s17545_s1 + $0x6] ss:$0 sm:$0xff]  ;;  %v3753_v25 = vld [vmem:[#allocation2 + $0x159] sm:$0x3f]  ;;  %v1932_v62 = vld [vmem:[#allocation2 + $0x14a] sm:$0xff] }
 0x153   : > { %v4358_v21 = vadd.f32 %v4238_v55, %v3993_v34  ;;  %v1811_v36 = vadd.f32 %v1691_v14, %v1446_v60  ;;  %v2538_v28 = vadd.f32 %v2418_v59, %v13835_v6  ;;  %v3148_v4 = vmul.f32 %v13915_v19, %v1931_v29  ;;  %v4118_v31 = vld [vmem:[#allocation2 + $0x15a] sm:$0x3f] }
 0x154   : > { %4477 = vst [vmem:[#allocation3 + $0xe8] sm:$0xff] %v4357_v50  ;;  %v3510_v63 = vmul.f32 %v13921_v58, %v12610_v48  ;;  %v3875_v6 = vmul.f32 %v13570_v42, %v1566_v49  ;;  %v1449_v46 = vmul.f32 %v13852_v30, %v1324_v24  ;;  %v4240_v54 = vmul.f32 %v13578_v17, %v1931_v29  ;;  %v1933_v29 = vld [vmem:[#allocation2 + $0x152] sm:$0xff] }
 0x155   : > { %4478 = vst [vmem:[#allocation3 + $0xf0] sm:$0xff] %v4358_v21  ;;  %v13926_v18 = vadd.f32 %v2056_v57, %v1811_v36  ;;  %v2903_v56 = vadd.f32 %v2783_v23, %v2538_v28  ;;  %v1694_v43 = vmul.f32 %v13858_v26, %v1569_v32  ;;  %v2059_v11 = vmul.f32 %v13870_v12, %v1934_v5 }
 0x156   : > { %v3630_v40 = vadd.f32 %v3510_v63, %v13845_v9  ;;  %v2421_v47 = vmul.f32 %v13898_v13, %v2296_v3  ;;  %v2786_v10 = vmul.f32 %v13936_v44, %v2661_v27  ;;  %v3151_v39 = vmul.f32 %v13915_v19, %v3026_v7 }
 0x157   : > { %v13939_v52 = vadd.f32 %v3148_v4, %v2903_v56  ;;  %v1814_v2 = vadd.f32 %v1694_v43, %v1449_v46  ;;  %v3513_v9 = vmul.f32 %v13921_v58, %v3388_v51  ;;  %v3878_v41 = vmul.f32 %v13570_v42, %v3753_v25  ;;  %v866_v46 = vpop.permute.xlu1 %865 }
 0x158   : > { %v3995_v49 = vadd.f32 %v3875_v6, %v3630_v40  ;;  %v2541_v20 = vadd.f32 %v2421_v47, %v13862_v45  ;;  %v4243_v55 = vmul.f32 %v13578_v17, %v4118_v31  ;;  %v1448_v61 = vmul.f32 %v12614_v33, %v13852_v30  ;;  %1223 = vst [vmem:[#allocation2 + $0x230] sm:$0xff] %v866_v46  ;;  %v13971_v40 = vld [vmem:[%s17545_s1 + $0x7] ss:$0 sm:$0xff]  ;;  %v3757_v46 = vld [vmem:[#allocation2 + $0x179] sm:$0x3f] }
 0x159   : > { %v3633_v37 = vadd.f32 %v3513_v9, %v13876_v53  ;;  %v1692_v22 = vmul.f32 %v13858_v26, %v1567_v35  ;;  %v1693_v34 = vmul.f32 %v13858_v26, %v1568_v16  ;;  %v13950_v60 = vadd.f32 %v2059_v11, %v1814_v2 }
 0x15a   : > { %v4360_v48 = vadd.f32 %v4240_v54, %v3995_v49  ;;  %v2906_v14 = vadd.f32 %v2786_v10, %v2541_v20  ;;  %v2057_v45 = vmul.f32 %v13870_v12, %v1932_v62  ;;  %v2058_v53 = vmul.f32 %v13870_v12, %v1933_v29 }
 0x15b   : > { %v4596_v59 = vld [vmem:[#allocation3 + $0xe0] ss:$2 sm:$0xff]  ;;  %v4716_v24 = vld [vmem:[#allocation3 + $0xe1] ss:$2 sm:$0xff]  ;;  %v3998_v50 = vadd.f32 %v3878_v41, %v3633_v37  ;;  %v1812_v57 = vadd.f32 %v1692_v22, %v13893_v8  ;;  %v1813_v23 = vadd.f32 %v1693_v34, %v1448_v61  ;;  %v2420_v28 = vmul.f32 %v12614_v33, %v13898_v13  ;;  %v861_v8 = vpop.permute.xlu0 %860  ;;  %v871_v41 = vpop.permute.xlu1 %870  ;;  %v1328_v22 = vld [vmem:[#allocation2 + $0x178] sm:$0x3f] }
 0x15c   : > { %v4598_v32 = vld [vmem:[#allocation3 + $0xf0] ss:$2 sm:$0x7f]  ;;  %v4718_v21 = vld [vmem:[#allocation3 + $0xf1] ss:$2 sm:$0x7f]  ;;  %v4821_v36 = vmax.f32 %v4596_v59, %v4716_v24  ;;  %v2784_v5 = vmul.f32 %v13936_v44, %v1567_v35  ;;  %v2785_v3 = vmul.f32 %v13936_v44, %v1568_v16  ;;  %v13958_v4 = vadd.f32 %v3151_v39, %v2906_v14 }
 0x15d   : > { %4480 = vst [vmem:[#allocation3 + $0x100] sm:$0xff] %v4360_v48  ;;  %v4822_v27 = vmax.f32 %v4598_v32, %v4718_v21  ;;  %v4363_v63 = vadd.f32 %v4243_v55, %v3998_v50  ;;  %v2177_v6 = vadd.f32 %v2057_v45, %v1812_v57  ;;  %v13960_v7 = vadd.f32 %v2058_v53, %v1813_v23  ;;  %v1935_v39 = vld [vmem:[#allocation2 + $0x162] sm:$0xff]  ;;  %v1573_v34 = vld [vmem:[#allocation2 + $0x179] sm:$0x3f] }
 0x15e   : > { %4881 = vst [vmem:[#allocation4 + $0x70] sm:$0xff] %v4821_v36  ;;  %v2540_v51 = vadd.f32 %v2420_v28, %v13882_v0  ;;  %v2904_v56 = vadd.f32 %v2784_v5, %v13905_v38  ;;  %v3149_v54 = vmul.f32 %v13915_v19, %v1932_v62  ;;  %1222 = vst [vmem:[#allocation2 + $0x228] sm:$0xff] %v861_v8  ;;  %v1570_v38 = vld [vmem:[#allocation2 + $0x161] sm:$0xff]  ;;  %v1938_v24 = vld [vmem:[#allocation2 + $0x17a] sm:$0x3f] }
 0x15f   : > { %4882 = vst [vmem:[#allocation4 + $0x78] sm:$0x7f] %v4822_v27  ;;  %4483 = vst [vmem:[#allocation3 + $0x118] sm:$0x3f] %v4363_v63  ;;  %v3150_v43 = vmul.f32 %v13915_v19, %v1933_v29  ;;  %v3512_v25 = vmul.f32 %v12614_v33, %v13921_v58  ;;  %v3876_v31 = vmul.f32 %v13570_v42, %v1567_v35  ;;  %v12616_v42 = vld [vmem:[#allocation2 + $0x168] sm:$0xff] }
 0x160   : > { %v3877_v0 = vmul.f32 %v13971_v40, %v1568_v16  ;;  %v2905_v11 = vadd.f32 %v2785_v3, %v2540_v51  ;;  %v3269_v47 = vadd.f32 %v3149_v54, %v2904_v56  ;;  %v4241_v10 = vmul.f32 %v13578_v17, %v1932_v62  ;;  %v851_v16 = vpop.permute.xlu0 %850  ;;  %v12617_v62 = vld [vmem:[#allocation2 + $0x160] sm:$0xff]  ;;  %1224 = vst [vmem:[#allocation2 + $0x238] sm:$0xff] %v871_v41  ;;  %v2300_v50 = vld [vmem:[#allocation2 + $0x178] sm:$0x3f]  ;;  %v14001_v5 = vld [vmem:[%s17545_s1 + $0x8] ss:$0 sm:$0xff] }
 0x161   : > { %v4242_v2 = vmul.f32 %v13578_v17, %v1933_v29  ;;  %v3632_v9 = vadd.f32 %v3512_v25, %v13887_v1  ;;  %v3996_v49 = vadd.f32 %v3876_v31, %v13909_v15  ;;  %v13979_v35 = vmul.f32 %v12616_v42, %v13852_v30  ;;  %1220 = vst [vmem:[#allocation2 + $0x218] sm:$0xff] %v851_v16  ;;  %v2665_v21 = vld [vmem:[#allocation2 + $0x179] sm:$0x3f] }
 0x162   : > { %v2423_v20 = vmul.f32 %v12616_v42, %v13898_v13  ;;  %v13982_v55 = vadd.f32 %v3150_v43, %v2905_v11  ;;  %v3515_v37 = vmul.f32 %v12616_v42, %v13921_v58  ;;  %v1450_v17 = vmul.f32 %v12617_v62, %v13852_v30  ;;  %v3392_v36 = vld [vmem:[#allocation2 + $0x178] sm:$0x3f] }
 0x163   : > { %v1695_v29 = vmul.f32 %v13858_v26, %v1570_v38  ;;  %v3997_v1 = vadd.f32 %v3877_v0, %v3632_v9  ;;  %v4361_v15 = vadd.f32 %v4241_v10, %v3996_v49  ;;  %v2060_v61 = vmul.f32 %v13870_v12, %v1935_v39  ;;  %v4122_v54 = vld [vmem:[#allocation2 + $0x17a] sm:$0x3f]  ;;  %v1572_v11 = vld [vmem:[#allocation2 + $0x171] sm:$0xff] }
 0x164   : > { %v13987_v33 = vadd.f32 %v2423_v20, %v2177_v6  ;;  %v13990_v48 = vadd.f32 %v3515_v37, %v3269_v47  ;;  %v2422_v45 = vmul.f32 %v12617_v62, %v13898_v13  ;;  %v2787_v59 = vmul.f32 %v13936_v44, %v1570_v38  ;;  %v3030_v6 = vld [vmem:[#allocation2 + $0x17a] sm:$0x3f]  ;;  %v12619_v20 = vld [vmem:[#allocation2 + $0x170] sm:$0xff]  ;;  %v881_v37 = vpop.permute.xlu1 %880 }
 0x165   : > { %v1815_v14 = vadd.f32 %v1695_v29, %v1450_v17  ;;  %v4362_v57 = vadd.f32 %v4242_v2, %v3997_v1  ;;  %4481 = vst [vmem:[#allocation3 + $0x108] sm:$0xff] %v4361_v15  ;;  %v3152_v23 = vmul.f32 %v13915_v19, %v1935_v39  ;;  %v3514_v53 = vmul.f32 %v12617_v62, %v13921_v58  ;;  %v1937_v16 = vld [vmem:[#allocation2 + $0x172] sm:$0xff]  ;;  %v876_v62 = vpop.permute.xlu0 %875 }
 0x166   : > { %v3879_v32 = vmul.f32 %v13971_v40, %v1570_v38  ;;  %v2542_v28 = vadd.f32 %v2422_v45, %v13926_v18  ;;  %v4244_v3 = vmul.f32 %v14001_v5, %v1935_v39  ;;  %v1453_v27 = vmul.f32 %v13852_v30, %v1328_v22  ;;  %v1571_v38 = vld [vmem:[#allocation2 + $0x169] sm:$0xff]  ;;  %1226 = vst [vmem:[#allocation2 + $0x248] sm:$0xff] %v881_v37  ;;  %v1332_v37 = vld [vmem:[#allocation2 + $0x198] sm:$0x3f] }
 0x167   : > { %v1698_v63 = vmul.f32 %v13858_v26, %v1573_v34  ;;  %4482 = vst [vmem:[#allocation3 + $0x110] sm:$0xff] %v4362_v57  ;;  %v14006_v8 = vadd.f32 %v2060_v61, %v1815_v14  ;;  %v3634_v51 = vadd.f32 %v3514_v53, %v13939_v52  ;;  %v2063_v18 = vmul.f32 %v13870_v12, %v1938_v24  ;;  %v1936_v39 = vld [vmem:[#allocation2 + $0x16a] sm:$0xff] }
 0x168   : > { %v2425_v56 = vmul.f32 %v13898_v13, %v2300_v50  ;;  %v2907_v43 = vadd.f32 %v2787_v59, %v2542_v28  ;;  %v2790_v31 = vmul.f32 %v13936_v44, %v2665_v21  ;;  %v3517_v0 = vmul.f32 %v13921_v58, %v3392_v36  ;;  %1225 = vst [vmem:[#allocation2 + $0x240] sm:$0xff] %v876_v62  ;;  %v891_v28 = vpop.permute.xlu1 %890 }
 0x169   : > { %v1818_v25 = vadd.f32 %v1698_v63, %v1453_v27  ;;  %v3999_v47 = vadd.f32 %v3879_v32, %v3634_v51  ;;  %v3155_v2 = vmul.f32 %v13915_v19, %v3030_v6  ;;  %v3882_v52 = vmul.f32 %v13971_v40, %v3757_v46  ;;  %1228 = vst [vmem:[#allocation2 + $0x258] sm:$0xff] %v891_v28  ;;  %v3761_v28 = vld [vmem:[#allocation2 + $0x199] sm:$0x3f] }
 0x16a   : > { %v2545_v10 = vadd.f32 %v2425_v56, %v13950_v60  ;;  %v14016_v9 = vadd.f32 %v3152_v23, %v2907_v43  ;;  %v3637_v49 = vadd.f32 %v3517_v0, %v13958_v4  ;;  %v4247_v42 = vmul.f32 %v14001_v5, %v4122_v54 }
 0x16b   : > { %v1452_v41 = vmul.f32 %v12619_v20, %v13852_v30  ;;  %v4364_v17 = vadd.f32 %v4244_v3, %v3999_v47  ;;  %v1696_v60 = vmul.f32 %v13858_v26, %v1571_v38  ;;  %v1697_v1 = vmul.f32 %v13858_v26, %v1572_v11 }
 0x16c   : > { %v2910_v29 = vadd.f32 %v2790_v31, %v2545_v10  ;;  %v4600_v15 = vld [vmem:[#allocation3 + $0x100] ss:$2 sm:$0xff]  ;;  %v4720_v61 = vld [vmem:[#allocation3 + $0x101] ss:$2 sm:$0xff]  ;;  %v14023_v22 = vadd.f32 %v2063_v18, %v1818_v25  ;;  %v4002_v4 = vadd.f32 %v3882_v52, %v3637_v49  ;;  %v2061_v34 = vmul.f32 %v13870_v12, %v1936_v39  ;;  %v886_v31 = vpop.permute.xlu0 %885 }
 0x16d   : > { %v2424_v14 = vmul.f32 %v12619_v20, %v13898_v13  ;;  %v4823_v45 = vmax.f32 %v4600_v15, %v4720_v61  ;;  %4484 = vst [vmem:[#allocation3 + $0x120] sm:$0xff] %v4364_v17  ;;  %v1816_v59 = vadd.f32 %v1696_v60, %v13979_v35  ;;  %v1817_v24 = vadd.f32 %v1697_v1, %v1452_v41  ;;  %v1574_v25 = vld [vmem:[#allocation2 + $0x181] sm:$0xff]  ;;  %v1577_v60 = vld [vmem:[#allocation2 + $0x199] sm:$0x3f] }
 0x16e   : > { %v2062_v50 = vmul.f32 %v13870_v12, %v1937_v16  ;;  %v4602_v57 = vld [vmem:[#allocation3 + $0x110] ss:$2 sm:$0x7f]  ;;  %v4722_v23 = vld [vmem:[#allocation3 + $0x111] ss:$2 sm:$0x7f]  ;;  %v4367_v53 = vadd.f32 %v4247_v42, %v4002_v4  ;;  %v2788_v21 = vmul.f32 %v13936_v44, %v1571_v38  ;;  %v2789_v36 = vmul.f32 %v13936_v44, %v1572_v11 }
 0x16f   : > { %v2544_v32 = vadd.f32 %v2424_v14, %v13960_v7  ;;  %v4824_v3 = vmax.f32 %v4602_v57, %v4722_v23  ;;  %4883 = vst [vmem:[#allocation4 + $0x80] sm:$0xff] %v4823_v45  ;;  %v14032_v27 = vadd.f32 %v3155_v2, %v2910_v29  ;;  %v2181_v63 = vadd.f32 %v2061_v34, %v1816_v59  ;;  %v1939_v2 = vld [vmem:[#allocation2 + $0x182] sm:$0xff]  ;;  %v1942_v34 = vld [vmem:[#allocation2 + $0x19a] sm:$0x3f] }
 0x170   : > { %v3153_v35 = vmul.f32 %v13915_v19, %v1936_v39  ;;  %4487 = vst [vmem:[#allocation3 + $0x138] sm:$0x3f] %v4367_v53  ;;  %v2908_v6 = vadd.f32 %v2788_v21, %v13987_v33  ;;  %v3154_v51 = vmul.f32 %v13915_v19, %v1937_v16  ;;  %v3516_v7 = vmul.f32 %v12619_v20, %v13921_v58  ;;  %v12620_v49 = vld [vmem:[#allocation2 + $0x188] sm:$0xff]  ;;  %v12621_v20 = vld [vmem:[#allocation2 + $0x180] sm:$0xff]  ;;  %v2304_v14 = vld [vmem:[#allocation2 + $0x198] sm:$0x3f] }
 0x171   : > { %v2909_v46 = vadd.f32 %v2789_v36, %v2544_v32  ;;  %4884 = vst [vmem:[#allocation4 + $0x88] sm:$0x7f] %v4824_v3  ;;  %v14038_v18 = vadd.f32 %v2062_v50, %v1817_v24  ;;  %v3880_v56 = vmul.f32 %v13971_v40, %v1571_v38  ;;  %v3881_v54 = vmul.f32 %v13971_v40, %v1572_v11  ;;  %v2669_v45 = vld [vmem:[#allocation2 + $0x199] sm:$0x3f] }
 0x172   : > { %v4245_v43 = vmul.f32 %v14001_v5, %v1936_v39  ;;  %v3273_v0 = vadd.f32 %v3153_v35, %v2908_v6  ;;  %v3636_v33 = vadd.f32 %v3516_v7, %v13982_v55  ;;  %v4246_v10 = vmul.f32 %v14001_v5, %v1937_v16  ;;  %1227 = vst [vmem:[#allocation2 + $0x250] sm:$0xff] %v886_v31  ;;  %v3034_v23 = vld [vmem:[#allocation2 + $0x19a] sm:$0x3f]  ;;  %v1576_v7 = vld [vmem:[#allocation2 + $0x191] sm:$0xff] }
 0x173   : > { %v14043_v47 = vadd.f32 %v3154_v51, %v2909_v46  ;;  %v4000_v52 = vadd.f32 %v3880_v56, %v13990_v48  ;;  %v14049_v38 = vmul.f32 %v12620_v49, %v13852_v30  ;;  %v2427_v11 = vmul.f32 %v12620_v49, %v13898_v13  ;;  %v3396_v53 = vld [vmem:[#allocation2 + $0x198] sm:$0x3f]  ;;  %v1575_v51 = vld [vmem:[#allocation2 + $0x189] sm:$0xff] }
 0x174   : > { %v3519_v39 = vmul.f32 %v12620_v49, %v13921_v58  ;;  %v4001_v42 = vadd.f32 %v3881_v54, %v3636_v33  ;;  %v1454_v41 = vmul.f32 %v12621_v20, %v13852_v30  ;;  %v1699_v55 = vmul.f32 %v13858_v26, %v1574_v25  ;;  %v4126_v3 = vld [vmem:[#allocation2 + $0x19a] sm:$0x3f]  ;;  %v1940_v31 = vld [vmem:[#allocation2 + $0x18a] sm:$0xff] }
 0x175   : > { %v2426_v16 = vmul.f32 %v12621_v20, %v13898_v13  ;;  %v4365_v62 = vadd.f32 %v4245_v43, %v4000_v52  ;;  %v14056_v17 = vadd.f32 %v2427_v11, %v2181_v63  ;;  %v2064_v48 = vmul.f32 %v13870_v12, %v1939_v2  ;;  %v12622_v49 = vld [vmem:[#allocation2 + $0x190] sm:$0xff] }
 0x176   : > { %v2791_v29 = vmul.f32 %v13936_v44, %v1574_v25  ;;  %v4366_v1 = vadd.f32 %v4246_v10, %v4001_v42  ;;  %v14060_v15 = vadd.f32 %v3519_v39, %v3273_v0  ;;  %v1819_v61 = vadd.f32 %v1699_v55, %v1454_v41 }
 0x177   : > { %v2546_v4 = vadd.f32 %v2426_v16, %v14006_v8  ;;  %4485 = vst [vmem:[#allocation3 + $0x128] sm:$0xff] %v4365_v62  ;;  %v3156_v59 = vmul.f32 %v13915_v19, %v1939_v2  ;;  %v3518_v24 = vmul.f32 %v12621_v20, %v13921_v58  ;;  %v3883_v50 = vmul.f32 %v13971_v40, %v1574_v25 }
 0x178   : > { %v1457_v57 = vmul.f32 %v13852_v30, %v1332_v37  ;;  %4486 = vst [vmem:[#allocation3 + $0x130] sm:$0xff] %v4366_v1  ;;  %v14067_v32 = vadd.f32 %v2064_v48, %v1819_v61  ;;  %v4248_v8 = vmul.f32 %v14001_v5, %v1939_v2  ;;  %v1702_v36 = vmul.f32 %v13858_v26, %v1577_v60  ;;  %v1941_v2 = vld [vmem:[#allocation2 + $0x192] sm:$0xff] }
 0x179   : > { %v2911_v21 = vadd.f32 %v2791_v29, %v2546_v4  ;;  %v3638_v63 = vadd.f32 %v3518_v24, %v14016_v9  ;;  %v2067_v35 = vmul.f32 %v13870_v12, %v1942_v34  ;;  %v2429_v6 = vmul.f32 %v13898_v13, %v2304_v14 }
 0x17a   : > { %v2794_v46 = vmul.f32 %v13936_v44, %v2669_v45  ;;  %v1822_v54 = vadd.f32 %v1702_v36, %v1457_v57  ;;  %v3159_v43 = vmul.f32 %v13915_v19, %v3034_v23  ;;  %v3521_v25 = vmul.f32 %v13921_v58, %v3396_v53 }
 0x17b   : > { %v14075_v56 = vadd.f32 %v3156_v59, %v2911_v21  ;;  %v4003_v0 = vadd.f32 %v3883_v50, %v3638_v63  ;;  %v2549_v33 = vadd.f32 %v2429_v6, %v14023_v22  ;;  %v3886_v9 = vmul.f32 %v13971_v40, %v3761_v28  ;;  %v901_v21 = vpop.permute.xlu1 %900 }
 0x17c   : > { %v4251_v10 = vmul.f32 %v14001_v5, %v4126_v3  ;;  %v3641_v52 = vadd.f32 %v3521_v25, %v14032_v27  ;;  %v1456_v11 = vmul.f32 %v12622_v49, %v13852_v30  ;;  %v1700_v39 = vmul.f32 %v13858_v26, %v1575_v51  ;;  %1230 = vst [vmem:[#allocation2 + $0x268] sm:$0xff] %v901_v21  ;;  %v4130_v21 = vld [vmem:[#allocation2 + $0x1ba] sm:$0x3f] }
 0x17d   : > { %v1701_v42 = vmul.f32 %v13858_v26, %v1576_v7  ;;  %v4368_v20 = vadd.f32 %v4248_v8, %v4003_v0  ;;  %v14086_v41 = vadd.f32 %v2067_v35, %v1822_v54  ;;  %v2914_v55 = vadd.f32 %v2794_v46, %v2549_v33  ;;  %v896_v8 = vpop.permute.xlu0 %895  ;;  %v1578_v35 = vld [vmem:[#allocation2 + $0x1a1] sm:$0xff] }
 0x17e   : > { %v2065_v22 = vmul.f32 %v13870_v12, %v1940_v31  ;;  %v4604_v16 = vld [vmem:[#allocation3 + $0x120] ss:$2 sm:$0xff]  ;;  %v4724_v37 = vld [vmem:[#allocation3 + $0x121] ss:$2 sm:$0xff]  ;;  %v4006_v62 = vadd.f32 %v3886_v9, %v3641_v52  ;;  %v1820_v48 = vadd.f32 %v1700_v39, %v14049_v38  ;;  %v2066_v27 = vmul.f32 %v13870_v12, %v1941_v2  ;;  %1229 = vst [vmem:[#allocation2 + $0x260] sm:$0xff] %v896_v8 }
 0x17f   : > { %v1821_v29 = vadd.f32 %v1701_v42, %v1456_v11  ;;  %v4606_v60 = vld [vmem:[#allocation3 + $0x130] ss:$2 sm:$0x7f]  ;;  %v4726_v1 = vld [vmem:[#allocation3 + $0x131] ss:$2 sm:$0x7f]  ;;  %v4825_v61 = vmax.f32 %v4604_v16, %v4724_v37  ;;  %v2428_v4 = vmul.f32 %v12622_v49, %v13898_v13  ;;  %v2792_v34 = vmul.f32 %v13936_v44, %v1575_v51 }
 0x180   : > { %4488 = vst [vmem:[#allocation3 + $0x140] sm:$0xff] %v4368_v20  ;;  %v2793_v14 = vmul.f32 %v13936_v44, %v1576_v7  ;;  %v4826_v45 = vmax.f32 %v4606_v60, %v4726_v1  ;;  %v14094_v59 = vadd.f32 %v3159_v43, %v2914_v55  ;;  %v4371_v24 = vadd.f32 %v4251_v10, %v4006_v62  ;;  %v1943_v54 = vld [vmem:[#allocation2 + $0x1a2] sm:$0xff]  ;;  %v1336_v11 = vld [vmem:[#allocation2 + $0x1b8] sm:$0x3f] }
 0x181   : > { %v2185_v50 = vadd.f32 %v2065_v22, %v1820_v48  ;;  %4885 = vst [vmem:[#allocation4 + $0x90] sm:$0xff] %v4825_v61  ;;  %v14096_v38 = vadd.f32 %v2066_v27, %v1821_v29  ;;  %v2548_v57 = vadd.f32 %v2428_v4, %v14038_v18  ;;  %v2912_v23 = vadd.f32 %v2792_v34, %v14056_v17  ;;  %v12623_v0 = vld [vmem:[#allocation2 + $0x1a8] sm:$0xff]  ;;  %v12624_v10 = vld [vmem:[#allocation2 + $0x1a0] sm:$0xff]  ;;  %v1581_v39 = vld [vmem:[#allocation2 + $0x1b9] sm:$0x3f] }
 0x182   : > { %v3157_v53 = vmul.f32 %v13915_v19, %v1940_v31  ;;  %4886 = vst [vmem:[#allocation4 + $0x98] sm:$0x7f] %v4826_v45  ;;  %4491 = vst [vmem:[#allocation3 + $0x158] sm:$0x3f] %v4371_v24  ;;  %v3158_v36 = vmul.f32 %v13915_v19, %v1941_v2  ;;  %v3520_v28 = vmul.f32 %v12622_v49, %v13921_v58  ;;  %v1946_v16 = vld [vmem:[#allocation2 + $0x1ba] sm:$0x3f] }
 0x183   : > { %v3884_v3 = vmul.f32 %v13971_v40, %v1575_v51  ;;  %v3885_v63 = vmul.f32 %v13971_v40, %v1576_v7  ;;  %v2913_v18 = vadd.f32 %v2793_v14, %v2548_v57  ;;  %v4249_v17 = vmul.f32 %v14001_v5, %v1940_v31  ;;  %v2308_v37 = vld [vmem:[#allocation2 + $0x1b8] sm:$0x3f] }
 0x184   : > { %v3277_v6 = vadd.f32 %v3157_v53, %v2912_v23  ;;  %v4250_v46 = vmul.f32 %v14001_v5, %v1941_v2  ;;  %v3640_v43 = vadd.f32 %v3520_v28, %v14043_v47  ;;  %v14110_v33 = vmul.f32 %v12623_v0, %v13852_v30  ;;  %v2673_v60 = vld [vmem:[#allocation2 + $0x1b9] sm:$0x3f] }
 0x185   : > { %v4004_v25 = vadd.f32 %v3884_v3, %v14060_v15  ;;  %v2431_v51 = vmul.f32 %v12623_v0, %v13898_v13  ;;  %v14113_v7 = vadd.f32 %v3158_v36, %v2913_v18  ;;  %v3523_v9 = vmul.f32 %v12623_v0, %v13921_v58  ;;  %v3400_v1 = vld [vmem:[#allocation2 + $0x1b8] sm:$0x3f]  ;;  %v1579_v3 = vld [vmem:[#allocation2 + $0x1a9] sm:$0xff] }
 0x186   : > { %v1458_v31 = vmul.f32 %v12624_v10, %v13852_v30  ;;  %v1703_v2 = vmul.f32 %v13858_v26, %v1578_v35  ;;  %v4005_v52 = vadd.f32 %v3885_v63, %v3640_v43  ;;  %v2068_v15 = vmul.f32 %v13870_v12, %v1943_v54  ;;  %v3038_v45 = vld [vmem:[#allocation2 + $0x1ba] sm:$0x3f]  ;;  %v1580_v63 = vld [vmem:[#allocation2 + $0x1b1] sm:$0xff] }
 0x187   : > { %v4369_v49 = vadd.f32 %v4249_v17, %v4004_v25  ;;  %v14118_v47 = vadd.f32 %v2431_v51, %v2185_v50  ;;  %v14121_v42 = vadd.f32 %v3523_v9, %v3277_v6  ;;  %v2430_v55 = vmul.f32 %v12624_v10, %v13898_v13  ;;  %v3765_v24 = vld [vmem:[#allocation2 + $0x1b9] sm:$0x3f]  ;;  %v1944_v17 = vld [vmem:[#allocation2 + $0x1aa] sm:$0xff] }
 0x188   : > { %v1823_v20 = vadd.f32 %v1703_v2, %v1458_v31  ;;  %v2795_v22 = vmul.f32 %v13936_v44, %v1578_v35  ;;  %v4370_v62 = vadd.f32 %v4250_v46, %v4005_v52  ;;  %v3160_v48 = vmul.f32 %v13915_v19, %v1943_v54  ;;  %v12625_v25 = vld [vmem:[#allocation2 + $0x1b0] sm:$0xff]  ;;  %v911_v2 = vpop.permute.xlu1 %910  ;;  %v906_v52 = vpop.permute.xlu0 %905 }
 0x189   : > { %4489 = vst [vmem:[#allocation3 + $0x148] sm:$0xff] %v4369_v49  ;;  %v3522_v29 = vmul.f32 %v12624_v10, %v13921_v58  ;;  %v3887_v27 = vmul.f32 %v13971_v40, %v1578_v35  ;;  %v2550_v61 = vadd.f32 %v2430_v55, %v14067_v32  ;;  %v4252_v4 = vmul.f32 %v14001_v5, %v1943_v54  ;;  %v1945_v51 = vld [vmem:[#allocation2 + $0x1b2] sm:$0xff] }
 0x18a   : > { %v1461_v34 = vmul.f32 %v13852_v30, %v1336_v11  ;;  %v1706_v14 = vmul.f32 %v13858_v26, %v1581_v39  ;;  %4490 = vst [vmem:[#allocation3 + $0x150] sm:$0xff] %v4370_v62  ;;  %v14132_v50 = vadd.f32 %v2068_v15, %v1823_v20  ;;  %v2071_v23 = vmul.f32 %v13870_v12, %v1946_v16 }
 0x18b   : > { %v3642_v57 = vadd.f32 %v3522_v29, %v14075_v56  ;;  %v2433_v53 = vmul.f32 %v13898_v13, %v2308_v37  ;;  %v2915_v8 = vadd.f32 %v2795_v22, %v2550_v61  ;;  %v2798_v36 = vmul.f32 %v13936_v44, %v2673_v60  ;;  %1232 = vst [vmem:[#allocation2 + $0x278] sm:$0xff] %v911_v2 }
 0x18c   : > { %v1826_v32 = vadd.f32 %v1706_v14, %v1461_v34  ;;  %v3525_v28 = vmul.f32 %v13921_v58, %v3400_v1  ;;  %v3163_v6 = vmul.f32 %v13915_v19, %v3038_v45  ;;  %v3890_v56 = vmul.f32 %v13971_v40, %v3765_v24  ;;  %1231 = vst [vmem:[#allocation2 + $0x270] sm:$0xff] %v906_v52 }
 0x18d   : > { %v4007_v35 = vadd.f32 %v3887_v27, %v3642_v57  ;;  %v2553_v18 = vadd.f32 %v2433_v53, %v14086_v41  ;;  %v14142_v46 = vadd.f32 %v3160_v48, %v2915_v8  ;;  %v4255_v43 = vmul.f32 %v14001_v5, %v4130_v21 }
 0x18e   : > { %v3645_v54 = vadd.f32 %v3525_v28, %v14094_v59  ;;  %v1460_v0 = vmul.f32 %v12625_v25, %v13852_v30  ;;  %v1704_v31 = vmul.f32 %v13858_v26, %v1579_v3  ;;  %v1705_v41 = vmul.f32 %v13858_v26, %v1580_v63 }
 0x18f   : > { %v4372_v9 = vadd.f32 %v4252_v4, %v4007_v35  ;;  %v2918_v10 = vadd.f32 %v2798_v36, %v2553_v18  ;;  %v14149_v11 = vadd.f32 %v2071_v23, %v1826_v32  ;;  %v2069_v59 = vmul.f32 %v13870_v12, %v1944_v17  ;;  %v916_v23 = vpop.permute.xlu0 %915  ;;  %v1582_v36 = vld [vmem:[#allocation2 + $0x1c1] sm:$0xff] }
 0x190   : > { %v4608_v49 = vld [vmem:[#allocation3 + $0x140] ss:$2 sm:$0xff]  ;;  %v4728_v15 = vld [vmem:[#allocation3 + $0x141] ss:$2 sm:$0xff]  ;;  %v4010_v39 = vadd.f32 %v3890_v56, %v3645_v54  ;;  %v2432_v20 = vmul.f32 %v12625_v25, %v13898_v13  ;;  %v1824_v22 = vadd.f32 %v1704_v31, %v14110_v33  ;;  %v1825_v16 = vadd.f32 %v1705_v41, %v1460_v0  ;;  %1233 = vst [vmem:[#allocation2 + $0x280] sm:$0xff] %v916_v23  ;;  %v1584_v23 = vld [vmem:[#allocation2 + $0x1d1] sm:$0xff] }
 0x191   : > { %v4827_v55 = vmax.f32 %v4608_v49, %v4728_v15  ;;  %4492 = vst [vmem:[#allocation3 + $0x160] sm:$0xff] %v4372_v9  ;;  %v2070_v37 = vmul.f32 %v13870_v12, %v1945_v51  ;;  %v4610_v62 = vld [vmem:[#allocation3 + $0x150] ss:$2 sm:$0x7f]  ;;  %v2796_v60 = vmul.f32 %v13936_v44, %v1579_v3  ;;  %v2797_v1 = vmul.f32 %v13936_v44, %v1580_v63  ;;  %v12626_v54 = vld [vmem:[#allocation2 + $0x1c8] sm:$0xff] }
 0x192   : > { %v4730_v48 = vld [vmem:[#allocation3 + $0x151] ss:$2 sm:$0x7f]  ;;  %v4375_v29 = vadd.f32 %v4255_v43, %v4010_v39  ;;  %v2552_v27 = vadd.f32 %v2432_v20, %v14096_v38  ;;  %v14158_v4 = vadd.f32 %v3163_v6, %v2918_v10  ;;  %v2189_v34 = vadd.f32 %v2069_v59, %v1824_v22  ;;  %v921_v38 = vpop.permute.xlu1 %920  ;;  %v1947_v6 = vld [vmem:[#allocation2 + $0x1c2] sm:$0xff] }
 0x193   : > { %v4828_v61 = vmax.f32 %v4610_v62, %v4730_v48  ;;  %4887 = vst [vmem:[#allocation4 + $0xa0] sm:$0xff] %v4827_v55  ;;  %v3161_v14 = vmul.f32 %v13915_v19, %v1944_v17  ;;  %v2916_v33 = vadd.f32 %v2796_v60, %v14118_v47  ;;  %v3162_v24 = vmul.f32 %v13915_v19, %v1945_v51  ;;  %v926_v31 = vpop.permute.xlu0 %925  ;;  %v1585_v49 = vld [vmem:[#allocation2 + $0x1d9] sm:$0x3f] }
 0x194   : > { %4495 = vst [vmem:[#allocation3 + $0x178] sm:$0x3f] %v4375_v29  ;;  %v2917_v45 = vadd.f32 %v2797_v1, %v2552_v27  ;;  %v3524_v57 = vmul.f32 %v12625_v25, %v13921_v58  ;;  %v14164_v53 = vadd.f32 %v2070_v37, %v1825_v16  ;;  %v3888_v21 = vmul.f32 %v13971_v40, %v1579_v3  ;;  %v12627_v25 = vld [vmem:[#allocation2 + $0x1c0] sm:$0xff]  ;;  %v1950_v55 = vld [vmem:[#allocation2 + $0x1da] sm:$0x3f] }
 0x195   : > { %4888 = vst [vmem:[#allocation4 + $0xa8] sm:$0x7f] %v4828_v61  ;;  %v3889_v8 = vmul.f32 %v13971_v40, %v1580_v63  ;;  %v4253_v32 = vmul.f32 %v14001_v5, %v1944_v17  ;;  %1234 = vst [vmem:[#allocation2 + $0x288] sm:$0xff] %v921_v38  ;;  %v3281_v47 = vadd.f32 %v3161_v14, %v2916_v33  ;;  %v2312_v22 = vld [vmem:[#allocation2 + $0x1d8] sm:$0x3f]  ;;  %v1583_v38 = vld [vmem:[#allocation2 + $0x1c9] sm:$0xff] }
 0x196   : > { %v14169_v28 = vadd.f32 %v3162_v24, %v2917_v45  ;;  %v3644_v35 = vadd.f32 %v3524_v57, %v14113_v7  ;;  %v4254_v18 = vmul.f32 %v14001_v5, %v1945_v51  ;;  %v4008_v56 = vadd.f32 %v3888_v21, %v14121_v42  ;;  %v1340_v51 = vld [vmem:[#allocation2 + $0x1d8] sm:$0x3f]  ;;  %v931_v10 = vpop.permute.xlu1 %930  ;;  %1235 = vst [vmem:[#allocation2 + $0x290] sm:$0xff] %v926_v31 }
 0x197   : > { %v14175_v3 = vmul.f32 %v12626_v54, %v13852_v30  ;;  %v2435_v63 = vmul.f32 %v12626_v54, %v13898_v13  ;;  %v3527_v17 = vmul.f32 %v12626_v54, %v13921_v58  ;;  %v1462_v0 = vmul.f32 %v12627_v25, %v13852_v30  ;;  %1236 = vst [vmem:[#allocation2 + $0x298] sm:$0xff] %v931_v10  ;;  %v2677_v16 = vld [vmem:[#allocation2 + $0x1d9] sm:$0x3f] }
 0x198   : > { %v4009_v43 = vadd.f32 %v3889_v8, %v3644_v35  ;;  %v1707_v9 = vmul.f32 %v13858_v26, %v1582_v36  ;;  %v2434_v7 = vmul.f32 %v12627_v25, %v13898_v13  ;;  %v4373_v42 = vadd.f32 %v4253_v32, %v4008_v56  ;;  %v3042_v27 = vld [vmem:[#allocation2 + $0x1da] sm:$0x3f]  ;;  %v1949_v56 = vld [vmem:[#allocation2 + $0x1d2] sm:$0xff] }
 0x199   : > { %v14182_v41 = vadd.f32 %v2435_v63, %v2189_v34  ;;  %v2072_v2 = vmul.f32 %v13870_v12, %v1947_v6  ;;  %v2799_v52 = vmul.f32 %v13936_v44, %v1582_v36  ;;  %v14186_v39 = vadd.f32 %v3527_v17, %v3281_v47  ;;  %v3404_v60 = vld [vmem:[#allocation2 + $0x1d8] sm:$0x3f]  ;;  %v1948_v47 = vld [vmem:[#allocation2 + $0x1ca] sm:$0xff]  ;;  %v14212_v63 = vld [vmem:[%s17545_s1] ss:$0 sm:$0xff] }
 0x19a   : > { %v4374_v15 = vadd.f32 %v4254_v18, %v4009_v43  ;;  %v1827_v59 = vadd.f32 %v1707_v9, %v1462_v0  ;;  %v2554_v20 = vadd.f32 %v2434_v7, %v14132_v50  ;;  %4493 = vst [vmem:[#allocation3 + $0x168] sm:$0xff] %v4373_v42  ;;  %v3164_v37 = vmul.f32 %v13915_v19, %v1947_v6  ;;  %v3769_v14 = vld [vmem:[#allocation2 + $0x1d9] sm:$0x3f]  ;;  %v12629_v17 = vld [vmem:[#allocation2 + $0x1d0] sm:$0xff] }
 0x19b   : > { %v3526_v62 = vmul.f32 %v12627_v25, %v13921_v58  ;;  %v3891_v48 = vmul.f32 %v13971_v40, %v1582_v36  ;;  %v1465_v29 = vmul.f32 %v13852_v30, %v1340_v51  ;;  %v4256_v50 = vmul.f32 %v14001_v5, %v1947_v6  ;;  %v4134_v33 = vld [vmem:[#allocation2 + $0x1da] sm:$0x3f] }
 0x19c   : > { %4494 = vst [vmem:[#allocation3 + $0x170] sm:$0xff] %v4374_v15  ;;  %v14193_v1 = vadd.f32 %v2072_v2, %v1827_v59  ;;  %v2919_v61 = vadd.f32 %v2799_v52, %v2554_v20  ;;  %v1710_v34 = vmul.f32 %v13858_v26, %v1585_v49  ;;  %v2075_v24 = vmul.f32 %v13870_v12, %v1950_v55 }
 0x19d   : > { %v3646_v45 = vadd.f32 %v3526_v62, %v14142_v46  ;;  %v2437_v57 = vmul.f32 %v13898_v13, %v2312_v22  ;;  %v2802_v30 = vmul.f32 %v13936_v44, %v2677_v16  ;;  %v3167_v32 = vmul.f32 %v13915_v19, %v3042_v27 }
 0x19e   : > { %v14201_v21 = vadd.f32 %v3164_v37, %v2919_v61  ;;  %v1830_v8 = vadd.f32 %v1710_v34, %v1465_v29  ;;  %v3529_v36 = vmul.f32 %v13921_v58, %v3404_v60  ;;  %v3894_v46 = vmul.f32 %v13971_v40, %v3769_v14  ;;  %v1586_v34 = vld [vmem:[#allocation2 + $0x1e1] sm:$0xff]  ;;  %v941_v14 = vpop.permute.xlu1 %940 }
 0x19f   : > { %v4011_v35 = vadd.f32 %v3891_v48, %v3646_v45  ;;  %v2557_v18 = vadd.f32 %v2437_v57, %v14149_v11  ;;  %v4259_v6 = vmul.f32 %v14001_v5, %v4134_v33  ;;  %v1464_v43 = vmul.f32 %v12629_v17, %v14212_v63  ;;  %v936_v33 = vpop.permute.xlu0 %935  ;;  %v1951_v57 = vld [vmem:[#allocation2 + $0x1e2] sm:$0xff]  ;;  %1238 = vst [vmem:[#allocation2 + $0x2a8] sm:$0xff] %v941_v14 }
 0x1a0   : > { %v3649_v54 = vadd.f32 %v3529_v36, %v14158_v4  ;;  %v1708_v25 = vmul.f32 %v13858_v26, %v1583_v38  ;;  %v1709_v0 = vmul.f32 %v13858_v26, %v1584_v23  ;;  %v14217_v9 = vadd.f32 %v2075_v24, %v1830_v8  ;;  %1237 = vst [vmem:[#allocation2 + $0x2a0] sm:$0xff] %v936_v33  ;;  %v12630_v8 = vld [vmem:[#allocation2 + $0x1e8] sm:$0xff] }
 0x1a1   : > { %v4376_v11 = vadd.f32 %v4256_v50, %v4011_v35  ;;  %v2922_v7 = vadd.f32 %v2802_v30, %v2557_v18  ;;  %v2073_v51 = vmul.f32 %v13870_v12, %v1948_v47  ;;  %v4612_v10 = vld [vmem:[#allocation3 + $0x160] ss:$2 sm:$0xff]  ;;  %v4732_v4 = vld [vmem:[#allocation3 + $0x161] ss:$2 sm:$0xff]  ;;  %v2074_v52 = vmul.f32 %v13870_v12, %v1949_v56 }
 0x1a2   : > { %v4014_v31 = vadd.f32 %v3894_v46, %v3649_v54  ;;  %v1828_v42 = vadd.f32 %v1708_v25, %v14175_v3  ;;  %v1829_v2 = vadd.f32 %v1709_v0, %v1464_v43  ;;  %v4829_v59 = vmax.f32 %v4612_v10, %v4732_v4  ;;  %v14251_v18 = vld [vmem:[%s17545_s1 + $0x1] ss:$0 sm:$0xff]  ;;  %v1589_v54 = vld [vmem:[#allocation2 + $0x1f9] sm:$0x3f]  ;;  %v1587_v33 = vld [vmem:[#allocation2 + $0x1e9] sm:$0xff] }
 0x1a3   : > { %v4614_v49 = vld [vmem:[#allocation3 + $0x170] ss:$2 sm:$0x7f]  ;;  %v4734_v15 = vld [vmem:[#allocation3 + $0x171] ss:$2 sm:$0x7f]  ;;  %v2436_v26 = vmul.f32 %v12629_v17, %v13898_v13  ;;  %v2800_v20 = vmul.f32 %v13936_v44, %v1583_v38  ;;  %v2801_v55 = vmul.f32 %v13936_v44, %v1584_v23  ;;  %v14225_v16 = vadd.f32 %v3167_v32, %v2922_v7  ;;  %v946_v43 = vpop.permute.xlu0 %945 }
 0x1a4   : > { %4496 = vst [vmem:[#allocation3 + $0x180] sm:$0xff] %v4376_v11  ;;  %v4830_v22 = vmax.f32 %v4614_v49, %v4734_v15  ;;  %v4379_v37 = vadd.f32 %v4259_v6, %v4014_v31  ;;  %v2193_v62 = vadd.f32 %v2073_v51, %v1828_v42  ;;  %4889 = vst [vmem:[#allocation4 + $0xb0] sm:$0xff] %v4829_v59  ;;  %v14267_v11 = vld [vmem:[%s17545_s1 + $0x3] ss:$0 sm:$0xff]  ;;  %v1954_v10 = vld [vmem:[#allocation2 + $0x1fa] sm:$0x3f] }
 0x1a5   : > { %v14227_v3 = vadd.f32 %v2074_v52, %v1829_v2  ;;  %v2556_v12 = vadd.f32 %v2436_v26, %v14164_v53  ;;  %v2920_v48 = vadd.f32 %v2800_v20, %v14182_v41  ;;  %v3165_v29 = vmul.f32 %v13915_v19, %v1948_v47  ;;  %v2316_v4 = vld [vmem:[#allocation2 + $0x1f8] sm:$0x3f]  ;;  %1239 = vst [vmem:[#allocation2 + $0x2b0] sm:$0xff] %v946_v43  ;;  %v14274_v42 = vld [vmem:[%s17545_s1 + $0x5] ss:$0 sm:$0xff] }
 0x1a6   : > { %4890 = vst [vmem:[#allocation4 + $0xb8] sm:$0x7f] %v4830_v22  ;;  %4499 = vst [vmem:[#allocation3 + $0x198] sm:$0x3f] %v4379_v37  ;;  %v3166_v27 = vmul.f32 %v13915_v19, %v1949_v56  ;;  %v3528_v60 = vmul.f32 %v12629_v17, %v13921_v58  ;;  %v3892_v61 = vmul.f32 %v13971_v40, %v1583_v38  ;;  %v951_v17 = vpop.permute.xlu1 %950  ;;  %v14280_v52 = vld [vmem:[%s17545_s1 + $0x6] ss:$0 sm:$0xff] }
 0x1a7   : > { %v3893_v50 = vmul.f32 %v13971_v40, %v1584_v23  ;;  %v2921_v45 = vadd.f32 %v2801_v55, %v2556_v12  ;;  %v3285_v24 = vadd.f32 %v3165_v29, %v2920_v48  ;;  %v4257_v53 = vmul.f32 %v14001_v5, %v1948_v47  ;;  %v12631_v47 = vld [vmem:[#allocation2 + $0x1e0] sm:$0xff]  ;;  %1240 = vst [vmem:[#allocation2 + $0x2b8] sm:$0xff] %v951_v17  ;;  %v2681_v15 = vld [vmem:[#allocation2 + $0x1f9] sm:$0x3f] }
 0x1a8   : > { %v4258_v41 = vmul.f32 %v14001_v5, %v1949_v56  ;;  %v3648_v19 = vadd.f32 %v3528_v60, %v14169_v28  ;;  %v4012_v30 = vadd.f32 %v3892_v61, %v14186_v39  ;;  %v14241_v38 = vmul.f32 %v12630_v8, %v14212_v63  ;;  %v1344_v56 = vld [vmem:[#allocation2 + $0x1f8] sm:$0x3f] }
 0x1a9   : > { %v2439_v23 = vmul.f32 %v12630_v8, %v13898_v13  ;;  %v14244_v32 = vadd.f32 %v3166_v27, %v2921_v45  ;;  %v3531_v36 = vmul.f32 %v12630_v8, %v13921_v58  ;;  %v1466_v35 = vmul.f32 %v12631_v47, %v14212_v63  ;;  %v14259_v13 = vld [vmem:[%s17545_s1 + $0x2] ss:$0 sm:$0xff]  ;;  %v3408_v59 = vld [vmem:[#allocation2 + $0x1f8] sm:$0x3f] }
 0x1aa   : > { %v1711_v28 = vmul.f32 %v14251_v18, %v1586_v34  ;;  %v4013_v39 = vadd.f32 %v3893_v50, %v3648_v19  ;;  %v4377_v46 = vadd.f32 %v4257_v53, %v4012_v30  ;;  %v2076_v58 = vmul.f32 %v14259_v13, %v1951_v57  ;;  %v3046_v37 = vld [vmem:[#allocation2 + $0x1fa] sm:$0x3f]  ;;  %v14296_v50 = vld [vmem:[%s17545_s1 + $0x4] ss:$0 sm:$0xff]  ;;  %v1588_v45 = vld [vmem:[#allocation2 + $0x1f1] sm:$0xff] }
 0x1ab   : > { %v14254_v6 = vadd.f32 %v2439_v23, %v2193_v62  ;;  %v14262_v25 = vadd.f32 %v3531_v36, %v3285_v24  ;;  %v2438_v7 = vmul.f32 %v14267_v11, %v12631_v47  ;;  %v2803_v51 = vmul.f32 %v13936_v44, %v1586_v34  ;;  %v3773_v62 = vld [vmem:[#allocation2 + $0x1f9] sm:$0x3f]  ;;  %v12638_v23 = vld [vmem:[#allocation2 + $0x1f0] sm:$0xff] }
 0x1ac   : > { %v1831_v0 = vadd.f32 %v1711_v28, %v1466_v35  ;;  %v4378_v31 = vadd.f32 %v4258_v41, %v4013_v39  ;;  %4497 = vst [vmem:[#allocation3 + $0x188] sm:$0xff] %v4377_v46  ;;  %v3168_v2 = vmul.f32 %v14274_v42, %v1951_v57  ;;  %v3530_v44 = vmul.f32 %v14280_v52, %v12631_v47  ;;  %v4138_v60 = vld [vmem:[#allocation2 + $0x1fa] sm:$0x3f]  ;;  %v1953_v47 = vld [vmem:[#allocation2 + $0x1f2] sm:$0xff] }
 0x1ad   : > { %v3895_v49 = vmul.f32 %v13971_v40, %v1586_v34  ;;  %v2558_v26 = vadd.f32 %v2438_v7, %v14193_v1  ;;  %v4260_v20 = vmul.f32 %v14001_v5, %v1951_v57  ;;  %v1469_v55 = vmul.f32 %v14212_v63, %v1344_v56  ;;  %v1952_v57 = vld [vmem:[#allocation2 + $0x1ea] sm:$0xff] }
 0x1ae   : > { %v1714_v22 = vmul.f32 %v14251_v18, %v1589_v54  ;;  %4498 = vst [vmem:[#allocation3 + $0x190] sm:$0xff] %v4378_v31  ;;  %v14288_v12 = vadd.f32 %v2076_v58, %v1831_v0  ;;  %v3650_v48 = vadd.f32 %v3530_v44, %v14201_v21  ;;  %v2079_v29 = vmul.f32 %v14259_v13, %v1954_v10 }
 0x1af   : > { %v2441_v27 = vmul.f32 %v14267_v11, %v2316_v4  ;;  %v2923_v61 = vadd.f32 %v2803_v51, %v2558_v26  ;;  %v2806_v34 = vmul.f32 %v14296_v50, %v2681_v15  ;;  %v3533_v14 = vmul.f32 %v14280_v52, %v3408_v59 }
 0x1b0   : > { %v1834_v1 = vadd.f32 %v1714_v22, %v1469_v55  ;;  %v4015_v24 = vadd.f32 %v3895_v49, %v3650_v48  ;;  %v3171_v53 = vmul.f32 %v14274_v42, %v3046_v37  ;;  %v3898_v41 = vmul.f32 %v13971_v40, %v3773_v62  ;;  %v14331_v48 = vld [vmem:[%s17545_s1 + $0x7] ss:$0 sm:$0xff] }
 0x1b1   : > { %v2561_v21 = vadd.f32 %v2441_v27, %v14217_v9  ;;  %v14303_v19 = vadd.f32 %v3168_v2, %v2923_v61  ;;  %v3653_v30 = vadd.f32 %v3533_v14, %v14225_v16  ;;  %v4263_v8 = vmul.f32 %v14001_v5, %v4138_v60  ;;  %v1955_v14 = vld [vmem:[#allocation2 + $0x202] sm:$0xff] }
 0x1b2   : > { %v1468_v36 = vmul.f32 %v12638_v23, %v14212_v63  ;;  %v4380_v35 = vadd.f32 %v4260_v20, %v4015_v24  ;;  %v1712_v39 = vmul.f32 %v14251_v18, %v1587_v33  ;;  %v1713_v9 = vmul.f32 %v14251_v18, %v1588_v45  ;;  %v961_v24 = vpop.permute.xlu1 %960 }
 0x1b3   : > { %v2926_v28 = vadd.f32 %v2806_v34, %v2561_v21  ;;  %v4616_v46 = vld [vmem:[#allocation3 + $0x180] ss:$2 sm:$0xff]  ;;  %v4736_v58 = vld [vmem:[#allocation3 + $0x181] ss:$2 sm:$0xff]  ;;  %v14310_v56 = vadd.f32 %v2079_v29, %v1834_v1  ;;  %v4018_v54 = vadd.f32 %v3898_v41, %v3653_v30  ;;  %v2077_v17 = vmul.f32 %v14259_v13, %v1952_v57  ;;  %1242 = vst [vmem:[#allocation2 + $0x2c8] sm:$0xff] %v961_v24 }
 0x1b4   : > { %v2440_v16 = vmul.f32 %v12638_v23, %v14267_v11  ;;  %v4831_v43 = vmax.f32 %v4616_v46, %v4736_v58  ;;  %4500 = vst [vmem:[#allocation3 + $0x1a0] sm:$0xff] %v4380_v35  ;;  %v1832_v0 = vadd.f32 %v1712_v39, %v14241_v38  ;;  %v1833_v7 = vadd.f32 %v1713_v9, %v1468_v36  ;;  %v12640_v21 = vld [vmem:[#allocation2 + $0x208] sm:$0xff]  ;;  %v12641_v30 = vld [vmem:[#allocation2 + $0x200] sm:$0xff]  ;;  %v4582_v24 = vld [vmem:[#allocation3 + $0x70] ss:$2 sm:$0x7f] }
 0x1b5   : > { %v2078_v51 = vmul.f32 %v14259_v13, %v1953_v47  ;;  %v4618_v10 = vld [vmem:[#allocation3 + $0x190] ss:$2 sm:$0x7f]  ;;  %v4738_v4 = vld [vmem:[#allocation3 + $0x191] ss:$2 sm:$0x7f]  ;;  %v4383_v31 = vadd.f32 %v4263_v8, %v4018_v54  ;;  %v2804_v44 = vmul.f32 %v14296_v50, %v1587_v33  ;;  %v2805_v49 = vmul.f32 %v14296_v50, %v1588_v45 }
 0x1b6   : > { %v2560_v2 = vadd.f32 %v2440_v16, %v14227_v3  ;;  %v4832_v15 = vmax.f32 %v4618_v10, %v4738_v4  ;;  %4891 = vst [vmem:[#allocation4 + $0xc0] sm:$0xff] %v4831_v43  ;;  %v14319_v59 = vadd.f32 %v3171_v53, %v2926_v28  ;;  %v2197_v26 = vadd.f32 %v2077_v17, %v1832_v0  ;;  %v4959_v28 = vld [vmem:[#allocation4 + $0x18] sm:$0x7f]  ;;  %v4927_v54 = vld [vmem:[#allocation4] sm:$0xff]  ;;  %v971_v16 = vpop.permute.xlu1 %970  ;;  %v4928_v10 = vld [vmem:[#allocation4 + $0x8] sm:$0x7f] }
 0x1b7   : > { %v3169_v20 = vmul.f32 %v14274_v42, %v1952_v57  ;;  %4503 = vst [vmem:[#allocation3 + $0x1b8] sm:$0x3f] %v4383_v31  ;;  %v2924_v38 = vadd.f32 %v2804_v44, %v14254_v6  ;;  %v3170_v22 = vmul.f32 %v14274_v42, %v1953_v47  ;;  %v3532_v37 = vmul.f32 %v12638_v23, %v14280_v52  ;;  %v1590_v6 = vld [vmem:[#allocation2 + $0x201] sm:$0xff]  ;;  %v4958_v23 = vld [vmem:[#allocation4 + $0x10] sm:$0xff]  ;;  %v14356_v17 = vld [vmem:[%s17554_s2] ss:$0 sm:$0xff] }
 0x1b8   : > { %v2925_v55 = vadd.f32 %v2805_v49, %v2560_v2  ;;  %4892 = vst [vmem:[#allocation4 + $0xc8] sm:$0x7f] %v4832_v15  ;;  %v14325_v3 = vadd.f32 %v2078_v51, %v1833_v7  ;;  %v3896_v62 = vmul.f32 %v13971_v40, %v1587_v33  ;;  %v3897_v29 = vmul.f32 %v14331_v48, %v1588_v45  ;;  %v956_v40 = vpop.permute.xlu0 %955  ;;  %v1591_v31 = vld [vmem:[#allocation2 + $0x209] sm:$0xff]  ;;  %v14364_v44 = vld [vmem:[%s17545_s1 + $0x8] ss:$0 sm:$0xff] }
 0x1b9   : > { %v4261_v27 = vmul.f32 %v14001_v5, %v1952_v57  ;;  %v3289_v60 = vadd.f32 %v3169_v20, %v2924_v38  ;;  %v3652_v1 = vadd.f32 %v3532_v37, %v14244_v32  ;;  %v4262_v34 = vmul.f32 %v14001_v5, %v1953_v47  ;;  %1241 = vst [vmem:[#allocation2 + $0x2c0] sm:$0xff] %v956_v40  ;;  %v12643_v38 = vld [vmem:[#allocation2 + $0x220] sm:$0xff]  ;;  %v1956_v37 = vld [vmem:[#allocation2 + $0x20a] sm:$0xff] }
 0x1ba   : > { %v14335_v61 = vadd.f32 %v3170_v22, %v2925_v55  ;;  %v4016_v33 = vadd.f32 %v3896_v62, %v14262_v25  ;;  %v1471_v53 = vmul.f32 %v12640_v21, %v14212_v63  ;;  %v2443_v45 = vmul.f32 %v12640_v21, %v14267_v11  ;;  %1244 = vst [vmem:[#allocation2 + $0x2d8] sm:$0xff] %v971_v16 }
 0x1bb   : > { %v3535_v41 = vmul.f32 %v12640_v21, %v14280_v52  ;;  %v4017_v57 = vadd.f32 %v3897_v29, %v3652_v1  ;;  %v1470_v32 = vmul.f32 %v12641_v30, %v14212_v63  ;;  %v1715_v5 = vmul.f32 %v14251_v18, %v1590_v6 }
 0x1bc   : > { %v2442_v8 = vmul.f32 %v12641_v30, %v14267_v11  ;;  %v4381_v36 = vadd.f32 %v4261_v27, %v4016_v33  ;;  %v14346_v25 = vadd.f32 %v2443_v45, %v2197_v26  ;;  %v2080_v47 = vmul.f32 %v14259_v13, %v1955_v14  ;;  %v966_v43 = vpop.permute.xlu0 %965 }
 0x1bd   : > { %v2807_v35 = vmul.f32 %v14296_v50, %v1590_v6  ;;  %v4382_v39 = vadd.f32 %v4262_v34, %v4017_v57  ;;  %v14350_v9 = vadd.f32 %v3535_v41, %v3289_v60  ;;  %v1835_v46 = vadd.f32 %v1715_v5, %v1470_v32  ;;  %1243 = vst [vmem:[#allocation2 + $0x2d0] sm:$0xff] %v966_v43  ;;  %v4702_v41 = vld [vmem:[#allocation3 + $0x71] ss:$2 sm:$0x7f] }
 0x1be   : > { %v2562_v58 = vadd.f32 %v2442_v8, %v14288_v12  ;;  %4501 = vst [vmem:[#allocation3 + $0x1a8] sm:$0xff] %v4381_v36  ;;  %v3172_v0 = vmul.f32 %v14274_v42, %v1955_v14  ;;  %v3534_v7 = vmul.f32 %v12641_v30, %v14280_v52  ;;  %v3899_v51 = vmul.f32 %v14331_v48, %v1590_v6  ;;  %v4929_v8 = vld [vmem:[#allocation4 + $0x20] sm:$0xff] }
 0x1bf   : > { %v4988_v4 = vmax.f32 %v4927_v54, %v4958_v23  ;;  %4502 = vst [vmem:[#allocation3 + $0x1b0] sm:$0xff] %v4382_v39  ;;  %v2200_v12 = vadd.f32 %v2080_v47, %v1835_v46  ;;  %v4264_v49 = vmul.f32 %v14364_v44, %v1955_v14  ;;  %v4989_v15 = vmax.f32 %v4928_v10, %v4959_v28  ;;  %v4960_v23 = vld [vmem:[#allocation4 + $0x30] sm:$0xff]  ;;  %v14387_v36 = vld [vmem:[#allocation2 + $0x221] sm:$0xff] }
 0x1c0   : > { %v2927_v2 = vadd.f32 %v2807_v35, %v2562_v58  ;;  %v3654_v26 = vadd.f32 %v3534_v7, %v14303_v19  ;;  %v14370_v55 = vmul.f32 %v12643_v38, %v14212_v63  ;;  %v2446_v22 = vmul.f32 %v12643_v38, %v14267_v11  ;;  %v12644_v19 = vld [vmem:[#allocation2 + $0x210] sm:$0xff] }
 0x1c1   : > { %v5025_v20 = vadd.f32 %v14356_v17, %v4988_v4  ;;  %v5026_v29 = vadd.f32 %v14356_v17, %v4989_v15  ;;  %v3538_v27 = vmul.f32 %v12643_v38, %v14280_v52  ;;  %v1716_v6 = vmul.f32 %v14251_v18, %v1591_v31  ;;  %v14394_v58 = vld [vmem:[#allocation2 + $0x229] sm:$0xff] }
 0x1c2   : > { %v3292_v62 = vadd.f32 %v3172_v0, %v2927_v2  ;;  %v4019_v60 = vadd.f32 %v3899_v51, %v3654_v26  ;;  %v14376_v34 = vadd.f32 %v2446_v22, %v2200_v12  ;;  %v14379_v14 = vmul.f32 %v12644_v19, %v14212_v63  ;;  %v1959_v2 = vld [vmem:[#allocation2 + $0x222] sm:$0xff]  ;;  %v1960_v38 = vld [vmem:[#allocation2 + $0x22a] sm:$0xff] }
 0x1c3   : > { %v5055_v1 = vmax.f32 %v5025_v20, 0.0  ;;  %v5056_v40 = vmax.f32 %v5026_v29, 0.0  ;;  %v1836_v33 = vadd.f32 %v1716_v6, %v1471_v53  ;;  %v2081_v21 = vmul.f32 %v14259_v13, %v1956_v37  ;;  %v12646_v26 = vld [vmem:[#allocation2 + $0x228] sm:$0xff] }
 0x1c4   : > { %v2444_v45 = vmul.f32 %v12644_v19, %v14267_v11  ;;  %v4384_v57 = vadd.f32 %v4264_v49, %v4019_v60  ;;  %v14383_v30 = vadd.f32 %v3538_v27, %v3292_v62  ;;  %v2808_v32 = vmul.f32 %v14296_v50, %v1591_v31  ;;  %v12645_v49 = vld [vmem:[#allocation2 + $0x230] sm:$0xff] }
 0x1c5   : > { %5085 = vst [vmem:[#allocation5] sm:$0xff] %v5055_v1  ;;  %v3173_v5 = vmul.f32 %v14274_v42, %v1956_v37  ;;  %v4620_v47 = vld [vmem:[#allocation3 + $0x1a0] ss:$2 sm:$0xff]  ;;  %v4740_v35 = vld [vmem:[#allocation3 + $0x1a1] ss:$2 sm:$0xff]  ;;  %v2201_v53 = vadd.f32 %v2081_v21, %v1836_v33  ;;  %v3536_v39 = vmul.f32 %v12644_v19, %v14280_v52  ;;  %v3900_v46 = vmul.f32 %v14331_v48, %v1591_v31  ;;  %v976_v33 = vpop.permute.xlu0 %975 }
 0x1c6   : > { %5086 = vst [vmem:[#allocation5 + $0x8] sm:$0x7f] %v5056_v40  ;;  %v14390_v28 = vadd.f32 %v2444_v45, %v14325_v3  ;;  %v4622_v54 = vld [vmem:[#allocation3 + $0x1b0] ss:$2 sm:$0x7f]  ;;  %v4833_v43 = vmax.f32 %v4620_v47, %v4740_v35  ;;  %4504 = vst [vmem:[#allocation3 + $0x1c0] sm:$0xff] %v4384_v57  ;;  %v2928_v0 = vadd.f32 %v2808_v32, %v14346_v25  ;;  %v981_v40 = vpop.permute.xlu1 %980 }
 0x1c7   : > { %v4742_v16 = vld [vmem:[#allocation3 + $0x1b1] ss:$2 sm:$0x7f]  ;;  %v4265_v7 = vmul.f32 %v14364_v44, %v1956_v37  ;;  %v4814_v51 = vmax.f32 %v4582_v24, %v4702_v41  ;;  %v14399_v4 = vadd.f32 %v3536_v39, %v14335_v61  ;;  %v4020_v3 = vadd.f32 %v3900_v46, %v14350_v9  ;;  %1246 = vst [vmem:[#allocation2 + $0x2e8] sm:$0xff] %v981_v40 }
 0x1c8   : > { %v4834_v10 = vmax.f32 %v4622_v54, %v4742_v16  ;;  %v4990_v12 = vmax.f32 %v4929_v8, %v4960_v23  ;;  %4893 = vst [vmem:[#allocation4 + $0xd0] sm:$0xff] %v4833_v43  ;;  %v3293_v31 = vadd.f32 %v3173_v5, %v2928_v0  ;;  %v14403_v15 = vmul.f32 %v12645_v49, %v14212_v63  ;;  %v1352_v8 = vld [vmem:[#allocation2 + $0x238] sm:$0x3f]  ;;  %v4930_v43 = vld [vmem:[#allocation4 + $0x28] sm:$0x7f] }
 0x1c9   : > { %4874 = vst [vmem:[#allocation4 + $0x38] sm:$0x7f] %v4814_v51  ;;  %v14406_v25 = vmul.f32 %v12645_v49, %v14267_v11  ;;  %v1475_v20 = vmul.f32 %v12646_v26, %v14212_v63  ;;  %v4385_v61 = vadd.f32 %v4265_v7, %v4020_v3  ;;  %v1719_v22 = vmul.f32 %v14251_v18, %v14387_v36  ;;  %v14438_v47 = vld [vmem:[#allocation2 + $0x231] sm:$0xff]  ;;  %v1597_v54 = vld [vmem:[#allocation2 + $0x239] sm:$0x3f] }
 0x1ca   : > { %4894 = vst [vmem:[#allocation4 + $0xd8] sm:$0x7f] %v4834_v10  ;;  %v14410_v9 = vadd.f32 %v14356_v17, %v4990_v12  ;;  %v1720_v37 = vmul.f32 %v14251_v18, %v14394_v58  ;;  %v14417_v62 = vmul.f32 %v12645_v49, %v14280_v52  ;;  %v2084_v29 = vmul.f32 %v14259_v13, %v1959_v2  ;;  %v1961_v16 = vld [vmem:[#allocation2 + $0x232] sm:$0xff]  ;;  %v1962_v12 = vld [vmem:[#allocation2 + $0x23a] sm:$0x3f]  ;;  %v991_v49 = vpop.permute.xlu1 %990 }
 0x1cb   : > { %v2447_v27 = vmul.f32 %v12646_v26, %v14267_v11  ;;  %v2811_v6 = vmul.f32 %v14296_v50, %v14387_v36  ;;  %4505 = vst [vmem:[#allocation3 + $0x1c8] sm:$0xff] %v4385_v61  ;;  %v1839_v1 = vadd.f32 %v1719_v22, %v14370_v55  ;;  %v2085_v24 = vmul.f32 %v14259_v13, %v1960_v38 }
 0x1cc   : > { %v5057_v60 = vmax.f32 %v14410_v9, 0.0  ;;  %v1840_v19 = vadd.f32 %v1720_v37, %v1475_v20  ;;  %v2812_v57 = vmul.f32 %v14296_v50, %v14394_v58  ;;  %v3176_v5 = vmul.f32 %v14274_v42, %v1959_v2  ;;  %1245 = vst [vmem:[#allocation2 + $0x2e0] sm:$0xff] %v976_v33  ;;  %1248 = vst [vmem:[#allocation2 + $0x2f8] sm:$0xff] %v991_v49  ;;  %v2320_v49 = vld [vmem:[#allocation2 + $0x218] sm:$0x3f] }
 0x1cd   : > { %v5167_v21 = vld [vmem:[#allocation5 + $0x2] sm:$0xff]  ;;  %v2567_v41 = vadd.f32 %v2447_v27, %v2201_v53  ;;  %v2931_v32 = vadd.f32 %v2811_v6, %v14376_v34  ;;  %v14434_v55 = vadd.f32 %v2084_v29, %v1839_v1  ;;  %v3177_v23 = vmul.f32 %v14274_v42, %v1960_v38  ;;  %v2689_v6 = vld [vmem:[#allocation2 + $0x239] sm:$0x3f] }
 0x1ce   : > { %v5141_v45 = vld [vmem:[#allocation5 + $0x1] sm:$0xff]  ;;  %5481 = vrot.lane.b32.xlu1 %v5167_v21, %s17520_s12  ;;  %5087 = vst [vmem:[#allocation5 + $0x10] sm:$0xff] %v5057_v60  ;;  %v3539_v34 = vmul.f32 %v12646_v26, %v14280_v52  ;;  %v14440_v35 = vadd.f32 %v2085_v24, %v1840_v19  ;;  %v3903_v46 = vmul.f32 %v14331_v48, %v14387_v36  ;;  %v986_v26 = vpop.permute.xlu0 %985  ;;  %v5142_v61 = vld [vmem:[#allocation5 + $0x9] sm:$0x1f]  ;;  %v3054_v1 = vld [vmem:[#allocation2 + $0x23a] sm:$0x3f] }
 0x1cf   : > { %5377 = vrot.lane.b32.xlu0 %v5141_v45, %s17512_s13  ;;  %v2932_v53 = vadd.f32 %v2812_v57, %v2567_v41  ;;  %v14442_v39 = vadd.f32 %v3176_v5, %v2931_v32  ;;  %v3904_v51 = vmul.f32 %v14331_v48, %v14394_v58  ;;  %v4268_v10 = vmul.f32 %v14364_v44, %v1959_v2  ;;  %v3416_v21 = vld [vmem:[#allocation2 + $0x238] sm:$0x3f] }
 0x1d0   : > { %v4961_v0 = vld [vmem:[#allocation4 + $0x38] sm:$0x7f]  ;;  %v3659_v7 = vadd.f32 %v3539_v34, %v3293_v31  ;;  %v1477_v3 = vmul.f32 %v14212_v63, %v1352_v8  ;;  %v4023_v22 = vadd.f32 %v3903_v46, %v14383_v30  ;;  %v4269_v36 = vmul.f32 %v14364_v44, %v1960_v38  ;;  %1247 = vst [vmem:[#allocation2 + $0x2f0] sm:$0xff] %v986_v26 }
 0x1d1   : > { %v4991_v20 = vmax.f32 %v4930_v43, %v4961_v0  ;;  %v1721_v37 = vmul.f32 %v14251_v18, %v14438_v47  ;;  %v2324_v31 = vld [vmem:[#allocation2 + $0x238] sm:$0x3f]  ;;  %v14455_v58 = vadd.f32 %v3177_v23, %v2932_v53  ;;  %v1722_v29 = vmul.f32 %v14251_v18, %v1597_v54 }
 0x1d2   : > { %v4024_v2 = vadd.f32 %v3904_v51, %v3659_v7  ;;  %v2086_v27 = vmul.f32 %v14259_v13, %v1961_v16  ;;  %v4624_v30 = vld [vmem:[#allocation3 + $0x1c0] ss:$2 sm:$0xff]  ;;  %v4744_v19 = vld [vmem:[#allocation3 + $0x1c1] ss:$2 sm:$0xff]  ;;  %v4388_v24 = vadd.f32 %v4268_v10, %v4023_v22  ;;  %v2087_v33 = vmul.f32 %v14259_v13, %v1962_v12  ;;  %v3781_v5 = vld [vmem:[#allocation2 + $0x239] sm:$0x3f] }
 0x1d3   : > { %5379 = vrot.lane.b32.xlu0 %v5142_v61, %s17512_s13  ;;  %v5028_v38 = vadd.f32 %v14356_v17, %v4991_v20  ;;  %v1841_v40 = vadd.f32 %v1721_v37, %v14403_v15  ;;  %v4835_v45 = vmax.f32 %v4624_v30, %v4744_v19  ;;  %v1842_v57 = vadd.f32 %v1722_v29, %v1477_v3  ;;  %v4146_v8 = vld [vmem:[#allocation2 + $0x23a] sm:$0x3f]  ;;  %v1592_v54 = vld [vmem:[#allocation2 + $0x211] sm:$0xff] }
 0x1d4   : > { %v4389_v41 = vadd.f32 %v4269_v36, %v4024_v2  ;;  %v14463_v32 = vmul.f32 %v14267_v11, %v2324_v31  ;;  %v1348_v23 = vld [vmem:[#allocation2 + $0x218] sm:$0x3f]  ;;  %4508 = vst [vmem:[#allocation3 + $0x1e0] sm:$0xff] %v4388_v24  ;;  %v14469_v46 = vmul.f32 %v14296_v50, %v14438_v47  ;;  %v14472_v15 = vmul.f32 %v14296_v50, %v2689_v6 }
 0x1d5   : > { %v5058_v34 = vmax.f32 %v5028_v38, 0.0  ;;  %v14465_v53 = vadd.f32 %v2086_v27, %v1841_v40  ;;  %v1593_v43 = vld [vmem:[#allocation2 + $0x219] sm:$0x3f]  ;;  %4895 = vst [vmem:[#allocation4 + $0xe0] sm:$0xff] %v4835_v45  ;;  %v14477_v7 = vadd.f32 %v2087_v33, %v1842_v57  ;;  %v14480_v51 = vmul.f32 %v14274_v42, %v1961_v16 }
 0x1d6   : > { %v1957_v0 = vld [vmem:[#allocation2 + $0x212] sm:$0xff]  ;;  %4509 = vst [vmem:[#allocation3 + $0x1e8] sm:$0xff] %v4389_v41  ;;  %v14483_v10 = vmul.f32 %v14274_v42, %v3054_v1  ;;  %v3541_v3 = vmul.f32 %v14280_v52, %v3416_v21  ;;  %v1958_v12 = vld [vmem:[#allocation2 + $0x21a] sm:$0x3f]  ;;  %v3905_v20 = vmul.f32 %v14331_v48, %v14438_v47  ;;  %v14489_v9 = vmul.f32 %v14331_v48, %v3781_v5 }
 0x1d7   : > { %5585 = vrot.lane.b32.xlu0 %v5057_v60, %s17516_s14  ;;  %v2685_v26 = vld [vmem:[#allocation2 + $0x219] sm:$0x3f]  ;;  %5088 = vst [vmem:[#allocation5 + $0x18] sm:$0x7f] %v5058_v34  ;;  %v14492_v60 = vmul.f32 %v14364_v44, %v1961_v16  ;;  %v1473_v61 = vmul.f32 %v14212_v63, %v1348_v23  ;;  %v14496_v36 = vmul.f32 %v14364_v44, %v4146_v8 }
 0x1d8   : > { %v3412_v22 = vld [vmem:[#allocation2 + $0x218] sm:$0x3f]  ;;  %v1717_v37 = vmul.f32 %v14251_v18, %v1592_v54  ;;  %v1718_v31 = vmul.f32 %v14251_v18, %v1593_v43  ;;  %v2082_v2 = vmul.f32 %v14259_v13, %v1957_v0  ;;  %v2083_v47 = vmul.f32 %v14259_v13, %v1958_v12 }
 0x1d9   : > { %v3050_v29 = vld [vmem:[#allocation2 + $0x21a] sm:$0x3f]  ;;  %v2445_v27 = vmul.f32 %v14267_v11, %v2320_v49  ;;  %v2809_v16 = vmul.f32 %v14296_v50, %v1592_v54  ;;  %v2810_v6 = vmul.f32 %v14296_v50, %v2685_v26  ;;  %v3174_v38 = vmul.f32 %v14274_v42, %v1957_v0 }
 0x1da   : > { %v3777_v1 = vld [vmem:[#allocation2 + $0x219] sm:$0x3f]  ;;  %v1837_v30 = vadd.f32 %v1717_v37, %v14379_v14  ;;  %v1838_v19 = vadd.f32 %v1718_v31, %v1473_v61  ;;  %v3537_v24 = vmul.f32 %v14280_v52, %v3412_v22  ;;  %v3175_v21 = vmul.f32 %v14274_v42, %v3050_v29  ;;  %v1598_v37 = vld [vmem:[#allocation2 + $0x241] sm:$0xff]  ;;  %v1001_v31 = vpop.permute.xlu1 %1000 }
 0x1db   : > { %v2565_v40 = vadd.f32 %v2445_v27, %v14310_v56  ;;  %v2929_v33 = vadd.f32 %v2809_v16, %v14390_v28  ;;  %v3901_v45 = vmul.f32 %v14331_v48, %v1592_v54  ;;  %v4142_v41 = vld [vmem:[#allocation2 + $0x21a] sm:$0x3f]  ;;  %v3902_v14 = vmul.f32 %v14331_v48, %v3777_v1  ;;  %1250 = vst [vmem:[#allocation2 + $0x308] sm:$0xff] %v1001_v31  ;;  %v12647_v16 = vld [vmem:[#allocation2 + $0x248] sm:$0xff] }
 0x1dc   : > { %v2202_v57 = vadd.f32 %v2082_v2, %v1837_v30  ;;  %v2203_v5 = vadd.f32 %v2083_v47, %v1838_v19  ;;  %v3657_v8 = vadd.f32 %v3537_v24, %v14319_v59  ;;  %v4266_v56 = vmul.f32 %v14364_v44, %v1957_v0  ;;  %v996_v2 = vpop.permute.xlu0 %995 }
 0x1dd   : > { %v4628_v23 = vld [vmem:[#allocation3 + $0x1e0] ss:$2 sm:$0xff]  ;;  %v4748_v34 = vld [vmem:[#allocation3 + $0x1e1] ss:$2 sm:$0xff]  ;;  %v2930_v43 = vadd.f32 %v2810_v6, %v2565_v40  ;;  %v3294_v12 = vadd.f32 %v3174_v38, %v2929_v33  ;;  %v4021_v49 = vadd.f32 %v3901_v45, %v14399_v4  ;;  %v4267_v22 = vmul.f32 %v14364_v44, %v4142_v41  ;;  %1249 = vst [vmem:[#allocation2 + $0x300] sm:$0xff] %v996_v2  ;;  %v4962_v41 = vld [vmem:[#allocation4 + $0x50] sm:$0xff] }
 0x1de   : > { %v14516_v28 = vld [vmem:[#allocation5 + $0x11] sm:$0xff]  ;;  %v4837_v26 = vmax.f32 %v4628_v23, %v4748_v34  ;;  %v14519_v54 = vadd.f32 %v14406_v25, %v2202_v57  ;;  %v4022_v61 = vadd.f32 %v3902_v14, %v3657_v8  ;;  %v1963_v25 = vld [vmem:[#allocation2 + $0x242] sm:$0xff]  ;;  %v2569_v47 = vadd.f32 %v14463_v32, %v2203_v5  ;;  %v5168_v40 = vld [vmem:[#allocation5 + $0xa] sm:$0x1f] }
 0x1df   : > { %v14522_v59 = vld [vmem:[#allocation5 + $0x12] sm:$0xff]  ;;  %5381 = vrot.lane.b32.xlu1 %v14516_v28, %s17512_s13  ;;  %v3295_v4 = vadd.f32 %v3175_v21, %v2930_v43  ;;  %v3660_v0 = vadd.f32 %v14417_v62, %v3294_v12  ;;  %v4386_v29 = vadd.f32 %v4266_v56, %v4021_v49  ;;  %v14531_v6 = vmul.f32 %v12647_v16, %v14212_v63  ;;  %v12648_v62 = vld [vmem:[#allocation2 + $0x240] sm:$0xff] }
 0x1e0   : > { %5485 = vrot.lane.b32.xlu0 %v14522_v59, %s17520_s12  ;;  %4897 = vst [vmem:[#allocation4 + $0xf0] sm:$0xff] %v4837_v26  ;;  %v4387_v27 = vadd.f32 %v4267_v22, %v4022_v61  ;;  %v2451_v1 = vmul.f32 %v12647_v16, %v14267_v11  ;;  %v1478_v38 = vmul.f32 %v12648_v62, %v14212_v63  ;;  %v1356_v23 = vld [vmem:[#allocation2 + $0x258] sm:$0x3f] }
 0x1e1   : > { %v3661_v30 = vadd.f32 %v3541_v3, %v3295_v4  ;;  %v4025_v19 = vadd.f32 %v3905_v20, %v3660_v0  ;;  %4506 = vst [vmem:[#allocation3 + $0x1d0] sm:$0xff] %v4386_v29  ;;  %v1723_v24 = vmul.f32 %v14251_v18, %v1598_v37  ;;  %v3543_v32 = vmul.f32 %v12647_v16, %v14280_v52  ;;  %v1011_v3 = vpop.permute.xlu1 %1010  ;;  %v1006_v20 = vpop.permute.xlu0 %1005  ;;  %v1601_v34 = vld [vmem:[#allocation2 + $0x259] sm:$0x3f] }
 0x1e2   : > { %4507 = vst [vmem:[#allocation3 + $0x1d8] sm:$0x3f] %v4387_v27  ;;  %v14537_v33 = vadd.f32 %v2451_v1, %v14440_v35  ;;  %v2088_v21 = vmul.f32 %v14259_v13, %v1963_v25  ;;  %v2450_v45 = vmul.f32 %v12648_v62, %v14267_v11  ;;  %v2815_v14 = vmul.f32 %v14296_v50, %v1598_v37  ;;  %v5195_v35 = vld [vmem:[#allocation5 + $0x18] sm:$0x1f] }
 0x1e3   : > { %5483 = vrot.lane.b32.xlu1 %v5168_v40, %s17520_s12  ;;  %v4026_v57 = vadd.f32 %v14489_v9, %v3661_v30  ;;  %v4390_v5 = vadd.f32 %v14492_v60, %v4025_v19  ;;  %v1843_v8 = vadd.f32 %v1723_v24, %v1478_v38  ;;  %1252 = vst [vmem:[#allocation2 + $0x318] sm:$0xff] %v1011_v3  ;;  %1251 = vst [vmem:[#allocation2 + $0x310] sm:$0xff] %v1006_v20  ;;  %v4931_v9 = vld [vmem:[#allocation4 + $0x40] sm:$0xff]  ;;  %v1966_v60 = vld [vmem:[#allocation2 + $0x25a] sm:$0x3f] }
 0x1e4   : > { %v14547_v43 = vadd.f32 %v3543_v32, %v14455_v58  ;;  %v2570_v12 = vadd.f32 %v2450_v45, %v14434_v55  ;;  %v3542_v49 = vmul.f32 %v12648_v62, %v14280_v52  ;;  %v3907_v56 = vmul.f32 %v14331_v48, %v1598_v37  ;;  %5587 = vrot.lane.b32.xlu0 %v5195_v35, %s17516_s14  ;;  %v2328_v26 = vld [vmem:[#allocation2 + $0x258] sm:$0x3f]  ;;  %v1599_v32 = vld [vmem:[#allocation2 + $0x249] sm:$0xff] }
 0x1e5   : > { %v4391_v61 = vadd.f32 %v14496_v36, %v4026_v57  ;;  %4510 = vst [vmem:[#allocation3 + $0x1f0] sm:$0xff] %v4390_v5  ;;  %v14554_v22 = vadd.f32 %v2088_v21, %v1843_v8  ;;  %v3180_v31 = vmul.f32 %v14274_v42, %v1963_v25  ;;  %v4992_v58 = vmax.f32 %v4931_v9, %v4962_v41  ;;  %v2693_v2 = vld [vmem:[#allocation2 + $0x259] sm:$0x3f]  ;;  %v1600_v21 = vld [vmem:[#allocation2 + $0x251] sm:$0xff] }
 0x1e6   : > { %v2935_v4 = vadd.f32 %v2815_v14, %v2570_v12  ;;  %v3662_v55 = vadd.f32 %v3542_v49, %v14442_v39  ;;  %v1481_v0 = vmul.f32 %v14212_v63, %v1356_v23  ;;  %v1726_v37 = vmul.f32 %v14251_v18, %v1601_v34  ;;  %v3058_v29 = vld [vmem:[#allocation2 + $0x25a] sm:$0x3f]  ;;  %v1964_v8 = vld [vmem:[#allocation2 + $0x24a] sm:$0xff] }
 0x1e7   : > { %v3420_v27 = vld [vmem:[#allocation2 + $0x258] sm:$0x3f]  ;;  %4511 = vst [vmem:[#allocation3 + $0x1f8] sm:$0x3f] %v4391_v61  ;;  %5689 = vrot.lane.b32.xlu1 %v14516_v28, %s17518_s15  ;;  %v4272_v36 = vmul.f32 %v14364_v44, %v1963_v25  ;;  %v5029_v16 = vadd.f32 %v14356_v17, %v4992_v58  ;;  %v2091_v1 = vmul.f32 %v14259_v13, %v1966_v60  ;;  %v12649_v34 = vld [vmem:[#allocation2 + $0x250] sm:$0xff] }
 0x1e8   : > { %v2453_v30 = vmul.f32 %v14267_v11, %v2328_v26  ;;  %v3785_v39 = vld [vmem:[#allocation2 + $0x259] sm:$0x3f]  ;;  %v4027_v19 = vadd.f32 %v3907_v56, %v3662_v55  ;;  %v1846_v62 = vadd.f32 %v1726_v37, %v1481_v0  ;;  %v2818_v38 = vmul.f32 %v14296_v50, %v2693_v2  ;;  %5793 = vrot.lane.b32.xlu0 %v14522_v59, %s17514_s16  ;;  %v1021_v37 = vpop.permute.xlu1 %1020 }
 0x1e9   : > { %v2934_v24 = vadd.f32 %v14472_v15, %v2569_v47  ;;  %v4150_v40 = vld [vmem:[#allocation2 + $0x25a] sm:$0x3f]  ;;  %v14570_v45 = vadd.f32 %v3180_v31, %v2935_v4  ;;  %v3183_v3 = vmul.f32 %v14274_v42, %v3058_v29  ;;  %v3545_v20 = vmul.f32 %v14280_v52, %v3420_v27  ;;  %v1016_v29 = vpop.permute.xlu0 %1015  ;;  %1254 = vst [vmem:[#allocation2 + $0x328] sm:$0xff] %v1021_v37 }
 0x1ea   : > { %v4626_v28 = vld [vmem:[#allocation3 + $0x1d0] ss:$2 sm:$0x7f]  ;;  %v4746_v25 = vld [vmem:[#allocation3 + $0x1d1] ss:$2 sm:$0x7f]  ;;  %v2573_v41 = vadd.f32 %v2453_v30, %v14477_v7  ;;  %v4392_v5 = vadd.f32 %v4272_v36, %v4027_v19  ;;  %v3910_v47 = vmul.f32 %v14331_v48, %v3785_v39  ;;  %v14578_v14 = vadd.f32 %v2091_v1, %v1846_v62 }
 0x1eb   : > { %v4836_v57 = vmax.f32 %v4626_v28, %v4746_v25  ;;  %v14575_v15 = vmax.f32 %v5029_v16, 0.0  ;;  %v3299_v35 = vadd.f32 %v14483_v10, %v2934_v24  ;;  %v2933_v23 = vadd.f32 %v14469_v46, %v14519_v54  ;;  %v1965_v10 = vld [vmem:[#allocation2 + $0x252] sm:$0xff]  ;;  %1253 = vst [vmem:[#allocation2 + $0x320] sm:$0xff] %v1016_v29  ;;  %v1602_v19 = vld [vmem:[#allocation2 + $0x261] sm:$0xff]  ;;  %v3062_v29 = vld [vmem:[#allocation2 + $0x27a] sm:$0x3f] }
 0x1ec   : > { %v2938_v59 = vadd.f32 %v2818_v38, %v2573_v41  ;;  %4512 = vst [vmem:[#allocation3 + $0x200] sm:$0xff] %v4392_v5  ;;  %v4275_v7 = vmul.f32 %v14364_v44, %v4150_v40  ;;  %v1480_v12 = vmul.f32 %v12649_v34, %v14212_v63  ;;  %v1724_v49 = vmul.f32 %v14251_v18, %v1599_v32  ;;  %v5221_v0 = vld [vmem:[#allocation5 + $0x19] sm:$0x1f]  ;;  %v12650_v25 = vld [vmem:[#allocation2 + $0x268] sm:$0xff] }
 0x1ed   : > { %4896 = vst [vmem:[#allocation4 + $0xe8] sm:$0x7f] %v4836_v57  ;;  %5089 = vst [vmem:[#allocation5 + $0x20] sm:$0xff] %v14575_v15  ;;  %5589 = vrot.lane.b32.xlu1 %v14575_v15, %s17516_s14  ;;  %v1725_v56 = vmul.f32 %v14251_v18, %v1600_v21  ;;  %v3665_v46 = vadd.f32 %v3545_v20, %v3299_v35  ;;  %v3298_v54 = vadd.f32 %v14480_v51, %v2933_v23  ;;  %v1031_v20 = vpop.permute.xlu1 %1030  ;;  %v1026_v57 = vpop.permute.xlu0 %1025 }
 0x1ee   : > { %v14590_v9 = vadd.f32 %v3183_v3, %v2938_v59  ;;  %v2089_v60 = vmul.f32 %v14259_v13, %v1964_v8  ;;  %v1844_v26 = vadd.f32 %v1724_v49, %v14531_v6  ;;  %v2452_v31 = vmul.f32 %v12649_v34, %v14267_v11  ;;  %v1967_v3 = vld [vmem:[#allocation2 + $0x262] sm:$0xff]  ;;  %1256 = vst [vmem:[#allocation2 + $0x338] sm:$0xff] %v1031_v20 }
 0x1ef   : > { %v1845_v61 = vadd.f32 %v1725_v56, %v1480_v12  ;;  %v2816_v58 = vmul.f32 %v14296_v50, %v1599_v32  ;;  %v4030_v63 = vadd.f32 %v3910_v47, %v3665_v46  ;;  %v2090_v2 = vmul.f32 %v14259_v13, %v1965_v10  ;;  %v12652_v47 = vld [vmem:[#allocation2 + $0x260] sm:$0xff]  ;;  %1255 = vst [vmem:[#allocation2 + $0x330] sm:$0xff] %v1026_v57  ;;  %v4710_v12 = vld [vmem:[#allocation3 + $0xb1] ss:$2 sm:$0x7f] }
 0x1f0   : > { %v2817_v4 = vmul.f32 %v14296_v50, %v1600_v21  ;;  %v3181_v55 = vmul.f32 %v14274_v42, %v1964_v8  ;;  %v2209_v51 = vadd.f32 %v2089_v60, %v1844_v26  ;;  %v2572_v27 = vadd.f32 %v2452_v31, %v14465_v53  ;;  %v1605_v60 = vld [vmem:[#allocation2 + $0x279] sm:$0x3f]  ;;  %v12653_v57 = vld [vmem:[#allocation2 + $0x270] sm:$0xff] }
 0x1f1   : > { %v2936_v6 = vadd.f32 %v2816_v58, %v14537_v33  ;;  %v3182_v36 = vmul.f32 %v14274_v42, %v1965_v10  ;;  %5691 = vrot.lane.b32.xlu1 %v5221_v0, %s17518_s15  ;;  %v4395_v16 = vadd.f32 %v4275_v7, %v4030_v63  ;;  %v14604_v1 = vadd.f32 %v2090_v2, %v1845_v61  ;;  %v1970_v58 = vld [vmem:[#allocation2 + $0x27a] sm:$0x3f] }
 0x1f2   : > { %v3544_v30 = vmul.f32 %v12649_v34, %v14280_v52  ;;  %v3908_v39 = vmul.f32 %v14331_v48, %v1599_v32  ;;  %v2937_v62 = vadd.f32 %v2817_v4, %v2572_v27  ;;  %v3909_v53 = vmul.f32 %v14331_v48, %v1600_v21  ;;  %v14618_v21 = vld [vmem:[%s17545_s1] ss:$0 sm:$0xff]  ;;  %v4590_v34 = vld [vmem:[#allocation3 + $0xb0] ss:$2 sm:$0x7f] }
 0x1f3   : > { %v3301_v38 = vadd.f32 %v3181_v55, %v2936_v6  ;;  %v4273_v33 = vmul.f32 %v14364_v44, %v1964_v8  ;;  %4515 = vst [vmem:[#allocation3 + $0x218] sm:$0x3f] %v4395_v16  ;;  %v4274_v28 = vmul.f32 %v14364_v44, %v1965_v10  ;;  %v2455_v41 = vmul.f32 %v12650_v25, %v14267_v11  ;;  %v2332_v63 = vld [vmem:[#allocation2 + $0x278] sm:$0x3f] }
 0x1f4   : > { %v3664_v24 = vadd.f32 %v3544_v30, %v3298_v54  ;;  %v4028_v40 = vadd.f32 %v3908_v39, %v14547_v43  ;;  %v14613_v32 = vadd.f32 %v3182_v36, %v2937_v62  ;;  %v14621_v5 = vmul.f32 %v14618_v21, %v12650_v25  ;;  %v1360_v54 = vld [vmem:[#allocation2 + $0x278] sm:$0x3f] }
 0x1f5   : > { %v1482_v43 = vmul.f32 %v12652_v47, %v14618_v21  ;;  %v1727_v8 = vmul.f32 %v14251_v18, %v1602_v19  ;;  %5897 = vrot.lane.b32.xlu1 %v14575_v15, %s17522_s25  ;;  %v14627_v23 = vadd.f32 %v2455_v41, %v2209_v51  ;;  %v3547_v7 = vmul.f32 %v12650_v25, %v14280_v52  ;;  %v2697_v2 = vld [vmem:[#allocation2 + $0x279] sm:$0x3f]  ;;  %v1968_v25 = vld [vmem:[#allocation2 + $0x26a] sm:$0xff] }
 0x1f6   : > { %v4029_v59 = vadd.f32 %v3909_v53, %v3664_v24  ;;  %v4393_v35 = vadd.f32 %v4273_v33, %v4028_v40  ;;  %v2092_v56 = vmul.f32 %v14259_v13, %v1967_v3  ;;  %v2454_v10 = vmul.f32 %v12652_v47, %v14267_v11  ;;  %v3424_v51 = vld [vmem:[#allocation2 + $0x278] sm:$0x3f]  ;;  %v1603_v53 = vld [vmem:[#allocation2 + $0x269] sm:$0xff] }
 0x1f7   : > { %v1847_v49 = vadd.f32 %v1727_v8, %v1482_v43  ;;  %v2819_v46 = vmul.f32 %v14296_v50, %v1602_v19  ;;  %v14633_v26 = vadd.f32 %v3547_v7, %v3301_v38  ;;  %v3546_v61 = vmul.f32 %v12652_v47, %v14280_v52  ;;  %v3789_v30 = vld [vmem:[#allocation2 + $0x279] sm:$0x3f] }
 0x1f8   : > { %v4394_v15 = vadd.f32 %v4274_v28, %v4029_v59  ;;  %4513 = vst [vmem:[#allocation3 + $0x208] sm:$0xff] %v4393_v35  ;;  %v3911_v31 = vmul.f32 %v14331_v48, %v1602_v19  ;;  %v2574_v55 = vadd.f32 %v2454_v10, %v14554_v22  ;;  %v3184_v0 = vmul.f32 %v14274_v42, %v1967_v3  ;;  %v4154_v39 = vld [vmem:[#allocation2 + $0x27a] sm:$0x3f]  ;;  %v1604_v28 = vld [vmem:[#allocation2 + $0x271] sm:$0xff]  ;;  %v14676_v10 = vld [vmem:[%s17545_s1 + $0x3] ss:$0 sm:$0xff] }
 0x1f9   : > { %v14637_v4 = vadd.f32 %v2092_v56, %v1847_v49  ;;  %v4818_v37 = vmax.f32 %v4590_v34, %v4710_v12  ;;  %v3666_v27 = vadd.f32 %v3546_v61, %v14570_v45  ;;  %v4276_v6 = vmul.f32 %v14364_v44, %v1967_v3  ;;  %v1969_v43 = vld [vmem:[#allocation2 + $0x272] sm:$0xff] }
 0x1fa   : > { %4514 = vst [vmem:[#allocation3 + $0x210] sm:$0xff] %v4394_v15  ;;  %v1485_v36 = vmul.f32 %v14618_v21, %v1360_v54  ;;  %v1730_v16 = vmul.f32 %v14251_v18, %v1605_v60  ;;  %v2939_v19 = vadd.f32 %v2819_v46, %v2574_v55  ;;  %v2095_v22 = vmul.f32 %v14259_v13, %v1970_v58 }
 0x1fb   : > { %4878 = vst [vmem:[#allocation4 + $0x58] sm:$0x7f] %v4818_v37  ;;  %v2457_v62 = vmul.f32 %v14267_v11, %v2332_v63  ;;  %v2822_v38 = vmul.f32 %v14296_v50, %v2697_v2  ;;  %v4031_v33 = vadd.f32 %v3911_v31, %v3666_v27  ;;  %v3187_v45 = vmul.f32 %v14274_v42, %v3062_v29  ;;  %v14660_v42 = vld [vmem:[%s17545_s1 + $0x1] ss:$0 sm:$0xff]  ;;  %v4932_v2 = vld [vmem:[#allocation4 + $0x48] sm:$0x7f]  ;;  %v1041_v29 = vpop.permute.xlu1 %1040 }
 0x1fc   : > { %v1850_v24 = vadd.f32 %v1730_v16, %v1485_v36  ;;  %v3549_v40 = vmul.f32 %v14280_v52, %v3424_v51  ;;  %v14650_v18 = vadd.f32 %v3184_v0, %v2939_v19  ;;  %v3914_v3 = vmul.f32 %v14331_v48, %v3789_v30  ;;  %v1036_v51 = vpop.permute.xlu0 %1035  ;;  %v14689_v16 = vld [vmem:[%s17545_s1 + $0x5] ss:$0 sm:$0xff]  ;;  %1258 = vst [vmem:[#allocation2 + $0x348] sm:$0xff] %v1041_v29 }
 0x1fd   : > { %v2577_v41 = vadd.f32 %v2457_v62, %v14578_v14  ;;  %v4279_v13 = vmul.f32 %v14364_v44, %v4154_v39  ;;  %v4396_v11 = vadd.f32 %v4276_v6, %v4031_v33  ;;  %v1484_v47 = vmul.f32 %v12653_v57, %v14618_v21  ;;  %1257 = vst [vmem:[#allocation2 + $0x340] sm:$0xff] %v1036_v51  ;;  %v14696_v39 = vld [vmem:[%s17545_s1 + $0x6] ss:$0 sm:$0xff] }
 0x1fe   : > { %v3669_v20 = vadd.f32 %v3549_v40, %v14590_v9  ;;  %v1728_v52 = vmul.f32 %v14660_v42, %v1603_v53  ;;  %v14663_v59 = vadd.f32 %v2095_v22, %v1850_v24  ;;  %v1729_v7 = vmul.f32 %v14660_v42, %v1604_v28  ;;  %v14669_v9 = vld [vmem:[%s17545_s1 + $0x2] ss:$0 sm:$0xff] }
 0x1ff   : > { %v4632_v8 = vld [vmem:[#allocation3 + $0x200] ss:$2 sm:$0xff]  ;;  %v4752_v14 = vld [vmem:[#allocation3 + $0x201] ss:$2 sm:$0xff]  ;;  %v2942_v35 = vadd.f32 %v2822_v38, %v2577_v41  ;;  %v2093_v34 = vmul.f32 %v14669_v9, %v1968_v25  ;;  %4516 = vst [vmem:[#allocation3 + $0x220] sm:$0xff] %v4396_v11  ;;  %v2456_v46 = vmul.f32 %v14676_v10, %v12653_v57  ;;  %v2094_v61 = vmul.f32 %v14669_v9, %v1969_v43 }
 0x200   : > { %v4839_v12 = vmax.f32 %v4632_v8, %v4752_v14  ;;  %v4034_v49 = vadd.f32 %v3914_v3, %v3669_v20  ;;  %v1848_v56 = vadd.f32 %v1728_v52, %v14621_v5  ;;  %v1849_v15 = vadd.f32 %v1729_v7, %v1484_v47  ;;  %v1606_v24 = vld [vmem:[#allocation2 + $0x281] sm:$0xff]  ;;  %v1046_v11 = vpop.permute.xlu0 %1045  ;;  %v1364_v7 = vld [vmem:[#allocation2 + $0x298] sm:$0x3f] }
 0x201   : > { %v4634_v54 = vld [vmem:[#allocation3 + $0x210] ss:$2 sm:$0x7f]  ;;  %v4754_v60 = vld [vmem:[#allocation3 + $0x211] ss:$2 sm:$0x7f]  ;;  %v2820_v31 = vmul.f32 %v14296_v50, %v1603_v53  ;;  %v2821_v58 = vmul.f32 %v14296_v50, %v1604_v28  ;;  %v14682_v55 = vadd.f32 %v3187_v45, %v2942_v35  ;;  %v2576_v37 = vadd.f32 %v2456_v46, %v14604_v1 }
 0x202   : > { %v4840_v63 = vmax.f32 %v4634_v54, %v4754_v60  ;;  %4899 = vst [vmem:[#allocation4 + $0x100] sm:$0xff] %v4839_v12  ;;  %v4963_v5 = vld [vmem:[#allocation4 + $0x58] sm:$0x7f]  ;;  %v4399_v0 = vadd.f32 %v4279_v13, %v4034_v49  ;;  %v2213_v6 = vadd.f32 %v2093_v34, %v1848_v56  ;;  %v3185_v50 = vmul.f32 %v14689_v16, %v1968_v25  ;;  %v1056_v13 = vpop.permute.xlu1 %1055  ;;  %v14726_v46 = vld [vmem:[%s17545_s1 + $0x4] ss:$0 sm:$0xff] }
 0x203   : > { %v4993_v27 = vmax.f32 %v4932_v2, %v4963_v5  ;;  %v2940_v36 = vadd.f32 %v2820_v31, %v14627_v23  ;;  %v2941_v30 = vadd.f32 %v2821_v58, %v2576_v37  ;;  %v3186_v1 = vmul.f32 %v14689_v16, %v1969_v43  ;;  %1261 = vst [vmem:[#allocation2 + $0x360] sm:$0xff] %v1056_v13  ;;  %v1609_v34 = vld [vmem:[#allocation2 + $0x299] sm:$0x3f] }
 0x204   : > { %4900 = vst [vmem:[#allocation4 + $0x108] sm:$0x7f] %v4840_v63  ;;  %4519 = vst [vmem:[#allocation3 + $0x238] sm:$0x3f] %v4399_v0  ;;  %v3548_v23 = vmul.f32 %v14696_v39, %v12653_v57  ;;  %v3912_v19 = vmul.f32 %v14331_v48, %v1603_v53  ;;  %v14701_v62 = vadd.f32 %v2094_v61, %v1849_v15  ;;  %v1974_v60 = vld [vmem:[#allocation2 + $0x29a] sm:$0x3f] }
 0x205   : > { %v5030_v22 = vadd.f32 %v14356_v17, %v4993_v27  ;;  %v3305_v38 = vadd.f32 %v3185_v50, %v2940_v36  ;;  %v3913_v33 = vmul.f32 %v14331_v48, %v1604_v28  ;;  %v14704_v45 = vadd.f32 %v3186_v1, %v2941_v30  ;;  %v12659_v17 = vld [vmem:[#allocation2 + $0x288] sm:$0xff]  ;;  %1259 = vst [vmem:[#allocation2 + $0x350] sm:$0xff] %v1046_v11  ;;  %v2336_v15 = vld [vmem:[#allocation2 + $0x298] sm:$0x3f]  ;;  %v14735_v63 = vld [vmem:[%s17545_s1 + $0x7] ss:$0 sm:$0xff] }
 0x206   : > { %v3668_v40 = vadd.f32 %v3548_v23, %v14613_v32  ;;  %v4032_v41 = vadd.f32 %v3912_v19, %v14633_v26  ;;  %v4277_v3 = vmul.f32 %v14364_v44, %v1968_v25  ;;  %v4278_v53 = vmul.f32 %v14364_v44, %v1969_v43  ;;  %v1971_v48 = vld [vmem:[#allocation2 + $0x282] sm:$0xff]  ;;  %v2701_v5 = vld [vmem:[#allocation2 + $0x299] sm:$0x3f] }
 0x207   : > { %v5060_v20 = vmax.f32 %v5030_v22, 0.0  ;;  %v2459_v57 = vmul.f32 %v12659_v17, %v14676_v10  ;;  %v3551_v47 = vmul.f32 %v12659_v17, %v14696_v39  ;;  %v12660_v32 = vld [vmem:[#allocation2 + $0x280] sm:$0xff]  ;;  %v1731_v25 = vmul.f32 %v14660_v42, %v1606_v24  ;;  %v3066_v0 = vld [vmem:[#allocation2 + $0x29a] sm:$0x3f]  ;;  %v14746_v19 = vld [vmem:[#allocation2 + $0x289] sm:$0xff]  ;;  %v1066_v22 = vpop.permute.xlu1 %1065 }
 0x208   : > { %v4033_v28 = vadd.f32 %v3913_v33, %v3668_v40  ;;  %v4397_v52 = vadd.f32 %v4277_v3, %v4032_v41  ;;  %v1486_v26 = vmul.f32 %v12660_v32, %v14618_v21  ;;  %v14715_v8 = vmul.f32 %v12659_v17, %v14618_v21  ;;  %v3428_v37 = vld [vmem:[#allocation2 + $0x298] sm:$0x3f]  ;;  %1263 = vst [vmem:[#allocation2 + $0x370] sm:$0xff] %v1066_v22 }
 0x209   : > { %5090 = vst [vmem:[#allocation5 + $0x28] sm:$0x7f] %v5060_v20  ;;  %v14717_v43 = vadd.f32 %v2459_v57, %v2213_v6  ;;  %v14719_v14 = vadd.f32 %v3551_v47, %v3305_v38  ;;  %v2458_v35 = vmul.f32 %v12660_v32, %v14676_v10  ;;  %v2096_v56 = vmul.f32 %v14669_v9, %v1971_v48  ;;  %v3793_v6 = vld [vmem:[#allocation2 + $0x299] sm:$0x3f]  ;;  %v1061_v38 = vpop.permute.xlu0 %1060  ;;  %v1608_v3 = vld [vmem:[#allocation2 + $0x291] sm:$0xff] }
 0x20a   : > { %v4398_v12 = vadd.f32 %v4278_v53, %v4033_v28  ;;  %4517 = vst [vmem:[#allocation3 + $0x228] sm:$0xff] %v4397_v52  ;;  %v1851_v49 = vadd.f32 %v1731_v25, %v1486_v26  ;;  %v2823_v54 = vmul.f32 %v14726_v46, %v1606_v24  ;;  %v3188_v31 = vmul.f32 %v14689_v16, %v1971_v48  ;;  %v4158_v23 = vld [vmem:[#allocation2 + $0x29a] sm:$0x3f] }
 0x20b   : > { %v2578_v61 = vadd.f32 %v2458_v35, %v14637_v4  ;;  %v3550_v58 = vmul.f32 %v12660_v32, %v14696_v39  ;;  %v3915_v2 = vmul.f32 %v14735_v63, %v1606_v24  ;;  %v4280_v51 = vmul.f32 %v14364_v44, %v1971_v48  ;;  %1262 = vst [vmem:[#allocation2 + $0x368] sm:$0xff] %v1061_v38  ;;  %v12663_v48 = vld [vmem:[#allocation2 + $0x290] sm:$0xff] }
 0x20c   : > { %4518 = vst [vmem:[#allocation3 + $0x230] sm:$0xff] %v4398_v12  ;;  %v14738_v29 = vadd.f32 %v2096_v56, %v1851_v49  ;;  %v1489_v4 = vmul.f32 %v14618_v21, %v1364_v7  ;;  %v1734_v27 = vmul.f32 %v14660_v42, %v1609_v34  ;;  %v2099_v30 = vmul.f32 %v14669_v9, %v1974_v60  ;;  %v1972_v32 = vld [vmem:[#allocation2 + $0x28a] sm:$0xff] }
 0x20d   : > { %v2943_v36 = vadd.f32 %v2823_v54, %v2578_v61  ;;  %v3670_v50 = vadd.f32 %v3550_v58, %v14650_v18  ;;  %v2461_v1 = vmul.f32 %v14676_v10, %v2336_v15  ;;  %v2826_v24 = vmul.f32 %v14726_v46, %v2701_v5  ;;  %v1051_v22 = vpop.permute.xlu0 %1050 }
 0x20e   : > { %v1854_v33 = vadd.f32 %v1734_v27, %v1489_v4  ;;  %v3191_v40 = vmul.f32 %v14689_v16, %v3066_v0  ;;  %v3553_v41 = vmul.f32 %v14696_v39, %v3428_v37  ;;  %v3918_v20 = vmul.f32 %v14735_v63, %v3793_v6  ;;  %v4964_v6 = vld [vmem:[#allocation4 + $0x70] sm:$0xff]  ;;  %1260 = vst [vmem:[#allocation2 + $0x358] sm:$0xff] %v1051_v22  ;;  %v3797_v22 = vld [vmem:[#allocation2 + $0x2b9] sm:$0x3f] }
 0x20f   : > { %v14751_v18 = vadd.f32 %v3188_v31, %v2943_v36  ;;  %v4035_v13 = vadd.f32 %v3915_v2, %v3670_v50  ;;  %v2581_v11 = vadd.f32 %v2461_v1, %v14663_v59  ;;  %v4283_v47 = vmul.f32 %v14364_v44, %v4158_v23  ;;  %v1973_v44 = vld [vmem:[#allocation2 + $0x292] sm:$0xff]  ;;  %v5247_v2 = vld [vmem:[#allocation5 + $0x1a] sm:$0x1f]  ;;  %v1071_v23 = vpop.permute.xlu1 %1070 }
 0x210   : > { %v14755_v53 = vld [vmem:[#allocation5 + $0x21] sm:$0xff]  ;;  %v3673_v57 = vadd.f32 %v3553_v41, %v14682_v55  ;;  %v1488_v28 = vmul.f32 %v12663_v48, %v14618_v21  ;;  %v1732_v52 = vmul.f32 %v14660_v42, %v14746_v19  ;;  %v1733_v55 = vmul.f32 %v14660_v42, %v1608_v3  ;;  %1264 = vst [vmem:[#allocation2 + $0x378] sm:$0xff] %v1071_v23 }
 0x211   : > { %v14757_v17 = vld [vmem:[#allocation5 + $0x22] sm:$0xff]  ;;  %5693 = vrot.lane.b32.xlu0 %v14755_v53, %s17518_s15  ;;  %v4400_v25 = vadd.f32 %v4280_v51, %v4035_v13  ;;  %v2946_v35 = vadd.f32 %v2826_v24, %v2581_v11  ;;  %v14769_v34 = vadd.f32 %v2099_v30, %v1854_v33  ;;  %v2097_v61 = vmul.f32 %v14669_v9, %v1972_v32 }
 0x212   : > { %v4636_v59 = vld [vmem:[#allocation3 + $0x220] ss:$2 sm:$0xff]  ;;  %v4756_v26 = vld [vmem:[#allocation3 + $0x221] ss:$2 sm:$0xff]  ;;  %5797 = vrot.lane.b32.xlu1 %v14757_v17, %s17514_s16  ;;  %v4038_v12 = vadd.f32 %v3918_v20, %v3673_v57  ;;  %v1852_v49 = vadd.f32 %v1732_v52, %v14715_v8  ;;  %v1853_v15 = vadd.f32 %v1733_v55, %v1488_v28  ;;  %v2460_v31 = vmul.f32 %v12663_v48, %v14676_v10 }
 0x213   : > { %v4841_v7 = vmax.f32 %v4636_v59, %v4756_v26  ;;  %v4638_v56 = vld [vmem:[#allocation3 + $0x230] ss:$2 sm:$0x7f]  ;;  %v4758_v54 = vld [vmem:[#allocation3 + $0x231] ss:$2 sm:$0x7f]  ;;  %v14772_v60 = vadd.f32 %v3191_v40, %v2946_v35  ;;  %v2098_v37 = vmul.f32 %v14669_v9, %v1973_v44  ;;  %v2824_v8 = vmul.f32 %v14726_v46, %v14746_v19 }
 0x214   : > { %4520 = vst [vmem:[#allocation3 + $0x240] sm:$0xff] %v4400_v25  ;;  %v4842_v58 = vmax.f32 %v4638_v56, %v4758_v54  ;;  %v5274_v5 = vld [vmem:[#allocation5 + $0x28] sm:$0x1f]  ;;  %v4403_v0 = vadd.f32 %v4283_v47, %v4038_v12  ;;  %v2217_v51 = vadd.f32 %v2097_v61, %v1852_v49  ;;  %v2580_v4 = vadd.f32 %v2460_v31, %v14701_v62  ;;  %v4933_v40 = vld [vmem:[#allocation4 + $0x60] sm:$0xff] }
 0x215   : > { %4901 = vst [vmem:[#allocation4 + $0x110] sm:$0xff] %v4841_v7  ;;  %5795 = vrot.lane.b32.xlu0 %v5247_v2, %s17514_s16  ;;  %v2825_v27 = vmul.f32 %v14726_v46, %v1608_v3  ;;  %v14783_v36 = vadd.f32 %v2098_v37, %v1853_v15  ;;  %v2944_v50 = vadd.f32 %v2824_v8, %v14717_v43  ;;  %v14796_v13 = vld [vmem:[%s17545_s1 + $0x8] ss:$0 sm:$0xff]  ;;  %v14810_v28 = vld [vmem:[%s17554_s2] ss:$0 sm:$0xff] }
 0x216   : > { %5899 = vrot.lane.b32.xlu1 %v5274_v5, %s17522_s25  ;;  %4902 = vst [vmem:[#allocation4 + $0x118] sm:$0x7f] %v4842_v58  ;;  %4523 = vst [vmem:[#allocation3 + $0x258] sm:$0x3f] %v4403_v0  ;;  %v3189_v30 = vmul.f32 %v14689_v16, %v1972_v32  ;;  %v3552_v1 = vmul.f32 %v12663_v48, %v14696_v39  ;;  %v3190_v33 = vmul.f32 %v14689_v16, %v1973_v44  ;;  %v1610_v57 = vld [vmem:[#allocation2 + $0x2a1] sm:$0xff] }
 0x217   : > { %v2945_v38 = vadd.f32 %v2825_v27, %v2580_v4  ;;  %v3916_v62 = vmul.f32 %v14735_v63, %v14746_v19  ;;  %v3917_v24 = vmul.f32 %v14735_v63, %v1608_v3  ;;  %v4281_v11 = vmul.f32 %v14796_v13, %v1972_v32  ;;  %v12666_v32 = vld [vmem:[#allocation2 + $0x2a8] sm:$0xff]  ;;  %v12667_v35 = vld [vmem:[#allocation2 + $0x2a0] sm:$0xff]  ;;  %v1368_v7 = vld [vmem:[#allocation2 + $0x2b8] sm:$0x3f] }
 0x218   : > { %v3309_v41 = vadd.f32 %v3189_v30, %v2944_v50  ;;  %v3672_v43 = vadd.f32 %v3552_v1, %v14704_v45  ;;  %v4994_v20 = vmax.f32 %v4933_v40, %v4964_v6  ;;  %v4282_v47 = vmul.f32 %v14796_v13, %v1973_v44  ;;  %v1975_v45 = vld [vmem:[#allocation2 + $0x2a2] sm:$0xff]  ;;  %v1613_v15 = vld [vmem:[#allocation2 + $0x2b9] sm:$0x3f] }
 0x219   : > { %6001 = vrot.lane.b32.xlu0 %v14755_v53, %s17526_s29  ;;  %v14801_v19 = vadd.f32 %v3190_v33, %v2945_v38  ;;  %v4036_v3 = vadd.f32 %v3916_v62, %v14719_v14  ;;  %v14814_v59 = vmul.f32 %v12666_v32, %v14618_v21  ;;  %v2463_v14 = vmul.f32 %v12666_v32, %v14676_v10  ;;  %v1978_v5 = vld [vmem:[#allocation2 + $0x2ba] sm:$0x3f] }
 0x21a   : > { %6105 = vrot.lane.b32.xlu1 %v14757_v17, %s17524_s30  ;;  %v4037_v48 = vadd.f32 %v3917_v24, %v3672_v43  ;;  %v5031_v52 = vadd.f32 %v14810_v28, %v4994_v20  ;;  %v3555_v25 = vmul.f32 %v12666_v32, %v14696_v39  ;;  %v1490_v55 = vmul.f32 %v12667_v35, %v14618_v21  ;;  %v2340_v0 = vld [vmem:[#allocation2 + $0x2b8] sm:$0x3f] }
 0x21b   : > { %v4401_v26 = vadd.f32 %v4281_v11, %v4036_v3  ;;  %v1735_v44 = vmul.f32 %v14660_v42, %v1610_v57  ;;  %v14822_v56 = vadd.f32 %v2463_v14, %v2217_v51  ;;  %v2100_v54 = vmul.f32 %v14669_v9, %v1975_v45  ;;  %v2705_v37 = vld [vmem:[#allocation2 + $0x2b9] sm:$0x3f]  ;;  %v1612_v3 = vld [vmem:[#allocation2 + $0x2b1] sm:$0xff] }
 0x21c   : > { %v4402_v12 = vadd.f32 %v4282_v47, %v4037_v48  ;;  %v14820_v49 = vmax.f32 %v5031_v52, 0.0  ;;  %v14825_v61 = vadd.f32 %v3555_v25, %v3309_v41  ;;  %v2462_v58 = vmul.f32 %v12667_v35, %v14676_v10  ;;  %v3070_v6 = vld [vmem:[#allocation2 + $0x2ba] sm:$0x3f]  ;;  %v1611_v41 = vld [vmem:[#allocation2 + $0x2a9] sm:$0xff] }
 0x21d   : > { %4521 = vst [vmem:[#allocation3 + $0x248] sm:$0xff] %v4401_v26  ;;  %v1855_v31 = vadd.f32 %v1735_v44, %v1490_v55  ;;  %v2827_v2 = vmul.f32 %v14726_v46, %v1610_v57  ;;  %v3192_v8 = vmul.f32 %v14689_v16, %v1975_v45  ;;  %v3554_v51 = vmul.f32 %v12667_v35, %v14696_v39  ;;  %v3432_v50 = vld [vmem:[#allocation2 + $0x2b8] sm:$0x3f]  ;;  %v1976_v52 = vld [vmem:[#allocation2 + $0x2aa] sm:$0xff]  ;;  %v1081_v44 = vpop.permute.xlu1 %1080 }
 0x21e   : > { %5385 = vrot.lane.b32.xlu1 %v14755_v53, %s17512_s13  ;;  %4522 = vst [vmem:[#allocation3 + $0x250] sm:$0xff] %v4402_v12  ;;  %5091 = vst [vmem:[#allocation5 + $0x30] sm:$0xff] %v14820_v49  ;;  %5901 = vrot.lane.b32.xlu0 %v14820_v49, %s17522_s25  ;;  %v3919_v4 = vmul.f32 %v14735_v63, %v1610_v57  ;;  %v1493_v27 = vmul.f32 %v14618_v21, %v1368_v7  ;;  %v4162_v38 = vld [vmem:[#allocation2 + $0x2ba] sm:$0x3f]  ;;  %v12668_v26 = vld [vmem:[#allocation2 + $0x2b0] sm:$0xff]  ;;  %v1076_v7 = vpop.permute.xlu0 %1075 }
 0x21f   : > { %v14838_v53 = vadd.f32 %v2100_v54, %v1855_v31  ;;  %v2582_v30 = vadd.f32 %v2462_v58, %v14738_v29  ;;  %v4284_v1 = vmul.f32 %v14796_v13, %v1975_v45  ;;  %v1738_v23 = vmul.f32 %v14660_v42, %v1613_v15  ;;  %v5144_v11 = vld [vmem:[#allocation5 + $0x19] sm:$0x1f]  ;;  %1266 = vst [vmem:[#allocation2 + $0x388] sm:$0xff] %v1081_v44  ;;  %v12669_v44 = vld [vmem:[#allocation2 + $0x2c8] sm:$0xff] }
 0x220   : > { %v3674_v33 = vadd.f32 %v3554_v51, %v14751_v18  ;;  %v2103_v62 = vmul.f32 %v14669_v9, %v1978_v5  ;;  %v2465_v24 = vmul.f32 %v14676_v10, %v2340_v0  ;;  %v2830_v40 = vmul.f32 %v14726_v46, %v2705_v37  ;;  %v1977_v55 = vld [vmem:[#allocation2 + $0x2b2] sm:$0xff]  ;;  %1265 = vst [vmem:[#allocation2 + $0x380] sm:$0xff] %v1076_v7 }
 0x221   : > { %v2947_v43 = vadd.f32 %v2827_v2, %v2582_v30  ;;  %v1858_v20 = vadd.f32 %v1738_v23, %v1493_v27  ;;  %v3195_v29 = vmul.f32 %v14689_v16, %v3070_v6  ;;  %v3557_v57 = vmul.f32 %v14696_v39, %v3432_v50  ;;  %v5300_v2 = vld [vmem:[#allocation5 + $0x29] sm:$0x1f] }
 0x222   : > { %v4039_v47 = vadd.f32 %v3919_v4, %v3674_v33  ;;  %5383 = vrot.lane.b32.xlu0 %v5144_v11, %s17512_s13  ;;  %v2585_v18 = vadd.f32 %v2465_v24, %v14769_v34  ;;  %v3922_v45 = vmul.f32 %v14735_v63, %v3797_v22  ;;  %v4287_v48 = vmul.f32 %v14796_v13, %v4162_v38  ;;  %v1091_v38 = vpop.permute.xlu1 %1090 }
 0x223   : > { %v14853_v32 = vadd.f32 %v3192_v8, %v2947_v43  ;;  %v3677_v14 = vadd.f32 %v3557_v57, %v14772_v60  ;;  %v1492_v25 = vmul.f32 %v12668_v26, %v14618_v21  ;;  %v1736_v35 = vmul.f32 %v14660_v42, %v1611_v41  ;;  %1268 = vst [vmem:[#allocation2 + $0x398] sm:$0xff] %v1091_v38  ;;  %v1086_v43 = vpop.permute.xlu0 %1085 }
 0x224   : > { %v4640_v12 = vld [vmem:[#allocation3 + $0x240] ss:$2 sm:$0xff]  ;;  %v4760_v54 = vld [vmem:[#allocation3 + $0x241] ss:$2 sm:$0xff]  ;;  %v4404_v34 = vadd.f32 %v4284_v1, %v4039_v47  ;;  %v14858_v15 = vadd.f32 %v2103_v62, %v1858_v20  ;;  %v2950_v31 = vadd.f32 %v2830_v40, %v2585_v18  ;;  %v1737_v58 = vmul.f32 %v14660_v42, %v1612_v3  ;;  %v5170_v18 = vld [vmem:[#allocation5 + $0x1a] sm:$0x1f] }
 0x225   : > { %v4642_v60 = vld [vmem:[#allocation3 + $0x250] ss:$2 sm:$0x7f]  ;;  %v4762_v5 = vld [vmem:[#allocation3 + $0x251] ss:$2 sm:$0x7f]  ;;  %v4843_v0 = vmax.f32 %v4640_v12, %v4760_v54  ;;  %v4042_v37 = vadd.f32 %v3922_v45, %v3677_v14  ;;  %v1856_v8 = vadd.f32 %v1736_v35, %v14814_v59  ;;  %v2101_v51 = vmul.f32 %v14669_v9, %v1976_v52 }
 0x226   : > { %v4844_v4 = vmax.f32 %v4642_v60, %v4762_v5  ;;  %4524 = vst [vmem:[#allocation3 + $0x260] sm:$0xff] %v4404_v34  ;;  %v1857_v27 = vadd.f32 %v1737_v58, %v1492_v25  ;;  %v2102_v6 = vmul.f32 %v14669_v9, %v1977_v55  ;;  %v2464_v50 = vmul.f32 %v12668_v26, %v14676_v10  ;;  %v4965_v59 = vld [vmem:[#allocation4 + $0x78] sm:$0x7f]  ;;  %v4934_v47 = vld [vmem:[#allocation4 + $0x68] sm:$0x7f] }
 0x227   : > { %6003 = vrot.lane.b32.xlu0 %v5300_v2, %s17526_s29  ;;  %4903 = vst [vmem:[#allocation4 + $0x120] sm:$0xff] %v4843_v0  ;;  %v14866_v30 = vadd.f32 %v3195_v29, %v2950_v31  ;;  %v4407_v1 = vadd.f32 %v4287_v48, %v4042_v37  ;;  %v2828_v23 = vmul.f32 %v14726_v46, %v1611_v41  ;;  %1267 = vst [vmem:[#allocation2 + $0x390] sm:$0xff] %v1086_v43  ;;  %v1614_v25 = vld [vmem:[#allocation2 + $0x2c1] sm:$0xff]  ;;  %v5326_v2 = vld [vmem:[#allocation5 + $0x2a] sm:$0x1f] }
 0x228   : > { %v2829_v22 = vmul.f32 %v14726_v46, %v1612_v3  ;;  %4904 = vst [vmem:[#allocation4 + $0x128] sm:$0x7f] %v4844_v4  ;;  %v2221_v33 = vadd.f32 %v2101_v51, %v1856_v8  ;;  %v14870_v62 = vadd.f32 %v2102_v6, %v1857_v27  ;;  %v2584_v24 = vadd.f32 %v2464_v50, %v14783_v36  ;;  %v12670_v31 = vld [vmem:[#allocation2 + $0x2c0] sm:$0xff]  ;;  %v1372_v37 = vld [vmem:[#allocation2 + $0x2d8] sm:$0x3f] }
 0x229   : > { %v3193_v40 = vmul.f32 %v14689_v16, %v1976_v52  ;;  %4527 = vst [vmem:[#allocation3 + $0x278] sm:$0x3f] %v4407_v1  ;;  %v2948_v11 = vadd.f32 %v2828_v23, %v14822_v56  ;;  %v3556_v20 = vmul.f32 %v12668_v26, %v14696_v39  ;;  %v3920_v29 = vmul.f32 %v14735_v63, %v1611_v41  ;;  %v1617_v8 = vld [vmem:[#allocation2 + $0x2d9] sm:$0x3f] }
 0x22a   : > { %v3921_v57 = vmul.f32 %v14735_v63, %v1612_v3  ;;  %v2949_v45 = vadd.f32 %v2829_v22, %v2584_v24  ;;  %v3194_v48 = vmul.f32 %v14689_v16, %v1977_v55  ;;  %v4285_v36 = vmul.f32 %v14796_v13, %v1976_v52  ;;  %v1982_v50 = vld [vmem:[#allocation2 + $0x2da] sm:$0x3f] }
 0x22b   : > { %v4995_v14 = vmax.f32 %v4934_v47, %v4965_v59  ;;  %5487 = vrot.lane.b32.xlu0 %v5170_v18, %s17520_s12  ;;  %v3313_v35 = vadd.f32 %v3193_v40, %v2948_v11  ;;  %v3676_v56 = vadd.f32 %v3556_v20, %v14801_v19  ;;  %v4040_v26 = vadd.f32 %v3920_v29, %v14825_v61  ;;  %v1979_v61 = vld [vmem:[#allocation2 + $0x2c2] sm:$0xff]  ;;  %v2344_v1 = vld [vmem:[#allocation2 + $0x2d8] sm:$0x3f] }
 0x22c   : > { %v4286_v41 = vmul.f32 %v14796_v13, %v1977_v55  ;;  %v14886_v7 = vmul.f32 %v12669_v44, %v14618_v21  ;;  %v2467_v12 = vmul.f32 %v12669_v44, %v14676_v10  ;;  %v3559_v52 = vmul.f32 %v12669_v44, %v14696_v39  ;;  %v3436_v24 = vld [vmem:[#allocation2 + $0x2d8] sm:$0x3f]  ;;  %v5197_v47 = vld [vmem:[#allocation5 + $0x28] sm:$0x1f] }
 0x22d   : > { %v5032_v3 = vadd.f32 %v14810_v28, %v4995_v14  ;;  %v4041_v54 = vadd.f32 %v3921_v57, %v3676_v56  ;;  %v4405_v34 = vadd.f32 %v4285_v36, %v4040_v26  ;;  %v1494_v58 = vmul.f32 %v12670_v31, %v14618_v21  ;;  %v3074_v29 = vld [vmem:[#allocation2 + $0x2da] sm:$0x3f]  ;;  %v1615_v26 = vld [vmem:[#allocation2 + $0x2c9] sm:$0xff] }
 0x22e   : > { %v1739_v19 = vmul.f32 %v14660_v42, %v1614_v25  ;;  %v14892_v55 = vadd.f32 %v3194_v48, %v2949_v45  ;;  %v14894_v5 = vadd.f32 %v2467_v12, %v2221_v33  ;;  %v14896_v0 = vadd.f32 %v3559_v52, %v3313_v35  ;;  %v2709_v33 = vld [vmem:[#allocation2 + $0x2d9] sm:$0x3f]  ;;  %v1980_v52 = vld [vmem:[#allocation2 + $0x2ca] sm:$0xff] }
 0x22f   : > { %v5062_v60 = vmax.f32 %v5032_v3, 0.0  ;;  %6107 = vrot.lane.b32.xlu0 %v5326_v2, %s17524_s30  ;;  %v4406_v51 = vadd.f32 %v4286_v41, %v4041_v54  ;;  %4525 = vst [vmem:[#allocation3 + $0x268] sm:$0xff] %v4405_v34  ;;  %v2466_v27 = vmul.f32 %v12670_v31, %v14676_v10  ;;  %v2831_v6 = vmul.f32 %v14726_v46, %v1614_v25  ;;  %v3801_v57 = vld [vmem:[#allocation2 + $0x2d9] sm:$0x3f]  ;;  %v1616_v41 = vld [vmem:[#allocation2 + $0x2d1] sm:$0xff] }
 0x230   : > { %v1859_v4 = vadd.f32 %v1739_v19, %v1494_v58  ;;  %v2104_v23 = vmul.f32 %v14669_v9, %v1979_v61  ;;  %v3196_v22 = vmul.f32 %v14689_v16, %v1979_v61  ;;  %v3558_v59 = vmul.f32 %v12670_v31, %v14696_v39  ;;  %v4166_v14 = vld [vmem:[#allocation2 + $0x2da] sm:$0x3f]  ;;  %v12671_v58 = vld [vmem:[#allocation2 + $0x2d0] sm:$0xff]  ;;  %v5223_v2 = vld [vmem:[#allocation5 + $0x29] sm:$0x1f] }
 0x231   : > { %5092 = vst [vmem:[#allocation5 + $0x38] sm:$0x7f] %v5062_v60  ;;  %v3923_v38 = vmul.f32 %v14735_v63, %v1614_v25  ;;  %4526 = vst [vmem:[#allocation3 + $0x270] sm:$0xff] %v4406_v51  ;;  %v2586_v40 = vadd.f32 %v2466_v27, %v14838_v53  ;;  %v4288_v43 = vmul.f32 %v14796_v13, %v1979_v61  ;;  %v1981_v61 = vld [vmem:[#allocation2 + $0x2d2] sm:$0xff] }
 0x232   : > { %v1497_v11 = vmul.f32 %v14618_v21, %v1372_v37  ;;  %v1742_v20 = vmul.f32 %v14660_v42, %v1617_v8  ;;  %v14909_v18 = vadd.f32 %v2104_v23, %v1859_v4  ;;  %v3678_v45 = vadd.f32 %v3558_v59, %v14853_v32 }
 0x233   : > { %v2107_v48 = vmul.f32 %v14669_v9, %v1982_v50  ;;  %v2469_v36 = vmul.f32 %v14676_v10, %v2344_v1  ;;  %5591 = vrot.lane.b32.xlu0 %v5197_v47, %s17516_s14  ;;  %v2951_v53 = vadd.f32 %v2831_v6, %v2586_v40  ;;  %v2834_v35 = vmul.f32 %v14726_v46, %v2709_v33  ;;  %v1096_v47 = vpop.permute.xlu0 %1095 }
 0x234   : > { %v1862_v25 = vadd.f32 %v1742_v20, %v1497_v11  ;;  %v3561_v56 = vmul.f32 %v14696_v39, %v3436_v24  ;;  %v4043_v3 = vadd.f32 %v3923_v38, %v3678_v45  ;;  %v3199_v32 = vmul.f32 %v14689_v16, %v3074_v29  ;;  %v5249_v29 = vld [vmem:[#allocation5 + $0x2a] sm:$0x1f]  ;;  %1269 = vst [vmem:[#allocation2 + $0x3a0] sm:$0xff] %v1096_v47 }
 0x235   : > { %v2589_v44 = vadd.f32 %v2469_v36, %v14858_v15  ;;  %v3926_v12 = vmul.f32 %v14735_v63, %v3801_v57  ;;  %v14920_v54 = vadd.f32 %v3196_v22, %v2951_v53  ;;  %v4291_v31 = vmul.f32 %v14796_v13, %v4166_v14  ;;  %v1101_v57 = vpop.permute.xlu1 %1100 }
 0x236   : > { %v3681_v34 = vadd.f32 %v3561_v56, %v14866_v30  ;;  %v1496_v19 = vmul.f32 %v12671_v58, %v14618_v21  ;;  %v4644_v60 = vld [vmem:[#allocation3 + $0x260] ss:$2 sm:$0xff]  ;;  %v4764_v37 = vld [vmem:[#allocation3 + $0x261] ss:$2 sm:$0xff]  ;;  %v4408_v8 = vadd.f32 %v4288_v43, %v4043_v3  ;;  %v1740_v51 = vmul.f32 %v14660_v42, %v1615_v26  ;;  %1270 = vst [vmem:[#allocation2 + $0x3a8] sm:$0xff] %v1101_v57 }
 0x237   : > { %v2954_v15 = vadd.f32 %v2834_v35, %v2589_v44  ;;  %v1741_v4 = vmul.f32 %v14660_v42, %v1616_v41  ;;  %5695 = vrot.lane.b32.xlu0 %v5223_v2, %s17518_s15  ;;  %v4845_v27 = vmax.f32 %v4644_v60, %v4764_v37  ;;  %v14930_v30 = vadd.f32 %v2107_v48, %v1862_v25  ;;  %v1106_v2 = vpop.permute.xlu0 %1105  ;;  %v12672_v60 = vld [vmem:[#allocation2 + $0x2e8] sm:$0xff] }
 0x238   : > { %v14928_v6 = vld [vmem:[#allocation5 + $0x31] sm:$0xff]  ;;  %v4046_v50 = vadd.f32 %v3926_v12, %v3681_v34  ;;  %v2105_v1 = vmul.f32 %v14669_v9, %v1980_v52  ;;  %4528 = vst [vmem:[#allocation3 + $0x280] sm:$0xff] %v4408_v8  ;;  %v1860_v59 = vadd.f32 %v1740_v51, %v14886_v7  ;;  %v2106_v33 = vmul.f32 %v14669_v9, %v1981_v61  ;;  %v12673_v8 = vld [vmem:[#allocation2 + $0x2e0] sm:$0xff] }
 0x239   : > { %v4646_v23 = vld [vmem:[#allocation3 + $0x270] ss:$2 sm:$0x7f]  ;;  %v4766_v22 = vld [vmem:[#allocation3 + $0x271] ss:$2 sm:$0x7f]  ;;  %6005 = vrot.lane.b32.xlu1 %v14928_v6, %s17526_s29  ;;  %v1861_v38 = vadd.f32 %v1741_v4, %v1496_v19  ;;  %v2468_v24 = vmul.f32 %v12671_v58, %v14676_v10  ;;  %v2832_v11 = vmul.f32 %v14726_v46, %v1615_v26  ;;  %v2833_v20 = vmul.f32 %v14726_v46, %v1616_v41  ;;  %v1111_v19 = vpop.permute.xlu1 %1110 }
 0x23a   : > { %v4846_v40 = vmax.f32 %v4646_v23, %v4766_v22  ;;  %4905 = vst [vmem:[#allocation4 + $0x130] sm:$0xff] %v4845_v27  ;;  %v4411_v43 = vadd.f32 %v4291_v31, %v4046_v50  ;;  %v14940_v45 = vadd.f32 %v3199_v32, %v2954_v15  ;;  %v2225_v48 = vadd.f32 %v2105_v1, %v1860_v59  ;;  %v1618_v32 = vld [vmem:[#allocation2 + $0x2e1] sm:$0xff]  ;;  %v1376_v4 = vld [vmem:[#allocation2 + $0x2f8] sm:$0x3f] }
 0x23b   : > { %v14942_v36 = vadd.f32 %v2106_v33, %v1861_v38  ;;  %v2588_v7 = vadd.f32 %v2468_v24, %v14870_v62  ;;  %5799 = vrot.lane.b32.xlu0 %v5249_v29, %s17514_s16  ;;  %v2952_v14 = vadd.f32 %v2832_v11, %v14894_v5  ;;  %v3197_v53 = vmul.f32 %v14689_v16, %v1980_v52  ;;  %v1621_v22 = vld [vmem:[#allocation2 + $0x2f9] sm:$0x3f] }
 0x23c   : > { %4906 = vst [vmem:[#allocation4 + $0x138] sm:$0x7f] %v4846_v40  ;;  %4531 = vst [vmem:[#allocation3 + $0x298] sm:$0x3f] %v4411_v43  ;;  %v3560_v25 = vmul.f32 %v12671_v58, %v14696_v39  ;;  %v3924_v35 = vmul.f32 %v14735_v63, %v1615_v26  ;;  %v3198_v62 = vmul.f32 %v14689_v16, %v1981_v61  ;;  %v1983_v58 = vld [vmem:[#allocation2 + $0x2e2] sm:$0xff] }
 0x23d   : > { %5489 = vrot.lane.b32.xlu1 %v14757_v17, %s17520_s12  ;;  %v2953_v56 = vadd.f32 %v2833_v20, %v2588_v7  ;;  %v3925_v3 = vmul.f32 %v14735_v63, %v1616_v41  ;;  %v4289_v44 = vmul.f32 %v14796_v13, %v1980_v52  ;;  %v3317_v12 = vadd.f32 %v3197_v53, %v2952_v14  ;;  %v5276_v26 = vld [vmem:[#allocation5 + $0x38] sm:$0x1f] }
 0x23e   : > { %v3680_v5 = vadd.f32 %v3560_v25, %v14892_v55  ;;  %v4044_v34 = vadd.f32 %v3924_v35, %v14896_v0  ;;  %v4290_v31 = vmul.f32 %v14796_v13, %v1981_v61  ;;  %v14961_v37 = vmul.f32 %v12672_v60, %v14618_v21  ;;  %1272 = vst [vmem:[#allocation2 + $0x3b8] sm:$0xff] %v1111_v19  ;;  %v14966_v61 = vld [vmem:[#allocation5 + $0x32] sm:$0xff]  ;;  %v1986_v40 = vld [vmem:[#allocation2 + $0x2fa] sm:$0x3f] }
 0x23f   : > { %v14958_v17 = vadd.f32 %v3198_v62, %v2953_v56  ;;  %v2471_v41 = vmul.f32 %v12672_v60, %v14676_v10  ;;  %v3563_v52 = vmul.f32 %v12672_v60, %v14696_v39  ;;  %5903 = vrot.lane.b32.xlu0 %v5276_v26, %s17522_s25  ;;  %1271 = vst [vmem:[#allocation2 + $0x3b0] sm:$0xff] %v1106_v2  ;;  %v2348_v43 = vld [vmem:[#allocation2 + $0x2f8] sm:$0x3f] }
 0x240   : > { %v4045_v55 = vadd.f32 %v3925_v3, %v3680_v5  ;;  %v4409_v0 = vadd.f32 %v4289_v44, %v4044_v34  ;;  %v1498_v15 = vmul.f32 %v12673_v8, %v14618_v21  ;;  %v1743_v51 = vmul.f32 %v14660_v42, %v1618_v32  ;;  %v2713_v11 = vld [vmem:[#allocation2 + $0x2f9] sm:$0x3f] }
 0x241   : > { %6109 = vrot.lane.b32.xlu1 %v14966_v61, %s17524_s30  ;;  %v14972_v27 = vadd.f32 %v2471_v41, %v2225_v48  ;;  %v2108_v50 = vmul.f32 %v14669_v9, %v1983_v58  ;;  %v2470_v1 = vmul.f32 %v12673_v8, %v14676_v10  ;;  %v2835_v23 = vmul.f32 %v14726_v46, %v1618_v32  ;;  %v3078_v48 = vld [vmem:[#allocation2 + $0x2fa] sm:$0x3f] }
 0x242   : > { %v4410_v59 = vadd.f32 %v4290_v31, %v4045_v55  ;;  %4529 = vst [vmem:[#allocation3 + $0x288] sm:$0xff] %v4409_v0  ;;  %v14977_v38 = vadd.f32 %v3563_v52, %v3317_v12  ;;  %v1863_v33 = vadd.f32 %v1743_v51, %v1498_v15  ;;  %v3562_v24 = vmul.f32 %v12673_v8, %v14696_v39  ;;  %v3440_v7 = vld [vmem:[#allocation2 + $0x2f8] sm:$0x3f]  ;;  %v15007_v52 = vld [vmem:[%s17545_s1] ss:$0 sm:$0xff]  ;;  %v12675_v55 = vld [vmem:[#allocation2 + $0x2f0] sm:$0xff] }
 0x243   : > { %v2590_v20 = vadd.f32 %v2470_v1, %v14909_v18  ;;  %v3200_v29 = vmul.f32 %v14689_v16, %v1983_v58  ;;  %v3927_v57 = vmul.f32 %v14735_v63, %v1618_v32  ;;  %v1501_v47 = vmul.f32 %v14618_v21, %v1376_v4  ;;  %5389 = vrot.lane.b32.xlu0 %v14928_v6, %s17512_s13  ;;  %v3805_v35 = vld [vmem:[#allocation2 + $0x2f9] sm:$0x3f]  ;;  %v1619_v32 = vld [vmem:[#allocation2 + $0x2e9] sm:$0xff]  ;;  %v1620_v31 = vld [vmem:[#allocation2 + $0x2f1] sm:$0xff]  ;;  %s17555_s13 = smov 32  }
 0x244   : > { %4530 = vst [vmem:[#allocation3 + $0x290] sm:$0xff] %v4410_v59  ;;  %v14986_v14 = vadd.f32 %v2108_v50, %v1863_v33  ;;  %v3682_v53 = vadd.f32 %v3562_v24, %v14920_v54  ;;  %v4292_v25 = vmul.f32 %v14796_v13, %v1983_v58  ;;  %v1746_v18 = vmul.f32 %v14660_v42, %v1621_v22  ;;  %v4170_v56 = vld [vmem:[#allocation2 + $0x2fa] sm:$0x3f]  ;;  %v1984_v58 = vld [vmem:[#allocation2 + $0x2ea] sm:$0xff]  ;;  %v1985_v15 = vld [vmem:[#allocation2 + $0x2f2] sm:$0xff] }
 0x245   : > { %v2955_v62 = vadd.f32 %v2835_v23, %v2590_v20  ;;  %5593 = vrot.lane.b32.xlu1 %v14820_v49, %s17516_s14  ;;  %v2111_v21 = vmul.f32 %v14669_v9, %v1986_v40  ;;  %v2473_v3 = vmul.f32 %v14676_v10, %v2348_v43  ;;  %v2838_v44 = vmul.f32 %v14726_v46, %v2713_v11  ;;  %s17556_s14 = smov 24  }
 0x246   : > { %v4047_v12 = vadd.f32 %v3927_v57, %v3682_v53  ;;  %v1866_v5 = vadd.f32 %v1746_v18, %v1501_v47  ;;  %v3203_v54 = vmul.f32 %v14689_v16, %v3078_v48  ;;  %v3565_v34 = vmul.f32 %v14696_v39, %v3440_v7  ;;  %v1121_v48 = vpop.permute.xlu1 %1120 }
 0x247   : > { %v14998_v26 = vadd.f32 %v3200_v29, %v2955_v62  ;;  %v2593_v19 = vadd.f32 %v2473_v3, %v14930_v30  ;;  %v3930_v49 = vmul.f32 %v14735_v63, %v3805_v35  ;;  %v4295_v2 = vmul.f32 %v14796_v13, %v4170_v56  ;;  %1274 = vst [vmem:[#allocation2 + $0x3c8] sm:$0xff] %v1121_v48  ;;  %v1622_v62 = vld [vmem:[#allocation2 + $0x301] sm:$0xff]  ;;  %v3082_v48 = vld [vmem:[#allocation2 + $0x31a] sm:$0x3f] }
 0x248   : > { %v4412_v60 = vadd.f32 %v4292_v25, %v4047_v12  ;;  %v3685_v41 = vadd.f32 %v3565_v34, %v14940_v45  ;;  %v1500_v0 = vmul.f32 %v12675_v55, %v15007_v52  ;;  %v1744_v8 = vmul.f32 %v14660_v42, %v1619_v32  ;;  %v12676_v34 = vld [vmem:[#allocation2 + $0x308] sm:$0xff] }
 0x249   : > { %v4648_v51 = vld [vmem:[#allocation3 + $0x280] ss:$2 sm:$0xff]  ;;  %v4768_v30 = vld [vmem:[#allocation3 + $0x281] ss:$2 sm:$0xff]  ;;  %v15011_v4 = vadd.f32 %v2111_v21, %v1866_v5  ;;  %v2958_v50 = vadd.f32 %v2838_v44, %v2593_v19  ;;  %v1745_v1 = vmul.f32 %v14660_v42, %v1620_v31  ;;  %v2109_v45 = vmul.f32 %v14669_v9, %v1984_v58  ;;  %5697 = vrot.lane.b32.xlu1 %v14928_v6, %s17518_s15  ;;  %s17557_s15 = smov 40  }
 0x24a   : > { %v4847_v23 = vmax.f32 %v4648_v51, %v4768_v30  ;;  %4532 = vst [vmem:[#allocation3 + $0x2a0] sm:$0xff] %v4412_v60  ;;  %v4050_v22 = vadd.f32 %v3930_v49, %v3685_v41  ;;  %v1864_v59 = vadd.f32 %v1744_v8, %v14961_v37  ;;  %v2472_v33 = vmul.f32 %v12675_v55, %v14676_v10  ;;  %v1116_v37 = vpop.permute.xlu0 %1115  ;;  %v1987_v44 = vld [vmem:[#allocation2 + $0x302] sm:$0xff]  ;;  %v15050_v41 = vld [vmem:[%s17545_s1 + $0x1] ss:$0 sm:$0xff]  ;;  %v1380_v51 = vld [vmem:[#allocation2 + $0x318] sm:$0x3f] }
 0x24b   : > { %v4650_v24 = vld [vmem:[#allocation3 + $0x290] ss:$2 sm:$0x7f]  ;;  %v4770_v40 = vld [vmem:[#allocation3 + $0x291] ss:$2 sm:$0x7f]  ;;  %v1865_v43 = vadd.f32 %v1745_v1, %v1500_v0  ;;  %v2110_v11 = vmul.f32 %v14669_v9, %v1985_v15  ;;  %v2836_v20 = vmul.f32 %v14726_v46, %v1619_v32  ;;  %v2837_v42 = vmul.f32 %v14726_v46, %v1620_v31 }
 0x24c   : > { %v4848_v29 = vmax.f32 %v4650_v24, %v4770_v40  ;;  %4907 = vst [vmem:[#allocation4 + $0x140] sm:$0xff] %v4847_v23  ;;  %v15022_v57 = vadd.f32 %v3203_v54, %v2958_v50  ;;  %v4415_v6 = vadd.f32 %v4295_v2, %v4050_v22  ;;  %v2592_v47 = vadd.f32 %v2472_v33, %v14942_v36  ;;  %v15062_v8 = vld [vmem:[%s17545_s1 + $0x3] ss:$0 sm:$0xff]  ;;  %v1625_v30 = vld [vmem:[#allocation2 + $0x319] sm:$0x3f] }
 0x24d   : > { %v2229_v7 = vadd.f32 %v2109_v45, %v1864_v59  ;;  %v2956_v53 = vadd.f32 %v2836_v20, %v14972_v27  ;;  %v3201_v25 = vmul.f32 %v14689_v16, %v1984_v58  ;;  %v3202_v9 = vmul.f32 %v14689_v16, %v1985_v15  ;;  %5801 = vrot.lane.b32.xlu1 %v14966_v61, %s17514_s16  ;;  %v2352_v22 = vld [vmem:[#allocation2 + $0x318] sm:$0x3f]  ;;  %s17558_s16 = smov 8  }
 0x24e   : > { %1273 = vst [vmem:[#allocation2 + $0x3c0] sm:$0xff] %v1116_v37  ;;  %4908 = vst [vmem:[#allocation4 + $0x148] sm:$0x7f] %v4848_v29  ;;  %v2957_v18 = vadd.f32 %v2837_v42, %v2592_v47  ;;  %v3564_v35 = vmul.f32 %v12675_v55, %v14696_v39  ;;  %v3928_v36 = vmul.f32 %v14735_v63, %v1619_v32  ;;  %v1126_v19 = vpop.permute.xlu0 %1125  ;;  %v3444_v20 = vld [vmem:[#allocation2 + $0x318] sm:$0x3f] }
 0x24f   : > { %4535 = vst [vmem:[#allocation3 + $0x2b8] sm:$0x3f] %v4415_v6  ;;  %v3929_v56 = vmul.f32 %v14735_v63, %v1620_v31  ;;  %v15033_v27 = vadd.f32 %v2110_v11, %v1865_v43  ;;  %v3321_v21 = vadd.f32 %v3201_v25, %v2956_v53  ;;  %v4293_v16 = vmul.f32 %v14796_v13, %v1984_v58  ;;  %v1131_v31 = vpop.permute.xlu1 %1130  ;;  %v12677_v58 = vld [vmem:[#allocation2 + $0x300] sm:$0xff]  ;;  %v1990_v43 = vld [vmem:[#allocation2 + $0x31a] sm:$0x3f] }
 0x250   : > { %v4294_v3 = vmul.f32 %v14796_v13, %v1985_v15  ;;  %v15037_v12 = vadd.f32 %v3202_v9, %v2957_v18  ;;  %v3684_v5 = vadd.f32 %v3564_v35, %v14958_v17  ;;  %v4048_v54 = vadd.f32 %v3928_v36, %v14977_v38  ;;  %1276 = vst [vmem:[#allocation2 + $0x3d8] sm:$0xff] %v1131_v31  ;;  %v2717_v11 = vld [vmem:[#allocation2 + $0x319] sm:$0x3f]  ;;  %v15078_v29 = vld [vmem:[%s17545_s1 + $0x5] ss:$0 sm:$0xff] }
 0x251   : > { %v15042_v32 = vmul.f32 %v12676_v34, %v15007_v52  ;;  %v2475_v49 = vmul.f32 %v12676_v34, %v14676_v10  ;;  %v3567_v2 = vmul.f32 %v12676_v34, %v14696_v39  ;;  %v1502_v60 = vmul.f32 %v12677_v58, %v15007_v52  ;;  %1275 = vst [vmem:[#allocation2 + $0x3d0] sm:$0xff] %v1126_v19  ;;  %v15056_v10 = vld [vmem:[%s17545_s1 + $0x2] ss:$0 sm:$0xff]  ;;  %v3809_v25 = vld [vmem:[#allocation2 + $0x319] sm:$0x3f] }
 0x252   : > { %v1747_v17 = vmul.f32 %v15050_v41, %v1622_v62  ;;  %v4049_v38 = vadd.f32 %v3929_v56, %v3684_v5  ;;  %v4413_v55 = vadd.f32 %v4293_v16, %v4048_v54  ;;  %v2112_v0 = vmul.f32 %v15056_v10, %v1987_v44  ;;  %v15091_v36 = vld [vmem:[%s17545_s1 + $0x6] ss:$0 sm:$0xff]  ;;  %v4174_v5 = vld [vmem:[#allocation2 + $0x31a] sm:$0x3f]  ;;  %v1988_v54 = vld [vmem:[#allocation2 + $0x30a] sm:$0xff] }
 0x253   : > { %v2474_v15 = vmul.f32 %v15062_v8, %v12677_v58  ;;  %v15065_v50 = vadd.f32 %v2475_v49, %v2229_v7  ;;  %v15067_v1 = vadd.f32 %v3567_v2, %v3321_v21  ;;  %v2839_v23 = vmul.f32 %v14726_v46, %v1622_v62  ;;  %v1624_v21 = vld [vmem:[#allocation2 + $0x311] sm:$0xff]  ;;  %v1141_v34 = vpop.permute.xlu1 %1140 }
 0x254   : > { %v1867_v45 = vadd.f32 %v1747_v17, %v1502_v60  ;;  %v4414_v59 = vadd.f32 %v4294_v3, %v4049_v38  ;;  %4533 = vst [vmem:[#allocation3 + $0x2a8] sm:$0xff] %v4413_v55  ;;  %v3566_v24 = vmul.f32 %v12677_v58, %v14696_v39  ;;  %v3931_v40 = vmul.f32 %v14735_v63, %v1622_v62  ;;  %v1623_v62 = vld [vmem:[#allocation2 + $0x309] sm:$0xff]  ;;  %v1989_v60 = vld [vmem:[#allocation2 + $0x312] sm:$0xff] }
 0x255   : > { %v2594_v33 = vadd.f32 %v2474_v15, %v14986_v14  ;;  %v3204_v6 = vmul.f32 %v15078_v29, %v1987_v44  ;;  %v1505_v47 = vmul.f32 %v15007_v52, %v1380_v51  ;;  %v1750_v14 = vmul.f32 %v15050_v41, %v1625_v30  ;;  %v12683_v2 = vld [vmem:[#allocation2 + $0x310] sm:$0xff]  ;;  %1278 = vst [vmem:[#allocation2 + $0x3e8] sm:$0xff] %v1141_v34 }
 0x256   : > { %v15073_v42 = vadd.f32 %v2112_v0, %v1867_v45  ;;  %4534 = vst [vmem:[#allocation3 + $0x2b0] sm:$0xff] %v4414_v59  ;;  %v3686_v37 = vadd.f32 %v3566_v24, %v14998_v26  ;;  %v4296_v7 = vmul.f32 %v14796_v13, %v1987_v44  ;;  %v2477_v53 = vmul.f32 %v15062_v8, %v2352_v22 }
 0x257   : > { %v2959_v39 = vadd.f32 %v2839_v23, %v2594_v33  ;;  %v1870_v9 = vadd.f32 %v1750_v14, %v1505_v47  ;;  %v2115_v18 = vmul.f32 %v15056_v10, %v1990_v43  ;;  %v2842_v35 = vmul.f32 %v14726_v46, %v2717_v11  ;;  %v1136_v46 = vpop.permute.xlu0 %1135  ;;  %v1151_v33 = vpop.permute.xlu1 %1150 }
 0x258   : > { %v3569_v56 = vmul.f32 %v15091_v36, %v3444_v20  ;;  %v4051_v16 = vadd.f32 %v3931_v40, %v3686_v37  ;;  %v2597_v3 = vadd.f32 %v2477_v53, %v15011_v4  ;;  %v3207_v44 = vmul.f32 %v15078_v29, %v3082_v48  ;;  %1277 = vst [vmem:[#allocation2 + $0x3e0] sm:$0xff] %v1136_v46 }
 0x259   : > { %v15094_v26 = vadd.f32 %v3204_v6, %v2959_v39  ;;  %v15098_v31 = vadd.f32 %v2115_v18, %v1870_v9  ;;  %v3934_v49 = vmul.f32 %v14735_v63, %v3809_v25  ;;  %v1504_v58 = vmul.f32 %v12683_v2, %v15007_v52  ;;  %v15114_v6 = vld [vmem:[%s17545_s1 + $0x4] ss:$0 sm:$0xff]  ;;  %1280 = vst [vmem:[#allocation2 + $0x3f8] sm:$0xff] %v1151_v33 }
 0x25a   : > { %v3689_v19 = vadd.f32 %v3569_v56, %v15022_v57  ;;  %v4416_v17 = vadd.f32 %v4296_v7, %v4051_v16  ;;  %v2962_v4 = vadd.f32 %v2842_v35, %v2597_v3  ;;  %v1748_v38 = vmul.f32 %v15050_v41, %v1623_v62  ;;  %v4966_v7 = vld [vmem:[#allocation4 + $0x90] sm:$0xff]  ;;  %v15129_v35 = vld [vmem:[%s17545_s1 + $0x7] ss:$0 sm:$0xff] }
 0x25b   : > { %v1749_v55 = vmul.f32 %v15050_v41, %v1624_v21  ;;  %v4652_v0 = vld [vmem:[#allocation3 + $0x2a0] ss:$2 sm:$0xff]  ;;  %v4772_v15 = vld [vmem:[#allocation3 + $0x2a1] ss:$2 sm:$0xff]  ;;  %v4299_v30 = vmul.f32 %v14796_v13, %v4174_v5  ;;  %v2113_v57 = vmul.f32 %v15056_v10, %v1988_v54  ;;  %v2476_v63 = vmul.f32 %v12683_v2, %v15062_v8  ;;  %v1146_v24 = vpop.permute.xlu0 %1145 }
 0x25c   : > { %v4054_v51 = vadd.f32 %v3934_v49, %v3689_v19  ;;  %v4849_v45 = vmax.f32 %v4652_v0, %v4772_v15  ;;  %4536 = vst [vmem:[#allocation3 + $0x2c0] sm:$0xff] %v4416_v17  ;;  %v1868_v23 = vadd.f32 %v1748_v38, %v15042_v32  ;;  %v2114_v59 = vmul.f32 %v15056_v10, %v1989_v60  ;;  %v1991_v49 = vld [vmem:[#allocation2 + $0x322] sm:$0xff] }
 0x25d   : > { %v1869_v22 = vadd.f32 %v1749_v55, %v1504_v58  ;;  %v4654_v40 = vld [vmem:[#allocation3 + $0x2b0] ss:$2 sm:$0x7f]  ;;  %v4774_v43 = vld [vmem:[#allocation3 + $0x2b1] ss:$2 sm:$0x7f]  ;;  %v2596_v20 = vadd.f32 %v2476_v63, %v15033_v27  ;;  %v2840_v47 = vmul.f32 %v15114_v6, %v1623_v62  ;;  %v2841_v14 = vmul.f32 %v15114_v6, %v1624_v21 }
 0x25e   : > { %v4419_v11 = vadd.f32 %v4299_v30, %v4054_v51  ;;  %1279 = vst [vmem:[#allocation2 + $0x3f0] sm:$0xff] %v1146_v24  ;;  %v4850_v32 = vmax.f32 %v4654_v40, %v4774_v43  ;;  %4909 = vst [vmem:[#allocation4 + $0x150] sm:$0xff] %v4849_v45  ;;  %v15118_v48 = vadd.f32 %v3207_v44, %v2962_v4  ;;  %v1626_v44 = vld [vmem:[#allocation2 + $0x321] sm:$0xff]  ;;  %v1384_v51 = vld [vmem:[#allocation2 + $0x338] sm:$0x3f] }
 0x25f   : > { %v2233_v39 = vadd.f32 %v2113_v57, %v1868_v23  ;;  %v15120_v37 = vadd.f32 %v2114_v59, %v1869_v22  ;;  %v2960_v27 = vadd.f32 %v2840_v47, %v15065_v50  ;;  %v2961_v53 = vadd.f32 %v2841_v14, %v2596_v20  ;;  %v4935_v50 = vld [vmem:[#allocation4 + $0x80] sm:$0xff]  ;;  %v12686_v17 = vld [vmem:[#allocation2 + $0x328] sm:$0xff]  ;;  %v2356_v23 = vld [vmem:[#allocation2 + $0x338] sm:$0x3f] }
 0x260   : > { %4539 = vst [vmem:[#allocation3 + $0x2d8] sm:$0x3f] %v4419_v11  ;;  %v3205_v25 = vmul.f32 %v15078_v29, %v1988_v54  ;;  %v3568_v9 = vmul.f32 %v12683_v2, %v15091_v36  ;;  %4910 = vst [vmem:[#allocation4 + $0x158] sm:$0x7f] %v4850_v32  ;;  %v3206_v18 = vmul.f32 %v15078_v29, %v1989_v60  ;;  %v12687_v38 = vld [vmem:[#allocation2 + $0x320] sm:$0xff] }
 0x261   : > { %v3932_v56 = vmul.f32 %v15129_v35, %v1623_v62  ;;  %v3933_v16 = vmul.f32 %v15129_v35, %v1624_v21  ;;  %v4297_v3 = vmul.f32 %v14796_v13, %v1988_v54  ;;  %v4298_v46 = vmul.f32 %v14796_v13, %v1989_v60  ;;  %v1994_v40 = vld [vmem:[#allocation2 + $0x33a] sm:$0x3f] }
 0x262   : > { %v3325_v5 = vadd.f32 %v3205_v25, %v2960_v27  ;;  %v3688_v34 = vadd.f32 %v3568_v9, %v15037_v12  ;;  %v4996_v19 = vmax.f32 %v4935_v50, %v4966_v7  ;;  %v15136_v2 = vadd.f32 %v3206_v18, %v2961_v53  ;;  %v2721_v43 = vld [vmem:[#allocation2 + $0x339] sm:$0x3f]  ;;  %v1627_v50 = vld [vmem:[#allocation2 + $0x329] sm:$0xff] }
 0x263   : > { %v4052_v58 = vadd.f32 %v3932_v56, %v15067_v1  ;;  %v15140_v62 = vmul.f32 %v12686_v17, %v15007_v52  ;;  %v2479_v21 = vmul.f32 %v12686_v17, %v15062_v8  ;;  %v1506_v12 = vmul.f32 %v12687_v38, %v15007_v52  ;;  %v3448_v11 = vld [vmem:[#allocation2 + $0x338] sm:$0x3f] }
 0x264   : > { %v4053_v54 = vadd.f32 %v3933_v16, %v3688_v34  ;;  %v5033_v4 = vadd.f32 %v14810_v28, %v4996_v19  ;;  %v1751_v60 = vmul.f32 %v15050_v41, %v1626_v44  ;;  %v3571_v15 = vmul.f32 %v12686_v17, %v15091_v36  ;;  %v1629_v28 = vld [vmem:[#allocation2 + $0x339] sm:$0x3f]  ;;  %v1992_v19 = vld [vmem:[#allocation2 + $0x32a] sm:$0xff] }
 0x265   : > { %v4417_v55 = vadd.f32 %v4297_v3, %v4052_v58  ;;  %v15146_v0 = vadd.f32 %v2479_v21, %v2233_v39  ;;  %v2116_v1 = vmul.f32 %v15056_v10, %v1991_v49  ;;  %v2478_v45 = vmul.f32 %v12687_v38, %v15062_v8  ;;  %v3086_v39 = vld [vmem:[#allocation2 + $0x33a] sm:$0x3f]  ;;  %v15183_v21 = vld [vmem:[%s17545_s1 + $0x8] ss:$0 sm:$0xff] }
 0x266   : > { %v4418_v30 = vadd.f32 %v4298_v46, %v4053_v54  ;;  %v15150_v57 = vmax.f32 %v5033_v4, 0.0  ;;  %v1871_v63 = vadd.f32 %v1751_v60, %v1506_v12  ;;  %v15153_v22 = vadd.f32 %v3571_v15, %v3325_v5  ;;  %v3813_v9 = vld [vmem:[#allocation2 + $0x339] sm:$0x3f]  ;;  %v1628_v46 = vld [vmem:[#allocation2 + $0x331] sm:$0xff] }
 0x267   : > { %4537 = vst [vmem:[#allocation3 + $0x2c8] sm:$0xff] %v4417_v55  ;;  %v2843_v59 = vmul.f32 %v15114_v6, %v1626_v44  ;;  %v3570_v33 = vmul.f32 %v12687_v38, %v15091_v36  ;;  %v3935_v24 = vmul.f32 %v15129_v35, %v1626_v44  ;;  %v2598_v47 = vadd.f32 %v2478_v45, %v15073_v42  ;;  %v4178_v18 = vld [vmem:[#allocation2 + $0x33a] sm:$0x3f]  ;;  %v12689_v12 = vld [vmem:[#allocation2 + $0x330] sm:$0xff] }
 0x268   : > { %4538 = vst [vmem:[#allocation3 + $0x2d0] sm:$0xff] %v4418_v30  ;;  %5093 = vst [vmem:[#allocation5 + $0x40] sm:$0xff] %v15150_v57  ;;  %5905 = vrot.lane.b32.xlu1 %v15150_v57, %s17522_s25  ;;  %v15161_v20 = vadd.f32 %v2116_v1, %v1871_v63  ;;  %v3208_v14 = vmul.f32 %v15078_v29, %v1991_v49  ;;  %v1509_v32 = vmul.f32 %v15007_v52, %v1384_v51  ;;  %v5302_v5 = vld [vmem:[#allocation5 + $0x39] sm:$0x1f] }
 0x269   : > { %v3690_v7 = vadd.f32 %v3570_v33, %v15094_v26  ;;  %v4300_v27 = vmul.f32 %v14796_v13, %v1991_v49  ;;  %v1754_v53 = vmul.f32 %v15050_v41, %v1629_v28  ;;  %v2481_v25 = vmul.f32 %v15062_v8, %v2356_v23 }
 0x26a   : > { %v2963_v56 = vadd.f32 %v2843_v59, %v2598_v47  ;;  %v2119_v16 = vmul.f32 %v15056_v10, %v1994_v40  ;;  %v2846_v42 = vmul.f32 %v15114_v6, %v2721_v43  ;;  %v3573_v3 = vmul.f32 %v15091_v36, %v3448_v11 }
 0x26b   : > { %v4055_v44 = vadd.f32 %v3935_v24, %v3690_v7  ;;  %v1874_v34 = vadd.f32 %v1754_v53, %v1509_v32  ;;  %v2601_v26 = vadd.f32 %v2481_v25, %v15098_v31  ;;  %v3211_v13 = vmul.f32 %v15078_v29, %v3086_v39  ;;  %v1993_v31 = vld [vmem:[#allocation2 + $0x332] sm:$0xff] }
 0x26c   : > { %v15175_v49 = vadd.f32 %v3208_v14, %v2963_v56  ;;  %6007 = vrot.lane.b32.xlu1 %v5302_v5, %s17526_s29  ;;  %v3693_v58 = vadd.f32 %v3573_v3, %v15118_v48  ;;  %v3938_v17 = vmul.f32 %v15129_v35, %v3813_v9  ;;  %v4303_v54 = vmul.f32 %v15183_v21, %v4178_v18  ;;  %v4967_v7 = vld [vmem:[#allocation4 + $0x98] sm:$0x7f] }
 0x26d   : > { %v4420_v4 = vadd.f32 %v4300_v27, %v4055_v44  ;;  %v2966_v38 = vadd.f32 %v2846_v42, %v2601_v26  ;;  %v1508_v60 = vmul.f32 %v12689_v12, %v15007_v52  ;;  %v1752_v55 = vmul.f32 %v15050_v41, %v1627_v50 }
 0x26e   : > { %v4656_v15 = vld [vmem:[#allocation3 + $0x2c0] ss:$2 sm:$0xff]  ;;  %v4776_v1 = vld [vmem:[#allocation3 + $0x2c1] ss:$2 sm:$0xff]  ;;  %v15188_v48 = vadd.f32 %v2119_v16, %v1874_v34  ;;  %v4058_v51 = vadd.f32 %v3938_v17, %v3693_v58  ;;  %v1753_v30 = vmul.f32 %v15050_v41, %v1628_v46  ;;  %v2117_v63 = vmul.f32 %v15056_v10, %v1992_v19 }
 0x26f   : > { %v4658_v45 = vld [vmem:[#allocation3 + $0x2d0] ss:$2 sm:$0x7f]  ;;  %v4778_v28 = vld [vmem:[#allocation3 + $0x2d1] ss:$2 sm:$0x7f]  ;;  %v4851_v23 = vmax.f32 %v4656_v15, %v4776_v1  ;;  %v1872_v59 = vadd.f32 %v1752_v55, %v15140_v62  ;;  %v2118_v33 = vmul.f32 %v15056_v10, %v1993_v31  ;;  %v2480_v24 = vmul.f32 %v12689_v12, %v15062_v8 }
 0x270   : > { %4540 = vst [vmem:[#allocation3 + $0x2e0] sm:$0xff] %v4420_v4  ;;  %v4852_v40 = vmax.f32 %v4658_v45, %v4778_v28  ;;  %v4423_v43 = vadd.f32 %v4303_v54, %v4058_v51  ;;  %v1873_v11 = vadd.f32 %v1753_v30, %v1508_v60  ;;  %v2844_v47 = vmul.f32 %v15114_v6, %v1627_v50  ;;  %v4936_v16 = vld [vmem:[#allocation4 + $0x88] sm:$0x7f] }
 0x271   : > { %5493 = vrot.lane.b32.xlu1 %v14966_v61, %s17520_s12  ;;  %4911 = vst [vmem:[#allocation4 + $0x160] sm:$0xff] %v4851_v23  ;;  %v15198_v14 = vadd.f32 %v3211_v13, %v2966_v38  ;;  %v2237_v32 = vadd.f32 %v2117_v63, %v1872_v59  ;;  %v2600_v39 = vadd.f32 %v2480_v24, %v15120_v37  ;;  %v1630_v34 = vld [vmem:[#allocation2 + $0x341] sm:$0xff]  ;;  %v1631_v23 = vld [vmem:[#allocation2 + $0x349] sm:$0xff] }
 0x272   : > { %v2845_v62 = vmul.f32 %v15114_v6, %v1628_v46  ;;  %4912 = vst [vmem:[#allocation4 + $0x168] sm:$0x7f] %v4852_v40  ;;  %4543 = vst [vmem:[#allocation3 + $0x2f8] sm:$0x3f] %v4423_v43  ;;  %v15202_v27 = vadd.f32 %v2118_v33, %v1873_v11  ;;  %v2964_v53 = vadd.f32 %v2844_v47, %v15146_v0  ;;  %v12690_v58 = vld [vmem:[#allocation2 + $0x348] sm:$0xff] }
 0x273   : > { %v3209_v25 = vmul.f32 %v15078_v29, %v1992_v19  ;;  %v3572_v9 = vmul.f32 %v12689_v12, %v15091_v36  ;;  %v3210_v18 = vmul.f32 %v15078_v29, %v1993_v31  ;;  %v3936_v56 = vmul.f32 %v15129_v35, %v1627_v50  ;;  %v1995_v50 = vld [vmem:[#allocation2 + $0x342] sm:$0xff]  ;;  %v1996_v43 = vld [vmem:[#allocation2 + $0x34a] sm:$0xff] }
 0x274   : > { %v2965_v61 = vadd.f32 %v2845_v62, %v2600_v39  ;;  %v3937_v37 = vmul.f32 %v15129_v35, %v1628_v46  ;;  %v4301_v44 = vmul.f32 %v15183_v21, %v1992_v19  ;;  %v4997_v5 = vmax.f32 %v4936_v16, %v4967_v7  ;;  %v15220_v46 = vld [vmem:[%s17554_s2] ss:$0 sm:$0xff] }
 0x275   : > { %v3329_v42 = vadd.f32 %v3209_v25, %v2964_v53  ;;  %v3692_v3 = vadd.f32 %v3572_v9, %v15136_v2  ;;  %v4056_v26 = vadd.f32 %v3936_v56, %v15153_v22  ;;  %v4302_v13 = vmul.f32 %v15183_v21, %v1993_v31  ;;  %v12692_v12 = vld [vmem:[#allocation2 + $0x340] sm:$0xff]  ;;  %v12694_v25 = vld [vmem:[#allocation2 + $0x350] sm:$0xff] }
 0x276   : > { %v15212_v0 = vadd.f32 %v3210_v18, %v2965_v61  ;;  %v2483_v17 = vmul.f32 %v12690_v58, %v15062_v8  ;;  %v5034_v2 = vadd.f32 %v15220_v46, %v4997_v5  ;;  %v1511_v19 = vmul.f32 %v12690_v58, %v15007_v52 }
 0x277   : > { %v4057_v54 = vadd.f32 %v3937_v37, %v3692_v3  ;;  %v3575_v4 = vmul.f32 %v12690_v58, %v15091_v36  ;;  %v4421_v38 = vadd.f32 %v4301_v44, %v4056_v26  ;;  %v1510_v31 = vmul.f32 %v12692_v12, %v15007_v52  ;;  %v15245_v37 = vpop.permute.xlu1 %5481  ;;  %v1634_v58 = vld [vmem:[#allocation2 + $0x361] sm:$0xff] }
 0x278   : > { %v2603_v22 = vadd.f32 %v2483_v17, %v2237_v32  ;;  %v1755_v60 = vmul.f32 %v15050_v41, %v1630_v34  ;;  %v5064_v15 = vmax.f32 %v5034_v2, 0.0  ;;  %v2120_v1 = vmul.f32 %v15056_v10, %v1995_v50  ;;  %v12693_v32 = vld [vmem:[#allocation2 + $0x360] sm:$0xff]  ;;  %v1635_v17 = vld [vmem:[#allocation2 + $0x369] sm:$0xff] }
 0x279   : > { %v4422_v55 = vadd.f32 %v4302_v13, %v4057_v54  ;;  %v2482_v51 = vmul.f32 %v12692_v12, %v15062_v8  ;;  %4541 = vst [vmem:[#allocation3 + $0x2e8] sm:$0xff] %v4421_v38  ;;  %v3695_v30 = vadd.f32 %v3575_v4, %v3329_v42  ;;  %v2847_v45 = vmul.f32 %v15114_v6, %v1630_v34 }
 0x27a   : > { %v1875_v63 = vadd.f32 %v1755_v60, %v1510_v31  ;;  %v3574_v28 = vmul.f32 %v12692_v12, %v15091_v36  ;;  %5094 = vst [vmem:[#allocation5 + $0x48] sm:$0x7f] %v5064_v15  ;;  %v3212_v33 = vmul.f32 %v15078_v29, %v1995_v50  ;;  %v3939_v24 = vmul.f32 %v15129_v35, %v1630_v34  ;;  %v1999_v12 = vld [vmem:[#allocation2 + $0x362] sm:$0xff] }
 0x27b   : > { %4542 = vst [vmem:[#allocation3 + $0x2f0] sm:$0xff] %v4422_v55  ;;  %v2602_v59 = vadd.f32 %v2482_v51, %v15161_v20  ;;  %v4304_v40 = vmul.f32 %v15183_v21, %v1995_v50  ;;  %v1514_v39 = vmul.f32 %v12693_v32, %v15007_v52  ;;  %v2486_v62 = vmul.f32 %v12693_v32, %v15062_v8 }
 0x27c   : > { %v2240_v11 = vadd.f32 %v2120_v1, %v1875_v63  ;;  %v3694_v47 = vadd.f32 %v3574_v28, %v15175_v49  ;;  %v3578_v53 = vmul.f32 %v12693_v32, %v15091_v36  ;;  %v15240_v20 = vmul.f32 %v12694_v25, %v15007_v52  ;;  %v12695_v28 = vld [vmem:[#allocation2 + $0x370] sm:$0xff] }
 0x27d   : > { %v2967_v7 = vadd.f32 %v2847_v45, %v2602_v59  ;;  %v1756_v9 = vmul.f32 %v15050_v41, %v1631_v23  ;;  %v2121_v56 = vmul.f32 %v15056_v10, %v1996_v43  ;;  %v2848_v49 = vmul.f32 %v15114_v6, %v1631_v23 }
 0x27e   : > { %v4059_v61 = vadd.f32 %v3939_v24, %v3694_v47  ;;  %v2606_v18 = vadd.f32 %v2486_v62, %v2240_v11  ;;  %v2484_v3 = vmul.f32 %v12694_v25, %v15062_v8  ;;  %v3576_v44 = vmul.f32 %v12694_v25, %v15091_v36  ;;  %v15271_v11 = vpop.permute.xlu1 %5381 }
 0x27f   : > { %v3332_v16 = vadd.f32 %v3212_v33, %v2967_v7  ;;  %v1876_v42 = vadd.f32 %v1756_v9, %v1511_v19  ;;  %v2968_v34 = vadd.f32 %v2848_v49, %v2603_v22  ;;  %v3213_v26 = vmul.f32 %v15078_v29, %v1996_v43  ;;  %v2000_v33 = vld [vmem:[#allocation2 + $0x36a] sm:$0xff] }
 0x280   : > { %v4424_v5 = vadd.f32 %v4304_v40, %v4059_v61  ;;  %v3940_v13 = vmul.f32 %v15129_v35, %v1631_v23  ;;  %v4660_v50 = vld [vmem:[#allocation3 + $0x2e0] ss:$2 sm:$0xff]  ;;  %v4780_v54 = vld [vmem:[#allocation3 + $0x2e1] ss:$2 sm:$0xff]  ;;  %v15252_v38 = vadd.f32 %v2484_v3, %v15202_v27  ;;  %v15255_v19 = vadd.f32 %v3576_v44, %v15212_v0  ;;  %v1392_v44 = vld [vmem:[#allocation2 + $0x378] sm:$0x3f] }
 0x281   : > { %v3698_v2 = vadd.f32 %v3578_v53, %v3332_v16  ;;  %v2241_v4 = vadd.f32 %v2121_v56, %v1876_v42  ;;  %v4853_v22 = vmax.f32 %v4660_v50, %v4780_v54  ;;  %v3333_v55 = vadd.f32 %v3213_v26, %v2968_v34  ;;  %v5303_v63 = vld [vmem:[#allocation5 + $0x41] sm:$0xff]  ;;  %v5328_v56 = vld [vmem:[#allocation5 + $0x3a] sm:$0x1f]  ;;  %v1636_v26 = vld [vmem:[#allocation2 + $0x371] sm:$0xff] }
 0x282   : > { %v4662_v31 = vld [vmem:[#allocation3 + $0x2f0] ss:$2 sm:$0x7f]  ;;  %v4782_v60 = vld [vmem:[#allocation3 + $0x2f1] ss:$2 sm:$0x7f]  ;;  %v4060_v15 = vadd.f32 %v3940_v13, %v3695_v30  ;;  %v4305_v1 = vmul.f32 %v15183_v21, %v1996_v43  ;;  %v15259_v23 = vmul.f32 %v12695_v28, %v15007_v52  ;;  %v15262_v27 = vmul.f32 %v12695_v28, %v15062_v8  ;;  %6009 = vrot.lane.b32.xlu0 %v5303_v63, %s17526_s29  ;;  %v15269_v43 = vpop.permute.xlu0 %5377 }
 0x283   : > { %4544 = vst [vmem:[#allocation3 + $0x300] sm:$0xff] %v4424_v5  ;;  %v4854_v51 = vmax.f32 %v4662_v31, %v4782_v60  ;;  %v5329_v45 = vld [vmem:[#allocation5 + $0x42] sm:$0xff]  ;;  %4913 = vst [vmem:[#allocation4 + $0x170] sm:$0xff] %v4853_v22  ;;  %v1759_v24 = vmul.f32 %v15050_v41, %v1634_v58  ;;  %v1760_v40 = vmul.f32 %v15050_v41, %v1635_v17  ;;  %v1637_v13 = vld [vmem:[#allocation2 + $0x379] sm:$0x3f]  ;;  %s17561_s29 = smov 56  }
 0x284   : > { %v12696_v0 = vld [vmem:[#allocation2 + $0x368] sm:$0xff]  ;;  %6113 = vrot.lane.b32.xlu1 %v5329_v45, %s17524_s30  ;;  %v4425_v30 = vadd.f32 %v4305_v1, %v4060_v15  ;;  %v15274_v47 = vmul.f32 %v12695_v28, %v15091_v36  ;;  %v2124_v32 = vmul.f32 %v15056_v10, %v1999_v12  ;;  %v2851_v7 = vmul.f32 %v15114_v6, %v1634_v58  ;;  %v2001_v31 = vld [vmem:[#allocation2 + $0x372] sm:$0xff] }
 0x285   : > { %v1515_v59 = vmul.f32 %v12696_v0, %v15007_v52  ;;  %4914 = vst [vmem:[#allocation4 + $0x178] sm:$0x7f] %v4854_v51  ;;  %v2487_v62 = vmul.f32 %v12696_v0, %v15062_v8  ;;  %v1879_v53 = vadd.f32 %v1759_v24, %v1514_v39  ;;  %v2125_v9 = vmul.f32 %v15056_v10, %v2000_v33  ;;  %v2002_v51 = vld [vmem:[#allocation2 + $0x37a] sm:$0x3f] }
 0x286   : > { %4545 = vst [vmem:[#allocation3 + $0x308] sm:$0xff] %v4425_v30  ;;  %v2852_v61 = vmul.f32 %v15114_v6, %v1635_v17  ;;  %v2971_v16 = vadd.f32 %v2851_v7, %v2606_v18  ;;  %v3216_v42 = vmul.f32 %v15078_v29, %v1999_v12  ;;  %v3579_v3 = vmul.f32 %v12696_v0, %v15091_v36  ;;  %v2729_v30 = vld [vmem:[#allocation2 + $0x379] sm:$0x3f] }
 0x287   : > { %v1880_v25 = vadd.f32 %v1760_v40, %v1515_v59  ;;  %v2607_v49 = vadd.f32 %v2487_v62, %v2241_v4  ;;  %6111 = vrot.lane.b32.xlu0 %v5328_v56, %s17524_s30  ;;  %v15285_v5 = vadd.f32 %v2124_v32, %v1879_v53  ;;  %v3217_v39 = vmul.f32 %v15078_v29, %v2000_v33  ;;  %v2364_v59 = vld [vmem:[#allocation2 + $0x378] sm:$0x3f]  ;;  %s17562_s30 = smov 64  }
 0x288   : > { %5701 = vrot.lane.b32.xlu1 %v5303_v63, %s17555_s13  ;;  %v3943_v34 = vmul.f32 %v15129_v35, %v1634_v58  ;;  %v3699_v54 = vadd.f32 %v3579_v3, %v3333_v55  ;;  %v3944_v4 = vmul.f32 %v15129_v35, %v1635_v17  ;;  %v15292_v60 = vadd.f32 %v3216_v42, %v2971_v16  ;;  %v15296_v63 = vpop.permute.xlu0 %5379  ;;  %v15298_v58 = vpop.permute.xlu1 %5483  ;;  %v3094_v40 = vld [vmem:[#allocation2 + $0x37a] sm:$0x3f]  ;;  %v1632_v3 = vld [vmem:[#allocation2 + $0x351] sm:$0xff] }
 0x289   : > { %v15289_v50 = vadd.f32 %v2125_v9, %v1880_v25  ;;  %v2972_v18 = vadd.f32 %v2852_v61, %v2607_v49  ;;  %v4308_v15 = vmul.f32 %v15183_v21, %v1999_v12  ;;  %v1517_v1 = vmul.f32 %v15007_v52, %v1392_v44  ;;  %v3456_v32 = vld [vmem:[#allocation2 + $0x378] sm:$0x3f]  ;;  %v5146_v25 = vld [vmem:[#allocation5 + $0x29] sm:$0x1f] }
 0x28a   : > { %v4063_v22 = vadd.f32 %v3943_v34, %v3698_v2  ;;  %v4064_v28 = vadd.f32 %v3944_v4, %v3699_v54  ;;  %v4309_v0 = vmul.f32 %v15183_v21, %v2000_v33  ;;  %v1761_v55 = vmul.f32 %v15050_v41, %v1636_v26  ;;  %v3821_v62 = vld [vmem:[#allocation2 + $0x379] sm:$0x3f] }
 0x28b   : > { %v1762_v17 = vmul.f32 %v15050_v41, %v1637_v13  ;;  %5597 = vrot.lane.b32.xlu0 %v15150_v57, %s17556_s14  ;;  %v15305_v2 = vadd.f32 %v3217_v39, %v2972_v18  ;;  %v2126_v24 = vmul.f32 %v15056_v10, %v2001_v31  ;;  %v2127_v56 = vmul.f32 %v15056_v10, %v2002_v51  ;;  %v1388_v57 = vld [vmem:[#allocation2 + $0x358] sm:$0x3f] }
 0x28c   : > { %v4428_v12 = vadd.f32 %v4308_v15, %v4063_v22  ;;  %5805 = vrot.lane.b32.xlu1 %v5329_v45, %s17557_s15  ;;  %v4429_v53 = vadd.f32 %v4309_v0, %v4064_v28  ;;  %v1881_v9 = vadd.f32 %v1761_v55, %v15259_v23  ;;  %v15312_v16 = vmul.f32 %v15062_v8, %v2364_v59  ;;  %v1633_v44 = vld [vmem:[#allocation2 + $0x359] sm:$0x3f]  ;;  %v15339_v55 = vpop.permute.xlu0 %5585 }
 0x28d   : > { %v4664_v33 = vld [vmem:[#allocation3 + $0x300] ss:$2 sm:$0xff]  ;;  %v4784_v7 = vld [vmem:[#allocation3 + $0x301] ss:$2 sm:$0xff]  ;;  %v1882_v61 = vadd.f32 %v1762_v17, %v1517_v1  ;;  %v15315_v45 = vmul.f32 %v15114_v6, %v1636_v26  ;;  %v15318_v42 = vmul.f32 %v15114_v6, %v2729_v30  ;;  %v1997_v39 = vld [vmem:[#allocation2 + $0x352] sm:$0xff]  ;;  %v15325_v13 = vmul.f32 %v15078_v29, %v2001_v31  ;;  %17559 = vst [vmem:[#allocation18_spill] sm:$0xff] %v15339_v55  ;;  %v15341_v17 = vpop.permute.xlu1 %5689 }
 0x28e   : > { %v4855_v49 = vmax.f32 %v4664_v33, %v4784_v7  ;;  %4548 = vst [vmem:[#allocation3 + $0x320] sm:$0xff] %v4428_v12  ;;  %4549 = vst [vmem:[#allocation3 + $0x328] sm:$0xff] %v4429_v53  ;;  %v15320_v23 = vadd.f32 %v2126_v24, %v1881_v9  ;;  %v15328_v18 = vmul.f32 %v15078_v29, %v3094_v40  ;;  %v1998_v54 = vld [vmem:[#allocation2 + $0x35a] sm:$0x3f] }
 0x28f   : > { %v15322_v34 = vadd.f32 %v2127_v56, %v1882_v61  ;;  %v2360_v4 = vld [vmem:[#allocation2 + $0x358] sm:$0x3f]  ;;  %5387 = vrot.lane.b32.xlu0 %v5146_v25, %s17558_s16  ;;  %v3581_v15 = vmul.f32 %v15091_v36, %v3456_v32  ;;  %v3945_v1 = vmul.f32 %v15129_v35, %v1636_v26  ;;  %v15334_v51 = vmul.f32 %v15129_v35, %v3821_v62  ;;  %v5172_v61 = vld [vmem:[#allocation5 + $0x2a] sm:$0x1f] }
 0x290   : > { %v2725_v22 = vld [vmem:[#allocation2 + $0x359] sm:$0x3f]  ;;  %4915 = vst [vmem:[#allocation4 + $0x180] sm:$0xff] %v4855_v49  ;;  %v15337_v28 = vmul.f32 %v15183_v21, %v2001_v31  ;;  %17560 = vst [vmem:[#allocation15_spill] sm:$0xff] %v15341_v17  ;;  %v1513_v59 = vmul.f32 %v15007_v52, %v1388_v57  ;;  %v1757_v30 = vmul.f32 %v15050_v41, %v1632_v3 }
 0x291   : > { %v3090_v0 = vld [vmem:[#allocation2 + $0x35a] sm:$0x3f]  ;;  %v1758_v12 = vmul.f32 %v15050_v41, %v1633_v44  ;;  %v2122_v24 = vmul.f32 %v15056_v10, %v1997_v39  ;;  %v2123_v40 = vmul.f32 %v15056_v10, %v1998_v54  ;;  %v2485_v32 = vmul.f32 %v15062_v8, %v2360_v4 }
 0x292   : > { %v3452_v26 = vld [vmem:[#allocation2 + $0x358] sm:$0x3f]  ;;  %v2849_v31 = vmul.f32 %v15114_v6, %v1632_v3  ;;  %v2850_v62 = vmul.f32 %v15114_v6, %v2725_v22  ;;  %v1877_v7 = vadd.f32 %v1757_v30, %v15240_v20  ;;  %v3214_v25 = vmul.f32 %v15078_v29, %v1997_v39 }
 0x293   : > { %v3817_v33 = vld [vmem:[#allocation2 + $0x359] sm:$0x3f]  ;;  %v1878_v53 = vadd.f32 %v1758_v12, %v1513_v59  ;;  %v3215_v9 = vmul.f32 %v15078_v29, %v3090_v0  ;;  %v2605_v57 = vadd.f32 %v2485_v32, %v15188_v48  ;;  %v3577_v44 = vmul.f32 %v15091_v36, %v3452_v26  ;;  %5491 = vrot.lane.b32.xlu0 %v5172_v61, %s17520_s12  ;;  %v4968_v26 = vld [vmem:[#allocation4 + $0xb0] sm:$0xff]  ;;  %v15363_v32 = vpop.permute.xlu0 %5485 }
 0x294   : > { %v4186_v56 = vld [vmem:[#allocation2 + $0x37a] sm:$0x3f]  ;;  %v2969_v49 = vadd.f32 %v2849_v31, %v15252_v38  ;;  %v3941_v54 = vmul.f32 %v15129_v35, %v1632_v3  ;;  %v2242_v22 = vadd.f32 %v2122_v24, %v1877_v7  ;;  %v3942_v59 = vmul.f32 %v15129_v35, %v3817_v33  ;;  %v15365_v3 = vpop.permute.xlu1 %5589 }
 0x295   : > { %v4182_v4 = vld [vmem:[#allocation2 + $0x35a] sm:$0x3f]  ;;  %v2243_v20 = vadd.f32 %v2123_v40, %v1878_v53  ;;  %v4306_v30 = vmul.f32 %v15183_v21, %v1997_v39  ;;  %v4668_v0 = vld [vmem:[#allocation3 + $0x320] ss:$2 sm:$0xff]  ;;  %v4788_v12 = vld [vmem:[#allocation3 + $0x321] ss:$2 sm:$0xff]  ;;  %v2970_v17 = vadd.f32 %v2850_v62, %v2605_v57  ;;  %v3697_v48 = vadd.f32 %v3577_v44, %v15198_v14 }
 0x296   : > { %v3334_v55 = vadd.f32 %v3214_v25, %v2969_v49  ;;  %v4061_v38 = vadd.f32 %v3941_v54, %v15255_v19  ;;  %v4857_v31 = vmax.f32 %v4668_v0, %v4788_v12  ;;  %v4311_v24 = vmul.f32 %v15183_v21, %v4186_v56  ;;  %v5148_v33 = vld [vmem:[#allocation5 + $0x39] sm:$0x1f]  ;;  %v4937_v19 = vld [vmem:[#allocation4 + $0xa0] sm:$0xff]  ;;  %v12697_v56 = vld [vmem:[#allocation2 + $0x388] sm:$0xff] }
 0x297   : > { %v15369_v40 = vadd.f32 %v15262_v27, %v2242_v22  ;;  %v4307_v39 = vmul.f32 %v15183_v21, %v4182_v4  ;;  %v3335_v62 = vadd.f32 %v3215_v9, %v2970_v17  ;;  %v4062_v14 = vadd.f32 %v3942_v59, %v3697_v48  ;;  %v1638_v25 = vld [vmem:[#allocation2 + $0x381] sm:$0xff]  ;;  %5391 = vrot.lane.b32.xlu0 %v5148_v33, %s17558_s16  ;;  %v1396_v0 = vld [vmem:[#allocation2 + $0x398] sm:$0x3f]  ;;  %v15392_v48 = vpop.permute.xlu0 %5587 }
 0x298   : > { %v3700_v7 = vadd.f32 %v15274_v47, %v3334_v55  ;;  %v4426_v53 = vadd.f32 %v4306_v30, %v4061_v38  ;;  %4917 = vst [vmem:[#allocation4 + $0x190] sm:$0xff] %v4857_v31  ;;  %v2609_v61 = vadd.f32 %v15312_v16, %v2243_v20  ;;  %v4998_v57 = vmax.f32 %v4937_v19, %v4968_v26  ;;  %v2003_v55 = vld [vmem:[#allocation2 + $0x382] sm:$0xff]  ;;  %v1641_v12 = vld [vmem:[#allocation2 + $0x399] sm:$0x3f] }
 0x299   : > { %v15376_v27 = vmul.f32 %v12697_v56, %v15007_v52  ;;  %v2491_v49 = vmul.f32 %v12697_v56, %v15062_v8  ;;  %v3701_v44 = vadd.f32 %v3581_v15, %v3335_v62  ;;  %v4427_v9 = vadd.f32 %v4307_v39, %v4062_v14  ;;  %v12698_v16 = vld [vmem:[#allocation2 + $0x380] sm:$0xff]  ;;  %v2006_v62 = vld [vmem:[#allocation2 + $0x39a] sm:$0x3f] }
 0x29a   : > { %v4065_v17 = vadd.f32 %v3945_v1, %v3700_v7  ;;  %4546 = vst [vmem:[#allocation3 + $0x310] sm:$0xff] %v4426_v53  ;;  %v3583_v47 = vmul.f32 %v12697_v56, %v15091_v36  ;;  %v5035_v54 = vadd.f32 %v15220_v46, %v4998_v57  ;;  %v1518_v22 = vmul.f32 %v12698_v16, %v15007_v52  ;;  %v2733_v7 = vld [vmem:[#allocation2 + $0x399] sm:$0x3f] }
 0x29b   : > { %v15382_v4 = vadd.f32 %v2491_v49, %v15289_v50  ;;  %v1763_v20 = vmul.f32 %v15050_v41, %v1638_v25  ;;  %v4066_v59 = vadd.f32 %v15334_v51, %v3701_v44  ;;  %4547 = vst [vmem:[#allocation3 + $0x318] sm:$0x3f] %v4427_v9  ;;  %v2490_v30 = vmul.f32 %v12698_v16, %v15062_v8  ;;  %v15394_v50 = vpop.permute.xlu1 %5691  ;;  %v3825_v9 = vld [vmem:[#allocation2 + $0x399] sm:$0x3f] }
 0x29c   : > { %v4430_v15 = vadd.f32 %v15337_v28, %v4065_v17  ;;  %v15389_v1 = vadd.f32 %v3583_v47, %v15305_v2  ;;  %v15396_v38 = vmax.f32 %v5035_v54, 0.0  ;;  %v2128_v26 = vmul.f32 %v15056_v10, %v2003_v55  ;;  %v2368_v28 = vld [vmem:[#allocation2 + $0x398] sm:$0x3f] }
 0x29d   : > { %v1883_v52 = vadd.f32 %v1763_v20, %v1518_v22  ;;  %v2855_v51 = vmul.f32 %v15114_v6, %v1638_v25  ;;  %v4431_v31 = vadd.f32 %v4311_v24, %v4066_v59  ;;  %v2610_v2 = vadd.f32 %v2490_v30, %v15285_v5  ;;  %v15412_v24 = vld [vmem:[%s17545_s1] ss:$0 sm:$0xff]  ;;  %v3460_v17 = vld [vmem:[#allocation2 + $0x398] sm:$0x3f]  ;;  %v1639_v59 = vld [vmem:[#allocation2 + $0x389] sm:$0xff] }
 0x29e   : > { %4550 = vst [vmem:[#allocation3 + $0x330] sm:$0xff] %v4430_v15  ;;  %v3582_v39 = vmul.f32 %v12698_v16, %v15091_v36  ;;  %v3947_v33 = vmul.f32 %v15129_v35, %v1638_v25  ;;  %5095 = vst [vmem:[#allocation5 + $0x50] sm:$0xff] %v15396_v38  ;;  %5909 = vrot.lane.b32.xlu1 %v15396_v38, %s17522_s25  ;;  %v3220_v53 = vmul.f32 %v15078_v29, %v2003_v55  ;;  %v3098_v25 = vld [vmem:[#allocation2 + $0x39a] sm:$0x3f]  ;;  %s12798_s25 = smov 80  }
 0x29f   : > { %v15406_v14 = vadd.f32 %v2128_v26, %v1883_v52  ;;  %v1521_v5 = vmul.f32 %v15412_v24, %v1396_v0  ;;  %v1766_v19 = vmul.f32 %v15050_v41, %v1641_v12  ;;  %4551 = vst [vmem:[#allocation3 + $0x338] sm:$0x3f] %v4431_v31  ;;  %v2975_v57 = vadd.f32 %v2855_v51, %v2610_v2  ;;  %v4190_v20 = vld [vmem:[#allocation2 + $0x39a] sm:$0x3f]  ;;  %v1640_v12 = vld [vmem:[#allocation2 + $0x391] sm:$0xff]  ;;  %v15426_v26 = vpop.permute.xlu0 %5793  ;;  %v15428_v51 = vpop.permute.xlu1 %5897 }
 0x2a0   : > { %v3702_v56 = vadd.f32 %v3582_v39, %v15292_v60  ;;  %v4312_v49 = vmul.f32 %v15183_v21, %v2003_v55  ;;  %v2493_v44 = vmul.f32 %v15062_v8, %v2368_v28  ;;  %v2131_v54 = vmul.f32 %v15056_v10, %v2006_v62  ;;  %v5199_v0 = vld [vmem:[#allocation5 + $0x38] sm:$0x1f]  ;;  %v2004_v52 = vld [vmem:[#allocation2 + $0x38a] sm:$0xff] }
 0x2a1   : > { %v1886_v47 = vadd.f32 %v1766_v19, %v1521_v5  ;;  %v2858_v16 = vmul.f32 %v15114_v6, %v2733_v7  ;;  %v2974_v22 = vadd.f32 %v15318_v42, %v2609_v61  ;;  %v15422_v15 = vadd.f32 %v3220_v53, %v2975_v57  ;;  %v12700_v5 = vld [vmem:[#allocation2 + $0x390] sm:$0xff] }
 0x2a2   : > { %v4067_v30 = vadd.f32 %v3947_v33, %v3702_v56  ;;  %v2613_v60 = vadd.f32 %v2493_v44, %v15322_v34  ;;  %v3223_v55 = vmul.f32 %v15078_v29, %v3098_v25  ;;  %v4666_v28 = vld [vmem:[#allocation3 + $0x310] ss:$2 sm:$0x7f]  ;;  %v4786_v31 = vld [vmem:[#allocation3 + $0x311] ss:$2 sm:$0x7f]  ;;  %5595 = vrot.lane.b32.xlu1 %v5199_v0, %s17556_s14  ;;  %v3585_v2 = vmul.f32 %v15091_v36, %v3460_v17 }
 0x2a3   : > { %v15431_v42 = vadd.f32 %v2131_v54, %v1886_v47  ;;  %v3339_v61 = vadd.f32 %v15328_v18, %v2974_v22  ;;  %v3950_v34 = vmul.f32 %v15129_v35, %v3825_v9  ;;  %v4856_v39 = vmax.f32 %v4666_v28, %v4786_v31  ;;  %v2005_v56 = vld [vmem:[#allocation2 + $0x392] sm:$0xff]  ;;  %v15455_v0 = vpop.permute.xlu1 %5797 }
 0x2a4   : > { %v4432_v33 = vadd.f32 %v4312_v49, %v4067_v30  ;;  %v2978_v62 = vadd.f32 %v2858_v16, %v2613_v60  ;;  %v2973_v7 = vadd.f32 %v15315_v45, %v15369_v40  ;;  %v1520_v19 = vmul.f32 %v12700_v5, %v15412_v24  ;;  %v5174_v45 = vld [vmem:[#allocation5 + $0x3a] sm:$0x1f]  ;;  %v15453_v30 = vpop.permute.xlu0 %5693 }
 0x2a5   : > { %v3705_v53 = vadd.f32 %v3585_v2, %v3339_v61  ;;  %v1764_v25 = vmul.f32 %v15050_v41, %v1639_v59  ;;  %v1765_v57 = vmul.f32 %v15050_v41, %v1640_v12  ;;  %4916 = vst [vmem:[#allocation4 + $0x188] sm:$0x7f] %v4856_v39  ;;  %v4315_v44 = vmul.f32 %v15183_v21, %v4190_v20  ;;  %v4938_v2 = vld [vmem:[#allocation4 + $0xa8] sm:$0x7f] }
 0x2a6   : > { %4552 = vst [vmem:[#allocation3 + $0x340] sm:$0xff] %v4432_v33  ;;  %v15441_v18 = vadd.f32 %v3223_v55, %v2978_v62  ;;  %v3338_v49 = vadd.f32 %v15325_v13, %v2973_v7  ;;  %v2129_v17 = vmul.f32 %v15056_v10, %v2004_v52  ;;  %v2492_v54 = vmul.f32 %v12700_v5, %v15062_v8  ;;  %v4969_v13 = vld [vmem:[#allocation4 + $0xb8] sm:$0x7f]  ;;  %v1642_v7 = vld [vmem:[#allocation2 + $0x3a1] sm:$0xff] }
 0x2a7   : > { %v4070_v40 = vadd.f32 %v3950_v34, %v3705_v53  ;;  %v1884_v9 = vadd.f32 %v1764_v25, %v15376_v27  ;;  %v1885_v47 = vadd.f32 %v1765_v57, %v1520_v19  ;;  %5495 = vrot.lane.b32.xlu1 %v5174_v45, %s17520_s12  ;;  %v2130_v41 = vmul.f32 %v15056_v10, %v2005_v56  ;;  %s17563_s12 = smov 48  }
 0x2a8   : > { %v2856_v16 = vmul.f32 %v15114_v6, %v1639_v59  ;;  %v2857_v22 = vmul.f32 %v15114_v6, %v1640_v12  ;;  %v3221_v20 = vmul.f32 %v15078_v29, %v2004_v52  ;;  %v2612_v55 = vadd.f32 %v2492_v54, %v15320_v23  ;;  %v15486_v45 = vpop.permute.xlu0 %5795 }
 0x2a9   : > { %v4435_v60 = vadd.f32 %v4315_v44, %v4070_v40  ;;  %v2249_v27 = vadd.f32 %v2129_v17, %v1884_v9  ;;  %v3222_v8 = vmul.f32 %v15078_v29, %v2005_v56  ;;  %v15459_v28 = vadd.f32 %v2130_v41, %v1885_v47  ;;  %v2007_v17 = vld [vmem:[#allocation2 + $0x3a2] sm:$0xff]  ;;  %v15488_v40 = vpop.permute.xlu1 %5899  ;;  %v1400_v41 = vld [vmem:[#allocation2 + $0x3b8] sm:$0x3f] }
 0x2aa   : > { %v2976_v10 = vadd.f32 %v2856_v16, %v15382_v4  ;;  %v3584_v31 = vmul.f32 %v12700_v5, %v15091_v36  ;;  %v3948_v61 = vmul.f32 %v15129_v35, %v1639_v59  ;;  %v2977_v34 = vadd.f32 %v2857_v22, %v2612_v55  ;;  %v12701_v5 = vld [vmem:[#allocation2 + $0x3a8] sm:$0xff]  ;;  %v1645_v16 = vld [vmem:[#allocation2 + $0x3b9] sm:$0x3f] }
 0x2ab   : > { %4555 = vst [vmem:[#allocation3 + $0x358] sm:$0x3f] %v4435_v60  ;;  %v3949_v39 = vmul.f32 %v15129_v35, %v1640_v12  ;;  %v4313_v33 = vmul.f32 %v15183_v21, %v2004_v52  ;;  %v4999_v62 = vmax.f32 %v4938_v2, %v4969_v13  ;;  %v4314_v19 = vmul.f32 %v15183_v21, %v2005_v56  ;;  %v15475_v12 = vld [vmem:[%s17545_s1 + $0x3] ss:$0 sm:$0xff]  ;;  %v2010_v55 = vld [vmem:[#allocation2 + $0x3ba] sm:$0x3f] }
 0x2ac   : > { %v3341_v23 = vadd.f32 %v3221_v20, %v2976_v10  ;;  %v3704_v53 = vadd.f32 %v3584_v31, %v3338_v49  ;;  %v4068_v29 = vadd.f32 %v3948_v61, %v15389_v1  ;;  %v15470_v59 = vmul.f32 %v12701_v5, %v15412_v24  ;;  %v12703_v1 = vld [vmem:[#allocation2 + $0x3a0] sm:$0xff]  ;;  %v2372_v10 = vld [vmem:[#allocation2 + $0x3b8] sm:$0x3f] }
 0x2ad   : > { %v5036_v4 = vadd.f32 %v15220_v46, %v4999_v62  ;;  %v2495_v52 = vmul.f32 %v15475_v12, %v12701_v5  ;;  %v3587_v25 = vmul.f32 %v12701_v5, %v15091_v36  ;;  %v1522_v56 = vmul.f32 %v12703_v1, %v15412_v24  ;;  %v15483_v46 = vld [vmem:[%s17545_s1 + $0x1] ss:$0 sm:$0xff]  ;;  %v15504_v31 = vld [vmem:[%s17545_s1 + $0x5] ss:$0 sm:$0xff]  ;;  %v15510_v2 = vld [vmem:[%s17545_s1 + $0x6] ss:$0 sm:$0xff] }
 0x2ae   : > { %v4069_v57 = vadd.f32 %v3949_v39, %v3704_v53  ;;  %v4433_v44 = vadd.f32 %v4313_v33, %v4068_v29  ;;  %v1767_v49 = vmul.f32 %v15483_v46, %v1642_v7  ;;  %v15490_v9 = vadd.f32 %v3222_v8, %v2977_v34  ;;  %v12705_v8 = vld [vmem:[%s17545_s1 + $0x2] ss:$0 sm:$0xff]  ;;  %v2737_v33 = vld [vmem:[#allocation2 + $0x3b9] sm:$0x3f] }
 0x2af   : > { %v5066_v36 = vmax.f32 %v5036_v4, 0.0  ;;  %v15492_v47 = vadd.f32 %v2495_v52, %v2249_v27  ;;  %v15494_v54 = vadd.f32 %v3587_v25, %v3341_v23  ;;  %v2494_v13 = vmul.f32 %v12703_v1, %v15475_v12  ;;  %v3464_v62 = vld [vmem:[#allocation2 + $0x3b8] sm:$0x3f] }
 0x2b0   : > { %v4434_v22 = vadd.f32 %v4314_v19, %v4069_v57  ;;  %4553 = vst [vmem:[#allocation3 + $0x348] sm:$0xff] %v4433_v44  ;;  %v1887_v20 = vadd.f32 %v1767_v49, %v1522_v56  ;;  %v2859_v60 = vmul.f32 %v15114_v6, %v1642_v7  ;;  %v2132_v27 = vmul.f32 %v12705_v8, %v2007_v17  ;;  %v3102_v4 = vld [vmem:[#allocation2 + $0x3ba] sm:$0x3f] }
 0x2b1   : > { %5096 = vst [vmem:[#allocation5 + $0x58] sm:$0x7f] %v5066_v36  ;;  %v3224_v61 = vmul.f32 %v15504_v31, %v2007_v17  ;;  %v3586_v34 = vmul.f32 %v15510_v2, %v12703_v1  ;;  %v3951_v39 = vmul.f32 %v15129_v35, %v1642_v7  ;;  %v2614_v23 = vadd.f32 %v2494_v13, %v15406_v14  ;;  %v3829_v5 = vld [vmem:[#allocation2 + $0x3b9] sm:$0x3f]  ;;  %v1644_v36 = vld [vmem:[#allocation2 + $0x3b1] sm:$0xff] }
 0x2b2   : > { %4554 = vst [vmem:[#allocation3 + $0x350] sm:$0xff] %v4434_v22  ;;  %v4316_v53 = vmul.f32 %v15183_v21, %v2007_v17  ;;  %v1525_v29 = vmul.f32 %v15412_v24, %v1400_v41  ;;  %v1770_v19 = vmul.f32 %v15483_v46, %v1645_v16  ;;  %v15518_v52 = vadd.f32 %v2132_v27, %v1887_v20  ;;  %v4194_v44 = vld [vmem:[#allocation2 + $0x3ba] sm:$0x3f]  ;;  %v1643_v17 = vld [vmem:[#allocation2 + $0x3a9] sm:$0xff]  ;;  %v15524_v41 = vpop.permute.xlu0 %6001  ;;  %v15526_v16 = vpop.permute.xlu1 %6105 }
 0x2b3   : > { %v3706_v25 = vadd.f32 %v3586_v34, %v15422_v15  ;;  %v2135_v57 = vmul.f32 %v12705_v8, %v2010_v55  ;;  %v2497_v7 = vmul.f32 %v15475_v12, %v2372_v10  ;;  %v2979_v1 = vadd.f32 %v2859_v60, %v2614_v23  ;;  %v2008_v55 = vld [vmem:[#allocation2 + $0x3aa] sm:$0xff] }
 0x2b4   : > { %v1890_v56 = vadd.f32 %v1770_v19, %v1525_v29  ;;  %v2862_v14 = vmul.f32 %v15114_v6, %v2737_v33  ;;  %v3589_v49 = vmul.f32 %v15510_v2, %v3464_v62  ;;  %v3227_v15 = vmul.f32 %v15504_v31, %v3102_v4  ;;  %v12708_v27 = vld [vmem:[#allocation2 + $0x3b0] sm:$0xff] }
 0x2b5   : > { %v4071_v22 = vadd.f32 %v3951_v39, %v3706_v25  ;;  %v2617_v20 = vadd.f32 %v2497_v7, %v15431_v42  ;;  %v3954_v13 = vmul.f32 %v15129_v35, %v3829_v5  ;;  %v15531_v60 = vadd.f32 %v3224_v61, %v2979_v1  ;;  %v2009_v33 = vld [vmem:[#allocation2 + $0x3b2] sm:$0xff] }
 0x2b6   : > { %v3709_v6 = vadd.f32 %v3589_v49, %v15441_v18  ;;  %v4319_v10 = vmul.f32 %v15183_v21, %v4194_v44  ;;  %v1524_v34 = vmul.f32 %v12708_v27, %v15412_v24  ;;  %v1768_v42 = vmul.f32 %v15483_v46, %v1643_v17 }
 0x2b7   : > { %v4672_v62 = vld [vmem:[#allocation3 + $0x340] ss:$2 sm:$0xff]  ;;  %v4792_v23 = vld [vmem:[#allocation3 + $0x341] ss:$2 sm:$0xff]  ;;  %v4436_v39 = vadd.f32 %v4316_v53, %v4071_v22  ;;  %v2982_v29 = vadd.f32 %v2862_v14, %v2617_v20  ;;  %v1769_v19 = vmul.f32 %v15483_v46, %v1644_v36  ;;  %v15542_v18 = vadd.f32 %v2135_v57, %v1890_v56  ;;  %v15556_v22 = vpop.permute.xlu0 %5901  ;;  %v15558_v20 = vpop.permute.xlu1 %5385 }
 0x2b8   : > { %v4859_v35 = vmax.f32 %v4672_v62, %v4792_v23  ;;  %v15538_v4 = vld [vmem:[#allocation5 + $0x51] sm:$0xff]  ;;  %v4074_v5 = vadd.f32 %v3954_v13, %v3709_v6  ;;  %v2133_v25 = vmul.f32 %v12705_v8, %v2008_v55  ;;  %v1888_v46 = vadd.f32 %v1768_v42, %v15470_v59  ;;  %v15553_v56 = vld [vmem:[%s17545_s1 + $0x4] ss:$0 sm:$0xff] }
 0x2b9   : > { %v15540_v61 = vld [vmem:[#allocation5 + $0x52] sm:$0xff]  ;;  %6013 = vrot.lane.b32.xlu0 %v15538_v4, %s17561_s29  ;;  %4556 = vst [vmem:[#allocation3 + $0x360] sm:$0xff] %v4436_v39  ;;  %v1889_v53 = vadd.f32 %v1769_v19, %v1524_v34  ;;  %v2134_v44 = vmul.f32 %v12705_v8, %v2009_v33  ;;  %v2496_v57 = vmul.f32 %v12708_v27, %v15475_v12  ;;  %v2738_v42 = vld [vmem:[#allocation2 + $0x3c1] sm:$0xff] }
 0x2ba   : > { %v4674_v7 = vld [vmem:[#allocation3 + $0x350] ss:$2 sm:$0x7f]  ;;  %v4794_v24 = vld [vmem:[#allocation3 + $0x351] ss:$2 sm:$0x7f]  ;;  %6117 = vrot.lane.b32.xlu1 %v15540_v61, %s17562_s30  ;;  %v4439_v14 = vadd.f32 %v4319_v10, %v4074_v5  ;;  %v2860_v49 = vmul.f32 %v15553_v56, %v1643_v17  ;;  %v15560_v13 = vadd.f32 %v3227_v15, %v2982_v29  ;;  %v2253_v59 = vadd.f32 %v2133_v25, %v1888_v46 }
 0x2bb   : > { %v4860_v1 = vmax.f32 %v4674_v7, %v4794_v24  ;;  %4919 = vst [vmem:[#allocation4 + $0x1a0] sm:$0xff] %v4859_v35  ;;  %v15562_v8 = vadd.f32 %v2134_v44, %v1889_v53  ;;  %v2861_v6 = vmul.f32 %v15553_v56, %v1644_v36  ;;  %v5225_v10 = vld [vmem:[#allocation5 + $0x39] sm:$0x1f]  ;;  %v2616_v34 = vadd.f32 %v2496_v57, %v15459_v28  ;;  %v15574_v29 = vld [vmem:[%s17545_s1 + $0x7] ss:$0 sm:$0xff]  ;;  %v12711_v7 = vld [vmem:[#allocation2 + $0x3c8] sm:$0xff] }
 0x2bc   : > { %4559 = vst [vmem:[#allocation3 + $0x378] sm:$0x3f] %v4439_v14  ;;  %v2980_v62 = vadd.f32 %v2860_v49, %v15492_v47  ;;  %v3225_v23 = vmul.f32 %v15504_v31, %v2008_v55  ;;  %v3588_v39 = vmul.f32 %v12708_v27, %v15510_v2  ;;  %v3226_v15 = vmul.f32 %v15504_v31, %v2009_v33  ;;  %v5251_v35 = vld [vmem:[#allocation5 + $0x3a] sm:$0x1f]  ;;  %v3103_v46 = vld [vmem:[#allocation2 + $0x3c2] sm:$0xff] }
 0x2bd   : > { %4920 = vst [vmem:[#allocation4 + $0x1a8] sm:$0x7f] %v4860_v1  ;;  %5699 = vrot.lane.b32.xlu0 %v5225_v10, %s17555_s13  ;;  %v3952_v19 = vmul.f32 %v15574_v29, %v1643_v17  ;;  %v3953_v28 = vmul.f32 %v15574_v29, %v1644_v36  ;;  %v4317_v47 = vmul.f32 %v15183_v21, %v2008_v55  ;;  %v12712_v17 = vld [vmem:[#allocation2 + $0x3c0] sm:$0xff]  ;;  %v2376_v1 = vld [vmem:[#allocation2 + $0x3d8] sm:$0x3f] }
 0x2be   : > { %v2981_v5 = vadd.f32 %v2861_v6, %v2616_v34  ;;  %v3345_v25 = vadd.f32 %v3225_v23, %v2980_v62  ;;  %v3708_v27 = vadd.f32 %v3588_v39, %v15490_v9  ;;  %5803 = vrot.lane.b32.xlu1 %v5251_v35, %s17557_s15  ;;  %v2499_v24 = vmul.f32 %v12711_v7, %v15475_v12  ;;  %v5201_v9 = vld [vmem:[#allocation5 + $0x48] sm:$0x1f]  ;;  %v2741_v10 = vld [vmem:[#allocation2 + $0x3d9] sm:$0x3f]  ;;  %v15589_v62 = vpop.permute.xlu0 %5383 }
 0x2bf   : > { %v4072_v53 = vadd.f32 %v3952_v19, %v15494_v54  ;;  %v4318_v44 = vmul.f32 %v15183_v21, %v2009_v33  ;;  %v2498_v36 = vmul.f32 %v12712_v17, %v15475_v12  ;;  %v2863_v55 = vmul.f32 %v15553_v56, %v2738_v42  ;;  %v3106_v34 = vld [vmem:[#allocation2 + $0x3da] sm:$0x3f]  ;;  %v15591_v54 = vpop.permute.xlu1 %6005 }
 0x2c0   : > { %v15586_v14 = vadd.f32 %v3226_v15, %v2981_v5  ;;  %v4073_v57 = vadd.f32 %v3953_v28, %v3708_v27  ;;  %v2619_v49 = vadd.f32 %v2499_v24, %v2253_v59  ;;  %v3591_v6 = vmul.f32 %v12711_v7, %v15510_v2  ;;  %v5278_v15 = vld [vmem:[#allocation5 + $0x48] sm:$0x1f]  ;;  %v3468_v19 = vld [vmem:[#allocation2 + $0x3d8] sm:$0x3f] }
 0x2c1   : > { %v4437_v21 = vadd.f32 %v4317_v47, %v4072_v53  ;;  %5599 = vrot.lane.b32.xlu0 %v5201_v9, %s17556_s14  ;;  %v2618_v33 = vadd.f32 %v2498_v36, %v15518_v52  ;;  %v3228_v23 = vmul.f32 %v15504_v31, %v3103_v46  ;;  %v3590_v39 = vmul.f32 %v12712_v17, %v15510_v2  ;;  %v3833_v59 = vld [vmem:[#allocation2 + $0x3d9] sm:$0x3f]  ;;  %v2739_v7 = vld [vmem:[#allocation2 + $0x3c9] sm:$0xff]  ;;  %v15604_v53 = vld [vmem:[%s17545_s1 + $0x8] ss:$0 sm:$0xff] }
 0x2c2   : > { %v4438_v28 = vadd.f32 %v4318_v44, %v4073_v57  ;;  %v3711_v35 = vadd.f32 %v3591_v6, %v3345_v25  ;;  %v3955_v5 = vmul.f32 %v15574_v29, %v2738_v42  ;;  %5907 = vrot.lane.b32.xlu1 %v5278_v15, %s17563_s12  ;;  %v2501_v27 = vmul.f32 %v15475_v12, %v2376_v1  ;;  %v4198_v47 = vld [vmem:[#allocation2 + $0x3da] sm:$0x3f]  ;;  %v2740_v42 = vld [vmem:[#allocation2 + $0x3d1] sm:$0xff]  ;;  %v5227_v17 = vld [vmem:[#allocation5 + $0x49] sm:$0x1f] }
 0x2c3   : > { %4557 = vst [vmem:[#allocation3 + $0x368] sm:$0xff] %v4437_v21  ;;  %v2983_v24 = vadd.f32 %v2863_v55, %v2618_v33  ;;  %v3710_v52 = vadd.f32 %v3590_v39, %v15531_v60  ;;  %v4320_v44 = vmul.f32 %v15604_v53, %v3103_v46  ;;  %v2866_v25 = vmul.f32 %v15553_v56, %v2741_v10  ;;  %v3104_v57 = vld [vmem:[#allocation2 + $0x3ca] sm:$0xff]  ;;  %v3105_v33 = vld [vmem:[#allocation2 + $0x3d2] sm:$0xff] }
 0x2c4   : > { %4558 = vst [vmem:[#allocation3 + $0x370] sm:$0xff] %v4438_v28  ;;  %v2621_v36 = vadd.f32 %v2501_v27, %v15542_v18  ;;  %v15610_v1 = vmul.f32 %v15504_v31, %v3106_v34  ;;  %v3593_v55 = vmul.f32 %v15510_v2, %v3468_v19  ;;  %v3958_v60 = vmul.f32 %v15574_v29, %v3833_v59  ;;  %v12714_v6 = vld [vmem:[#allocation2 + $0x3d0] sm:$0xff]  ;;  %v5253_v18 = vld [vmem:[#allocation5 + $0x4a] sm:$0x1f]  ;;  %v15621_v59 = vpop.permute.xlu0 %6003  ;;  %v15623_v28 = vpop.permute.xlu1 %5489 }
 0x2c5   : > { %v4075_v9 = vadd.f32 %v3955_v5, %v3710_v52  ;;  %5703 = vrot.lane.b32.xlu0 %v5227_v17, %s17555_s13  ;;  %v4323_v46 = vmul.f32 %v15604_v53, %v4198_v47  ;;  %v2500_v10 = vmul.f32 %v12714_v6, %v15475_v12  ;;  %v2864_v21 = vmul.f32 %v15553_v56, %v2739_v7 }
 0x2c6   : > { %v3348_v39 = vadd.f32 %v3228_v23, %v2983_v24  ;;  %v2986_v34 = vadd.f32 %v2866_v25, %v2621_v36  ;;  %v3713_v15 = vadd.f32 %v3593_v55, %v15560_v13  ;;  %v2865_v19 = vmul.f32 %v15553_v56, %v2740_v42  ;;  %5807 = vrot.lane.b32.xlu1 %v5253_v18, %s17557_s15  ;;  %v5149_v24 = vld [vmem:[#allocation5 + $0x41] sm:$0xff]  ;;  %v3837_v18 = vld [vmem:[#allocation2 + $0x3f9] sm:$0x3f] }
 0x2c7   : > { %v4440_v5 = vadd.f32 %v4320_v44, %v4075_v9  ;;  %v2620_v12 = vadd.f32 %v2500_v10, %v15562_v8  ;;  %v2984_v27 = vadd.f32 %v2864_v21, %v2619_v49  ;;  %v3229_v47 = vmul.f32 %v15504_v31, %v3104_v57  ;;  %v3834_v25 = vld [vmem:[#allocation2 + $0x3e1] sm:$0xff] }
 0x2c8   : > { %v4078_v52 = vadd.f32 %v3958_v60, %v3713_v15  ;;  %v3230_v23 = vmul.f32 %v15504_v31, %v3105_v33  ;;  %v3592_v13 = vmul.f32 %v12714_v6, %v15510_v2  ;;  %v3956_v56 = vmul.f32 %v15574_v29, %v2739_v7  ;;  %v4199_v8 = vld [vmem:[#allocation2 + $0x3e2] sm:$0xff]  ;;  %v3472_v60 = vld [vmem:[#allocation2 + $0x3f8] sm:$0x3f] }
 0x2c9   : > { %4560 = vst [vmem:[#allocation3 + $0x380] sm:$0xff] %v4440_v5  ;;  %v2985_v17 = vadd.f32 %v2865_v19, %v2620_v12  ;;  %v3349_v36 = vadd.f32 %v3229_v47, %v2984_v27  ;;  %v3957_v55 = vmul.f32 %v15574_v29, %v2740_v42  ;;  %v4321_v44 = vmul.f32 %v15604_v53, %v3104_v57  ;;  %v5175_v49 = vld [vmem:[#allocation5 + $0x42] sm:$0xff] }
 0x2ca   : > { %5393 = vrot.lane.b32.xlu0 %v5149_v24, %s17558_s16  ;;  %v4676_v9 = vld [vmem:[#allocation3 + $0x360] ss:$2 sm:$0xff]  ;;  %v4796_v31 = vld [vmem:[#allocation3 + $0x361] ss:$2 sm:$0xff]  ;;  %v4443_v10 = vadd.f32 %v4323_v46, %v4078_v52  ;;  %v3712_v6 = vadd.f32 %v3592_v13, %v15586_v14  ;;  %v4076_v7 = vadd.f32 %v3956_v56, %v3711_v35  ;;  %v4322_v21 = vmul.f32 %v15604_v53, %v3105_v33  ;;  %v3836_v13 = vld [vmem:[#allocation2 + $0x3f1] sm:$0xff]  ;;  %v15639_v56 = vpop.permute.xlu0 %5487 }
 0x2cb   : > { %5497 = vrot.lane.b32.xlu1 %v5175_v49, %s17564_s24  ;;  %v4678_v15 = vld [vmem:[#allocation3 + $0x370] ss:$2 sm:$0x7f]  ;;  %v4798_v42 = vld [vmem:[#allocation3 + $0x371] ss:$2 sm:$0x7f]  ;;  %v4861_v19 = vmax.f32 %v4676_v9, %v4796_v31  ;;  %v3350_v57 = vadd.f32 %v3230_v23, %v2985_v17  ;;  %v3959_v35 = vmul.f32 %v15574_v29, %v3834_v25  ;;  %v15641_v49 = vpop.permute.xlu1 %6109  ;;  %v3351_v23 = vadd.f32 %v15610_v1, %v2986_v34 }
 0x2cc   : > { %v12715_v5 = vld [vmem:[#allocation2 + $0x3e8] sm:$0xff]  ;;  %v12716_v27 = vld [vmem:[#allocation2 + $0x3e0] sm:$0xff]  ;;  %v4862_v24 = vmax.f32 %v4678_v15, %v4798_v42  ;;  %4563 = vst [vmem:[#allocation3 + $0x398] sm:$0x3f] %v4443_v10  ;;  %v4077_v46 = vadd.f32 %v3957_v55, %v3712_v6  ;;  %v4441_v14 = vadd.f32 %v4321_v44, %v4076_v7  ;;  %v3597_v31 = vmul.f32 %v15510_v2, %v3472_v60  ;;  %v4202_v55 = vld [vmem:[#allocation2 + $0x3fa] sm:$0x3f] }
 0x2cd   : > { %v3595_v12 = vmul.f32 %v12715_v5, %v15510_v2  ;;  %v3594_v47 = vmul.f32 %v12716_v27, %v15510_v2  ;;  %v5304_v33 = vld [vmem:[#allocation5 + $0x49] sm:$0x1f]  ;;  %4921 = vst [vmem:[#allocation4 + $0x1b0] sm:$0xff] %v4861_v19  ;;  %v4324_v6 = vmul.f32 %v15604_v53, %v4199_v8  ;;  %v3962_v7 = vmul.f32 %v15574_v29, %v3837_v18  ;;  %v12717_v15 = vld [vmem:[#allocation2 + $0x3f0] sm:$0xff]  ;;  %v5280_v5 = vld [vmem:[#allocation5 + $0x58] sm:$0x1f] }
 0x2ce   : > { %v3835_v52 = vld [vmem:[#allocation2 + $0x3e9] sm:$0xff]  ;;  %6011 = vrot.lane.b32.xlu0 %v5304_v33, %s17561_s29  ;;  %4922 = vst [vmem:[#allocation4 + $0x1b8] sm:$0x7f] %v4862_v24  ;;  %v4442_v25 = vadd.f32 %v4322_v21, %v4077_v46  ;;  %4561 = vst [vmem:[#allocation3 + $0x388] sm:$0xff] %v4441_v14  ;;  %v3596_v42 = vmul.f32 %v12717_v15, %v15510_v2  ;;  %v4201_v60 = vld [vmem:[#allocation2 + $0x3f2] sm:$0xff]  ;;  %v4327_v21 = vmul.f32 %v15604_v53, %v4202_v55  ;;  %v15660_v33 = vpop.permute.xlu0 %6107 }
 0x2cf   : > { %v3715_v17 = vadd.f32 %v3595_v12, %v3349_v36  ;;  %v3714_v9 = vadd.f32 %v3594_v47, %v3348_v39  ;;  %v4200_v44 = vld [vmem:[#allocation2 + $0x3ea] sm:$0xff]  ;;  %v3717_v39 = vadd.f32 %v3597_v31, %v3351_v23  ;;  %v3960_v34 = vmul.f32 %v15574_v29, %v3835_v52  ;;  %v5115_v18 = vld [vmem:[#allocation5] sm:$0xff]  ;;  %v15662_v52 = vpop.permute.xlu1 %5593 }
 0x2d0   : > { %v5330_v10 = vld [vmem:[#allocation5 + $0x4a] sm:$0x1f]  ;;  %v3961_v36 = vmul.f32 %v15574_v29, %v3836_v13  ;;  %4562 = vst [vmem:[#allocation3 + $0x390] sm:$0xff] %v4442_v25  ;;  %v3716_v19 = vadd.f32 %v3596_v42, %v3350_v57  ;;  %v4325_v8 = vmul.f32 %v15604_v53, %v4200_v44  ;;  %v6184_v47 = vsel %vm6183_vm0, %v5115_v18, %v15269_v43  ;;  %v5117_v57 = vld [vmem:[#allocation5 + $0x10] sm:$0xff]  ;;  %v4939_v55 = vld [vmem:[#allocation4 + $0xc0] sm:$0xff] }
 0x2d1   : > { %6115 = vrot.lane.b32.xlu1 %v5330_v10, %s17562_s30  ;;  %v4079_v1 = vadd.f32 %v3959_v35, %v3714_v9  ;;  %v4082_v2 = vadd.f32 %v3962_v7, %v3717_v39  ;;  %v4080_v27 = vadd.f32 %v3960_v34, %v3715_v17  ;;  %v4326_v29 = vmul.f32 %v15604_v53, %v4201_v60  ;;  %v5116_v46 = vld [vmem:[#allocation5 + $0x8] sm:$0x1f]  ;;  %v4970_v14 = vld [vmem:[#allocation4 + $0xd0] sm:$0xff]  ;;  %v4971_v44 = vld [vmem:[#allocation4 + $0xd8] sm:$0x7f] }
 0x2d2   : > { %5911 = vrot.lane.b32.xlu0 %v5280_v5, %s17563_s12  ;;  %v4081_v24 = vadd.f32 %v3961_v36, %v3716_v19  ;;  %v6429_v35 = vlaneseq  ;;  %v6186_v43 = vsel %vm6183_vm0, %v5117_v57, %v15271_v11  ;;  %v6185_v53 = vsel %vm6183_vm0, %v5116_v46, %v15296_v63  ;;  %v5176_v11 = vld [vmem:[#allocation5 + $0x4a] sm:$0x1f]  ;;  %v5306_v5 = vld [vmem:[#allocation5 + $0x59] sm:$0x1f] }
 0x2d3   : > { %v4444_v12 = vadd.f32 %v4324_v6, %v4079_v1  ;;  %v4447_v13 = vadd.f32 %v4327_v21, %v4082_v2  ;;  %v4445_v23 = vadd.f32 %v4325_v8, %v4080_v27  ;;  %v6212_v9 = vsel %vm6210_vm1, %v6185_v53, %v15298_v58  ;;  %v17565_v6 = vld [vmem:[#allocation18_spill] sm:$0xff]  ;;  %v17566_v42 = vld [vmem:[#allocation15_spill] sm:$0xff]  ;;  %v15698_v2 = vpop.permute.xlu1 %5697  ;;  %v5332_v27 = vld [vmem:[#allocation5 + $0x5a] sm:$0x1f] }
 0x2d4   : > { %v4446_v17 = vadd.f32 %v4326_v29, %v4081_v24  ;;  %v6211_v31 = vsel %vm6210_vm1, %v6184_v47, %v15245_v37  ;;  %v6213_v7 = vsel %vm6210_vm1, %v6186_v43, %v15363_v32  ;;  %v6239_v58 = vsel %vm6237_vm2, %v6212_v9, %v15392_v48  ;;  %v4940_v39 = vld [vmem:[#allocation4 + $0xc8] sm:$0x7f]  ;;  %v15687_v32 = vld [vmem:[%s17554_s2] ss:$0 sm:$0xff]  ;;  %s17532_s2 = smov 112  }
 0x2d5   : > { %5601 = vrot.lane.b32.xlu1 %v15396_v38, %s17556_s14  ;;  %4564 = vst [vmem:[#allocation3 + $0x3a0] sm:$0xff] %v4444_v12  ;;  %v5150_v38 = vld [vmem:[#allocation5 + $0x49] sm:$0x1f]  ;;  %4567 = vst [vmem:[#allocation3 + $0x3b8] sm:$0x3f] %v4447_v13  ;;  %v6238_v63 = vsel %vm6237_vm2, %v6211_v31, %v17565_v6  ;;  %v5000_v37 = vmax.f32 %v4939_v55, %v4970_v14  ;;  %v6240_v60 = vsel %vm6237_vm2, %v6213_v7, %v15365_v3  ;;  %v15696_v12 = vpop.permute.xlu0 %5591 }
 0x2d6   : > { %v4680_v10 = vld [vmem:[#allocation3 + $0x380] ss:$2 sm:$0xff]  ;;  %v4800_v25 = vld [vmem:[#allocation3 + $0x381] ss:$2 sm:$0xff]  ;;  %4565 = vst [vmem:[#allocation3 + $0x3a8] sm:$0xff] %v4445_v23  ;;  %5395 = vrot.lane.b32.xlu0 %v5150_v38, %s17558_s16  ;;  %4566 = vst [vmem:[#allocation3 + $0x3b0] sm:$0xff] %v4446_v17  ;;  %v6265_v1 = vsel %vm6264_vm3, %v6238_v63, %v17566_v42  ;;  %v6266_v21 = vsel %vm6264_vm3, %v6239_v58, %v15394_v50  ;;  %v5001_v19 = vmax.f32 %v4940_v39, %v4971_v44 }
 0x2d7   : > { %v4863_v15 = vmax.f32 %v4680_v10, %v4800_v25  ;;  %v4682_v34 = vld [vmem:[#allocation3 + $0x390] ss:$2 sm:$0x7f]  ;;  %v4802_v36 = vld [vmem:[#allocation3 + $0x391] ss:$2 sm:$0x7f]  ;;  %v5037_v48 = vadd.f32 %v15687_v32, %v5000_v37  ;;  %v6292_v18 = vsel %vm6291_vm4, %v6265_v1, %v15426_v26  ;;  %v6267_v3 = vsel %vm6264_vm3, %v6240_v60, %v15453_v30 }
 0x2d8   : > { %v4864_v8 = vmax.f32 %v4682_v34, %v4802_v36  ;;  %v6319_v50 = vsel %vm6318_vm5, %v6292_v18, %v15428_v51  ;;  %v5038_v24 = vadd.f32 %v15687_v32, %v5001_v19  ;;  %v6294_v26 = vsel %vm6291_vm4, %v6267_v3, %v15455_v0  ;;  %v4630_v0 = vld [vmem:[#allocation3 + $0x1f0] ss:$2 sm:$0x7f]  ;;  %v4750_v23 = vld [vmem:[#allocation3 + $0x1f1] ss:$2 sm:$0x7f] }
 0x2d9   : > { %5499 = vrot.lane.b32.xlu1 %v5176_v11, %s17564_s24  ;;  %4923 = vst [vmem:[#allocation4 + $0x1c0] sm:$0xff] %v4863_v15  ;;  %v15701_v47 = vmax.f32 %v5037_v48, 0.0  ;;  %v6293_v30 = vsel %vm6291_vm4, %v6266_v21, %v15486_v45  ;;  %v6346_v29 = vsel %vm6345_vm6, %v6319_v50, %v15524_v41  ;;  %v12795_v46 = vmov 1966171168   ;;  %v12535_v38 = vld [vmem:[%s17567_s3] sm:$0xff]   ;;  %v15735_v25 = vpop.permute.xlu0 %5695  ;;  %v15737_v11 = vpop.permute.xlu1 %5801 }
 0x2da   : > { %6015 = vrot.lane.b32.xlu0 %v5306_v5, %s17561_s29  ;;  %4924 = vst [vmem:[#allocation4 + $0x1c8] sm:$0x7f] %v4864_v8  ;;  %v5068_v57 = vmax.f32 %v5038_v24, 0.0  ;;  %v6427_v51 = vunpack.c.l.s4 %v12795_v46  ;;  %v6430_v14 = vshrl.u32 %v6429_v35, 7  ;;  %v6373_v13 = vsel %vm6372_vm7, %v6346_v29, %v15526_v16  ;;  %v5203_v63 = vld [vmem:[#allocation5 + $0x58] sm:$0x1f] }
 0x2db   : > { %5097 = vst [vmem:[#allocation5 + $0x60] sm:$0xff] %v15701_v47  ;;  %v6320_v45 = vsel %vm6318_vm5, %v6293_v30, %v15488_v40  ;;  %v6425_v17 = vcombine.high %v6373_v13, %v6373_v13  ;;  %v6321_v41 = vsel %vm6318_vm5, %v6294_v26, %v15556_v22  ;;  %v5119_v42 = vld [vmem:[#allocation5 + $0x20] sm:$0xff]  ;;  %v5118_v36 = vld [vmem:[#allocation5 + $0x18] sm:$0x1f]  ;;  %v12537_v24 = vld [vmem:[%s17567_s3 + $0x10] sm:$0xff]  }
 0x2dc   : > { %5098 = vst [vmem:[#allocation5 + $0x68] sm:$0x7f] %v5068_v57  ;;  %v6428_v16 = vunpack.c.0.s8 %v6427_v51  ;;  %v6348_v55 = vsel %vm6345_vm6, %v6321_v41, %v15591_v54  ;;  %v6347_v40 = vsel %vm6345_vm6, %v6320_v45, %v15621_v59  ;;  %v12796_v54 = vmov 0.0   ;;  %v4972_v59 = vld [vmem:[#allocation4 + $0xf0] sm:$0xff]  ;;  %v4941_v39 = vld [vmem:[#allocation4 + $0xe0] sm:$0xff] }
 0x2dd   : > { %6119 = vrot.lane.b32.xlu1 %v5332_v27, %s17562_s30  ;;  %v4684_v43 = vld [vmem:[#allocation3 + $0x3a0] ss:$2 sm:$0xff]  ;;  %v4804_v53 = vld [vmem:[#allocation3 + $0x3a1] ss:$2 sm:$0xff]  ;;  %v6375_v22 = vsel %vm6372_vm7, %v6348_v55, %v15641_v49  ;;  %v6374_v10 = vsel %vm6372_vm7, %v6347_v40, %v15660_v33  ;;  %12303 = vmatprep.subr.bf16.mxu0 %v12796_v54  ;;  %v4838_v33 = vmax.f32 %v4630_v0, %v4750_v23  ;;  %v5229_v18 = vld [vmem:[#allocation5 + $0x59] sm:$0x1f]  ;;  %v15767_v26 = vpop.permute.xlu0 %5799 }
 0x2de   : > { %v4686_v9 = vld [vmem:[#allocation3 + $0x3b0] ss:$2 sm:$0x7f]  ;;  %v4806_v35 = vld [vmem:[#allocation3 + $0x3b1] ss:$2 sm:$0x7f]  ;;  %v4865_v31 = vmax.f32 %v4684_v43, %v4804_v53  ;;  %5705 = vrot.lane.b32.xlu0 %v15538_v4, %s17555_s13  ;;  %v15739_v6 = vsub.s32 %v6428_v16, %v6430_v14  ;;  %v6513_v7 = vcombine.high %v6375_v22, %v6375_v22  ;;  %v6474_v58 = vcombine.high %v6374_v10, %v6374_v10 }
 0x2df   : > { %v4866_v44 = vmax.f32 %v4686_v9, %v4806_v35  ;;  %12304 = vmatpush3.bf16.msra.mxu0 %v12535_v38  ;;  %v12536_v49 = vld [vmem:[%s17567_s3 + $0x8] sm:$0xff]   ;;  %v6188_v34 = vsel %vm6183_vm0, %v5119_v42, %v15558_v20  ;;  %v5002_v48 = vmax.f32 %v4941_v39, %v4972_v59  ;;  %4898 = vst [vmem:[#allocation4 + $0xf8] sm:$0x7f] %v4838_v33  ;;  %v12538_v9 = vld [vmem:[%s17567_s3 + $0x18] sm:$0xff]   ;;  %v12539_v35 = vld [vmem:[%s17567_s3 + $0x20] ss:$0 sps:$4 sm:$0xff]  }
 0x2e0   : > { %4925 = vst [vmem:[#allocation4 + $0x1d0] sm:$0xff] %v4865_v31  ;;  %v6432_v37 = vrot.slane %v6373_v13, %v15739_v6  ;;  %v6439_v15 = vrot.slane %v6425_v17, %v15739_v6  ;;  %v6520_v1 = vrot.slane %v6375_v22, %v15739_v6  ;;  %v6481_v60 = vrot.slane %v6374_v10, %v15739_v6 }
 0x2e1   : > { %5809 = vrot.lane.b32.xlu1 %v15540_v61, %s17557_s15  ;;  %4926 = vst [vmem:[#allocation4 + $0x1d8] sm:$0x7f] %v4866_v44  ;;  %12305 = vmatprep.subr.bf16.mxu0 %v12796_v54  ;;  %v6187_v8 = vsel %vm6183_vm0, %v5118_v36, %v15589_v62  ;;  %v6215_v5 = vsel %vm6210_vm1, %v6188_v34, %v15623_v28  ;;  %v15769_v62 = vpop.permute.xlu1 %5905  ;;  %v5255_v28 = vld [vmem:[#allocation5 + $0x5a] sm:$0x1f]  ;;  %v5904_v59 = vpop.permute.xlu0 %5903  ;;  %v8717_v39 = vsel %vm8715_vm8, %v12539_v35, 0 }
 0x2e2   : > { %5603 = vrot.lane.b32.xlu0 %v5203_v63, %s17556_s14  ;;  %v6440_v21 = vcombine.high %v6432_v37, %v6432_v37  ;;  %v6441_v19 = vcombine.high %v6439_v15, %v6439_v15  ;;  %v15760_v3 = vrot.slane %v6513_v7, %v15739_v6  ;;  %v6528_v20 = vcombine.high %v6520_v1, %v6520_v1  ;;  %v4979_v35 = vld [vmem:[#allocation4 + $0x158] sm:$0x7f] }
 0x2e3   : > { %v6536_v27 = vrot.slane %v6520_v1, %v15739_v6  ;;  %v6488_v50 = vrot.slane %v6474_v58, %v15739_v6  ;;  %12306 = vmatpush3.bf16.msra.mxu0 %v12536_v49  ;;  %v6448_v30 = vrot.slane %v6432_v37, %v15739_v6  ;;  %v6455_v29 = vrot.slane %v6439_v15, %v15739_v6  ;;  %v15816_v33 = vld [vmem:[#allocation5 + $0x61] sm:$0xff] }
 0x2e4   : > { %v6462_v57 = vrot.slane %v6440_v21, %v15739_v6  ;;  %v6469_v46 = vrot.slane %v6441_v19, %v15739_v6  ;;  %v15778_v51 = vrot.slane %v6528_v20, %v15739_v6  ;;  %v6489_v13 = vcombine.high %v6481_v60, %v6481_v60  ;;  %12307 = vmatprep.subr.bf16.mxu0 %v12796_v54  ;;  %v4942_v1 = vld [vmem:[#allocation4 + $0xe8] sm:$0x7f] }
 0x2e5   : > { %5913 = vrot.lane.b32.xlu1 %v15701_v47, %s17563_s12  ;;  %v6558_v14 = vcombine.high %v6536_v27, %v6536_v27  ;;  %v5039_v0 = vadd.f32 %v15687_v32, %v5002_v48  ;;  %v6214_v17 = vsel %vm6210_vm1, %v6187_v8, %v15639_v56  ;;  %v6503_v38 = vrot.slane %v6488_v50, %v15739_v6  ;;  %v15808_v63 = vpop.permute.xlu1 %6007  ;;  %v15823_v34 = vld [vmem:[#allocation5 + $0x62] sm:$0xff]  ;;  %v4975_v50 = vld [vmem:[#allocation4 + $0x118] sm:$0x7f] }
 0x2e6   : > { %5707 = vrot.lane.b32.xlu0 %v5229_v18, %s17555_s13  ;;  %v7569_v23 = vcombine.low %v6448_v30, %v6462_v57  ;;  %v12104_v43 = vcombine.high %v6448_v30, %v6462_v57  ;;  %v7571_v53 = vcombine.low %v6455_v29, %v6469_v46  ;;  %v12105_v45 = vcombine.high %v6455_v29, %v6469_v46  ;;  %v4973_v10 = vld [vmem:[#allocation4 + $0xf8] sm:$0x7f]  ;;  %v15846_v57 = vpop.permute.xlu0 %5389 }
 0x2e7   : > { %v7621_v41 = vcombine.low %v15778_v51, %v6558_v14  ;;  %12308 = vmatpush3.bf16.msra.mxu0 %v12537_v24  ;;  %v6529_v40 = vcombine.high %v15760_v3, %v15760_v3  ;;  %v15804_v44 = vrot.slane %v15760_v3, %v15739_v6  ;;  %v6510_v22 = vrot.slane %v6489_v13, %v15739_v6  ;;  %v5282_v24 = vld [vmem:[#allocation5 + $0x68] sm:$0x1f] }
 0x2e8   : > { %v7579_v31 = vrot.slane %v7569_v23, %v15739_v6  ;;  %v7586_v56 = vrot.slane %v12104_v43, %v15739_v6  ;;  %v7593_v16 = vrot.slane %v7571_v53, %v15739_v6  ;;  %v7600_v55 = vrot.slane %v12105_v45, %v15739_v6  ;;  %12309 = vmatprep.subr.bf16.mxu0 %v12796_v54  ;;  %v4944_v23 = vld [vmem:[#allocation4 + $0x108] sm:$0x7f]  ;;  %v4977_v43 = vld [vmem:[#allocation4 + $0x138] sm:$0x7f] }
 0x2e9   : > { %5811 = vrot.lane.b32.xlu1 %v5255_v28, %s17557_s15  ;;  %v7649_v7 = vrot.slane %v7621_v41, %v15739_v6  ;;  %v7620_v58 = vcombine.low %v6503_v38, %v6536_v27  ;;  %v15811_v49 = vmax.f32 %v5039_v0, 0.0  ;;  %v6241_v42 = vsel %vm6237_vm2, %v6214_v17, %v15696_v12  ;;  %v4974_v27 = vld [vmem:[#allocation4 + $0x110] sm:$0xff]  ;;  %v15848_v46 = vpop.permute.xlu1 %5493  ;;  %12313 = vmatprep.mubr.msk.bf16.mxu0 %vm12797_vm9, %v12796_v54  ;;  %v4945_v38 = vld [vmem:[#allocation4 + $0x120] sm:$0xff] }
 0x2ea   : > { %5397 = vrot.lane.b32.xlu0 %v15538_v4, %s17558_s16  ;;  %v6496_v4 = vrot.slane %v6481_v60, %v15739_v6  ;;  %v7601_v36 = vcombine.low %v7579_v31, %v7586_v56  ;;  %v5003_v48 = vmax.f32 %v4942_v1, %v4973_v10  ;;  %v15830_v12 = vrot.slane %v6529_v40, %v15739_v6  ;;  %v4946_v40 = vld [vmem:[#allocation4 + $0x128] sm:$0x7f] }
 0x2eb   : > { %12310 = vmatpush3.bf16.msra.mxu0 %v12538_v9  ;;  %v7642_v60 = vrot.slane %v7620_v58, %v15739_v6  ;;  %5099 = vst [vmem:[#allocation5 + $0x70] sm:$0xff] %v15811_v49  ;;  %v6559_v21 = vcombine.high %v15804_v44, %v15804_v44  ;;  %v6268_v30 = vsel %vm6264_vm3, %v6241_v42, %v15735_v25  ;;  %v4978_v9 = vld [vmem:[#allocation4 + $0x150] sm:$0xff]  ;;  %v4948_v58 = vld [vmem:[#allocation4 + $0x148] sm:$0x7f]  ;;  %v4981_v42 = vld [vmem:[#allocation4 + $0x178] sm:$0x7f] }
 0x2ec   : > { %v7618_v37 = vcombine.low %v6496_v4, %v6510_v22  ;;  %v12106_v15 = vcombine.high %v6496_v4, %v6510_v22  ;;  %v5040_v20 = vadd.f32 %v15687_v32, %v5003_v48  ;;  %12311 = vmatprep.subr.bf16.mxu0 %v12796_v54  ;;  %v7609_v13 = vrot.slane %v7601_v36, %v15739_v6 }
 0x2ed   : > { %5501 = vrot.lane.b32.xlu1 %v15540_v61, %s17564_s24  ;;  %v6242_v61 = vsel %vm6237_vm2, %v6215_v5, %v15662_v52  ;;  %v7602_v52 = vcombine.low %v7593_v16, %v7600_v55  ;;  %v6560_v5 = vcombine.high %v15778_v51, %v15778_v51  ;;  %v7651_v18 = vcombine.low %v7642_v60, %v7649_v7  ;;  %v4947_v7 = vld [vmem:[#allocation4 + $0x140] sm:$0xff]  ;;  %v4984_v51 = vld [vmem:[#allocation4 + $0x1b0] sm:$0xff] }
 0x2ee   : > { %6017 = vrot.lane.b32.xlu0 %v15816_v33, %s17561_s29  ;;  %v7628_v19 = vrot.slane %v7618_v37, %v15739_v6  ;;  %v7635_v8 = vrot.slane %v12106_v15, %v15739_v6  ;;  %v6269_v3 = vsel %vm6264_vm3, %v6242_v61, %v15698_v2  ;;  %v4976_v2 = vld [vmem:[#allocation4 + $0x130] sm:$0xff]  ;;  %v5070_v14 = vmax.f32 %v5040_v20, 0.0  ;;  %v5178_v61 = vld [vmem:[#allocation5 + $0x5a] sm:$0x1f] }
 0x2ef   : > { %v6296_v29 = vsel %vm6291_vm4, %v6269_v3, %v15737_v11  ;;  %12312 = vmatpush3.bf16.msra.mxu0 %v8717_v39  ;;  %v7616_v25 = vrot.slane %v7602_v52, %v15739_v6  ;;  %v7665_v0 = vrot.slane %v7651_v18, %v15739_v6  ;;  %v4943_v11 = vld [vmem:[#allocation4 + $0x100] sm:$0xff]  ;;  %v6295_v53 = vsel %vm6291_vm4, %v6268_v30, %v15767_v26  ;;  %v4980_v15 = vld [vmem:[#allocation4 + $0x170] sm:$0xff] }
 0x2f0   : > { %v7650_v28 = vcombine.low %v7628_v19, %v7635_v8  ;;  %v5004_v17 = vmax.f32 %v4943_v11, %v4974_v27  ;;  %v5005_v41 = vmax.f32 %v4944_v23, %v4975_v50  ;;  %5100 = vst [vmem:[#allocation5 + $0x78] sm:$0x7f] %v5070_v14  ;;  %v6323_v31 = vsel %vm6318_vm5, %v6296_v29, %v15769_v62  ;;  %v4949_v19 = vld [vmem:[#allocation4 + $0x160] sm:$0xff]  ;;  %v4670_v8 = vld [vmem:[#allocation3 + $0x330] ss:$2 sm:$0x7f] }
 0x2f1   : > { %6121 = vrot.lane.b32.xlu1 %v15823_v34, %s17562_s30  ;;  %v6322_v56 = vsel %vm6318_vm5, %v6295_v53, %v5904_v59  ;;  %v7617_v16 = vcombine.low %v7609_v13, %v7616_v25  ;;  %v5006_v55 = vmax.f32 %v4945_v38, %v4976_v2  ;;  %12369 = vmatprep.subr.bf16.mxu0 %v12796_v54  ;;  %v4950_v50 = vld [vmem:[#allocation4 + $0x168] sm:$0x7f] }
 0x2f2   : > { %5915 = vrot.lane.b32.xlu0 %v5282_v24, %s17563_s12  ;;  %v7658_v45 = vrot.slane %v7650_v28, %v15739_v6  ;;  %v5041_v4 = vadd.f32 %v15687_v32, %v5004_v17  ;;  %v5042_v22 = vadd.f32 %v15687_v32, %v5005_v41  ;;  %v5007_v10 = vmax.f32 %v4946_v40, %v4977_v43  ;;  %v4790_v24 = vld [vmem:[#allocation3 + $0x331] ss:$2 sm:$0x7f]  ;;  %v5308_v28 = vld [vmem:[#allocation5 + $0x69] sm:$0x1f] }
 0x2f3   : > { %v5043_v62 = vadd.f32 %v15687_v32, %v5006_v55  ;;  %v5008_v59 = vmax.f32 %v4947_v7, %v4978_v9  ;;  %v5009_v37 = vmax.f32 %v4948_v58, %v4979_v35  ;;  %v5010_v2 = vmax.f32 %v4949_v19, %v4980_v15  ;;  %v5334_v13 = vld [vmem:[#allocation5 + $0x6a] sm:$0x1f]  ;;  %v4982_v55 = vld [vmem:[#allocation4 + $0x190] sm:$0xff]  ;;  %v4951_v7 = vld [vmem:[#allocation4 + $0x180] sm:$0xff] }
 0x2f4   : > { %v7666_v26 = vcombine.low %v7658_v45, %v7665_v0  ;;  %v15870_v39 = vmax.f32 %v5041_v4, 0.0  ;;  %v6010_v36 = vpop.permute.xlu0 %6009  ;;  %v5072_v52 = vmax.f32 %v5042_v22, 0.0  ;;  %v5044_v48 = vadd.f32 %v15687_v32, %v5007_v10  ;;  %v5205_v40 = vld [vmem:[#allocation5 + $0x68] sm:$0x1f] }
 0x2f5   : > { %5605 = vrot.lane.b32.xlu1 %v15701_v47, %s17556_s14  ;;  %v5152_v47 = vld [vmem:[#allocation5 + $0x59] sm:$0x1f]  ;;  %v6350_v18 = vsel %vm6345_vm6, %v6323_v31, %v6010_v36  ;;  %v15874_v3 = vmax.f32 %v5043_v62, 0.0  ;;  %v5045_v20 = vadd.f32 %v15687_v32, %v5008_v59  ;;  %v5046_v27 = vadd.f32 %v15687_v32, %v5009_v37  ;;  %v4953_v37 = vld [vmem:[#allocation4 + $0x1a0] sm:$0xff] }
 0x2f6   : > { %5399 = vrot.lane.b32.xlu0 %v5152_v47, %s17558_s16  ;;  %v8634_v1 = vpack.c.bf16 %v7666_v26, %v7617_v16  ;;  %v6114_v60 = vpop.permute.xlu1 %6113  ;;  %5101 = vst [vmem:[#allocation5 + $0x80] sm:$0xff] %v15870_v39  ;;  %5102 = vst [vmem:[#allocation5 + $0x88] sm:$0x7f] %v5072_v52  ;;  %v5074_v29 = vmax.f32 %v5044_v48, 0.0  ;;  %v5011_v14 = vmax.f32 %v4950_v50, %v4981_v42  ;;  %v4986_v50 = vld [vmem:[#allocation4 + $0x1d0] sm:$0xff] }
 0x2f7   : > { %v6377_v30 = vsel %vm6372_vm7, %v6350_v18, %v6114_v60  ;;  %5103 = vst [vmem:[#allocation5 + $0x90] sm:$0xff] %v15874_v3  ;;  %v15886_v11 = vmax.f32 %v5045_v20, 0.0  ;;  %v5076_v23 = vmax.f32 %v5046_v27, 0.0  ;;  %v6349_v43 = vsel %vm6345_vm6, %v6322_v56, %v15808_v63 }
 0x2f8   : > { %12314 = vmatmul.mubr.msk.bf16.vlgmr.msra.gmra.mrb[0].mxu0 %vm8681_vm10, %v8634_v1  ;;  %v6601_v25 = vcombine.high %v6377_v30, %v6377_v30  ;;  %v6608_v0 = vrot.slane %v6377_v30, %v15739_v6  ;;  %5104 = vst [vmem:[#allocation5 + $0x98] sm:$0x7f] %v5074_v29  ;;  %v5047_v45 = vadd.f32 %v15687_v32, %v5010_v2 }
 0x2f9   : > { %5503 = vrot.lane.b32.xlu1 %v5178_v61, %s17564_s24  ;;  %12317 = vmatprep.mubr.msk.bf16.mxu0 %vm12797_vm9, %v12796_v54  ;;  %v6112_v53 = vpop.permute.xlu0 %6111  ;;  %v5048_v17 = vadd.f32 %v15687_v32, %v5011_v14  ;;  %v4858_v41 = vmax.f32 %v4670_v8, %v4790_v24  ;;  %v15897_v38 = vcombine.low %v15830_v12, %v6559_v21  ;;  %v4985_v8 = vld [vmem:[#allocation4 + $0x1b8] sm:$0x7f]  ;;  %v4954_v14 = vld [vmem:[#allocation4 + $0x1a8] sm:$0x7f] }
 0x2fa   : > { %6019 = vrot.lane.b32.xlu0 %v5308_v28, %s17561_s29  ;;  %v6615_v9 = vrot.slane %v6601_v25, %v15739_v6  ;;  %v6616_v35 = vcombine.high %v6608_v0, %v6608_v0  ;;  %v6376_v31 = vsel %vm6372_vm7, %v6349_v43, %v6112_v53  ;;  %5105 = vst [vmem:[#allocation5 + $0xa0] sm:$0xff] %v15886_v11  ;;  %5106 = vst [vmem:[#allocation5 + $0xa8] sm:$0x7f] %v5076_v23  ;;  %v4987_v24 = vld [vmem:[#allocation4 + $0x1d8] sm:$0x7f]  ;;  %v4955_v43 = vld [vmem:[#allocation4 + $0x1c0] sm:$0xff] }
 0x2fb   : > { %v7667_v63 = vcombine.low %v6560_v5, %v15804_v44  ;;  %v6561_v56 = vcombine.high %v15830_v12, %v15830_v12  ;;  %v6562_v16 = vcombine.high %v6376_v31, %v6376_v31  ;;  %v6569_v21 = vrot.slane %v6376_v31, %v15739_v6  ;;  %4918 = vst [vmem:[#allocation4 + $0x198] sm:$0x7f] %v4858_v41  ;;  %v4956_v53 = vld [vmem:[#allocation4 + $0x1c8] sm:$0x7f] }
 0x2fc   : > { %v6617_v47 = vcombine.high %v6615_v9, %v6615_v9  ;;  %v6624_v26 = vrot.slane %v6608_v0, %v15739_v6  ;;  %v6638_v4 = vrot.slane %v6616_v35, %v15739_v6  ;;  %v15913_v22 = vmax.f32 %v5047_v45, 0.0 }
 0x2fd   : > { %6123 = vrot.lane.b32.xlu1 %v5334_v13, %s17562_s30  ;;  %v6576_v44 = vrot.slane %v6562_v16, %v15739_v6  ;;  %v6577_v12 = vcombine.high %v6569_v21, %v6569_v21  ;;  %v6584_v5 = vrot.slane %v6569_v21, %v15739_v6  ;;  %v5078_v10 = vmax.f32 %v5048_v17, 0.0  ;;  %v5231_v16 = vld [vmem:[#allocation5 + $0x69] sm:$0x1f] }
 0x2fe   : > { %5709 = vrot.lane.b32.xlu0 %v15816_v33, %s17555_s13  ;;  %v15919_v58 = vrot.slane %v6615_v9, %v15739_v6  ;;  %v15922_v61 = vrot.slane %v6617_v47, %v15739_v6  ;;  %v12107_v62 = vcombine.high %v6624_v26, %v6638_v4  ;;  %5107 = vst [vmem:[#allocation5 + $0xb0] sm:$0xff] %v15913_v22  ;;  %v5257_v47 = vld [vmem:[#allocation5 + $0x6a] sm:$0x1f] }
 0x2ff   : > { %v5012_v59 = vmax.f32 %v4951_v7, %v4982_v55  ;;  %v6598_v15 = vrot.slane %v6577_v12, %v15739_v6  ;;  %v6599_v42 = vcombine.high %v6584_v5, %v6584_v5  ;;  %v7669_v1 = vcombine.low %v6561_v56, %v6584_v5  ;;  %5108 = vst [vmem:[#allocation5 + $0xb8] sm:$0x7f] %v5078_v10  ;;  %v4952_v12 = vld [vmem:[#allocation4 + $0x188] sm:$0x7f] }
 0x300   : > { %v5014_v36 = vmax.f32 %v4953_v37, %v4984_v51  ;;  %v7677_v52 = vrot.slane %v7667_v63, %v15739_v6  ;;  %v7684_v60 = vrot.slane %v15897_v38, %v15739_v6  ;;  %v7719_v48 = vcombine.low %v15919_v58, %v15922_v61  ;;  %v5232_v37 = vld [vmem:[#allocation5 + $0x71] sm:$0xff] }
 0x301   : > { %5607 = vrot.lane.b32.xlu1 %v5205_v40, %s17556_s14  ;;  %v12108_v19 = vcombine.high %v15919_v58, %v15922_v61  ;;  %v7717_v18 = vcombine.low %v6624_v26, %v6638_v4  ;;  %v6591_v20 = vrot.slane %v6576_v44, %v15739_v6  ;;  %v6600_v27 = vcombine.high %v6598_v15, %v6598_v15 }
 0x302   : > { %5401 = vrot.lane.b32.xlu0 %v15816_v33, %s17558_s16  ;;  %v7670_v33 = vcombine.low %v6598_v15, %v6599_v42  ;;  %v7740_v28 = vrot.slane %v12107_v62, %v15739_v6  ;;  %v7747_v30 = vrot.slane %v7719_v48, %v15739_v6  ;;  %v7691_v29 = vrot.slane %v7669_v1, %v15739_v6  ;;  %v4983_v5 = vld [vmem:[#allocation4 + $0x198] sm:$0x7f]  ;;  %v5702_v15 = vpop.permute.xlu1 %5701 }
 0x303   : > { %v5049_v2 = vadd.f32 %v15687_v32, %v5012_v59  ;;  %v7716_v25 = vcombine.low %v6600_v27, %v6591_v20  ;;  %v5051_v0 = vadd.f32 %v15687_v32, %v5014_v36  ;;  %v5015_v23 = vmax.f32 %v4954_v14, %v4985_v8  ;;  %v5335_v48 = vld [vmem:[#allocation5 + $0x72] sm:$0xff]  ;;  %v5336_v20 = vld [vmem:[#allocation5 + $0x7a] sm:$0x1f]  ;;  %v5154_v14 = vld [vmem:[#allocation5 + $0x69] sm:$0x1f] }
 0x304   : > { %v7698_v13 = vrot.slane %v7670_v33, %v15739_v6  ;;  %v7749_v45 = vcombine.low %v7740_v28, %v7747_v30  ;;  %v5016_v17 = vmax.f32 %v4955_v43, %v4986_v50  ;;  %v5017_v41 = vmax.f32 %v4956_v53, %v4987_v24  ;;  %v5311_v50 = vld [vmem:[#allocation5 + $0x81] sm:$0xff] }
 0x305   : > { %5505 = vrot.lane.b32.xlu1 %v15823_v34, %s17564_s24  ;;  %v7699_v38 = vcombine.low %v7677_v52, %v7684_v60  ;;  %v7733_v9 = vrot.slane %v7717_v18, %v15739_v6  ;;  %v7726_v31 = vrot.slane %v7716_v25, %v15739_v6  ;;  %v15950_v63 = vmax.f32 %v5049_v2, 0.0  ;;  %v5284_v18 = vld [vmem:[#allocation5 + $0x78] sm:$0x1f]  ;;  %v15979_v30 = vld [vmem:[#allocation5 + $0x82] sm:$0xff] }
 0x306   : > { %5813 = vrot.lane.b32.xlu0 %v15823_v34, %s17557_s15  ;;  %v7700_v35 = vcombine.low %v7691_v29, %v7698_v13  ;;  %v5081_v56 = vmax.f32 %v5051_v0, 0.0  ;;  %v7763_v34 = vrot.slane %v7749_v45, %v15739_v6  ;;  %v5052_v40 = vadd.f32 %v15687_v32, %v5015_v23  ;;  %v5806_v8 = vpop.permute.xlu1 %5805  ;;  %v5180_v0 = vld [vmem:[#allocation5 + $0x6a] sm:$0x1f]  ;;  %v5121_v23 = vld [vmem:[#allocation5 + $0x30] sm:$0xff]  ;;  %v5207_v45 = vld [vmem:[#allocation5 + $0x78] sm:$0x1f] }
 0x307   : > { %v7748_v21 = vcombine.low %v7726_v31, %v7733_v9  ;;  %5109 = vst [vmem:[#allocation5 + $0xc0] sm:$0xff] %v15950_v63  ;;  %v5053_v26 = vadd.f32 %v15687_v32, %v5016_v17  ;;  %v5054_v4 = vadd.f32 %v15687_v32, %v5017_v41  ;;  %v7707_v51 = vrot.slane %v7699_v38, %v15739_v6  ;;  %v5233_v9 = vld [vmem:[#allocation5 + $0x79] sm:$0x1f] }
 0x308   : > { %v7714_v55 = vrot.slane %v7700_v35, %v15739_v6  ;;  %5111 = vst [vmem:[#allocation5 + $0xd0] sm:$0xff] %v5081_v56  ;;  %v5013_v62 = vmax.f32 %v4952_v12, %v4983_v5  ;;  %v5082_v59 = vmax.f32 %v5052_v40, 0.0  ;;  %v6190_v53 = vsel %vm6183_vm0, %v5121_v23, %v15846_v57  ;;  %v16007_v57 = vld [vmem:[#allocation5 + $0x91] sm:$0xff]  ;;  %v5120_v40 = vld [vmem:[#allocation5 + $0x28] sm:$0x1f] }
 0x309   : > { %5917 = vrot.lane.b32.xlu1 %v15811_v49, %s17563_s12  ;;  %v7756_v44 = vrot.slane %v7748_v21, %v15739_v6  ;;  %v5083_v42 = vmax.f32 %v5053_v26, 0.0  ;;  %v5084_v1 = vmax.f32 %v5054_v4, 0.0  ;;  %v6217_v17 = vsel %vm6210_vm1, %v6190_v53, %v15848_v46  ;;  %v16016_v26 = vld [vmem:[#allocation5 + $0x92] sm:$0xff] }
 0x30a   : > { %5711 = vrot.lane.b32.xlu0 %v5231_v16, %s17555_s13  ;;  %v7715_v10 = vcombine.low %v7707_v51, %v7714_v55  ;;  %v5050_v52 = vadd.f32 %v15687_v32, %v5013_v62  ;;  %5112 = vst [vmem:[#allocation5 + $0xd8] sm:$0x7f] %v5082_v59  ;;  %v5310_v32 = vld [vmem:[#allocation5 + $0x79] sm:$0x1f] }
 0x30b   : > { %v7764_v7 = vcombine.low %v7756_v44, %v7763_v34  ;;  %5113 = vst [vmem:[#allocation5 + $0xe0] sm:$0xff] %v5083_v42  ;;  %5114 = vst [vmem:[#allocation5 + $0xe8] sm:$0x7f] %v5084_v1  ;;  %v5259_v55 = vld [vmem:[#allocation5 + $0x7a] sm:$0x1f] }
 0x30c   : > { %v5080_v60 = vmax.f32 %v5050_v52, 0.0 }
 0x30d   : > { %5815 = vrot.lane.b32.xlu1 %v5257_v47, %s17557_s15  ;;  %v8635_v36 = vpack.c.bf16 %v7764_v7, %v7715_v10  ;;  %v5286_v10 = vld [vmem:[#allocation5 + $0x88] sm:$0x1f] }
 0x30e   : > { %5609 = vrot.lane.b32.xlu0 %v15811_v49, %s17556_s14  ;;  %5110 = vst [vmem:[#allocation5 + $0xc8] sm:$0x7f] %v5080_v60  ;;  %v5598_v49 = vpop.permute.xlu0 %5597 }
 0x30f   : > { %12318 = vmatmul.mubr.msk.bf16.gmra.mrb[4].mxu0 %vm8681_vm10, %v8635_v36  ;;  %v6244_v41 = vsel %vm6237_vm2, %v6217_v17, %v5598_v49  ;;  %v5156_v36 = vld [vmem:[#allocation5 + $0x79] sm:$0x1f] }
 0x310   : > { %12321 = vmatprep.mubr.msk.bf16.mxu0 %vm12797_vm9, %v12796_v54  ;;  %v5910_v33 = vpop.permute.xlu1 %5909  ;;  %v6271_v31 = vsel %vm6264_vm3, %v6244_v41, %v5702_v15 }
 0x311   : > { %5713 = vrot.lane.b32.xlu1 %v5232_v37, %s17555_s13  ;;  %v6298_v56 = vsel %vm6291_vm4, %v6271_v31, %v5806_v8 }
 0x312   : > { %6021 = vrot.lane.b32.xlu0 %v5232_v37, %s17561_s29  ;;  %v5388_v27 = vpop.permute.xlu0 %5387  ;;  %v6325_v46 = vsel %vm6318_vm5, %v6298_v56, %v5910_v33  ;;  %v5312_v33 = vld [vmem:[#allocation5 + $0x89] sm:$0x1f] }
 0x313   : > { %v6189_v4 = vsel %vm6183_vm0, %v5120_v40, %v5388_v27 }
 0x314   : > { %v5596_v28 = vpop.permute.xlu1 %5595 }
 0x315   : > { %6125 = vrot.lane.b32.xlu1 %v5335_v48, %s17562_s30 }
 0x316   : > { %5919 = vrot.lane.b32.xlu0 %v5284_v18, %s17563_s12  ;;  %v5492_v24 = vpop.permute.xlu0 %5491 }
 0x317   : > { %v6216_v51 = vsel %vm6210_vm1, %v6189_v4, %v5492_v24 }
 0x318   : > { %v6243_v12 = vsel %vm6237_vm2, %v6216_v51, %v5596_v28 }
 0x319   : > { %6023 = vrot.lane.b32.xlu1 %v5310_v32, %s17561_s29  ;;  %v15986_v2 = vpop.permute.xlu1 %5495 }
 0x31a   : > { %5817 = vrot.lane.b32.xlu0 %v5335_v48, %s17557_s15  ;;  %v15984_v29 = vpop.permute.xlu0 %5391 }
 0x31d   : > { %6127 = vrot.lane.b32.xlu1 %v5336_v20, %s17562_s30 }
 0x31e   : > { %5921 = vrot.lane.b32.xlu0 %v15870_v39, %s17563_s12 }
 0x321   : > { %6025 = vrot.lane.b32.xlu1 %v5311_v50, %s17561_s29 }
 0x322   : > { %5405 = vrot.lane.b32.xlu0 %v5232_v37, %s17558_s16 }
 0x325   : > { %6129 = vrot.lane.b32.xlu1 %v15979_v30, %s17562_s30 }
 0x326   : > { %5509 = vrot.lane.b32.xlu0 %v5335_v48, %s17564_s24  ;;  %v5182_v48 = vld [vmem:[#allocation5 + $0x7a] sm:$0x1f] }
 0x329   : > { %5613 = vrot.lane.b32.xlu1 %v15870_v39, %s17556_s14 }
 0x32a   : > { %5403 = vrot.lane.b32.xlu0 %v5154_v14, %s17558_s16  ;;  %v5122_v14 = vld [vmem:[#allocation5 + $0x38] sm:$0x1f] }
 0x32b   : > { %v6014_v13 = vpop.permute.xlu0 %6013 }
 0x32c   : > { %v6118_v25 = vpop.permute.xlu1 %6117  ;;  %v6352_v21 = vsel %vm6345_vm6, %v6325_v46, %v6014_v13 }
 0x32d   : > { %5717 = vrot.lane.b32.xlu1 %v5311_v50, %s17555_s13  ;;  %v6379_v47 = vsel %vm6372_vm7, %v6352_v21, %v6118_v25  ;;  %v5338_v25 = vld [vmem:[#allocation5 + $0x8a] sm:$0x1f] }
 0x32e   : > { %5507 = vrot.lane.b32.xlu0 %v5180_v0, %s17564_s24  ;;  %v6696_v5 = vrot.slane %v6379_v47, %v15739_v6  ;;  %v6689_v37 = vcombine.high %v6379_v47, %v6379_v47  ;;  %v6191_v0 = vsel %vm6183_vm0, %v5122_v14, %v15984_v29 }
 0x32f   : > { %v5700_v43 = vpop.permute.xlu0 %5699  ;;  %v6218_v53 = vsel %vm6210_vm1, %v6191_v0, %v15986_v2 }
 0x330   : > { %v5804_v39 = vpop.permute.xlu1 %5803  ;;  %v6270_v62 = vsel %vm6264_vm3, %v6243_v12, %v5700_v43  ;;  %v6704_v1 = vcombine.high %v6696_v5, %v6696_v5  ;;  %v6703_v32 = vrot.slane %v6689_v37, %v15739_v6  ;;  %v6712_v13 = vrot.slane %v6696_v5, %v15739_v6  ;;  %v5209_v12 = vld [vmem:[#allocation5 + $0x88] sm:$0x1f] }
 0x331   : > { %5821 = vrot.lane.b32.xlu1 %v15979_v30, %s17557_s15  ;;  %v6297_v59 = vsel %vm6291_vm4, %v6270_v62, %v5804_v39  ;;  %v7775_v37 = vrot.slane %v12108_v19, %v15739_v6 }
 0x332   : > { %5611 = vrot.lane.b32.xlu0 %v5207_v45, %s17556_s14  ;;  %v6726_v27 = vrot.slane %v6704_v1, %v15739_v6  ;;  %v6705_v45 = vcombine.high %v6703_v32, %v6703_v32  ;;  %v6719_v17 = vrot.slane %v6703_v32, %v15739_v6  ;;  %v6734_v31 = vcombine.high %v6712_v13, %v6712_v13  ;;  %v5261_v32 = vld [vmem:[#allocation5 + $0x8a] sm:$0x1f] }
 0x333   : > { %v16003_v38 = vpop.permute.xlu0 %5599 }
 0x334   : > { %v5908_v35 = vpop.permute.xlu1 %5907  ;;  %v6736_v41 = vcombine.high %v6726_v27, %v6726_v27  ;;  %v6733_v47 = vrot.slane %v6705_v45, %v15739_v6  ;;  %v6735_v4 = vcombine.high %v6719_v17, %v6719_v17  ;;  %v5314_v45 = vld [vmem:[#allocation5 + $0x99] sm:$0x1f] }
 0x335   : > { %5925 = vrot.lane.b32.xlu1 %v15874_v3, %s17563_s12  ;;  %v6324_v15 = vsel %vm6318_vm5, %v6297_v59, %v5908_v35 }
 0x336   : > { %5715 = vrot.lane.b32.xlu0 %v5233_v9, %s17555_s13  ;;  %v6245_v9 = vsel %vm6237_vm2, %v6218_v53, %v16003_v38  ;;  %v7815_v51 = vcombine.low %v6736_v41, %v6719_v17  ;;  %v5123_v53 = vld [vmem:[#allocation5 + $0x40] sm:$0xff] }
 0x337   : > { %v5704_v16 = vpop.permute.xlu0 %5703 }
 0x338   : > { %v5808_v34 = vpop.permute.xlu1 %5807  ;;  %v6272_v56 = vsel %vm6264_vm3, %v6245_v9, %v5704_v16  ;;  %v7831_v1 = vrot.slane %v7815_v51, %v15739_v6 }
 0x339   : > { %6029 = vrot.lane.b32.xlu1 %v16007_v57, %s17561_s29  ;;  %v6299_v2 = vsel %vm6291_vm4, %v6272_v56, %v5808_v34 }
 0x33a   : > { %5819 = vrot.lane.b32.xlu0 %v5259_v55, %s17557_s15 }
 0x33c   : > { %v16022_v44 = vpop.permute.xlu0 %5393 }
 0x33d   : > { %6133 = vrot.lane.b32.xlu1 %v16016_v26, %s17562_s30  ;;  %v16026_v7 = vpop.permute.xlu1 %5497  ;;  %v6192_v17 = vsel %vm6183_vm0, %v5123_v53, %v16022_v44 }
 0x33e   : > { %5923 = vrot.lane.b32.xlu0 %v5286_v10, %s17563_s12 }
 0x340   : > { %v6012_v42 = vpop.permute.xlu0 %6011 }
 0x341   : > { %5409 = vrot.lane.b32.xlu1 %v5311_v50, %s17558_s16  ;;  %v6351_v52 = vsel %vm6345_vm6, %v6324_v15, %v6012_v42  ;;  %v7816_v42 = vcombine.low %v6733_v47, %v6735_v4 }
 0x342   : > { %5407 = vrot.lane.b32.xlu0 %v5156_v36, %s17558_s16  ;;  %v5235_v36 = vld [vmem:[#allocation5 + $0x89] sm:$0x1f] }
 0x343   : > { %v6116_v60 = vpop.permute.xlu1 %6115 }
 0x344   : > { %v6378_v49 = vsel %vm6372_vm7, %v6351_v52, %v6116_v60  ;;  %v5912_v20 = vpop.permute.xlu0 %5911  ;;  %v6737_v52 = vcombine.high %v6733_v47, %v6733_v47 }
 0x345   : > { %5511 = vrot.lane.b32.xlu1 %v5182_v48, %s17564_s24  ;;  %v6650_v8 = vcombine.high %v6378_v49, %v6378_v49  ;;  %v6657_v18 = vrot.slane %v6378_v49, %v15739_v6  ;;  %v6326_v38 = vsel %vm6318_vm5, %v6299_v2, %v5912_v20  ;;  %v7838_v20 = vrot.slane %v7816_v42, %v15739_v6 }
 0x346   : > { %6027 = vrot.lane.b32.xlu0 %v5312_v33, %s17561_s29 }
 0x347   : > { %v6664_v50 = vrot.slane %v6650_v8, %v15739_v6  ;;  %v6665_v24 = vcombine.high %v6657_v18, %v6657_v18  ;;  %v16041_v28 = vpop.permute.xlu1 %5601  ;;  %v6672_v29 = vrot.slane %v6657_v18, %v15739_v6 }
 0x348   : > { %v16052_v39 = vpop.permute.xlu0 %5395 }
 0x349   : > { %6131 = vrot.lane.b32.xlu1 %v5338_v25, %s17562_s30  ;;  %v6679_v23 = vrot.slane %v6664_v50, %v15739_v6  ;;  %v6686_v43 = vrot.slane %v6665_v24, %v15739_v6  ;;  %v5288_v25 = vld [vmem:[#allocation5 + $0x98] sm:$0x1f] }
 0x34a   : > { %5513 = vrot.lane.b32.xlu0 %v15979_v30, %s17564_s24  ;;  %v7814_v30 = vcombine.low %v6726_v27, %v6734_v31 }
 0x34b   : > { %v16058_v35 = vpop.permute.xlu1 %5499  ;;  %v7766_v46 = vcombine.low %v6672_v29, %v6686_v43  ;;  %v12109_v21 = vcombine.high %v6672_v29, %v6686_v43  ;;  %v7768_v55 = vcombine.low %v6679_v23, %v6712_v13  ;;  %v6219_v29 = vsel %vm6210_vm1, %v6192_v17, %v16026_v7 }
 0x34c   : > { %v6016_v40 = vpop.permute.xlu0 %6015  ;;  %v7824_v49 = vrot.slane %v7814_v30, %v15739_v6  ;;  %v6246_v56 = vsel %vm6237_vm2, %v6219_v29, %v16041_v28  ;;  %v16127_v28 = vld [vmem:[#allocation5 + $0xa1] sm:$0xff] }
 0x34d   : > { %5617 = vrot.lane.b32.xlu1 %v15874_v3, %s17556_s14  ;;  %v6353_v16 = vsel %vm6345_vm6, %v6326_v38, %v6016_v40  ;;  %v7782_v3 = vrot.slane %v7766_v46, %v15739_v6  ;;  %v7789_v10 = vrot.slane %v12109_v21, %v15739_v6  ;;  %v7796_v62 = vrot.slane %v7768_v55, %v15739_v6 }
 0x34e   : > { %5615 = vrot.lane.b32.xlu0 %v5209_v12, %s17556_s14  ;;  %v7846_v19 = vcombine.low %v7824_v49, %v7831_v1 }
 0x34f   : > { %v6120_v5 = vpop.permute.xlu1 %6119  ;;  %v7797_v8 = vcombine.low %v7775_v37, %v7782_v3  ;;  %v7798_v18 = vcombine.low %v7789_v10, %v7796_v62  ;;  %v5124_v62 = vld [vmem:[#allocation5 + $0x48] sm:$0x1f] }
 0x350   : > { %v16071_v34 = vsel %vm6372_vm7, %v6353_v16, %v6120_v5  ;;  %v5706_v15 = vpop.permute.xlu0 %5705  ;;  %v7854_v23 = vrot.slane %v7846_v19, %v15739_v6  ;;  %v5340_v5 = vld [vmem:[#allocation5 + $0x9a] sm:$0x1f]  ;;  %v6193_v37 = vsel %vm6183_vm0, %v5124_v62, %v16052_v39 }
 0x351   : > { %5721 = vrot.lane.b32.xlu1 %v16007_v57, %s17555_s13  ;;  %v16080_v59 = vrot.slane %v16071_v34, %v15739_v6  ;;  %v7805_v24 = vrot.slane %v7797_v8, %v15739_v6  ;;  %v7812_v14 = vrot.slane %v7798_v18, %v15739_v6  ;;  %v6273_v21 = vsel %vm6264_vm3, %v6246_v56, %v5706_v15  ;;  %v5160_v8 = vld [vmem:[#allocation5 + $0x99] sm:$0x1f] }
 0x352   : > { %5719 = vrot.lane.b32.xlu0 %v5235_v36, %s17555_s13  ;;  %v6738_v12 = vcombine.high %v16071_v34, %v16071_v34  ;;  %v6220_v34 = vsel %vm6210_vm1, %v6193_v37, %v16058_v35 }
 0x353   : > { %v16089_v60 = vrot.slane %v16080_v59, %v15739_v6  ;;  %v5810_v48 = vpop.permute.xlu1 %5809  ;;  %v7813_v41 = vcombine.low %v7805_v24, %v7812_v14 }
 0x354   : > { %v5604_v61 = vpop.permute.xlu0 %5603  ;;  %v6300_v44 = vsel %vm6291_vm4, %v6273_v21, %v5810_v48  ;;  %v6752_v42 = vrot.slane %v6738_v12, %v15739_v6  ;;  %v5213_v12 = vld [vmem:[#allocation5 + $0xa8] sm:$0x1f] }
 0x355   : > { %5825 = vrot.lane.b32.xlu1 %v16016_v26, %s17557_s15  ;;  %v7817_v58 = vcombine.low %v6737_v52, %v16089_v60  ;;  %v6247_v36 = vsel %vm6237_vm2, %v6220_v34, %v5604_v61  ;;  %v6775_v19 = vcombine.high %v16089_v60, %v16089_v60 }
 0x356   : > { %5823 = vrot.lane.b32.xlu0 %v5261_v32, %s17557_s15  ;;  %v6767_v61 = vrot.slane %v6752_v42, %v15739_v6  ;;  %v5237_v42 = vld [vmem:[#allocation5 + $0x99] sm:$0x1f] }
 0x357   : > { %v7845_v27 = vrot.slane %v7817_v58, %v15739_v6  ;;  %v5914_v33 = vpop.permute.xlu1 %5913 }
 0x358   : > { %v5708_v13 = vpop.permute.xlu0 %5707  ;;  %v6327_v7 = vsel %vm6318_vm5, %v6300_v44, %v5914_v33 }
 0x359   : > { %5929 = vrot.lane.b32.xlu1 %v15886_v11, %s17563_s12  ;;  %v7847_v50 = vcombine.low %v7838_v20, %v7845_v27  ;;  %v6274_v39 = vsel %vm6264_vm3, %v6247_v36, %v5708_v13  ;;  %v5158_v27 = vld [vmem:[#allocation5 + $0x89] sm:$0x1f] }
 0x35a   : > { %5927 = vrot.lane.b32.xlu0 %v5288_v25, %s17563_s12  ;;  %v5184_v25 = vld [vmem:[#allocation5 + $0x8a] sm:$0x1f] }
 0x35b   : > { %v5812_v0 = vpop.permute.xlu1 %5811  ;;  %v7861_v43 = vrot.slane %v7847_v50, %v15739_v6 }
 0x35c   : > { %v16111_v31 = vpop.permute.xlu0 %5397  ;;  %v6301_v18 = vsel %vm6291_vm4, %v6274_v39, %v5812_v0 }
 0x35d   : > { %6031 = vrot.lane.b32.xlu1 %v5314_v45, %s17561_s29  ;;  %v7862_v9 = vcombine.low %v7854_v23, %v7861_v43 }
 0x35e   : > { %5413 = vrot.lane.b32.xlu0 %v16007_v57, %s17558_s16  ;;  %v6753_v57 = vcombine.high %v16080_v59, %v16080_v59 }
 0x35f   : > { %v16115_v2 = vpop.permute.xlu1 %5501  ;;  %v8636_v46 = vpack.c.bf16 %v7862_v9, %v7813_v41 }
 0x360   : > { %v6018_v55 = vpop.permute.xlu0 %6017  ;;  %v6774_v59 = vrot.slane %v6753_v57, %v15739_v6  ;;  %v5186_v57 = vld [vmem:[#allocation5 + $0x9a] sm:$0x1f] }
 0x361   : > { %5517 = vrot.lane.b32.xlu1 %v16016_v26, %s17564_s24  ;;  %12322 = vmatmul.mubr.msk.bf16.gmra.mrb[8].mxu0 %vm8681_vm10, %v8636_v46  ;;  %v6354_v38 = vsel %vm6345_vm6, %v6327_v7, %v6018_v55  ;;  %v16134_v26 = vld [vmem:[#allocation5 + $0xa2] sm:$0xff] }
 0x362   : > { %12325 = vmatprep.mubr.msk.bf16.mxu0 %vm12797_vm9, %v12796_v54  ;;  %6033 = vrot.lane.b32.xlu0 %v16127_v28, %s17561_s29  ;;  %v6776_v49 = vcombine.high %v6774_v59, %v6774_v59  ;;  %v7863_v45 = vcombine.low %v6774_v59, %v6775_v19  ;;  %v5211_v59 = vld [vmem:[#allocation5 + $0x98] sm:$0x1f] }
 0x363   : > { %v6122_v40 = vpop.permute.xlu1 %6121  ;;  %v16212_v19 = vld [vmem:[#allocation5 + $0xb2] sm:$0xff] }
 0x364   : > { %v6381_v47 = vsel %vm6372_vm7, %v6354_v38, %v6122_v40  ;;  %v5916_v16 = vpop.permute.xlu0 %5915  ;;  %v7864_v13 = vcombine.low %v6776_v49, %v6767_v61  ;;  %v7873_v38 = vrot.slane %v7863_v45, %v15739_v6  ;;  %v5125_v61 = vld [vmem:[#allocation5 + $0x50] sm:$0xff] }
 0x365   : > { %6137 = vrot.lane.b32.xlu1 %v16134_v26, %s17562_s30  ;;  %v6777_v4 = vcombine.high %v6381_v47, %v6381_v47  ;;  %v6784_v51 = vrot.slane %v6381_v47, %v15739_v6  ;;  %v6328_v32 = vsel %vm6318_vm5, %v6301_v18, %v5916_v16 }
 0x366   : > { %6135 = vrot.lane.b32.xlu0 %v5340_v5, %s17562_s30  ;;  %v7880_v56 = vrot.slane %v7864_v13, %v15739_v6 }
 0x367   : > { %v6791_v30 = vrot.slane %v6777_v4, %v15739_v6  ;;  %v6792_v3 = vcombine.high %v6784_v51, %v6784_v51  ;;  %v16143_v10 = vpop.permute.xlu1 %5605  ;;  %v6800_v35 = vrot.slane %v6784_v51, %v15739_v6 }
 0x368   : > { %v16154_v1 = vpop.permute.xlu0 %5399  ;;  %v7895_v16 = vcombine.low %v7873_v38, %v7880_v56 }
 0x369   : > { %5725 = vrot.lane.b32.xlu1 %v16127_v28, %s17555_s13  ;;  %v6793_v15 = vcombine.high %v6791_v30, %v6791_v30  ;;  %v6814_v52 = vrot.slane %v6792_v3, %v15739_v6 }
 0x36a   : > { %5621 = vrot.lane.b32.xlu0 %v15886_v11, %s17556_s14  ;;  %v6807_v11 = vrot.slane %v6791_v30, %v15739_v6  ;;  %v7903_v36 = vrot.slane %v7895_v16, %v15739_v6 }
 0x36b   : > { %v16158_v48 = vpop.permute.xlu1 %5503  ;;  %v6821_v58 = vrot.slane %v6793_v15, %v15739_v6  ;;  %v7865_v33 = vcombine.low %v6800_v35, %v6814_v52  ;;  %v12110_v50 = vcombine.high %v6800_v35, %v6814_v52 }
 0x36c   : > { %v6020_v20 = vpop.permute.xlu0 %6019 }
 0x36d   : > { %5415 = vrot.lane.b32.xlu1 %v5160_v8, %s17558_s16  ;;  %v6355_v24 = vsel %vm6345_vm6, %v6328_v32, %v6020_v20  ;;  %v7912_v23 = vcombine.low %v6807_v11, %v6821_v58  ;;  %v12111_v60 = vcombine.high %v6807_v11, %v6821_v58  ;;  %v7887_v17 = vrot.slane %v7865_v33, %v15739_v6  ;;  %v16208_v8 = vld [vmem:[#allocation5 + $0xb1] sm:$0xff] }
 0x36e   : > { %5411 = vrot.lane.b32.xlu0 %v5158_v27, %s17558_s16  ;;  %v7894_v41 = vrot.slane %v12110_v50, %v15739_v6  ;;  %v6194_v32 = vsel %vm6183_vm0, %v5125_v61, %v16111_v31  ;;  %v5239_v50 = vld [vmem:[#allocation5 + $0xa9] sm:$0x1f]  ;;  %v5344_v61 = vld [vmem:[#allocation5 + $0xba] sm:$0x1f] }
 0x36f   : > { %v6124_v14 = vpop.permute.xlu1 %6123  ;;  %v7922_v46 = vrot.slane %v7912_v23, %v15739_v6  ;;  %v7929_v21 = vrot.slane %v12111_v60, %v15739_v6  ;;  %v6221_v27 = vsel %vm6210_vm1, %v6194_v32, %v16115_v2  ;;  %v5265_v31 = vld [vmem:[#allocation5 + $0xaa] sm:$0x1f] }
 0x370   : > { %v16175_v0 = vsel %vm6372_vm7, %v6355_v24, %v6124_v14  ;;  %v5710_v53 = vpop.permute.xlu0 %5709  ;;  %v7896_v40 = vcombine.low %v7887_v17, %v7894_v41  ;;  %v6248_v33 = vsel %vm6237_vm2, %v6221_v27, %v16143_v10  ;;  %v5263_v10 = vld [vmem:[#allocation5 + $0x9a] sm:$0x1f] }
 0x371   : > { %5515 = vrot.lane.b32.xlu1 %v5184_v25, %s17564_s24  ;;  %v6833_v43 = vrot.slane %v16175_v0, %v15739_v6  ;;  %v7944_v5 = vcombine.low %v7922_v46, %v7929_v21  ;;  %v6275_v14 = vsel %vm6264_vm3, %v6248_v33, %v5710_v53  ;;  %v5292_v53 = vld [vmem:[#allocation5 + $0xb8] sm:$0x1f] }
 0x372   : > { %5829 = vrot.lane.b32.xlu0 %v16134_v26, %s17557_s15  ;;  %v7910_v34 = vrot.slane %v7896_v40, %v15739_v6 }
 0x373   : > { %v6841_v9 = vcombine.high %v6833_v43, %v6833_v43  ;;  %v16182_v29 = vpop.permute.xlu1 %5607  ;;  %v6848_v44 = vrot.slane %v6833_v43, %v15739_v6  ;;  %v7952_v52 = vrot.slane %v7944_v5, %v15739_v6  ;;  %v5126_v43 = vld [vmem:[#allocation5 + $0x58] sm:$0x1f] }
 0x374   : > { %v16193_v55 = vpop.permute.xlu0 %5401  ;;  %v7911_v35 = vcombine.low %v7903_v36, %v7910_v34  ;;  %v6195_v17 = vsel %vm6183_vm0, %v5126_v43, %v16154_v1  ;;  %v5316_v1 = vld [vmem:[#allocation5 + $0xa9] sm:$0x1f] }
 0x375   : > { %5933 = vrot.lane.b32.xlu1 %v15913_v22, %s17563_s12  ;;  %v6862_v7 = vrot.slane %v6841_v9, %v15739_v6  ;;  %v6222_v56 = vsel %vm6210_vm1, %v6195_v17, %v16158_v48  ;;  %v6826_v48 = vcombine.high %v16175_v0, %v16175_v0 }
 0x376   : > { %5519 = vrot.lane.b32.xlu0 %v5186_v57, %s17564_s24  ;;  %v6249_v21 = vsel %vm6237_vm2, %v6222_v56, %v16182_v29 }
 0x377   : > { %v7914_v47 = vcombine.low %v6848_v44, %v6862_v7  ;;  %v12112_v4 = vcombine.high %v6848_v44, %v6862_v7  ;;  %v16196_v51 = vpop.permute.xlu1 %5505  ;;  %v5290_v44 = vld [vmem:[#allocation5 + $0xa8] sm:$0x1f] }
 0x378   : > { %v5814_v62 = vpop.permute.xlu0 %5813 }
 0x379   : > { %5623 = vrot.lane.b32.xlu1 %v5213_v12, %s17556_s14  ;;  %v7936_v30 = vrot.slane %v7914_v47, %v15739_v6  ;;  %v7943_v3 = vrot.slane %v12112_v4, %v15739_v6  ;;  %v6302_v13 = vsel %vm6291_vm4, %v6275_v14, %v5814_v62  ;;  %v5127_v62 = vld [vmem:[#allocation5 + $0x60] sm:$0xff] }
 0x37a   : > { %5619 = vrot.lane.b32.xlu0 %v5211_v59, %s17556_s14  ;;  %v6196_v0 = vsel %vm6183_vm0, %v5127_v62, %v16193_v55  ;;  %v5215_v62 = vld [vmem:[#allocation5 + $0xb8] sm:$0x1f] }
 0x37b   : > { %v7945_v37 = vcombine.low %v7936_v30, %v7943_v3  ;;  %v5918_v15 = vpop.permute.xlu1 %5917  ;;  %v6223_v34 = vsel %vm6210_vm1, %v6196_v0, %v16196_v51 }
 0x37c   : > { %v5712_v39 = vpop.permute.xlu0 %5711  ;;  %v6329_v2 = vsel %vm6318_vm5, %v6302_v13, %v5918_v15  ;;  %v6840_v15 = vrot.slane %v6826_v48, %v15739_v6 }
 0x37d   : > { %5723 = vrot.lane.b32.xlu1 %v5237_v42, %s17555_s13  ;;  %v7959_v49 = vrot.slane %v7945_v37, %v15739_v6  ;;  %v6276_v57 = vsel %vm6264_vm3, %v6249_v21, %v5712_v39  ;;  %v5162_v21 = vld [vmem:[#allocation5 + $0xa9] sm:$0x1f] }
 0x37e   : > { %6037 = vrot.lane.b32.xlu0 %v16208_v8, %s17561_s29 }
 0x37f   : > { %v5816_v18 = vpop.permute.xlu1 %5815  ;;  %v7960_v58 = vcombine.low %v7952_v52, %v7959_v49  ;;  %v5318_v49 = vld [vmem:[#allocation5 + $0xb9] sm:$0x1f] }
 0x380   : > { %v5610_v11 = vpop.permute.xlu0 %5609  ;;  %v6303_v47 = vsel %vm6291_vm4, %v6276_v57, %v5816_v18 }
 0x381   : > { %6141 = vrot.lane.b32.xlu1 %v16212_v19, %s17562_s30  ;;  %v8637_v20 = vpack.c.bf16 %v7960_v58, %v7911_v35 }
 0x382   : > { %5727 = vrot.lane.b32.xlu0 %v5239_v50, %s17555_s13 }
 0x383   : > { %v5714_v24 = vpop.permute.xlu1 %5713  ;;  %12326 = vmatmul.mubr.msk.bf16.gmra.mrb[12].mxu0 %vm8681_vm10, %v8637_v20 }
 0x384   : > { %12329 = vmatprep.mubr.msk.bf16.mxu0 %vm12797_vm9, %v12796_v54  ;;  %v6022_v25 = vpop.permute.xlu0 %6021 }
 0x385   : > { %5831 = vrot.lane.b32.xlu1 %v5265_v31, %s17557_s15  ;;  %v6356_v23 = vsel %vm6345_vm6, %v6329_v2, %v6022_v25 }
 0x386   : > { %5827 = vrot.lane.b32.xlu0 %v5263_v10, %s17557_s15  ;;  %v6855_v10 = vrot.slane %v6840_v15, %v15739_v6 }
 0x387   : > { %v6126_v60 = vpop.permute.xlu1 %6125 }
 0x388   : > { %v6383_v45 = vsel %vm6372_vm7, %v6356_v23, %v6126_v60  ;;  %v5920_v46 = vpop.permute.xlu0 %5919 }
 0x389   : > { %5935 = vrot.lane.b32.xlu1 %v5292_v53, %s17563_s12  ;;  %v6865_v41 = vcombine.high %v6383_v45, %v6383_v45  ;;  %v6872_v9 = vrot.slane %v6383_v45, %v15739_v6  ;;  %v6330_v29 = vsel %vm6318_vm5, %v6303_v47, %v5920_v46 }
 0x38a   : > { %5931 = vrot.lane.b32.xlu0 %v5290_v44, %s17563_s12 }
 0x38b   : > { %v6879_v7 = vrot.slane %v6865_v41, %v15739_v6  ;;  %v6880_v38 = vcombine.high %v6872_v9, %v6872_v9  ;;  %v6024_v40 = vpop.permute.xlu1 %6023  ;;  %v6888_v59 = vrot.slane %v6872_v9, %v15739_v6 }
 0x38c   : > { %v5818_v12 = vpop.permute.xlu0 %5817  ;;  %v6357_v30 = vsel %vm6345_vm6, %v6330_v29, %v6024_v40 }
 0x38d   : > { %6035 = vrot.lane.b32.xlu1 %v5316_v1, %s17561_s29  ;;  %v6902_v4 = vrot.slane %v6880_v38, %v15739_v6  ;;  %v6881_v16 = vcombine.high %v6879_v7, %v6879_v7  ;;  %v6895_v5 = vrot.slane %v6879_v7, %v15739_v6  ;;  %v7961_v41 = vcombine.low %v6855_v10, %v6888_v59  ;;  %v16337_v10 = vld [vmem:[#allocation5 + $0xc1] sm:$0xff] }
 0x38e   : > { %5417 = vrot.lane.b32.xlu0 %v16127_v28, %s17558_s16  ;;  %v6250_v28 = vsel %vm6237_vm2, %v6223_v34, %v5610_v11 }
 0x38f   : > { %v6128_v3 = vpop.permute.xlu1 %6127  ;;  %v6912_v42 = vcombine.high %v6902_v4, %v6902_v4  ;;  %v6909_v39 = vrot.slane %v6881_v16, %v15739_v6  ;;  %v6911_v18 = vcombine.high %v6895_v5, %v6895_v5  ;;  %v6277_v58 = vsel %vm6264_vm3, %v6250_v28, %v5714_v24  ;;  %v5342_v24 = vld [vmem:[#allocation5 + $0xaa] sm:$0x1f] }
 0x390   : > { %v6384_v37 = vsel %vm6372_vm7, %v6357_v30, %v6128_v3  ;;  %v5922_v52 = vpop.permute.xlu0 %5921  ;;  %v6304_v20 = vsel %vm6291_vm4, %v6277_v58, %v5818_v12  ;;  %v7971_v29 = vrot.slane %v7961_v41, %v15739_v6 }
 0x391   : > { %5521 = vrot.lane.b32.xlu1 %v16134_v26, %s17564_s24  ;;  %v6921_v36 = vrot.slane %v6384_v37, %v15739_v6  ;;  %v6914_v35 = vcombine.high %v6384_v37, %v6384_v37  ;;  %v6910_v26 = vcombine.high %v6888_v59, %v6888_v59  ;;  %v7963_v27 = vcombine.low %v6912_v42, %v6895_v5  ;;  %v5188_v5 = vld [vmem:[#allocation5 + $0xaa] sm:$0x1f] }
 0x392   : > { %6039 = vrot.lane.b32.xlu0 %v5318_v49, %s17561_s29  ;;  %v6331_v50 = vsel %vm6318_vm5, %v6304_v20, %v5922_v52  ;;  %v7964_v31 = vcombine.low %v6909_v39, %v6911_v18  ;;  %v6913_v43 = vcombine.high %v6909_v39, %v6909_v39 }
 0x393   : > { %v6026_v55 = vpop.permute.xlu1 %6025  ;;  %v6929_v32 = vcombine.high %v6921_v36, %v6921_v36  ;;  %v6936_v51 = vrot.slane %v6921_v36, %v15739_v6  ;;  %v6928_v13 = vrot.slane %v6914_v35, %v15739_v6  ;;  %v7962_v23 = vcombine.low %v6902_v4, %v6910_v26  ;;  %v5129_v26 = vld [vmem:[#allocation5 + $0x70] sm:$0xff] }
 0x394   : > { %v5406_v14 = vpop.permute.xlu0 %5405  ;;  %v6358_v2 = vsel %vm6345_vm6, %v6331_v50, %v6026_v55  ;;  %v7985_v9 = vrot.slane %v7963_v27, %v15739_v6  ;;  %v7992_v46 = vrot.slane %v7964_v31, %v15739_v6  ;;  %v5241_v27 = vld [vmem:[#allocation5 + $0xb9] sm:$0x1f] }
 0x395   : > { %6143 = vrot.lane.b32.xlu1 %v5344_v61, %s17562_s30  ;;  %v6950_v11 = vrot.slane %v6929_v32, %v15739_v6  ;;  %v6951_v33 = vcombine.high %v6936_v51, %v6936_v51  ;;  %v6943_v44 = vrot.slane %v6928_v13, %v15739_v6  ;;  %v8010_v7 = vcombine.low %v6913_v43, %v6936_v51  ;;  %v5267_v50 = vld [vmem:[#allocation5 + $0xba] sm:$0x1f] }
 0x396   : > { %6139 = vrot.lane.b32.xlu0 %v5342_v24, %s17562_s30  ;;  %v7994_v12 = vcombine.low %v7985_v9, %v7992_v46  ;;  %v6198_v61 = vsel %vm6183_vm0, %v5129_v26, %v5406_v14  ;;  %v5128_v9 = vld [vmem:[#allocation5 + $0x68] sm:$0x1f] }
 0x397   : > { %v6130_v25 = vpop.permute.xlu1 %6129  ;;  %v6952_v53 = vcombine.high %v6950_v11, %v6950_v11  ;;  %v8011_v45 = vcombine.low %v6950_v11, %v6951_v33  ;;  %v8020_v16 = vrot.slane %v8010_v7, %v15739_v6 }
 0x398   : > { %v16278_v60 = vsel %vm6372_vm7, %v6358_v2, %v6130_v25  ;;  %v5510_v56 = vpop.permute.xlu0 %5509  ;;  %v8008_v52 = vrot.slane %v7994_v12, %v15739_v6 }
 0x399   : > { %5625 = vrot.lane.b32.xlu1 %v15913_v22, %s17556_s14  ;;  %v6960_v17 = vrot.slane %v16278_v60, %v15739_v6  ;;  %v7978_v22 = vrot.slane %v7962_v23, %v15739_v6  ;;  %v8012_v57 = vcombine.low %v6952_v53, %v6943_v44  ;;  %v8027_v1 = vrot.slane %v8011_v45, %v15739_v6 }
 0x39a   : > { %5419 = vrot.lane.b32.xlu0 %v5162_v21, %s17558_s16  ;;  %v6225_v32 = vsel %vm6210_vm1, %v6198_v61, %v5510_v56  ;;  %v6953_v33 = vcombine.high %v16278_v60, %v16278_v60 }
 0x39b   : > { %v6968_v38 = vcombine.high %v6960_v17, %v6960_v17  ;;  %v5614_v40 = vpop.permute.xlu1 %5613  ;;  %v16293_v47 = vrot.slane %v6960_v17, %v15739_v6  ;;  %v7993_v59 = vcombine.low %v7971_v29, %v7978_v22  ;;  %v8034_v37 = vrot.slane %v8012_v57, %v15739_v6 }
 0x39c   : > { %v16298_v4 = vpop.permute.xlu0 %5403  ;;  %v8042_v0 = vcombine.low %v8020_v16, %v8027_v1  ;;  %v6252_v20 = vsel %vm6237_vm2, %v6225_v32, %v5614_v40  ;;  %v6967_v25 = vrot.slane %v6953_v33, %v15739_v6  ;;  %v5346_v32 = vld [vmem:[#allocation5 + $0xca] sm:$0x1f] }
 0x39d   : > { %5729 = vrot.lane.b32.xlu1 %v16208_v8, %s17555_s13  ;;  %v16296_v48 = vrot.slane %v6968_v38, %v15739_v6  ;;  %v8001_v28 = vrot.slane %v7993_v59, %v15739_v6  ;;  %v6197_v56 = vsel %vm6183_vm0, %v5128_v9, %v16298_v4  ;;  %v5294_v38 = vld [vmem:[#allocation5 + $0xc8] sm:$0x1f] }
 0x39e   : > { %5523 = vrot.lane.b32.xlu0 %v5188_v5, %s17564_s24  ;;  %v8050_v49 = vrot.slane %v8042_v0, %v15739_v6  ;;  %v6969_v41 = vcombine.high %v6967_v25, %v6967_v25  ;;  %v6983_v16 = vrot.slane %v6967_v25, %v15739_v6  ;;  %v5217_v25 = vld [vmem:[#allocation5 + $0xc8] sm:$0x1f] }
 0x39f   : > { %v8013_v30 = vcombine.low %v16293_v47, %v16296_v48  ;;  %v5718_v3 = vpop.permute.xlu1 %5717  ;;  %v8009_v55 = vcombine.low %v8001_v28, %v8008_v52 }
 0x3a0   : > { %v5508_v34 = vpop.permute.xlu0 %5507  ;;  %v6997_v1 = vrot.slane %v6969_v41, %v15739_v6 }
 0x3a1   : > { %5627 = vrot.lane.b32.xlu1 %v5215_v62, %s17556_s14  ;;  %v8041_v15 = vrot.slane %v8013_v30, %v15739_v6  ;;  %v6224_v21 = vsel %vm6210_vm1, %v6197_v56, %v5508_v34  ;;  %v5190_v34 = vld [vmem:[#allocation5 + $0xba] sm:$0x1f] }
 0x3a2   : > { %5421 = vrot.lane.b32.xlu0 %v16208_v8, %s17558_s16  ;;  %v12114_v61 = vcombine.high %v6983_v16, %v6997_v1 }
 0x3a3   : > { %v8043_v42 = vcombine.low %v8034_v37, %v8041_v15  ;;  %v5822_v36 = vpop.permute.xlu1 %5821  ;;  %v8060_v15 = vcombine.low %v6983_v16, %v6997_v1 }
 0x3a4   : > { %v5612_v18 = vpop.permute.xlu0 %5611 }
 0x3a5   : > { %5525 = vrot.lane.b32.xlu1 %v16212_v19, %s17564_s24  ;;  %v8057_v39 = vrot.slane %v8043_v42, %v15739_v6  ;;  %v6251_v7 = vsel %vm6237_vm2, %v6224_v21, %v5612_v18 }
 0x3a6   : > { %5833 = vrot.lane.b32.xlu0 %v16212_v19, %s17557_s15  ;;  %v6279_v19 = vsel %vm6264_vm3, %v6252_v20, %v5718_v3  ;;  %v5164_v3 = vld [vmem:[#allocation5 + $0xb9] sm:$0x1f] }
 0x3a7   : > { %v5926_v35 = vpop.permute.xlu1 %5925  ;;  %v8058_v58 = vcombine.low %v8050_v49, %v8057_v39  ;;  %v6306_v14 = vsel %vm6291_vm4, %v6279_v19, %v5822_v36  ;;  %v12113_v49 = vcombine.high %v16293_v47, %v16296_v48 }
 0x3a8   : > { %v5716_v51 = vpop.permute.xlu0 %5715  ;;  %v6333_v31 = vsel %vm6318_vm5, %v6306_v14, %v5926_v35  ;;  %v5320_v35 = vld [vmem:[#allocation5 + $0xc9] sm:$0x1f] }
 0x3a9   : > { %5937 = vrot.lane.b32.xlu1 %v15950_v63, %s17563_s12  ;;  %v8638_v8 = vpack.c.bf16 %v8058_v58, %v8009_v55  ;;  %v6278_v4 = vsel %vm6264_vm3, %v6251_v7, %v5716_v51 }
 0x3aa   : > { %5731 = vrot.lane.b32.xlu0 %v5241_v27, %s17555_s13  ;;  %v8069_v27 = vrot.slane %v12113_v49, %v15739_v6 }
 0x3ab   : > { %v6030_v11 = vpop.permute.xlu1 %6029  ;;  %12330 = vmatmul.mubr.msk.bf16.gmra.mrb[16].mxu0 %vm8681_vm10, %v8638_v8  ;;  %v8076_v8 = vrot.slane %v8060_v15, %v15739_v6  ;;  %v5243_v15 = vld [vmem:[#allocation5 + $0xc9] sm:$0x1f] }
 0x3ac   : > { %12333 = vmatprep.mubr.msk.bf16.mxu0 %vm12797_vm9, %v12796_v54  ;;  %v5820_v24 = vpop.permute.xlu0 %5819  ;;  %v6360_v13 = vsel %vm6345_vm6, %v6333_v31, %v6030_v11 }
 0x3ad   : > { %5835 = vrot.lane.b32.xlu1 %v5267_v50, %s17557_s15  ;;  %v6305_v29 = vsel %vm6291_vm4, %v6278_v4, %v5820_v24  ;;  %v8083_v24 = vrot.slane %v12114_v61, %v15739_v6  ;;  %v16421_v4 = vld [vmem:[#allocation5 + $0xd1] sm:$0xff] }
 0x3ae   : > { %5629 = vrot.lane.b32.xlu0 %v15950_v63, %s17556_s14  ;;  %v16347_v63 = vld [vmem:[#allocation5 + $0xc2] sm:$0xff] }
 0x3af   : > { %v6134_v2 = vpop.permute.xlu1 %6133 }
 0x3b0   : > { %v6387_v23 = vsel %vm6372_vm7, %v6360_v13, %v6134_v2  ;;  %v5924_v43 = vpop.permute.xlu0 %5923  ;;  %v8091_v13 = vcombine.low %v8069_v27, %v8076_v8  ;;  %v16403_v2 = vld [vmem:[#allocation5 + $0xd0] sm:$0xff] }
 0x3b1   : > { %5733 = vrot.lane.b32.xlu1 %v16337_v10, %s17555_s13  ;;  %v7048_v60 = vrot.slane %v6387_v23, %v15739_v6  ;;  %v7041_v53 = vcombine.high %v6387_v23, %v6387_v23  ;;  %v6332_v5 = vsel %vm6318_vm5, %v6305_v29, %v5924_v43 }
 0x3b2   : > { %6041 = vrot.lane.b32.xlu0 %v16337_v10, %s17561_s29  ;;  %v8099_v21 = vrot.slane %v8091_v13, %v15739_v6 }
 0x3b3   : > { %v7056_v45 = vcombine.high %v7048_v60, %v7048_v60  ;;  %v16343_v17 = vpop.permute.xlu1 %5409  ;;  %v16359_v40 = vrot.slane %v7041_v53, %v15739_v6  ;;  %v7064_v22 = vrot.slane %v7048_v60, %v15739_v6 }
 0x3b4   : > { %v16355_v44 = vpop.permute.xlu0 %5407 }
 0x3b5   : > { %6145 = vrot.lane.b32.xlu1 %v16347_v63, %s17562_s30  ;;  %v7078_v46 = vrot.slane %v7056_v45, %v15739_v6  ;;  %v16374_v62 = vrot.slane %v16359_v40, %v15739_v6  ;;  %v7086_v59 = vcombine.high %v7064_v22, %v7064_v22 }
 0x3b6   : > { %5939 = vrot.lane.b32.xlu0 %v5294_v38, %s17563_s12 }
 0x3b7   : > { %v16362_v57 = vpop.permute.xlu1 %5511  ;;  %v7088_v12 = vcombine.high %v7078_v46, %v7078_v46  ;;  %v8110_v18 = vcombine.low %v7078_v46, %v7086_v59  ;;  %v7057_v46 = vcombine.high %v16359_v40, %v16359_v40 }
 0x3b8   : > { %v6028_v30 = vpop.permute.xlu0 %6027 }
 0x3b9   : > { %5837 = vrot.lane.b32.xlu1 %v16347_v63, %s17557_s15  ;;  %v6359_v37 = vsel %vm6345_vm6, %v6332_v5, %v6028_v30  ;;  %v8111_v36 = vcombine.low %v7088_v12, %v16374_v62  ;;  %v8132_v33 = vrot.slane %v8110_v18, %v15739_v6  ;;  %v16424_v16 = vrot.slane %v7057_v46, %v15739_v6  ;;  %v5130_v30 = vld [vmem:[#allocation5 + $0x78] sm:$0x1f] }
 0x3ba   : > { %5423 = vrot.lane.b32.xlu0 %v5164_v3, %s17558_s16 }
 0x3bb   : > { %v6132_v0 = vpop.permute.xlu1 %6131  ;;  %v8139_v51 = vrot.slane %v8111_v36, %v15739_v6 }
 0x3bc   : > { %v6386_v42 = vsel %vm6372_vm7, %v6359_v37, %v6132_v0  ;;  %v16384_v39 = vpop.permute.xlu0 %5513  ;;  %v5131_v37 = vld [vmem:[#allocation5 + $0x80] sm:$0xff]  ;;  %v6199_v0 = vsel %vm6183_vm0, %v5130_v30, %v16355_v44  ;;  %v5269_v44 = vld [vmem:[#allocation5 + $0xca] sm:$0x1f] }
 0x3bd   : > { %5527 = vrot.lane.b32.xlu1 %v5190_v34, %s17564_s24  ;;  %v7002_v52 = vcombine.high %v6386_v42, %v6386_v42  ;;  %v7009_v28 = vrot.slane %v6386_v42, %v15739_v6  ;;  %v8141_v23 = vcombine.low %v8132_v33, %v8139_v51  ;;  %v6226_v49 = vsel %vm6210_vm1, %v6199_v0, %v16362_v57 }
 0x3be   : > { %6043 = vrot.lane.b32.xlu0 %v5320_v35, %s17561_s29  ;;  %v7089_v51 = vcombine.high %v16424_v16, %v16424_v16 }
 0x3bf   : > { %v7016_v55 = vrot.slane %v7002_v52, %v15739_v6  ;;  %v7017_v58 = vcombine.high %v7009_v28, %v7009_v28  ;;  %v16387_v26 = vpop.permute.xlu1 %5617  ;;  %v7024_v47 = vrot.slane %v7009_v28, %v15739_v6  ;;  %v6200_v28 = vsel %vm6183_vm0, %v5131_v37, %v16343_v17 }
 0x3c0   : > { %v16397_v11 = vpop.permute.xlu0 %5615  ;;  %v6227_v35 = vsel %vm6210_vm1, %v6200_v28, %v16384_v39 }
 0x3c1   : > { %6147 = vrot.lane.b32.xlu1 %v5346_v32, %s17562_s30  ;;  %v7031_v48 = vrot.slane %v7016_v55, %v15739_v6  ;;  %v7038_v20 = vrot.slane %v7017_v58, %v15739_v6  ;;  %v6254_v57 = vsel %vm6237_vm2, %v6227_v35, %v16387_v26  ;;  %v6253_v8 = vsel %vm6237_vm2, %v6226_v49, %v16397_v11 }
 0x3c2   : > { %5941 = vrot.lane.b32.xlu0 %v16403_v2, %s17563_s12 }
 0x3c3   : > { %v8062_v19 = vcombine.low %v7024_v47, %v7038_v20  ;;  %v12115_v50 = vcombine.high %v7024_v47, %v7038_v20  ;;  %v8109_v14 = vcombine.low %v7031_v48, %v7064_v22  ;;  %v16400_v31 = vpop.permute.xlu1 %5721  ;;  %v8155_v22 = vrot.slane %v8141_v23, %v15739_v6 }
 0x3c4   : > { %v5720_v45 = vpop.permute.xlu0 %5719  ;;  %v6281_v47 = vsel %vm6264_vm3, %v6254_v57, %v16400_v31 }
 0x3c5   : > { %5631 = vrot.lane.b32.xlu1 %v5217_v25, %s17556_s14  ;;  %v8090_v60 = vrot.slane %v8062_v19, %v15739_v6  ;;  %v8118_v43 = vrot.slane %v12115_v50, %v15739_v6  ;;  %v8125_v53 = vrot.slane %v8109_v14, %v15739_v6  ;;  %v6280_v33 = vsel %vm6264_vm3, %v6253_v8, %v5720_v45  ;;  %v5296_v19 = vld [vmem:[#allocation5 + $0xd8] sm:$0x1f] }
 0x3c6   : > { %5425 = vrot.lane.b32.xlu0 %v16337_v10, %s17558_s16  ;;  %v7087_v10 = vcombine.high %v16374_v62, %v16374_v62 }
 0x3c7   : > { %v8092_v41 = vcombine.low %v8083_v24, %v8090_v60  ;;  %v8140_v9 = vcombine.low %v8118_v43, %v8125_v53  ;;  %v5826_v56 = vpop.permute.xlu1 %5825 }
 0x3c8   : > { %v5824_v1 = vpop.permute.xlu0 %5823  ;;  %v16439_v52 = vcombine.low %v16424_v16, %v7087_v10  ;;  %v6308_v11 = vsel %vm6291_vm4, %v6281_v47, %v5826_v56  ;;  %v5323_v16 = vld [vmem:[#allocation5 + $0xe1] sm:$0xff] }
 0x3c9   : > { %5529 = vrot.lane.b32.xlu1 %v16347_v63, %s17564_s24  ;;  %v8106_v7 = vrot.slane %v8092_v41, %v15739_v6  ;;  %v8148_v38 = vrot.slane %v8140_v9, %v15739_v6  ;;  %v16430_v63 = vld [vmem:[#allocation5 + $0xd2] sm:$0xff]  ;;  %v6307_v23 = vsel %vm6291_vm4, %v6280_v33, %v5824_v1  ;;  %v12720_v33 = vld [vmem:[#allocation5 + $0xe0] sm:$0xff] }
 0x3ca   : > { %6045 = vrot.lane.b32.xlu0 %v16421_v4, %s17561_s29 }
 0x3cb   : > { %v5930_v29 = vpop.permute.xlu1 %5929  ;;  %v8107_v12 = vcombine.low %v8099_v21, %v8106_v7  ;;  %v8156_v40 = vcombine.low %v8148_v38, %v8155_v22  ;;  %v8753_v59 = vpop.f32.mrb[0].mxu0  ;;  %v5322_v7 = vld [vmem:[#allocation5 + $0xd9] sm:$0x1f] }
 0x3cc   : > { %v5928_v3 = vpop.permute.xlu0 %5927  ;;  %v8862_v62 = vcombine.high %v8753_v59, %v8753_v59  ;;  %v8869_v42 = vrot.slane %v8753_v59, %v15739_v6  ;;  %v12315_v36 = vpop.f32.mrb[1].mxu0  ;;  %v6335_v60 = vsel %vm6318_vm5, %v6308_v11, %v5930_v29  ;;  %v5349_v11 = vld [vmem:[#allocation5 + $0xe2] sm:$0xff] }
 0x3cd   : > { %6149 = vrot.lane.b32.xlu1 %v16430_v63, %s17562_s30  ;;  %v8639_v5 = vpack.c.bf16 %v8156_v40, %v8107_v12  ;;  %v8756_v18 = vpop.f32.mrb[2].mxu0  ;;  %v6334_v21 = vsel %vm6318_vm5, %v6307_v23, %v5928_v3 }
 0x3ce   : > { %5735 = vrot.lane.b32.xlu0 %v5243_v15, %s17555_s13  ;;  %v8876_v55 = vrot.slane %v8862_v62, %v15739_v6  ;;  %v8877_v58 = vcombine.high %v8869_v42, %v8869_v42  ;;  %v8911_v61 = vcombine.high %v8756_v18, %v8756_v18  ;;  %v12316_v17 = vpop.f32.mrb[3].mxu0  ;;  %v8918_v39 = vrot.slane %v8756_v18, %v15739_v6 }
 0x3cf   : > { %v6032_v34 = vpop.permute.xlu1 %6031  ;;  %12334 = vmatmul.mubr.msk.bf16.gmra.mrb[20].mxu0 %vm8681_vm10, %v8639_v5  ;;  %v8885_v27 = vrot.slane %v8869_v42, %v15739_v6 }
 0x3d0   : > { %12337 = vmatprep.mubr.msk.bf16.mxu0 %vm12797_vm9, %v12796_v54  ;;  %v16456_v32 = vpop.permute.xlu0 %5413  ;;  %v8878_v20 = vcombine.high %v8876_v55, %v8876_v55  ;;  %v8899_v26 = vrot.slane %v8877_v58, %v15739_v6  ;;  %v8925_v50 = vrot.slane %v8911_v61, %v15739_v6  ;;  %v8926_v14 = vcombine.high %v8918_v39, %v8918_v39 }
 0x3d1   : > { %5839 = vrot.lane.b32.xlu1 %v5269_v44, %s17557_s15  ;;  %v8892_v31 = vrot.slane %v8876_v55, %v15739_v6  ;;  %v8934_v3 = vrot.slane %v8918_v39, %v15739_v6 }
 0x3d2   : > { %5633 = vrot.lane.b32.xlu0 %v16403_v2, %s17556_s14  ;;  %v8906_v24 = vrot.slane %v8878_v20, %v15739_v6  ;;  %v9905_v13 = vcombine.low %v8885_v27, %v8899_v26  ;;  %v12141_v25 = vcombine.high %v8885_v27, %v8899_v26  ;;  %v8167_v2 = vrot.slane %v16439_v52, %v15739_v6 }
 0x3d3   : > { %v16463_v48 = vpop.permute.xlu1 %5517  ;;  %v8927_v53 = vcombine.high %v8925_v50, %v8925_v50  ;;  %v16487_v1 = vrot.slane %v8926_v14, %v15739_v6  ;;  %v16496_v59 = vrot.slane %v8925_v50, %v15739_v6 }
 0x3d4   : > { %v6034_v43 = vpop.permute.xlu0 %6033  ;;  %v9907_v9 = vcombine.low %v8892_v31, %v8906_v24  ;;  %v12142_v56 = vcombine.high %v8892_v31, %v8906_v24  ;;  %v9915_v46 = vrot.slane %v9905_v13, %v15739_v6  ;;  %v9922_v22 = vrot.slane %v12141_v25, %v15739_v6 }
 0x3d5   : > { %5943 = vrot.lane.b32.xlu1 %v5296_v19, %s17563_s12  ;;  %v6362_v45 = vsel %vm6345_vm6, %v6335_v60, %v6034_v43  ;;  %v16503_v42 = vrot.slane %v8927_v53, %v15739_v6  ;;  %v9954_v44 = vcombine.low %v8934_v3, %v16487_v1  ;;  %v12143_v58 = vcombine.high %v8934_v3, %v16487_v1 }
 0x3d6   : > { %5737 = vrot.lane.b32.xlu0 %v16421_v4, %s17555_s13  ;;  %v9929_v40 = vrot.slane %v9907_v9, %v15739_v6  ;;  %v9936_v10 = vrot.slane %v12142_v56, %v15739_v6  ;;  %v6361_v4 = vsel %vm6345_vm6, %v6334_v21, %v6032_v34  ;;  %v9937_v30 = vcombine.low %v9915_v46, %v9922_v22  ;;  %v5348_v34 = vld [vmem:[#allocation5 + $0xda] sm:$0x1f] }
 0x3d7   : > { %v6138_v41 = vpop.permute.xlu1 %6137  ;;  %v9962_v21 = vrot.slane %v9954_v44, %v15739_v6  ;;  %v8957_v22 = vcombine.high %v16496_v59, %v16496_v59  ;;  %v9976_v1 = vrot.slane %v16496_v59, %v15739_v6 }
 0x3d8   : > { %v6389_v38 = vsel %vm6372_vm7, %v6362_v45, %v6138_v41  ;;  %v6136_v5 = vpop.permute.xlu0 %6135  ;;  %v9938_v49 = vcombine.low %v9929_v40, %v9936_v10  ;;  %v9945_v8 = vrot.slane %v9937_v30, %v15739_v6  ;;  %v9969_v10 = vrot.slane %v12143_v58, %v15739_v6 }
 0x3d9   : > { %6047 = vrot.lane.b32.xlu1 %v5322_v7, %s17561_s29  ;;  %v7129_v29 = vcombine.high %v6389_v38, %v6389_v38  ;;  %v7136_v12 = vrot.slane %v6389_v38, %v15739_v6  ;;  %v6388_v15 = vsel %vm6372_vm7, %v6361_v4, %v6136_v5 }
 0x3da   : > { %5841 = vrot.lane.b32.xlu0 %v16430_v63, %s17557_s15  ;;  %v7090_v36 = vcombine.high %v6388_v15, %v6388_v15  ;;  %v7097_v28 = vrot.slane %v6388_v15, %v15739_v6  ;;  %v9952_v31 = vrot.slane %v9938_v49, %v15739_v6 }
 0x3db   : > { %v7143_v37 = vrot.slane %v7129_v29, %v15739_v6  ;;  %v7144_v0 = vcombine.high %v7136_v12, %v7136_v12  ;;  %v16500_v62 = vpop.permute.xlu1 %5725  ;;  %v7152_v35 = vrot.slane %v7136_v12, %v15739_v6  ;;  %v5133_v29 = vld [vmem:[#allocation5 + $0x90] sm:$0xff] }
 0x3dc   : > { %v7104_v61 = vrot.slane %v7090_v36, %v15739_v6  ;;  %v7105_v17 = vcombine.high %v7097_v28, %v7097_v28  ;;  %v7112_v63 = vrot.slane %v7097_v28, %v15739_v6  ;;  %v16515_v57 = vpop.permute.xlu0 %5621  ;;  %v9953_v38 = vcombine.low %v9945_v8, %v9952_v31 }
 0x3dd   : > { %6151 = vrot.lane.b32.xlu1 %v5348_v34, %s17562_s30  ;;  %v7145_v18 = vcombine.high %v7143_v37, %v7143_v37  ;;  %v7166_v55 = vrot.slane %v7144_v0, %v15739_v6  ;;  %v7159_v39 = vrot.slane %v7143_v37, %v15739_v6  ;;  %v6202_v4 = vsel %vm6183_vm0, %v5133_v29, %v16456_v32 }
 0x3de   : > { %5945 = vrot.lane.b32.xlu0 %v12720_v33, %s17563_s12  ;;  %v7126_v19 = vrot.slane %v7105_v17, %v15739_v6  ;;  %v7127_v50 = vcombine.high %v7112_v63, %v7112_v63  ;;  %v8158_v14 = vcombine.low %v7089_v51, %v7112_v63  ;;  %v7119_v60 = vrot.slane %v7104_v61, %v15739_v6 }
 0x3df   : > { %v7173_v47 = vrot.slane %v7145_v18, %v15739_v6  ;;  %v8206_v20 = vcombine.low %v7152_v35, %v7166_v55  ;;  %v12116_v27 = vcombine.high %v7152_v35, %v7166_v55  ;;  %v16520_v26 = vpop.permute.xlu1 %5415  ;;  %11075 = vst [vmem:[#allocation6] sm:$0xff] %v9953_v38  ;;  %v6229_v59 = vsel %vm6210_vm1, %v6202_v4, %v16463_v48 }
 0x3e0   : > { %v7128_v43 = vcombine.high %v7126_v19, %v7126_v19  ;;  %v8159_v53 = vcombine.low %v7126_v19, %v7127_v50  ;;  %v8174_v45 = vrot.slane %v8158_v14, %v15739_v6  ;;  %v16533_v41 = vpop.permute.xlu0 %5411  ;;  %v9977_v0 = vcombine.low %v9962_v21, %v9969_v10 }
 0x3e1   : > { %6153 = vrot.lane.b32.xlu1 %v5349_v11, %s17562_s30  ;;  %v8208_v24 = vcombine.low %v7159_v39, %v7173_v47  ;;  %v12117_v13 = vcombine.high %v7159_v39, %v7173_v47  ;;  %v8216_v25 = vrot.slane %v8206_v20, %v15739_v6  ;;  %v8223_v23 = vrot.slane %v12116_v27, %v15739_v6 }
 0x3e2   : > { %6049 = vrot.lane.b32.xlu0 %v5323_v16, %s17561_s29  ;;  %v8160_v7 = vcombine.low %v7128_v43, %v7119_v60  ;;  %v8189_v40 = vcombine.low %v8167_v2, %v8174_v45  ;;  %v8181_v5 = vrot.slane %v8159_v53, %v15739_v6  ;;  %v8761_v37 = vpop.f32.mrb[4].mxu0  ;;  %v9991_v32 = vrot.slane %v9976_v1, %v15739_v6 }
 0x3e3   : > { %v8230_v51 = vrot.slane %v8208_v24, %v15739_v6  ;;  %v8237_v9 = vrot.slane %v12117_v13, %v15739_v6  ;;  %v8238_v56 = vcombine.low %v8216_v25, %v8223_v23  ;;  %v16537_v46 = vpop.permute.xlu1 %5515  ;;  %v12319_v34 = vpop.f32.mrb[5].mxu0  ;;  %v9993_v28 = vcombine.low %v16503_v42, %v8957_v22 }
 0x3e4   : > { %v8188_v30 = vrot.slane %v8160_v7, %v15739_v6  ;;  %v5830_v3 = vpop.permute.xlu0 %5829  ;;  %v8960_v49 = vcombine.high %v8761_v37, %v8761_v37  ;;  %v8764_v44 = vpop.f32.mrb[6].mxu0  ;;  %v9984_v18 = vrot.slane %v9977_v0, %v15739_v6  ;;  %v8197_v35 = vrot.slane %v8189_v40, %v15739_v6 }
 0x3e5   : > { %v8239_v12 = vcombine.low %v8230_v51, %v8237_v9  ;;  %v8246_v52 = vrot.slane %v8238_v56, %v15739_v6  ;;  %v8967_v55 = vrot.slane %v8761_v37, %v15739_v6  ;;  %v12320_v58 = vpop.f32.mrb[7].mxu0  ;;  %v9009_v8 = vcombine.high %v8764_v44, %v8764_v44 }
 0x3e6   : > { %v8190_v36 = vcombine.low %v8181_v5, %v8188_v30  ;;  %v8974_v63 = vrot.slane %v8960_v49, %v15739_v6  ;;  %v9016_v39 = vrot.slane %v8764_v44, %v15739_v6  ;;  %v9992_v47 = vcombine.low %v9984_v18, %v9991_v32 }
 0x3e7   : > { %v16555_v15 = vpop.permute.xlu1 %5933  ;;  %v8253_v2 = vrot.slane %v8239_v12, %v15739_v6  ;;  %v8959_v27 = vcombine.high %v16503_v42, %v16503_v42  ;;  %v8975_v33 = vcombine.high %v8967_v55, %v8967_v55  ;;  %v8983_v11 = vrot.slane %v8967_v55, %v15739_v6 }
 0x3e8   : > { %v16564_v61 = vpop.permute.xlu0 %5519  ;;  %v8204_v17 = vrot.slane %v8190_v36, %v15739_v6  ;;  %v6256_v19 = vsel %vm6237_vm2, %v6229_v59, %v16515_v57  ;;  %v8976_v14 = vcombine.high %v8974_v63, %v8974_v63  ;;  %v8990_v31 = vrot.slane %v8974_v63, %v15739_v6  ;;  %11076 = vst [vmem:[#allocation6 + $0x8] sm:$0x1f] %v9992_v47 }
 0x3e9   : > { %v8254_v48 = vcombine.low %v8246_v52, %v8253_v2  ;;  %v8997_v24 = vrot.slane %v8975_v33, %v15739_v6  ;;  %v9005_v13 = vcombine.high %v8983_v11, %v8983_v11  ;;  %v9994_v25 = vcombine.low %v8959_v27, %v8983_v11 }
 0x3ea   : > { %v8205_v50 = vcombine.low %v8197_v35, %v8204_v17  ;;  %v9023_v23 = vrot.slane %v9009_v8, %v15739_v6  ;;  %v9004_v43 = vrot.slane %v8976_v14, %v15739_v6  ;;  %v9006_v53 = vcombine.high %v8990_v31, %v8990_v31 }
 0x3eb   : > { %v16569_v20 = vpop.permute.xlu1 %5623  ;;  %v9024_v45 = vcombine.high %v9016_v39, %v9016_v39  ;;  %v9007_v57 = vcombine.high %v8997_v24, %v8997_v24  ;;  %v9995_v51 = vcombine.low %v8997_v24, %v9005_v13  ;;  %v10003_v9 = vrot.slane %v9993_v28, %v15739_v6 }
 0x3ec   : > { %v16579_v60 = vpop.permute.xlu0 %5619  ;;  %v8640_v42 = vpack.c.bf16 %v8254_v48, %v8205_v50  ;;  %v10010_v56 = vrot.slane %v9994_v25, %v15739_v6  ;;  %v9008_v21 = vcombine.high %v9004_v43, %v9004_v43  ;;  %v9025_v7 = vcombine.high %v9023_v23, %v9023_v23 }
 0x3ed   : > { %v6283_v38 = vsel %vm6264_vm3, %v6256_v19, %v16500_v62  ;;  %v9996_v22 = vcombine.low %v9007_v57, %v8990_v31  ;;  %v9032_v29 = vrot.slane %v9016_v39, %v15739_v6  ;;  %v10042_v40 = vcombine.low %v9004_v43, %v9006_v53  ;;  %v5134_v43 = vld [vmem:[#allocation5 + $0x98] sm:$0x1f]  ;;  %v5132_v57 = vld [vmem:[#allocation5 + $0x88] sm:$0x1f] }
 0x3ee   : > { %12338 = vmatmul.mubr.msk.bf16.gmra.mrb[24].mxu0 %vm8681_vm10, %v8640_v42  ;;  %v10025_v1 = vcombine.low %v10003_v9, %v10010_v56  ;;  %v16593_v10 = vrot.slane %v9023_v23, %v15739_v6  ;;  %v9046_v4 = vrot.slane %v9024_v45, %v15739_v6  ;;  %v16597_v5 = vrot.slane %v9025_v7, %v15739_v6 }
 0x3ef   : > { %v16582_v16 = vpop.permute.xlu1 %5723  ;;  %12341 = vmatprep.mubr.msk.bf16.mxu0 %vm12797_vm9, %v12796_v54  ;;  %v6310_v30 = vsel %vm6291_vm4, %v6283_v38, %v5830_v3  ;;  %v10017_v37 = vrot.slane %v9995_v51, %v15739_v6  ;;  %v10024_v59 = vrot.slane %v9996_v22, %v15739_v6  ;;  %v10043_v0 = vcombine.low %v9008_v21, %v9032_v29  ;;  %v11101_v52 = vld [vmem:[#allocation6] ss:$2 sm:$0x3f]  ;;  %v11127_v2 = vld [vmem:[#allocation6 + $0x1] ss:$2 sm:$0x3f] }
 0x3f0   : > { %v6038_v12 = vpop.permute.xlu0 %6037  ;;  %v6337_v34 = vsel %vm6318_vm5, %v6310_v30, %v16555_v15  ;;  %v12144_v36 = vcombine.high %v9032_v29, %v9046_v4  ;;  %v10082_v32 = vcombine.low %v16593_v10, %v16597_v5  ;;  %v11152_v28 = vmax.f32 %v11101_v52, %v11127_v2 }
 0x3f1   : > { %v6364_v49 = vsel %vm6345_vm6, %v6337_v34, %v6038_v12  ;;  %v10026_v44 = vcombine.low %v10017_v37, %v10024_v59  ;;  %v10050_v35 = vrot.slane %v10042_v40, %v15739_v6  ;;  %v10057_v48 = vrot.slane %v10043_v0, %v15739_v6 }
 0x3f2   : > { %v10064_v55 = vrot.slane %v9046_v4, %v15739_v6  ;;  %11165 = vst [vmem:[#allocation7] sm:$0x3f] %v11152_v28  ;;  %v10033_v15 = vrot.slane %v10025_v1, %v15739_v6  ;;  %v16614_v8 = vrot.slane %v12144_v36, %v15739_v6  ;;  %v16617_v39 = vrot.slane %v10082_v32, %v15739_v6 }
 0x3f3   : > { %v6142_v62 = vpop.permute.xlu1 %6141  ;;  %v10040_v17 = vrot.slane %v10026_v44, %v15739_v6  ;;  %v10065_v63 = vcombine.low %v10050_v35, %v10057_v48  ;;  %v6203_v53 = vsel %vm6183_vm0, %v5134_v43, %v16520_v26  ;;  %v6201_v7 = vsel %vm6183_vm0, %v5132_v57, %v16533_v41 }
 0x3f4   : > { %v6391_v3 = vsel %vm6372_vm7, %v6364_v49, %v6142_v62  ;;  %v5728_v18 = vpop.permute.xlu0 %5727  ;;  %v10079_v50 = vrot.slane %v10064_v55, %v15739_v6  ;;  %v10113_v14 = vcombine.low %v16614_v8, %v16617_v39  ;;  %v6230_v51 = vsel %vm6210_vm1, %v6203_v53, %v16564_v61 }
 0x3f5   : > { %v7217_v47 = vcombine.high %v6391_v3, %v6391_v3  ;;  %v7224_v27 = vrot.slane %v6391_v3, %v15739_v6  ;;  %v10041_v11 = vcombine.low %v10033_v15, %v10040_v17  ;;  %v10072_v19 = vrot.slane %v10065_v63, %v15739_v6 }
 0x3f6   : > { %v6257_v38 = vsel %vm6237_vm2, %v6230_v51, %v16569_v20  ;;  %v6228_v26 = vsel %vm6210_vm1, %v6201_v7, %v16537_v46 }
 0x3f7   : > { %v5832_v58 = vpop.permute.xlu1 %5831  ;;  %11077 = vst [vmem:[#allocation6 + $0x10] sm:$0xff] %v10041_v11  ;;  %v10080_v24 = vcombine.low %v10072_v19, %v10079_v50  ;;  %v7231_v13 = vrot.slane %v7217_v47, %v15739_v6  ;;  %v7232_v25 = vcombine.high %v7224_v27, %v7224_v27  ;;  %v6284_v1 = vsel %vm6264_vm3, %v6257_v38, %v5728_v18 }
 0x3f8   : > { %v5828_v33 = vpop.permute.xlu0 %5827  ;;  %v6255_v61 = vsel %vm6237_vm2, %v6228_v26, %v16579_v60  ;;  %v6311_v12 = vsel %vm6291_vm4, %v6284_v1, %v5832_v58  ;;  %v7240_v60 = vrot.slane %v7224_v27, %v15739_v6 }
 0x3f9   : > { %11078 = vst [vmem:[#allocation6 + $0x18] sm:$0x1f] %v10080_v24  ;;  %v7233_v45 = vcombine.high %v7231_v13, %v7231_v13  ;;  %v7247_v9 = vrot.slane %v7231_v13, %v15739_v6  ;;  %v7254_v56 = vrot.slane %v7232_v25, %v15739_v6  ;;  %v6282_v46 = vsel %vm6264_vm3, %v6255_v61, %v16582_v16 }
 0x3fa   : > { %v6309_v52 = vsel %vm6291_vm4, %v6282_v46, %v5828_v33  ;;  %v7262_v55 = vcombine.high %v7240_v60, %v7240_v60 }
 0x3fb   : > { %v5936_v31 = vpop.permute.xlu1 %5935  ;;  %v7261_v29 = vrot.slane %v7233_v45, %v15739_v6  ;;  %v7263_v41 = vcombine.high %v7247_v9, %v7247_v9  ;;  %v7264_v30 = vcombine.high %v7254_v56, %v7254_v56 }
 0x3fc   : > { %v5932_v23 = vpop.permute.xlu0 %5931  ;;  %v6338_v20 = vsel %vm6318_vm5, %v6311_v12, %v5936_v31  ;;  %v8258_v13 = vcombine.low %v7254_v56, %v7262_v55 }
 0x3fd   : > { %v6336_v34 = vsel %vm6318_vm5, %v6309_v52, %v5932_v23  ;;  %v8304_v32 = vcombine.low %v7264_v30, %v7247_v9  ;;  %v8305_v28 = vcombine.low %v7261_v29, %v7263_v41  ;;  %v7265_v44 = vcombine.high %v7261_v29, %v7261_v29 }
 0x3fe   : > { %v8286_v1 = vrot.slane %v8258_v13, %v15739_v6 }
 0x3ff   : > { %v6036_v42 = vpop.permute.xlu1 %6035  ;;  %v8314_v27 = vrot.slane %v8304_v32, %v15739_v6  ;;  %v8321_v33 = vrot.slane %v8305_v28, %v15739_v6  ;;  %v5135_v32 = vld [vmem:[#allocation5 + $0xa0] sm:$0xff] }
 0x400   : > { %v16631_v21 = vpop.permute.xlu0 %5417  ;;  %v11103_v40 = vld [vmem:[#allocation6 + $0x10] ss:$2 sm:$0x3f]  ;;  %v11129_v4 = vld [vmem:[#allocation6 + $0x11] ss:$2 sm:$0x3f]  ;;  %v6363_v16 = vsel %vm6345_vm6, %v6336_v34, %v6036_v42 }
 0x401   : > { %v11153_v62 = vmax.f32 %v11103_v40, %v11129_v4  ;;  %v8336_v45 = vcombine.low %v8314_v27, %v8321_v33  ;;  %v6204_v28 = vsel %vm6183_vm0, %v5135_v32, %v16631_v21 }
 0x403   : > { %v16637_v22 = vpop.permute.xlu1 %5521  ;;  %11166 = vst [vmem:[#allocation7 + $0x8] sm:$0x3f] %v11153_v62  ;;  %v8344_v30 = vrot.slane %v8336_v45, %v15739_v6 }
 0x404   : > { %v6040_v37 = vpop.permute.xlu0 %6039 }
 0x405   : > { %v6365_v59 = vsel %vm6345_vm6, %v6338_v20, %v6040_v37 }
 0x407   : > { %v6144_v0 = vpop.permute.xlu1 %6143 }
 0x408   : > { %v16653_v2 = vsel %vm6372_vm7, %v6365_v59, %v6144_v0  ;;  %v6140_v49 = vpop.permute.xlu0 %6139 }
 0x409   : > { %v7273_v36 = vrot.slane %v16653_v2, %v15739_v6  ;;  %v6390_v35 = vsel %vm6372_vm7, %v6363_v16, %v6140_v49  ;;  %v6231_v16 = vsel %vm6210_vm1, %v6204_v28, %v16637_v22  ;;  %v7266_v21 = vcombine.high %v16653_v2, %v16653_v2 }
 0x40a   : > { %v7178_v58 = vcombine.high %v6390_v35, %v6390_v35  ;;  %v7185_v15 = vrot.slane %v6390_v35, %v15739_v6 }
 0x40b   : > { %v7281_v3 = vcombine.high %v7273_v36, %v7273_v36  ;;  %v7288_v18 = vrot.slane %v7273_v36, %v15739_v6  ;;  %v5626_v48 = vpop.permute.xlu1 %5625 }
 0x40c   : > { %v7192_v11 = vrot.slane %v7178_v58, %v15739_v6  ;;  %v7193_v19 = vcombine.high %v7185_v15, %v7185_v15  ;;  %v5420_v50 = vpop.permute.xlu0 %5419  ;;  %v7200_v25 = vrot.slane %v7185_v15, %v15739_v6 }
 0x40d   : > { %v16663_v17 = vrot.slane %v7281_v3, %v15739_v6  ;;  %v7303_v63 = vcombine.high %v7288_v18, %v7288_v18  ;;  %v8306_v47 = vcombine.low %v7265_v44, %v7288_v18  ;;  %v6258_v44 = vsel %vm6237_vm2, %v6231_v16, %v5626_v48 }
 0x40e   : > { %v7207_v23 = vrot.slane %v7192_v11, %v15739_v6  ;;  %v7214_v42 = vrot.slane %v7193_v19, %v15739_v6  ;;  %v7280_v11 = vrot.slane %v7266_v21, %v15739_v6  ;;  %v5136_v19 = vld [vmem:[#allocation5 + $0xa8] sm:$0x1f] }
 0x40f   : > { %v8307_v31 = vcombine.low %v16663_v17, %v7303_v63  ;;  %v5730_v24 = vpop.permute.xlu1 %5729  ;;  %v8328_v43 = vrot.slane %v8306_v47, %v15739_v6 }
 0x410   : > { %v8255_v57 = vcombine.low %v7200_v25, %v7214_v42  ;;  %v12118_v51 = vcombine.high %v7200_v25, %v7214_v42  ;;  %v8257_v9 = vcombine.low %v7207_v23, %v7240_v60  ;;  %v5524_v7 = vpop.permute.xlu0 %5523  ;;  %v6285_v18 = vsel %vm6264_vm3, %v6258_v44, %v5730_v24 }
 0x411   : > { %v8335_v53 = vrot.slane %v8307_v31, %v15739_v6  ;;  %v6205_v31 = vsel %vm6183_vm0, %v5136_v19, %v5420_v50  ;;  %v7304_v24 = vcombine.high %v16663_v17, %v16663_v17  ;;  %v7295_v45 = vrot.slane %v7280_v11, %v15739_v6 }
 0x412   : > { %v8265_v56 = vrot.slane %v8255_v57, %v15739_v6  ;;  %v8272_v61 = vrot.slane %v12118_v51, %v15739_v6  ;;  %v8279_v29 = vrot.slane %v8257_v9, %v15739_v6  ;;  %v6232_v13 = vsel %vm6210_vm1, %v6205_v31, %v5524_v7  ;;  %v5137_v51 = vld [vmem:[#allocation5 + $0xb0] sm:$0xff] }
 0x413   : > { %v8337_v38 = vcombine.low %v8328_v43, %v8335_v53  ;;  %v5628_v26 = vpop.permute.xlu1 %5627  ;;  %v12145_v53 = vcombine.high %v16593_v10, %v16597_v5  ;;  %v16714_v57 = vcombine.low %v7304_v24, %v7295_v45 }
 0x414   : > { %v8287_v40 = vcombine.low %v8265_v56, %v8272_v61  ;;  %v8288_v4 = vcombine.low %v8279_v29, %v8286_v1  ;;  %v5422_v41 = vpop.permute.xlu0 %5421  ;;  %v6259_v2 = vsel %vm6237_vm2, %v6232_v13, %v5628_v26 }
 0x415   : > { %v8351_v12 = vrot.slane %v8337_v38, %v15739_v6  ;;  %v6206_v38 = vsel %vm6183_vm0, %v5137_v51, %v5422_v41  ;;  %v16723_v56 = vrot.slane %v12145_v53, %v15739_v6 }
 0x416   : > { %v8295_v62 = vrot.slane %v8287_v40, %v15739_v6  ;;  %v8302_v37 = vrot.slane %v8288_v4, %v15739_v6 }
 0x417   : > { %v5526_v20 = vpop.permute.xlu1 %5525  ;;  %v8352_v46 = vcombine.low %v8344_v30, %v8351_v12 }
 0x418   : > { %v5834_v59 = vpop.permute.xlu0 %5833  ;;  %v8303_v0 = vcombine.low %v8295_v62, %v8302_v37  ;;  %v6233_v61 = vsel %vm6210_vm1, %v6206_v38, %v5526_v20  ;;  %v16736_v37 = vrot.slane %v10113_v14, %v15739_v6  ;;  %v8363_v20 = vrot.slane %v16714_v57, %v15739_v6 }
 0x419   : > { %v6312_v35 = vsel %vm6291_vm4, %v6285_v18, %v5834_v59 }
 0x41a   : > { %v8641_v52 = vpack.c.bf16 %v8352_v46, %v8303_v0 }
 0x41b   : > { %v5938_v60 = vpop.permute.xlu1 %5937 }
 0x41c   : > { %12342 = vmatmul.mubr.msk.bf16.gmra.mrb[28].mxu0 %vm8681_vm10, %v8641_v52  ;;  %v5732_v34 = vpop.permute.xlu0 %5731  ;;  %v6339_v55 = vsel %vm6318_vm5, %v6312_v35, %v5938_v60 }
 0x41d   : > { %12345 = vmatprep.mubr.msk.bf16.mxu0 %vm12797_vm9, %v12796_v54  ;;  %v6286_v50 = vsel %vm6264_vm3, %v6259_v2, %v5732_v34 }
 0x41f   : > { %v5836_v36 = vpop.permute.xlu1 %5835 }
 0x420   : > { %v5630_v49 = vpop.permute.xlu0 %5629  ;;  %v6313_v17 = vsel %vm6291_vm4, %v6286_v50, %v5836_v36 }
 0x421   : > { %v6260_v40 = vsel %vm6237_vm2, %v6233_v61, %v5630_v49 }
 0x423   : > { %v5734_v3 = vpop.permute.xlu1 %5733 }
 0x424   : > { %v6042_v58 = vpop.permute.xlu0 %6041  ;;  %v6287_v46 = vsel %vm6264_vm3, %v6260_v40, %v5734_v3 }
 0x425   : > { %v6366_v15 = vsel %vm6345_vm6, %v6339_v55, %v6042_v58 }
 0x427   : > { %v6146_v63 = vpop.permute.xlu1 %6145 }
 0x428   : > { %v6393_v47 = vsel %vm6372_vm7, %v6366_v15, %v6146_v63  ;;  %v5940_v22 = vpop.permute.xlu0 %5939 }
 0x429   : > { %v7305_v27 = vcombine.high %v6393_v47, %v6393_v47  ;;  %v7312_v48 = vrot.slane %v6393_v47, %v15739_v6  ;;  %v6340_v9 = vsel %vm6318_vm5, %v6313_v17, %v5940_v22 }
 0x42b   : > { %v5838_v33 = vpop.permute.xlu1 %5837  ;;  %v7319_v23 = vrot.slane %v7305_v27, %v15739_v6  ;;  %v7320_v42 = vcombine.high %v7312_v48, %v7312_v48  ;;  %v16729_v4 = vrot.slane %v7312_v48, %v15739_v6 }
 0x42c   : > { %v16703_v25 = vpop.permute.xlu0 %5423  ;;  %v6314_v39 = vsel %vm6291_vm4, %v6287_v46, %v5838_v33 }
 0x42d   : > { %v7321_v26 = vcombine.high %v7319_v23, %v7319_v23  ;;  %v16719_v1 = vrot.slane %v7320_v42, %v15739_v6  ;;  %v16743_v52 = vrot.slane %v7319_v23, %v15739_v6 }
 0x42f   : > { %v16707_v43 = vpop.permute.xlu1 %5527  ;;  %v16746_v34 = vrot.slane %v7321_v26, %v15739_v6  ;;  %v8354_v8 = vcombine.low %v16729_v4, %v16719_v1  ;;  %v12119_v32 = vcombine.high %v16729_v4, %v16719_v1 }
 0x430   : > { %v6044_v7 = vpop.permute.xlu0 %6043 }
 0x431   : > { %v6367_v10 = vsel %vm6345_vm6, %v6340_v9, %v6044_v7  ;;  %v8356_v47 = vcombine.low %v16743_v52, %v16746_v34  ;;  %v12120_v22 = vcombine.high %v16743_v52, %v16746_v34 }
 0x433   : > { %v6148_v5 = vpop.permute.xlu1 %6147  ;;  %v8412_v1 = vrot.slane %v12120_v22, %v15739_v6 }
 0x434   : > { %v6394_v29 = vsel %vm6372_vm7, %v6367_v10, %v6148_v5  ;;  %v8769_v12 = vpop.f32.mrb[8].mxu0  ;;  %v5942_v59 = vpop.permute.xlu0 %5941 }
 0x435   : > { %v7361_v41 = vrot.slane %v6394_v29, %v15739_v6  ;;  %v9058_v30 = vcombine.high %v8769_v12, %v8769_v12  ;;  %v12323_v62 = vpop.f32.mrb[9].mxu0  ;;  %v9065_v0 = vrot.slane %v8769_v12, %v15739_v6  ;;  %v7354_v44 = vcombine.high %v6394_v29, %v6394_v29 }
 0x436   : > { %v8772_v60 = vpop.f32.mrb[10].mxu0  ;;  %v6341_v9 = vsel %vm6318_vm5, %v6314_v39, %v5942_v59 }
 0x437   : > { %v16751_v14 = vpop.permute.xlu1 %5631  ;;  %v12324_v36 = vpop.f32.mrb[11].mxu0  ;;  %v9072_v28 = vrot.slane %v9058_v30, %v15739_v6  ;;  %v9073_v16 = vcombine.high %v9065_v0, %v9065_v0  ;;  %v9107_v49 = vcombine.high %v8772_v60, %v8772_v60  ;;  %v7369_v3 = vcombine.high %v7361_v41, %v7361_v41 }
 0x438   : > { %v9081_v18 = vrot.slane %v9065_v0, %v15739_v6  ;;  %v9114_v35 = vrot.slane %v8772_v60, %v15739_v6  ;;  %v16761_v21 = vpop.permute.xlu0 %5425  ;;  %v16772_v13 = vrot.slane %v7354_v44, %v15739_v6  ;;  %v16779_v53 = vrot.slane %v7361_v41, %v15739_v6 }
 0x439   : > { %v9074_v55 = vcombine.high %v9072_v28, %v9072_v28  ;;  %v9088_v58 = vrot.slane %v9072_v28, %v15739_v6  ;;  %v9095_v15 = vrot.slane %v9073_v16, %v15739_v6  ;;  %v9121_v63 = vrot.slane %v9107_v49, %v15739_v6 }
 0x43a   : > { %v9122_v27 = vcombine.high %v9114_v35, %v9114_v35  ;;  %v9130_v48 = vrot.slane %v9114_v35, %v15739_v6  ;;  %v16775_v2 = vrot.slane %v7369_v3, %v15739_v6 }
 0x43b   : > { %v16768_v33 = vpop.permute.xlu1 %5529  ;;  %v9102_v11 = vrot.slane %v9074_v55, %v15739_v6  ;;  %v9104_v19 = vcombine.high %v9088_v58, %v9088_v58  ;;  %v10084_v31 = vcombine.low %v9081_v18, %v9095_v15  ;;  %v12146_v24 = vcombine.high %v9081_v18, %v9095_v15 }
 0x43c   : > { %v9123_v23 = vcombine.high %v9121_v63, %v9121_v63  ;;  %v9137_v42 = vrot.slane %v9121_v63, %v15739_v6  ;;  %v6046_v51 = vpop.permute.xlu0 %6045  ;;  %v9144_v38 = vrot.slane %v9122_v27, %v15739_v6  ;;  %v9152_v12 = vcombine.high %v9130_v48, %v9130_v48 }
 0x43d   : > { %v10112_v45 = vrot.slane %v10084_v31, %v15739_v6  ;;  %v10131_v50 = vcombine.low %v9088_v58, %v9102_v11  ;;  %v10152_v17 = vrot.slane %v9104_v19, %v15739_v6  ;;  %v9106_v7 = vcombine.high %v9102_v11, %v9102_v11 }
 0x43e   : > { %v16786_v26 = vrot.slane %v9123_v23, %v15739_v6  ;;  %v10138_v61 = vrot.slane %v12146_v24, %v15739_v6  ;;  %v8403_v40 = vcombine.low %v16779_v53, %v16775_v2  ;;  %v9153_v41 = vcombine.high %v9137_v42, %v9137_v42 }
 0x43f   : > { %v6150_v10 = vpop.permute.xlu1 %6149  ;;  %v10114_v5 = vcombine.low %v16723_v56, %v10112_v45  ;;  %v10145_v29 = vrot.slane %v10131_v50, %v15739_v6  ;;  %v9154_v30 = vcombine.high %v9144_v38, %v9144_v38  ;;  %v10169_v62 = vcombine.low %v9106_v7, %v9130_v48  ;;  %v5138_v50 = vld [vmem:[#allocation5 + $0xb8] sm:$0x1f] }
 0x440   : > { %v10167_v0 = vrot.slane %v10152_v17, %v15739_v6  ;;  %v10170_v60 = vcombine.low %v9144_v38, %v9152_v12  ;;  %v5736_v39 = vpop.permute.xlu0 %5735  ;;  %v10172_v56 = vcombine.low %v16786_v26, %v9153_v41  ;;  %v6368_v16 = vsel %vm6345_vm6, %v6341_v9, %v6046_v51 }
 0x441   : > { %v10128_v46 = vrot.slane %v10114_v5, %v15739_v6  ;;  %v10153_v59 = vcombine.low %v10138_v61, %v10145_v29  ;;  %v10171_v36 = vcombine.low %v9154_v30, %v9137_v42  ;;  %v10179_v28 = vrot.slane %v10169_v62, %v15739_v6 }
 0x442   : > { %v10186_v18 = vrot.slane %v10170_v60, %v15739_v6  ;;  %v6395_v35 = vsel %vm6372_vm7, %v6368_v16, %v6150_v10  ;;  %v10200_v58 = vrot.slane %v10172_v56, %v15739_v6  ;;  %v8370_v27 = vrot.slane %v8354_v8, %v15739_v6 }
 0x443   : > { %v5840_v49 = vpop.permute.xlu1 %5839  ;;  %v10129_v44 = vcombine.low %v16736_v37, %v10128_v46  ;;  %v10160_v3 = vrot.slane %v10153_v59, %v15739_v6  ;;  %v10193_v55 = vrot.slane %v10171_v36, %v15739_v6  ;;  %v7393_v15 = vcombine.high %v6395_v35, %v6395_v35  ;;  %v5139_v36 = vld [vmem:[#allocation5 + $0xc0] sm:$0xff] }
 0x444   : > { %v7400_v63 = vrot.slane %v6395_v35, %v15739_v6  ;;  %v8384_v37 = vrot.slane %v8356_v47, %v15739_v6  ;;  %v10201_v11 = vcombine.low %v10179_v28, %v10186_v18  ;;  %v5634_v19 = vpop.permute.xlu0 %5633  ;;  %v8377_v31 = vrot.slane %v12119_v32, %v15739_v6 }
 0x445   : > { %v10168_v48 = vcombine.low %v10160_v3, %v10167_v0  ;;  %11079 = vst [vmem:[#allocation6 + $0x20] sm:$0xff] %v10129_v44  ;;  %v8419_v24 = vrot.slane %v8403_v40, %v15739_v6  ;;  %v10202_v23 = vcombine.low %v10193_v55, %v10200_v58  ;;  %v7383_v8 = vrot.slane %v16772_v13, %v15739_v6 }
 0x446   : > { %v16816_v42 = vrot.slane %v7400_v63, %v15739_v6  ;;  %v12121_v47 = vcombine.high %v16779_v53, %v16775_v2  ;;  %v10209_v17 = vrot.slane %v10201_v11, %v15739_v6  ;;  %v7408_v51 = vcombine.high %v7400_v63, %v7400_v63 }
 0x447   : > { %v5944_v45 = vpop.permute.xlu1 %5943  ;;  %11080 = vst [vmem:[#allocation6 + $0x28] sm:$0x1f] %v10168_v48  ;;  %v6207_v4 = vsel %vm6183_vm0, %v5138_v50, %v16703_v25  ;;  %v10216_v32 = vrot.slane %v10202_v23, %v15739_v6  ;;  %v7407_v9 = vrot.slane %v7393_v15, %v15739_v6  ;;  %v8386_v13 = vcombine.low %v8377_v31, %v8384_v37 }
 0x448   : > { %v6234_v2 = vsel %vm6210_vm1, %v6207_v4, %v16707_v43  ;;  %v8405_v53 = vcombine.low %v7383_v8, %v16816_v42  ;;  %v5738_v7 = vpop.permute.xlu0 %5737  ;;  %v8385_v38 = vcombine.low %v8363_v20, %v8370_v27  ;;  %v8434_v52 = vcombine.low %v8412_v1, %v8419_v24 }
 0x449   : > { %v10217_v34 = vcombine.low %v10209_v17, %v10216_v32  ;;  %v6261_v25 = vsel %vm6237_vm2, %v6234_v2, %v16751_v14  ;;  %v8426_v10 = vrot.slane %v12121_v47, %v15739_v6  ;;  %v7430_v5 = vrot.slane %v7408_v51, %v15739_v6 }
 0x44a   : > { %v8433_v61 = vrot.slane %v8405_v53, %v15739_v6  ;;  %v6288_v43 = vsel %vm6264_vm3, %v6261_v25, %v5736_v39  ;;  %v7409_v29 = vcombine.high %v7407_v9, %v7407_v9  ;;  %v8400_v41 = vrot.slane %v8386_v13, %v15739_v6 }
 0x44b   : > { %v6048_v22 = vpop.permute.xlu1 %6047  ;;  %11081 = vst [vmem:[#allocation6 + $0x30] sm:$0xff] %v10217_v34  ;;  %v6315_v12 = vsel %vm6291_vm4, %v6288_v43, %v5840_v49  ;;  %v7423_v62 = vrot.slane %v7407_v9, %v15739_v6  ;;  %v8393_v0 = vrot.slane %v8385_v38, %v15739_v6  ;;  %v8442_v60 = vrot.slane %v8434_v52, %v15739_v6 }
 0x44c   : > { %v8435_v57 = vcombine.low %v8426_v10, %v8433_v61  ;;  %v6342_v20 = vsel %vm6318_vm5, %v6315_v12, %v5944_v45  ;;  %v5842_v40 = vpop.permute.xlu0 %5841  ;;  %v7440_v56 = vcombine.high %v7430_v5, %v7430_v5  ;;  %v6208_v49 = vsel %vm6183_vm0, %v5139_v36, %v16761_v21 }
 0x44d   : > { %v6369_v46 = vsel %vm6345_vm6, %v6342_v20, %v6048_v22  ;;  %v7437_v44 = vrot.slane %v7409_v29, %v15739_v6  ;;  %v6235_v35 = vsel %vm6210_vm1, %v6208_v49, %v16768_v33  ;;  %v7438_v55 = vcombine.high %v16816_v42, %v16816_v42 }
 0x44e   : > { %v11105_v14 = vld [vmem:[#allocation6 + $0x20] ss:$2 sm:$0x3f]  ;;  %v11131_v30 = vld [vmem:[#allocation6 + $0x21] ss:$2 sm:$0x3f]  ;;  %v8449_v16 = vrot.slane %v8435_v57, %v15739_v6  ;;  %v8401_v15 = vcombine.low %v8393_v0, %v8400_v41  ;;  %v7439_v27 = vcombine.high %v7423_v62, %v7423_v62  ;;  %v6262_v37 = vsel %vm6237_vm2, %v6235_v35, %v5634_v19 }
 0x44f   : > { %v6152_v59 = vpop.permute.xlu1 %6151  ;;  %v11154_v39 = vmax.f32 %v11105_v14, %v11131_v30  ;;  %v8452_v11 = vcombine.low %v7440_v56, %v7423_v62  ;;  %v6289_v31 = vsel %vm6264_vm3, %v6262_v37, %v5738_v7  ;;  %v7441_v45 = vcombine.high %v7437_v44, %v7437_v44 }
 0x450   : > { %v6396_v28 = vsel %vm6372_vm7, %v6369_v46, %v6152_v59  ;;  %v5946_v58 = vpop.permute.xlu0 %5945  ;;  %v8450_v63 = vcombine.low %v8442_v60, %v8449_v16  ;;  %v6316_v23 = vsel %vm6291_vm4, %v6289_v31, %v5842_v40  ;;  %v8451_v8 = vcombine.low %v7430_v5, %v7438_v55 }
 0x451   : > { %v7442_v3 = vcombine.high %v6396_v28, %v6396_v28  ;;  %v7449_v18 = vrot.slane %v6396_v28, %v15739_v6  ;;  %11167 = vst [vmem:[#allocation7 + $0x10] sm:$0x3f] %v11154_v39  ;;  %v6343_v47 = vsel %vm6318_vm5, %v6316_v23, %v5946_v58  ;;  %v8453_v51 = vcombine.low %v7437_v44, %v7439_v27 }
 0x452   : > { %v8642_v24 = vpack.c.bf16 %v8450_v63, %v8401_v15  ;;  %v8468_v52 = vrot.slane %v8452_v11, %v15739_v6  ;;  %v8461_v43 = vrot.slane %v8451_v8, %v15739_v6  ;;  %v9155_v57 = vcombine.high %v16786_v26, %v16786_v26 }
 0x453   : > { %v7457_v48 = vcombine.high %v7449_v18, %v7449_v18  ;;  %v7464_v21 = vrot.slane %v7449_v18, %v15739_v6  ;;  %v7456_v33 = vrot.slane %v7442_v3, %v15739_v6  ;;  %v6154_v50 = vpop.permute.xlu1 %6153  ;;  %v8475_v20 = vrot.slane %v8453_v51, %v15739_v6 }
 0x454   : > { %12346 = vmatmul.mubr.msk.bf16.gmra.mrb[32].mxu0 %vm8681_vm10, %v8642_v24  ;;  %v6050_v19 = vpop.permute.xlu0 %6049  ;;  %v8483_v30 = vcombine.low %v8461_v43, %v8468_v52  ;;  %v11185_v43 = vld [vmem:[#allocation7 + $0x8] sm:$0x3f] }
 0x455   : > { %v7478_v42 = vrot.slane %v7457_v48, %v15739_v6  ;;  %v8454_v4 = vcombine.low %v7441_v45, %v7464_v21  ;;  %v6370_v32 = vsel %vm6345_vm6, %v6343_v47, %v6050_v19  ;;  %12349 = vmatprep.mubr.msk.bf16.mxu0 %vm12797_vm9, %v12796_v54  ;;  %v7479_v13 = vcombine.high %v7464_v21, %v7464_v21 }
 0x456   : > { %v8777_v17 = vpop.f32.mrb[12].mxu0  ;;  %v16872_v2 = vsel %vm6372_vm7, %v6370_v32, %v6154_v50  ;;  %v7471_v34 = vrot.slane %v7456_v33, %v15739_v6 }
 0x457   : > { %v7480_v1 = vcombine.high %v7478_v42, %v7478_v42  ;;  %v12327_v9 = vpop.f32.mrb[13].mxu0  ;;  %v9156_v53 = vcombine.high %v8777_v17, %v8777_v17  ;;  %v9163_v7 = vrot.slane %v8777_v17, %v15739_v6  ;;  %v7488_v22 = vrot.slane %v16872_v2, %v15739_v6 }
 0x458   : > { %v16875_v38 = vpop.f32.mrb[14].mxu0  ;;  %v8482_v29 = vrot.slane %v8454_v4, %v15739_v6  ;;  %v8500_v40 = vcombine.low %v7478_v42, %v7479_v13  ;;  %v8491_v42 = vrot.slane %v8483_v30, %v15739_v6  ;;  %v16927_v30 = vld [vmem:[%s17499_s4] ss:$0 sm:$0xff] }
 0x459   : > { %v12328_v25 = vpop.f32.mrb[15].mxu0  ;;  %v9170_v10 = vrot.slane %v9156_v53, %v15739_v6  ;;  %v9171_v5 = vcombine.high %v9163_v7, %v9163_v7  ;;  %v9179_v61 = vrot.slane %v9163_v7, %v15739_v6  ;;  %v8501_v12 = vcombine.low %v7480_v1, %v7471_v34 }
 0x45a   : > { %v7496_v41 = vcombine.high %v7488_v22, %v7488_v22  ;;  %v7504_v62 = vrot.slane %v7488_v22, %v15739_v6  ;;  %v9212_v59 = vrot.slane %v16875_v38, %v15739_v6  ;;  %v8484_v26 = vcombine.low %v8475_v20, %v8482_v29 }
 0x45b   : > { %v9172_v14 = vcombine.high %v9170_v10, %v9170_v10  ;;  %v9193_v46 = vrot.slane %v9171_v5, %v15739_v6  ;;  %v9201_v39 = vcombine.high %v9179_v61, %v9179_v61  ;;  %v10218_v36 = vcombine.low %v9155_v57, %v9179_v61 }
 0x45c   : > { %v7518_v0 = vrot.slane %v7496_v41, %v15739_v6  ;;  %v8517_v56 = vrot.slane %v8501_v12, %v15739_v6  ;;  %v9186_v28 = vrot.slane %v9170_v10, %v15739_v6  ;;  %v8510_v49 = vrot.slane %v8500_v40, %v15739_v6  ;;  %v11178_v40 = vld [vmem:[#allocation7] sm:$0x3f] }
 0x45d   : > { %v9200_v60 = vrot.slane %v9172_v14, %v15739_v6  ;;  %v9203_v16 = vcombine.high %v9193_v46, %v9193_v46  ;;  %v10219_v18 = vcombine.low %v9193_v46, %v9201_v39  ;;  %v10226_v35 = vrot.slane %v10218_v36, %v15739_v6  ;;  %v11179_v39 = vld [vmem:[#allocation7 + $0x10] sm:$0x3f] }
 0x45e   : > { %v8502_v44 = vcombine.low %v7504_v62, %v7518_v0  ;;  %v12122_v3 = vcombine.high %v7504_v62, %v7518_v0  ;;  %v9220_v15 = vcombine.high %v9212_v59, %v9212_v59  ;;  %v8532_v21 = vcombine.low %v8510_v49, %v8517_v56 }
 0x45f   : > { %v10240_v55 = vrot.slane %v9203_v16, %v15739_v6  ;;  %v10257_v58 = vcombine.low %v9186_v28, %v9200_v60  ;;  %v10233_v37 = vrot.slane %v10219_v18, %v15739_v6  ;;  %v12147_v48 = vcombine.high %v9186_v28, %v9200_v60 }
 0x460   : > { %v8524_v63 = vrot.slane %v8502_v44, %v15739_v6  ;;  %v8531_v27 = vrot.slane %v12122_v3, %v15739_v6  ;;  %v9228_v45 = vrot.slane %v9212_v59, %v15739_v6  ;;  %v9242_v33 = vrot.slane %v9220_v15, %v15739_v6 }
 0x461   : > { %v10267_v11 = vrot.slane %v10257_v58, %v15739_v6  ;;  %v10241_v24 = vcombine.low %v10226_v35, %v10233_v37  ;;  %v10274_v23 = vrot.slane %v12147_v48, %v15739_v6  ;;  %v8498_v50 = vrot.slane %v8484_v26, %v15739_v6 }
 0x462   : > { %v8533_v31 = vcombine.low %v8524_v63, %v8531_v27  ;;  %v10255_v47 = vrot.slane %v10240_v55, %v15739_v6  ;;  %v9205_v17 = vcombine.high %v16875_v38, %v16875_v38  ;;  %v10259_v51 = vcombine.low %v9228_v45, %v9242_v33 }
 0x463   : > { %v10248_v8 = vrot.slane %v10241_v24, %v15739_v6  ;;  %v10289_v19 = vcombine.low %v10267_v11, %v10274_v23  ;;  %v12148_v1 = vcombine.high %v9228_v45, %v9242_v33  ;;  %v8540_v4 = vrot.slane %v8532_v21, %v15739_v6 }
 0x464   : > { %v8547_v32 = vrot.slane %v8533_v31, %v15739_v6  ;;  %v10281_v13 = vrot.slane %v10259_v51, %v15739_v6  ;;  %v8499_v7 = vcombine.low %v8491_v42, %v8498_v50  ;;  %v9219_v34 = vrot.slane %v9205_v17, %v15739_v6 }
 0x465   : > { %v10256_v9 = vcombine.low %v10248_v8, %v10255_v47  ;;  %v10288_v53 = vrot.slane %v12148_v1, %v15739_v6  ;;  %v10297_v25 = vrot.slane %v10289_v19, %v15739_v6  ;;  %v11191_v14 = vmax.f32 %v11178_v40, %v11185_v43 }
 0x466   : > { %v8548_v52 = vcombine.low %v8540_v4, %v8547_v32  ;;  %v9221_v5 = vcombine.high %v9219_v34, %v9219_v34  ;;  %v9235_v41 = vrot.slane %v9219_v34, %v15739_v6 }
 0x467   : > { %11082 = vst [vmem:[#allocation6 + $0x38] sm:$0x1f] %v10256_v9  ;;  %v10290_v22 = vcombine.low %v10281_v13, %v10288_v53  ;;  %v11204_v59 = vadd.f32 %v16927_v30, %v11191_v14 }
 0x468   : > { %v8643_v38 = vpack.c.bf16 %v8548_v52, %v8499_v7  ;;  %v9249_v20 = vrot.slane %v9221_v5, %v15739_v6 }
 0x469   : > { %v10304_v10 = vrot.slane %v10290_v22, %v15739_v6  ;;  %v16932_v56 = vmax.f32 %v11204_v59, 0.0 }
 0x46a   : > { %12350 = vmatmul.mubr.msk.bf16.gmra.mrb[36].mxu0 %vm8681_vm10, %v8643_v38  ;;  %v10306_v62 = vcombine.low %v9235_v41, %v9249_v20  ;;  %v12149_v46 = vcombine.high %v9235_v41, %v9249_v20 }
 0x46b   : > { %12353 = vmatprep.mubr.msk.bf16.mxu0 %vm12797_vm9, %v12796_v54  ;;  %v10305_v61 = vcombine.low %v10297_v25, %v10304_v10  ;;  %v11221_v58 = vrot.slane %v16932_v56, 2  ;;  %v11217_v24 = vrot.slane %v16932_v56, 1 }
 0x46c   : > { %v10314_v0 = vrot.slane %v10306_v62, %v15739_v6  ;;  %v10321_v60 = vrot.slane %v12149_v46, %v15739_v6 }
 0x46d   : > { %11083 = vst [vmem:[#allocation6 + $0x40] sm:$0xff] %v10305_v61 }
 0x46e   : > { %v11107_v29 = vld [vmem:[#allocation6 + $0x30] ss:$2 sm:$0x3f]  ;;  %v11133_v12 = vld [vmem:[#allocation6 + $0x31] ss:$2 sm:$0x3f]  ;;  %v10329_v28 = vcombine.low %v10314_v0, %v10321_v60 }
 0x46f   : > { %v11155_v57 = vmax.f32 %v11107_v29, %v11133_v12 }
 0x470   : > { %v10336_v21 = vrot.slane %v10329_v28, %v15739_v6 }
 0x471   : > { %11168 = vst [vmem:[#allocation7 + $0x18] sm:$0x3f] %v11155_v57 }
 0x478   : > { %v11186_v36 = vld [vmem:[#allocation7 + $0x18] sm:$0x3f] }
 0x479   : > { %v11192_v26 = vmax.f32 %v11179_v39, %v11186_v36  ;;  %v12540_v39 = vld [vmem:[%s17500_s5 + $0x40] sm:$0xff]  }
 0x47a   : > { %v12541_v36 = vld [vmem:[%s17500_s5] sm:$0xff]   ;;  %12236 = vmatprep.subr.bf16.mxu1 %v12540_v39 }
 0x47b   : > { %v11205_v49 = vadd.f32 %v16927_v30, %v11192_v26  ;;  %v12542_v26 = vld [vmem:[%s17500_s5 + $0x48] sm:$0xff]   ;;  %12237 = vmatpush3.bf16.msra.mxu1 %v12541_v36  ;;  %v11229_v36 = vrot.slane %v16932_v56, 4 }
 0x47c   : > { %12238 = vmatprep.subr.bf16.mxu1 %v12542_v26 }
 0x47d   : > { %v16936_v55 = vmax.f32 %v11205_v49, 0.0 }
 0x47e   : > { %v8785_v16 = vpop.f32.mrb[16].mxu0 }
 0x47f   : > { %v9254_v44 = vcombine.high %v8785_v16, %v8785_v16  ;;  %v9261_v3 = vrot.slane %v8785_v16, %v15739_v6  ;;  %v12331_v18 = vpop.f32.mrb[17].mxu0  ;;  %v11251_v31 = vrot.slane %v16936_v55, 4  ;;  %v11247_v53 = vrot.slane %v16936_v55, 3 }
 0x480   : > { %v8788_v35 = vpop.f32.mrb[18].mxu0  ;;  %v11255_v40 = vrot.slane %v16936_v55, 5  ;;  %v11225_v16 = vrot.slane %v16932_v56, 3 }
 0x481   : > { %v9268_v15 = vrot.slane %v9254_v44, %v15739_v6  ;;  %v9269_v63 = vcombine.high %v9261_v3, %v9261_v3  ;;  %v9277_v27 = vrot.slane %v9261_v3, %v15739_v6  ;;  %v9303_v37 = vcombine.high %v8788_v35, %v8788_v35  ;;  %v12332_v48 = vpop.f32.mrb[19].mxu0 }
 0x482   : > { %v9310_v11 = vrot.slane %v8788_v35, %v15739_v6  ;;  %v12470_v12 = vpack.i.bf16 %v11221_v58, %v11251_v31  ;;  %v12465_v46 = vpack.i.bf16 %v11217_v24, %v11247_v53  ;;  %v12475_v18 = vpack.i.bf16 %v11225_v16, %v11255_v40  ;;  %v12543_v35 = vld [vmem:[%s17500_s5 + $0x8] sm:$0xff]   ;;  %v12545_v31 = vld [vmem:[%s17500_s5 + $0x10] sm:$0xff]   ;;  %v12546_v24 = vld [vmem:[%s17500_s5 + $0x58] sm:$0xff]  }
 0x483   : > { %v9270_v23 = vcombine.high %v9268_v15, %v9268_v15  ;;  %v9284_v45 = vrot.slane %v9268_v15, %v15739_v6  ;;  %v9291_v33 = vrot.slane %v9269_v63, %v15739_v6  ;;  %v9299_v42 = vcombine.high %v9277_v27, %v9277_v27  ;;  %v12544_v63 = vld [vmem:[%s17500_s5 + $0x50] sm:$0xff]   ;;  %12239 = vmatpush3.bf16.msra.mxu1 %v12543_v35 }
 0x484   : > { %v10328_v50 = vrot.slane %v9277_v27, %v15739_v6  ;;  %v9317_v8 = vrot.slane %v9303_v37, %v15739_v6  ;;  %v9318_v47 = vcombine.high %v9310_v11, %v9310_v11  ;;  %v9326_v19 = vrot.slane %v9310_v11, %v15739_v6  ;;  %12471 = vrot.lane.b32.xlu1 %v12470_v12, %s17555_s13 }
 0x485   : > { %v9298_v17 = vrot.slane %v9270_v23, %v15739_v6  ;;  %v9300_v51 = vcombine.high %v9284_v45, %v9284_v45  ;;  %v9301_v1 = vcombine.high %v9291_v33, %v9291_v33  ;;  %v10345_v4 = vcombine.low %v9291_v33, %v9299_v42  ;;  %12466 = vrot.lane.b32.xlu0 %v12465_v46, %s17564_s24  ;;  %v12547_v23 = vld [vmem:[%s17500_s5 + $0x18] sm:$0xff]   ;;  %v12549_v33 = vld [vmem:[%s17500_s5 + $0x20] sm:$0xff]  }
 0x486   : > { %v10343_v32 = vrot.slane %v10328_v50, %v15739_v6  ;;  %v9319_v9 = vcombine.high %v9317_v8, %v9317_v8  ;;  %v9340_v13 = vrot.slane %v9318_v47, %v15739_v6  ;;  %v16955_v25 = vrot.slane %v9317_v8, %v15739_v6  ;;  %12240 = vmatprep.subr.bf16.mxu1 %v12544_v63 }
 0x487   : > { %v10346_v7 = vcombine.low %v9301_v1, %v9284_v45  ;;  %v10347_v52 = vcombine.low %v9298_v17, %v9300_v51  ;;  %v9302_v34 = vcombine.high %v9298_v17, %v9298_v17  ;;  %v9348_v10 = vcombine.high %v9326_v19, %v9326_v19  ;;  %12241 = vmatpush3.bf16.msra.mxu1 %v12545_v31  ;;  %v12548_v45 = vld [vmem:[%s17500_s5 + $0x60] sm:$0xff]  }
 0x488   : > { %v10344_v22 = vcombine.low %v10336_v21, %v10343_v32  ;;  %v16958_v38 = vrot.slane %v9319_v9, %v15739_v6  ;;  %v9350_v5 = vcombine.high %v9340_v13, %v9340_v13  ;;  %v10355_v61 = vrot.slane %v10345_v4, %v15739_v6  ;;  %12242 = vmatprep.subr.bf16.mxu1 %v12546_v24 }
 0x489   : > { %v10362_v43 = vrot.slane %v10346_v7, %v15739_v6  ;;  %v10348_v29 = vcombine.low %v9302_v34, %v9326_v19  ;;  %v10394_v57 = vcombine.low %v9340_v13, %v9348_v10  ;;  %v10369_v14 = vrot.slane %v10347_v52, %v15739_v6  ;;  %12476 = vrot.lane.b32.xlu0 %v12475_v18, %s17563_s12  ;;  %v12550_v7 = vld [vmem:[%s17500_s5 + $0x68] sm:$0xff]  }
 0x48a   : > { %11084 = vst [vmem:[#allocation6 + $0x48] sm:$0x1f] %v10344_v22  ;;  %v10395_v20 = vcombine.low %v9350_v5, %v16955_v25  ;;  %v10416_v60 = vrot.slane %v16958_v38, %v15739_v6  ;;  %v12551_v52 = vld [vmem:[%s17500_s5 + $0x28] sm:$0xff]   ;;  %v12150_v10 = vcombine.high %v16955_v25, %v16958_v38 }
 0x48b   : > { %v10377_v41 = vcombine.low %v10355_v61, %v10362_v43  ;;  %v10376_v62 = vrot.slane %v10348_v29, %v15739_v6  ;;  %v10402_v59 = vrot.slane %v10394_v57, %v15739_v6  ;;  %12243 = vmatpush3.bf16.msra.mxu1 %v12547_v23 }
 0x48c   : > { %v10409_v0 = vrot.slane %v10395_v20, %v15739_v6  ;;  %v10431_v15 = vrot.slane %v10416_v60, %v15739_v6  ;;  %12244 = vmatprep.subr.bf16.mxu1 %v12548_v45  ;;  %v10443_v46 = vrot.slane %v12150_v10, %v15739_v6 }
 0x48d   : > { %v10378_v28 = vcombine.low %v10369_v14, %v10376_v62  ;;  %v10385_v44 = vrot.slane %v10377_v41, %v15739_v6 }
 0x48e   : > { %v10417_v49 = vcombine.low %v10402_v59, %v10409_v0 }
 0x48f   : > { %v10392_v3 = vrot.slane %v10378_v28, %v15739_v6  ;;  %12245 = vmatpush3.bf16.msra.mxu1 %v12549_v33 }
 0x490   : > { %v10424_v58 = vrot.slane %v10417_v49, %v15739_v6  ;;  %12246 = vmatprep.subr.bf16.mxu1 %v12550_v7 }
 0x491   : > { %v11109_v27 = vld [vmem:[#allocation6 + $0x40] ss:$2 sm:$0x3f]  ;;  %v11135_v37 = vld [vmem:[#allocation6 + $0x41] ss:$2 sm:$0x3f]  ;;  %v10393_v48 = vcombine.low %v10385_v44, %v10392_v3 }
 0x492   : > { %v11156_v21 = vmax.f32 %v11109_v27, %v11135_v37  ;;  %v10432_v11 = vcombine.low %v10424_v58, %v10431_v15  ;;  %v11233_v58 = vrot.slane %v16932_v56, 5 }
 0x493   : > { %11085 = vst [vmem:[#allocation6 + $0x50] sm:$0xff] %v10393_v48  ;;  %12247 = vmatpush3.bf16.msra.mxu1 %v12551_v52  ;;  %v12552_v52 = vld [vmem:[%s17500_s5 + $0x70] sm:$0xff]  }
 0x494   : > { %11169 = vst [vmem:[#allocation7 + $0x20] sm:$0x3f] %v11156_v21  ;;  %11086 = vst [vmem:[#allocation6 + $0x58] sm:$0x1f] %v10432_v11  ;;  %12248 = vmatprep.subr.bf16.mxu1 %v12552_v52 }
 0x49b   : > { %v11111_v42 = vld [vmem:[#allocation6 + $0x50] ss:$2 sm:$0x3f]  ;;  %v11137_v50 = vld [vmem:[#allocation6 + $0x51] ss:$2 sm:$0x3f] }
 0x49c   : > { %v11157_v8 = vmax.f32 %v11111_v42, %v11137_v50  ;;  %v11180_v4 = vld [vmem:[#allocation7 + $0x20] sm:$0x3f]  ;;  %v11241_v42 = vrot.slane %v16936_v55, 1 }
 0x49e   : > { %11170 = vst [vmem:[#allocation7 + $0x28] sm:$0x3f] %v11157_v8 }
 0x4a2   : > { %v8793_v47 = vpop.f32.mrb[20].mxu0 }
 0x4a3   : > { %v9352_v19 = vcombine.high %v8793_v47, %v8793_v47  ;;  %v9359_v17 = vrot.slane %v8793_v47, %v15739_v6  ;;  %v12335_v51 = vpop.f32.mrb[21].mxu0 }
 0x4a4   : > { %v8796_v1 = vpop.f32.mrb[22].mxu0 }
 0x4a5   : > { %v9366_v32 = vrot.slane %v9352_v19, %v15739_v6  ;;  %v9367_v9 = vcombine.high %v9359_v17, %v9359_v17  ;;  %v12336_v13 = vpop.f32.mrb[23].mxu0  ;;  %v11187_v53 = vld [vmem:[#allocation7 + $0x28] sm:$0x3f]  ;;  %v9408_v34 = vrot.slane %v8796_v1, %v15739_v6  ;;  %v9375_v61 = vrot.slane %v9359_v17, %v15739_v6 }
 0x4a6   : > { %v11193_v22 = vmax.f32 %v11180_v4, %v11187_v53  ;;  %v9401_v63 = vcombine.high %v8796_v1, %v8796_v1 }
 0x4a7   : > { %v9368_v5 = vcombine.high %v9366_v32, %v9366_v32  ;;  %v9389_v43 = vrot.slane %v9367_v9, %v15739_v6  ;;  %v9416_v29 = vcombine.high %v9408_v34, %v9408_v34  ;;  %v9424_v12 = vrot.slane %v9408_v34, %v15739_v6  ;;  %v12553_v34 = vld [vmem:[%s17500_s5 + $0x30] sm:$0xff]  }
 0x4a8   : > { %v11206_v57 = vadd.f32 %v16927_v30, %v11193_v22  ;;  %v9382_v20 = vrot.slane %v9366_v32, %v15739_v6  ;;  %v9415_v8 = vrot.slane %v9401_v63, %v15739_v6  ;;  %12249 = vmatpush3.bf16.msra.mxu1 %v12553_v34 }
 0x4a9   : > { %v9396_v40 = vrot.slane %v9368_v5, %v15739_v6  ;;  %v10434_v41 = vcombine.low %v9375_v61, %v9389_v43  ;;  %v12151_v14 = vcombine.high %v9375_v61, %v9389_v43  ;;  %v9438_v25 = vrot.slane %v9416_v29, %v15739_v6 }
 0x4aa   : > { %v9446_v38 = vcombine.high %v9424_v12, %v9424_v12  ;;  %v17026_v62 = vmax.f32 %v11206_v57, 0.0  ;;  %v9417_v19 = vcombine.high %v9415_v8, %v9415_v8  ;;  %v9431_v17 = vrot.slane %v9415_v8, %v15739_v6 }
 0x4ab   : > { %v10436_v59 = vcombine.low %v9382_v20, %v9396_v40  ;;  %v10450_v0 = vrot.slane %v10434_v41, %v15739_v6  ;;  %v12152_v60 = vcombine.high %v9382_v20, %v9396_v40  ;;  %v10483_v39 = vcombine.low %v9424_v12, %v9438_v25 }
 0x4ac   : > { %v10457_v26 = vrot.slane %v12151_v14, %v15739_v6  ;;  %v10504_v3 = vrot.slane %v9446_v38, %v15739_v6  ;;  %v12480_v18 = vpack.i.bf16 %v11229_v36, %v17026_v62  ;;  %v11263_v15 = vrot.slane %v17026_v62, 1 }
 0x4ad   : > { %v10464_v28 = vrot.slane %v10436_v59, %v15739_v6  ;;  %v10465_v16 = vcombine.low %v10443_v46, %v10450_v0  ;;  %v10490_v49 = vrot.slane %v12152_v60, %v15739_v6  ;;  %v10497_v44 = vrot.slane %v10483_v39, %v15739_v6 }
 0x4ae   : > { %12481 = vrot.lane.b32.xlu1 %v12480_v18, %s17562_s30  ;;  %v11267_v37 = vrot.slane %v17026_v62, 2  ;;  %v12485_v11 = vpack.i.bf16 %v11233_v58, %v11263_v15  ;;  %v11271_v31 = vrot.slane %v17026_v62, 3  ;;  %v10519_v23 = vrot.slane %v10504_v3, %v15739_v6 }
 0x4af   : > { %v10466_v35 = vcombine.low %v10457_v26, %v10464_v28  ;;  %v10505_v27 = vcombine.low %v10490_v49, %v10497_v44  ;;  %v10473_v48 = vrot.slane %v10465_v16, %v15739_v6  ;;  %v9445_v51 = vrot.slane %v9417_v19, %v15739_v6  ;;  %v12554_v16 = vld [vmem:[%s17500_s5 + $0x78] sm:$0xff]  }
 0x4b0   : > { %v12490_v45 = vpack.i.bf16 %v16936_v55, %v11267_v37  ;;  %12486 = vrot.lane.b32.xlu0 %v12485_v11, %s12798_s25  ;;  %v12495_v47 = vpack.i.bf16 %v11241_v42, %v11271_v31  ;;  %v9447_v1 = vcombine.high %v9431_v17, %v9431_v17  ;;  %v9448_v4 = vcombine.high %v9438_v25, %v9438_v25  ;;  %v12555_v49 = vld [vmem:[%s17500_s5 + $0x38] sm:$0xff]  }
 0x4b1   : > { %v10480_v21 = vrot.slane %v10466_v35, %v15739_v6  ;;  %v10512_v24 = vrot.slane %v10505_v27, %v15739_v6  ;;  %v9449_v25 = vcombine.high %v9445_v51, %v9445_v51  ;;  %12250 = vmatprep.subr.bf16.mxu1 %v12554_v16 }
 0x4b2   : > { %12491 = vrot.lane.b32.xlu1 %v12490_v45, %s17531_s22  ;;  %v10521_v53 = vcombine.low %v9448_v4, %v9431_v17  ;;  %v10522_v7 = vcombine.low %v9445_v51, %v9447_v1  ;;  %12251 = vmatpush3.bf16.msra.mxu1 %v12555_v49 }
 0x4b3   : > { %v10481_v33 = vcombine.low %v10473_v48, %v10480_v21  ;;  %v10520_v50 = vcombine.low %v10512_v24, %v10519_v23 }
 0x4b4   : > { %12496 = vrot.lane.b32.xlu0 %v12495_v47, %s17532_s2  ;;  %v10531_v43 = vrot.slane %v10521_v53, %v15739_v6  ;;  %v10538_v29 = vrot.slane %v10522_v7, %v15739_v6 }
 0x4b5   : > { %11087 = vst [vmem:[#allocation6 + $0x60] sm:$0xff] %v10481_v33  ;;  %11088 = vst [vmem:[#allocation6 + $0x68] sm:$0x1f] %v10520_v50 }
 0x4b6   : > { %v10553_v39 = vcombine.low %v10531_v43, %v10538_v29 }
 0x4b8   : > { %v10561_v4 = vrot.slane %v10553_v39, %v15739_v6 }
 0x4bc   : > { %v11113_v32 = vld [vmem:[#allocation6 + $0x60] ss:$2 sm:$0x3f]  ;;  %v11139_v9 = vld [vmem:[#allocation6 + $0x61] ss:$2 sm:$0x3f] }
 0x4bd   : > { %v11158_v13 = vmax.f32 %v11113_v32, %v11139_v9 }
 0x4bf   : > { %11171 = vst [vmem:[#allocation7 + $0x30] sm:$0x3f] %v11158_v13 }
 0x4c1   : > { %v8801_v22 = vpop.f32.mrb[24].mxu0 }
 0x4c2   : > { %v9450_v10 = vcombine.high %v8801_v22, %v8801_v22  ;;  %v9457_v5 = vrot.slane %v8801_v22, %v15739_v6  ;;  %v12339_v61 = vpop.f32.mrb[25].mxu0 }
 0x4c3   : > { %v8804_v12 = vpop.f32.mrb[26].mxu0 }
 0x4c4   : > { %v9464_v57 = vrot.slane %v9450_v10, %v15739_v6  ;;  %v9465_v20 = vcombine.high %v9457_v5, %v9457_v5  ;;  %v9473_v40 = vrot.slane %v9457_v5, %v15739_v6  ;;  %v9499_v41 = vcombine.high %v8804_v12, %v8804_v12  ;;  %v12340_v14 = vpop.f32.mrb[27].mxu0 }
 0x4c5   : > { %v9506_v38 = vrot.slane %v8804_v12, %v15739_v6 }
 0x4c6   : > { %v9466_v46 = vcombine.high %v9464_v57, %v9464_v57  ;;  %v9480_v59 = vrot.slane %v9464_v57, %v15739_v6  ;;  %v9487_v0 = vrot.slane %v9465_v20, %v15739_v6  ;;  %v9495_v60 = vcombine.high %v9473_v40, %v9473_v40 }
 0x4c7   : > { %v10523_v36 = vcombine.low %v9449_v25, %v9473_v40  ;;  %v9513_v26 = vrot.slane %v9499_v41, %v15739_v6  ;;  %v9514_v28 = vcombine.high %v9506_v38, %v9506_v38  ;;  %v9522_v27 = vrot.slane %v9506_v38, %v15739_v6 }
 0x4c8   : > { %v9494_v44 = vrot.slane %v9466_v46, %v15739_v6  ;;  %v9496_v3 = vcombine.high %v9480_v59, %v9480_v59  ;;  %v9497_v18 = vcombine.high %v9487_v0, %v9487_v0  ;;  %v10524_v35 = vcombine.low %v9487_v0, %v9495_v60 }
 0x4c9   : > { %v10545_v58 = vrot.slane %v10523_v36, %v15739_v6  ;;  %v9515_v63 = vcombine.high %v9513_v26, %v9513_v26  ;;  %v9536_v37 = vrot.slane %v9514_v28, %v15739_v6  ;;  %v9529_v24 = vrot.slane %v9513_v26, %v15739_v6 }
 0x4ca   : > { %v9498_v48 = vcombine.high %v9494_v44, %v9494_v44  ;;  %v10552_v21 = vrot.slane %v10524_v35, %v15739_v6  ;;  %v10570_v11 = vcombine.low %v9497_v18, %v9480_v59  ;;  %v10571_v31 = vcombine.low %v9494_v44, %v9496_v3 }
 0x4cb   : > { %v9543_v23 = vrot.slane %v9515_v63, %v15739_v6  ;;  %v10609_v45 = vcombine.low %v9522_v27, %v9536_v37  ;;  %v12153_v33 = vcombine.high %v9522_v27, %v9536_v37 }
 0x4cc   : > { %v10554_v42 = vcombine.low %v10545_v58, %v10552_v21  ;;  %v10578_v50 = vrot.slane %v10570_v11, %v15739_v6  ;;  %v10585_v8 = vrot.slane %v10571_v31, %v15739_v6  ;;  %v10592_v47 = vrot.slane %v9498_v48, %v15739_v6 }
 0x4cd   : > { %v10611_v19 = vcombine.low %v9529_v24, %v9543_v23  ;;  %v12154_v17 = vcombine.high %v9529_v24, %v9543_v23  ;;  %v10619_v51 = vrot.slane %v10609_v45, %v15739_v6  ;;  %v10626_v1 = vrot.slane %v12153_v33, %v15739_v6 }
 0x4ce   : > { %v10568_v32 = vrot.slane %v10554_v42, %v15739_v6  ;;  %v10593_v9 = vcombine.low %v10578_v50, %v10585_v8  ;;  %v10607_v22 = vrot.slane %v10592_v47, %v15739_v6 }
 0x4cf   : > { %v10633_v13 = vrot.slane %v10611_v19, %v15739_v6  ;;  %v10640_v53 = vrot.slane %v12154_v17, %v15739_v6  ;;  %v10641_v7 = vcombine.low %v10619_v51, %v10626_v1 }
 0x4d0   : > { %v10569_v52 = vcombine.low %v10561_v4, %v10568_v32  ;;  %v10600_v34 = vrot.slane %v10593_v9, %v15739_v6 }
 0x4d1   : > { %v10642_v10 = vcombine.low %v10633_v13, %v10640_v53  ;;  %v10649_v61 = vrot.slane %v10641_v7, %v15739_v6 }
 0x4d2   : > { %v10608_v5 = vcombine.low %v10600_v34, %v10607_v22  ;;  %11089 = vst [vmem:[#allocation6 + $0x70] sm:$0xff] %v10569_v52 }
 0x4d3   : > { %v10656_v43 = vrot.slane %v10642_v10, %v15739_v6 }
 0x4d4   : > { %11090 = vst [vmem:[#allocation6 + $0x78] sm:$0x1f] %v10608_v5 }
 0x4d5   : > { %v10657_v29 = vcombine.low %v10649_v61, %v10656_v43 }
 0x4d7   : > { %11091 = vst [vmem:[#allocation6 + $0x80] sm:$0xff] %v10657_v29 }
 0x4db   : > { %v11115_v12 = vld [vmem:[#allocation6 + $0x70] ss:$2 sm:$0x3f]  ;;  %v11141_v57 = vld [vmem:[#allocation6 + $0x71] ss:$2 sm:$0x3f] }
 0x4dc   : > { %v11159_v20 = vmax.f32 %v11115_v12, %v11141_v57  ;;  %v11245_v57 = vrot.slane %v16936_v55, 2 }
 0x4de   : > { %11172 = vst [vmem:[#allocation7 + $0x38] sm:$0x3f] %v11159_v20 }
 0x4ef   : > { %v8809_v40 = vpop.f32.mrb[28].mxu0 }
 0x4f0   : > { %v9548_v41 = vcombine.high %v8809_v40, %v8809_v40  ;;  %v9555_v14 = vrot.slane %v8809_v40, %v15739_v6  ;;  %v12343_v25 = vpop.f32.mrb[29].mxu0 }
 0x4f1   : > { %v8812_v38 = vpop.f32.mrb[30].mxu0 }
 0x4f2   : > { %v9562_v46 = vrot.slane %v9548_v41, %v15739_v6  ;;  %v9563_v59 = vcombine.high %v9555_v14, %v9555_v14  ;;  %v9597_v0 = vcombine.high %v8812_v38, %v8812_v38  ;;  %v12344_v60 = vpop.f32.mrb[31].mxu0  ;;  %v9604_v39 = vrot.slane %v8812_v38, %v15739_v6 }
 0x4f3   : > { %v9571_v26 = vrot.slane %v9555_v14, %v15739_v6 }
 0x4f4   : > { %v9564_v36 = vcombine.high %v9562_v46, %v9562_v46  ;;  %v9578_v28 = vrot.slane %v9562_v46, %v15739_v6  ;;  %v9585_v16 = vrot.slane %v9563_v59, %v15739_v6  ;;  %v9611_v49 = vrot.slane %v9597_v0, %v15739_v6 }
 0x4f5   : > { %v9612_v44 = vcombine.high %v9604_v39, %v9604_v39  ;;  %v9620_v3 = vrot.slane %v9604_v39, %v15739_v6 }
 0x4f6   : > { %v9592_v18 = vrot.slane %v9564_v36, %v15739_v6  ;;  %v9594_v35 = vcombine.high %v9578_v28, %v9578_v28  ;;  %v10658_v58 = vcombine.low %v9571_v26, %v9585_v16  ;;  %v12155_v63 = vcombine.high %v9571_v26, %v9585_v16  ;;  %v12472_v61 = vpop.permute.xlu1 %12471 }
 0x4f7   : > { %v10680_v27 = vrot.slane %v9578_v28, %v15739_v6  ;;  %v9634_v37 = vrot.slane %v9612_v44, %v15739_v6  ;;  %v9642_v24 = vcombine.high %v9620_v3, %v9620_v3  ;;  %v9627_v45 = vrot.slane %v9611_v49, %v15739_v6  ;;  %v12467_v5 = vpop.permute.xlu0 %12466 }
 0x4f8   : > { %v10666_v48 = vrot.slane %v10658_v58, %v15739_v6  ;;  %v10673_v21 = vrot.slane %v12155_v63, %v15739_v6  ;;  %v10697_v11 = vcombine.low %v9592_v18, %v9594_v35  ;;  %v9596_v31 = vcombine.high %v9592_v18, %v9592_v18 }
 0x4f9   : > { %v9644_v33 = vcombine.high %v9634_v37, %v9634_v37  ;;  %v10695_v50 = vrot.slane %v10680_v27, %v15739_v6  ;;  %v10699_v8 = vcombine.low %v9634_v37, %v9642_v24  ;;  %v12469_v43 = vunpack.i.h.bf16 %v12467_v5 }
 0x4fa   : > { %v10681_v23 = vcombine.low %v10666_v48, %v10673_v21  ;;  %v10698_v42 = vcombine.low %v9596_v31, %v9620_v3  ;;  %v10707_v17 = vrot.slane %v10697_v11, %v15739_v6  ;;  %v12468_v29 = vunpack.i.l.bf16 %v12467_v5 }
 0x4fb   : > { %v10700_v19 = vcombine.low %v9644_v33, %v9627_v45  ;;  %v10721_v4 = vrot.slane %v10699_v8, %v15739_v6  ;;  %v12477_v12 = vpop.permute.xlu0 %12476  ;;  %v12474_v20 = vunpack.i.h.bf16 %v12472_v61  ;;  %v12473_v40 = vunpack.i.l.bf16 %v12472_v61 }
 0x4fc   : > { %v10688_v47 = vrot.slane %v10681_v23, %v15739_v6  ;;  %v10714_v51 = vrot.slane %v10698_v42, %v15739_v6  ;;  %v11275_v41 = vsel %vm6210_vm1, %v16932_v56, %v12469_v43  ;;  %v11285_v14 = vsel %vm6210_vm1, %v11245_v57, %v12468_v29 }
 0x4fd   : > { %v10728_v32 = vrot.slane %v10700_v19, %v15739_v6  ;;  %v12479_v25 = vunpack.i.h.bf16 %v12477_v12  ;;  %v12478_v38 = vunpack.i.l.bf16 %v12477_v12  ;;  %v9613_v46 = vcombine.high %v9611_v49, %v9611_v49 }
 0x4fe   : > { %v10696_v1 = vcombine.low %v10688_v47, %v10695_v50  ;;  %v10729_v9 = vcombine.low %v10707_v17, %v10714_v51  ;;  %v11276_v0 = vsel %vm6264_vm3, %v11275_v41, %v12474_v20  ;;  %v11286_v60 = vsel %vm6264_vm3, %v11285_v14, %v12473_v40 }
 0x4ff   : > { %v10730_v13 = vcombine.low %v10721_v4, %v10728_v32  ;;  %v11277_v26 = vsel %vm6318_vm5, %v11276_v0, %v12479_v25  ;;  %v11287_v55 = vsel %vm6318_vm5, %v11286_v60, %v12478_v38  ;;  %v9641_v28 = vrot.slane %v9613_v46, %v15739_v6 }
 0x500   : > { %11092 = vst [vmem:[#allocation6 + $0x88] sm:$0x1f] %v10696_v1  ;;  %v10737_v53 = vrot.slane %v10729_v9, %v15739_v6  ;;  %v9643_v56 = vcombine.high %v9627_v45, %v9627_v45 }
 0x501   : > { %v10744_v7 = vrot.slane %v10730_v13, %v15739_v6  ;;  %v9645_v8 = vcombine.high %v9641_v28, %v9641_v28 }
 0x502   : > { %v10746_v48 = vcombine.low %v9641_v28, %v9643_v56 }
 0x503   : > { %v10745_v52 = vcombine.low %v10737_v53, %v10744_v7 }
 0x504   : > { %v10754_v32 = vrot.slane %v10746_v48, %v15739_v6 }
 0x505   : > { %11093 = vst [vmem:[#allocation6 + $0x90] sm:$0xff] %v10745_v52 }
 0x507   : > { %v11117_v34 = vld [vmem:[#allocation6 + $0x80] ss:$2 sm:$0x3f]  ;;  %v11143_v22 = vld [vmem:[#allocation6 + $0x81] ss:$2 sm:$0x3f] }
 0x508   : > { %v11160_v10 = vmax.f32 %v11117_v34, %v11143_v22 }
 0x50a   : > { %11173 = vst [vmem:[#allocation7 + $0x40] sm:$0x3f] %v11160_v10 }
 0x520   : > { %v12482_v59 = vpop.permute.xlu1 %12481 }
 0x521   : > { %v12484_v39 = vunpack.i.h.bf16 %v12482_v59  ;;  %v12483_v36 = vunpack.i.l.bf16 %v12482_v59 }
 0x522   : > { %v12487_v49 = vpop.permute.xlu0 %12486 }
 0x523   : > { %v11278_v16 = vsel %vm6372_vm7, %v11277_v26, %v12484_v39  ;;  %v11288_v44 = vsel %vm6372_vm7, %v11287_v55, %v12483_v36  ;;  %v12489_v3 = vunpack.i.h.bf16 %v12487_v49  ;;  %v12488_v18 = vunpack.i.l.bf16 %v12487_v49 }
 0x524   : > { %v12492_v35 = vpop.permute.xlu1 %12491 }
 0x525   : > { %v12494_v58 = vunpack.i.h.bf16 %v12492_v35  ;;  %v12493_v63 = vunpack.i.l.bf16 %v12492_v35  ;;  %v11280_v27 = vsel %vm11279_vm11, %v11278_v16, %v12489_v3  ;;  %v11289_v37 = vsel %vm11279_vm11, %v11288_v44, %v12488_v18 }
 0x526   : > { %v12497_v31 = vpop.permute.xlu0 %12496 }
 0x527   : > { %v11282_v21 = vsel %vm11281_vm12, %v11280_v27, %v12494_v58  ;;  %v8817_v11 = vpop.f32.mrb[32].mxu0  ;;  %v11290_v24 = vsel %vm11281_vm12, %v11289_v37, %v12493_v63  ;;  %v12499_v42 = vunpack.i.h.bf16 %v12497_v31  ;;  %v12498_v50 = vunpack.i.l.bf16 %v12497_v31 }
 0x528   : > { %v9646_v23 = vcombine.high %v8817_v11, %v8817_v11  ;;  %v9653_v45 = vrot.slane %v8817_v11, %v15739_v6  ;;  %v12347_v33 = vpop.f32.mrb[33].mxu0 }
 0x529   : > { %v8820_v47 = vpop.f32.mrb[34].mxu0  ;;  %v11291_v13 = vsel %vm11283_vm13, %v11290_v24, %v12498_v50  ;;  %v11284_v53 = vsel %vm11283_vm13, %v11282_v21, %v12499_v42 }
 0x52a   : > { %v9660_v19 = vrot.slane %v9646_v23, %v15739_v6  ;;  %v9661_v17 = vcombine.high %v9653_v45, %v9653_v45  ;;  %v9669_v51 = vrot.slane %v9653_v45, %v15739_v6  ;;  %v9695_v1 = vcombine.high %v8820_v47, %v8820_v47  ;;  %v12348_v4 = vpop.f32.mrb[35].mxu0 }
 0x52b   : > { %v9702_v9 = vrot.slane %v8820_v47, %v15739_v6  ;;  %v11389_v43 = vpack.c.bf16 %v11291_v13, %v11291_v13  ;;  %v11388_v25 = vpack.c.bf16 %v11284_v53, %v11284_v53  ;;  %v11181_v13 = vld [vmem:[#allocation7 + $0x30] sm:$0x3f] }
 0x52c   : > { %v9662_v7 = vcombine.high %v9660_v19, %v9660_v19  ;;  %v9676_v52 = vrot.slane %v9660_v19, %v15739_v6  ;;  %v9683_v34 = vrot.slane %v9661_v17, %v15739_v6  ;;  %v10747_v22 = vcombine.low %v9645_v8, %v9669_v51  ;;  %v11188_v17 = vld [vmem:[#allocation7 + $0x38] sm:$0x3f] }
 0x52d   : > { %v9709_v10 = vrot.slane %v9695_v1, %v15739_v6  ;;  %v9710_v5 = vcombine.high %v9702_v9, %v9702_v9  ;;  %v9718_v61 = vrot.slane %v9702_v9, %v15739_v6  ;;  %11717 = vmatprep.mubr.bf16.mxu1 %v11389_v43 }
 0x52e   : > { %v9690_v29 = vrot.slane %v9662_v7, %v15739_v6  ;;  %v10761_v12 = vrot.slane %v10747_v22, %v15739_v6  ;;  %v10768_v57 = vrot.slane %v9683_v34, %v15739_v6  ;;  %v12156_v20 = vcombine.high %v9669_v51, %v9683_v34  ;;  %11718 = vmatmul.mubr.bf16.vlgmr.msra.gmra.mrb[0].mxu1 %v11388_v25 }
 0x52f   : > { %v9711_v40 = vcombine.high %v9709_v10, %v9709_v10  ;;  %v9725_v41 = vrot.slane %v9709_v10, %v15739_v6  ;;  %v9732_v14 = vrot.slane %v9710_v5, %v15739_v6 }
 0x530   : > { %v10769_v38 = vcombine.low %v10754_v32, %v10761_v12  ;;  %v10783_v46 = vrot.slane %v10768_v57, %v15739_v6  ;;  %v10786_v59 = vcombine.low %v9676_v52, %v9690_v29  ;;  %v12157_v0 = vcombine.high %v9676_v52, %v9690_v29 }
 0x531   : > { %v10795_v60 = vrot.slane %v12156_v20, %v15739_v6  ;;  %v9739_v39 = vrot.slane %v9711_v40, %v15739_v6  ;;  %v9741_v36 = vcombine.high %v9725_v41, %v9725_v41  ;;  %v10788_v26 = vcombine.low %v9718_v61, %v9732_v14 }
 0x532   : > { %v10776_v55 = vrot.slane %v10769_v38, %v15739_v6  ;;  %v10802_v28 = vrot.slane %v10786_v59, %v15739_v6  ;;  %v10809_v56 = vrot.slane %v12157_v0, %v15739_v6  ;;  %v12158_v16 = vcombine.high %v9718_v61, %v9732_v14 }
 0x533   : > { %v10816_v44 = vrot.slane %v10788_v26, %v15739_v6  ;;  %v10835_v49 = vcombine.low %v9725_v41, %v9739_v39  ;;  %v10856_v27 = vrot.slane %v9741_v36, %v15739_v6  ;;  %v9743_v53 = vcombine.high %v9739_v39, %v9739_v39  ;;  %v11182_v39 = vld [vmem:[#allocation7 + $0x40] sm:$0x3f] }
 0x534   : > { %v10784_v3 = vcombine.low %v10776_v55, %v10783_v46  ;;  %v10817_v18 = vcombine.low %v10795_v60, %v10802_v28  ;;  %v10842_v58 = vrot.slane %v12158_v16, %v15739_v6  ;;  %v11194_v52 = vmax.f32 %v11181_v13, %v11188_v17  ;;  %v12558_v17 = vld [vmem:[%s17500_s5 + $0xc8] sm:$0xff]   ;;  %v12560_v13 = vld [vmem:[%s17500_s5 + $0xd0] sm:$0xff]  }
 0x535   : > { %v10818_v35 = vcombine.low %v10809_v56, %v10816_v44  ;;  %v10849_v63 = vrot.slane %v10835_v49, %v15739_v6  ;;  %v10871_v24 = vrot.slane %v10856_v27, %v15739_v6 }
 0x536   : > { %v10825_v37 = vrot.slane %v10817_v18, %v15739_v6  ;;  %11094 = vst [vmem:[#allocation6 + $0x98] sm:$0x1f] %v10784_v3  ;;  %v11207_v38 = vadd.f32 %v16927_v30, %v11194_v52 }
 0x537   : > { %v10832_v48 = vrot.slane %v10818_v35, %v15739_v6  ;;  %v10857_v21 = vcombine.low %v10842_v58, %v10849_v63 }
 0x539   : > { %v10833_v11 = vcombine.low %v10825_v37, %v10832_v48  ;;  %v10864_v31 = vrot.slane %v10857_v21, %v15739_v6  ;;  %v17183_v37 = vmax.f32 %v11207_v38, 0.0 }
 0x53b   : > { %v10872_v23 = vcombine.low %v10864_v31, %v10871_v24  ;;  %11095 = vst [vmem:[#allocation6 + $0xa0] sm:$0xff] %v10833_v11  ;;  %v11300_v52 = vrot.slane %v17183_v37, 5 }
 0x53d   : > { %v11119_v45 = vld [vmem:[#allocation6 + $0x90] ss:$2 sm:$0x3f]  ;;  %v11145_v33 = vld [vmem:[#allocation6 + $0x91] ss:$2 sm:$0x3f] }
 0x53e   : > { %11096 = vst [vmem:[#allocation6 + $0xa8] sm:$0x1f] %v10872_v23  ;;  %v11161_v42 = vmax.f32 %v11119_v45, %v11145_v33  ;;  %v8825_v50 = vpop.f32.mrb[36].mxu0  ;;  %v12556_v23 = vld [vmem:[%s17500_s5 + $0xc0] sm:$0xff]  }
 0x53f   : > { %v9744_v8 = vcombine.high %v8825_v50, %v8825_v50  ;;  %v9751_v47 = vrot.slane %v8825_v50, %v15739_v6  ;;  %v12351_v19 = vpop.f32.mrb[37].mxu0  ;;  %12258 = vmatprep.subr.bf16.mxu1 %v12556_v23  ;;  %v5350_v23 = vld [vmem:[#allocation5 + $0xea] sm:$0x1f] }
 0x540   : > { %11174 = vst [vmem:[#allocation7 + $0x48] sm:$0x3f] %v11161_v42  ;;  %v17165_v51 = vpop.f32.mrb[38].mxu0  ;;  %v11296_v42 = vrot.slane %v17183_v37, 4 }
 0x541   : > { %v9758_v1 = vrot.slane %v9744_v8, %v15739_v6  ;;  %v9759_v4 = vcombine.high %v9751_v47, %v9751_v47  ;;  %v9767_v32 = vrot.slane %v9751_v47, %v15739_v6  ;;  %v12352_v9 = vpop.f32.mrb[39].mxu0  ;;  %v9800_v7 = vrot.slane %v17165_v51, %v15739_v6 }
 0x543   : > { %v9760_v34 = vcombine.high %v9758_v1, %v9758_v1  ;;  %v9774_v22 = vrot.slane %v9758_v1, %v15739_v6  ;;  %v9781_v10 = vrot.slane %v9759_v4, %v15739_v6  ;;  %v9789_v5 = vcombine.high %v9767_v32, %v9767_v32  ;;  %v12559_v1 = vld [vmem:[%s17500_s5 + $0x88] sm:$0xff]  }
 0x544   : > { %v10873_v29 = vcombine.low %v9743_v53, %v9767_v32  ;;  %v9808_v12 = vcombine.high %v9800_v7, %v9800_v7  ;;  %v9816_v57 = vrot.slane %v9800_v7, %v15739_v6  ;;  %v11304_v7 = vrot.slane %v17183_v37, 6 }
 0x545   : > { %v11121_v61 = vld [vmem:[#allocation6 + $0xa0] ss:$2 sm:$0x3f]  ;;  %v11147_v43 = vld [vmem:[#allocation6 + $0xa1] ss:$2 sm:$0x3f]  ;;  %v9788_v40 = vrot.slane %v9760_v34, %v15739_v6  ;;  %v9790_v41 = vcombine.high %v9774_v22, %v9774_v22  ;;  %v9791_v14 = vcombine.high %v9781_v10, %v9781_v10  ;;  %v10874_v25 = vcombine.low %v9781_v10, %v9789_v5 }
 0x546   : > { %v11162_v20 = vmax.f32 %v11121_v61, %v11147_v43  ;;  %v9830_v60 = vrot.slane %v9808_v12, %v15739_v6  ;;  %v10883_v26 = vrot.slane %v10873_v29, %v15739_v6  ;;  %v9838_v28 = vcombine.high %v9816_v57, %v9816_v57  ;;  %v12562_v5 = vld [vmem:[%s17500_s5 + $0xd8] sm:$0xff]   ;;  %v12564_v12 = vld [vmem:[%s17500_s5 + $0xe0] sm:$0xff]  }
 0x547   : > { %v10875_v46 = vcombine.low %v9791_v14, %v9774_v22  ;;  %v10876_v59 = vcombine.low %v9788_v40, %v9790_v41  ;;  %v9792_v0 = vcombine.high %v9788_v40, %v9788_v40  ;;  %v11189_v36 = vld [vmem:[#allocation7 + $0x48] sm:$0x3f]  ;;  %v10890_v55 = vrot.slane %v10874_v25, %v15739_v6  ;;  %v12563_v43 = vld [vmem:[%s17500_s5 + $0x98] sm:$0xff]   ;;  %v12565_v41 = vld [vmem:[%s17500_s5 + $0xa0] sm:$0xff]  }
 0x548   : > { %11175 = vst [vmem:[#allocation7 + $0x50] sm:$0x3f] %v11162_v20  ;;  %v11195_v56 = vmax.f32 %v11182_v39, %v11189_v36  ;;  %v9840_v49 = vcombine.high %v9830_v60, %v9830_v60  ;;  %v10923_v35 = vcombine.low %v9830_v60, %v9838_v28  ;;  %v11308_v61 = vrot.slane %v17183_v37, 7  ;;  %v12566_v14 = vld [vmem:[%s17500_s5 + $0xe8] sm:$0xff]   ;;  %v12570_v39 = vld [vmem:[%s17500_s5 + $0xf8] sm:$0xff]  }
 0x549   : > { %v10897_v16 = vrot.slane %v10875_v46, %v15739_v6  ;;  %v10904_v44 = vrot.slane %v10876_v59, %v15739_v6  ;;  %v10922_v3 = vcombine.low %v9792_v0, %v9816_v57  ;;  %v10905_v18 = vcombine.low %v10883_v26, %v10890_v55  ;;  %v12567_v25 = vld [vmem:[%s17500_s5 + $0xa8] sm:$0xff]   ;;  %v12568_v59 = vld [vmem:[%s17500_s5 + $0xf0] sm:$0xff]   ;;  %v12721_v36 = vld [vmem:[%s17499_s4] ss:$0 sm:$0xff] }
 0x54a   : > { %v11208_v27 = vadd.f32 %v16927_v30, %v11195_v56  ;;  %v10937_v48 = vrot.slane %v10923_v35, %v15739_v6  ;;  %v10944_v21 = vrot.slane %v9840_v49, %v15739_v6  ;;  %v12557_v30 = vld [vmem:[%s17500_s5 + $0x80] sm:$0xff]   ;;  %v12569_v0 = vld [vmem:[%s17500_s5 + $0xb0] sm:$0xff]   ;;  %v12571_v55 = vld [vmem:[%s17500_s5 + $0xb8] sm:$0xff]   ;;  %v11315_v56 = vrot.slane %v17183_v37, 1 }
 0x54b   : > { %v10906_v58 = vcombine.low %v10897_v16, %v10904_v44  ;;  %v10930_v63 = vrot.slane %v10922_v3, %v15739_v6  ;;  %v10913_v11 = vrot.slane %v10905_v18, %v15739_v6  ;;  %12259 = vmatpush3.bf16.msra.mxu1 %v12557_v30  ;;  %v12576_v30 = vld [vmem:[%s17502_s7] sm:$0xff]  }
 0x54c   : > { %v17189_v24 = vmax.f32 %v11208_v27, 0.0  ;;  %v10959_v19 = vrot.slane %v10944_v21, %v15739_v6  ;;  %12260 = vmatprep.subr.bf16.mxu1 %v12558_v17  ;;  %v5219_v27 = vld [vmem:[#allocation5 + $0xd8] sm:$0x1f]  ;;  %12370 = vmatpush3.bf16.msra.mxu0 %v12576_v30  ;;  %v12574_v30 = vld [vmem:[%s17500_s5 + $0x110] sm:$0xff]  }
 0x54d   : > { %v10920_v31 = vrot.slane %v10906_v58, %v15739_v6  ;;  %v10945_v45 = vcombine.low %v10930_v63, %v10937_v48  ;;  %v5166_v63 = vld [vmem:[#allocation5 + $0xc9] sm:$0x1f]  ;;  %v5271_v48 = vld [vmem:[#allocation5 + $0xda] sm:$0x1f]  ;;  %12371 = vmatprep.subr.bf16.mxu0 %v12796_v54 }
 0x54e   : > { %v11326_v50 = vrot.slane %v17189_v24, 6  ;;  %v11322_v8 = vrot.slane %v17189_v24, 5  ;;  %v11330_v9 = vrot.slane %v17189_v24, 7  ;;  %v12515_v34 = vpack.i.bf16 %v11304_v7, %v17189_v24  ;;  %v5245_v21 = vld [vmem:[#allocation5 + $0xd9] sm:$0x1f] }
 0x54f   : > { %v10921_v33 = vcombine.low %v10913_v11, %v10920_v31  ;;  %v10952_v47 = vrot.slane %v10945_v45, %v15739_v6  ;;  %12261 = vmatpush3.bf16.msra.mxu1 %v12559_v1  ;;  %v11337_v10 = vrot.slane %v17189_v24, 1  ;;  %v11183_v38 = vld [vmem:[#allocation7 + $0x50] sm:$0x3f]  ;;  %v5324_v11 = vld [vmem:[#allocation5 + $0xe9] sm:$0x1f] }
 0x550   : > { %v12505_v4 = vpack.i.bf16 %v11296_v42, %v11326_v50  ;;  %v12500_v32 = vpack.i.bf16 %v11263_v15, %v11322_v8  ;;  %v12561_v15 = vld [vmem:[%s17500_s5 + $0x90] sm:$0xff]   ;;  %v12510_v22 = vpack.i.bf16 %v11300_v52, %v11330_v9  ;;  %12262 = vmatprep.subr.bf16.mxu1 %v12560_v13  ;;  %v5298_v31 = vld [vmem:[#allocation5 + $0xe8] sm:$0x1f]  ;;  %v12579_v42 = vld [vmem:[%s17502_s7 + $0x18] sm:$0xff]  }
 0x551   : > { %11097 = vst [vmem:[#allocation6 + $0xb0] sm:$0xff] %v10921_v33  ;;  %v10960_v53 = vcombine.low %v10952_v47, %v10959_v19  ;;  %v12520_v29 = vpack.i.bf16 %v11308_v61, %v11337_v10  ;;  %v12577_v45 = vld [vmem:[%s17502_s7 + $0x8] sm:$0xff]   ;;  %v12578_v33 = vld [vmem:[%s17502_s7 + $0x10] sm:$0xff]   ;;  %v12580_v50 = vld [vmem:[%s17502_s7 + $0x20] sm:$0xff]  }
 0x552   : > { %12506 = vrot.lane.b32.xlu0 %v12505_v4, %s17555_s13  ;;  %12501 = vrot.lane.b32.xlu1 %v12500_v32, %s17564_s24  ;;  %v12581_v8 = vld [vmem:[%s17502_s7 + $0x28] sm:$0xff]   ;;  %v11320_v32 = vrot.slane %v17189_v24, 4 }
 0x553   : > { %11098 = vst [vmem:[#allocation6 + $0xb8] sm:$0x1f] %v10960_v53  ;;  %12263 = vmatpush3.bf16.msra.mxu1 %v12561_v15  ;;  %12372 = vmatpush3.bf16.msra.mxu0 %v12577_v45 }
 0x554   : > { %12264 = vmatprep.subr.bf16.mxu1 %v12562_v5  ;;  %12373 = vmatprep.subr.bf16.mxu0 %v12796_v54 }
 0x556   : > { %12516 = vrot.lane.b32.xlu0 %v12515_v34, %s17562_s30  ;;  %12511 = vrot.lane.b32.xlu1 %v12510_v22, %s17563_s12 }
 0x557   : > { %12265 = vmatpush3.bf16.msra.mxu1 %v12563_v43  ;;  %12374 = vmatpush3.bf16.msra.mxu0 %v12578_v33 }
 0x558   : > { %12266 = vmatprep.subr.bf16.mxu1 %v12564_v12  ;;  %12375 = vmatprep.subr.bf16.mxu0 %v12796_v54 }
 0x55a   : > { %v11123_v57 = vld [vmem:[#allocation6 + $0xb0] ss:$2 sm:$0x3f]  ;;  %v11149_v20 = vld [vmem:[#allocation6 + $0xb1] ss:$2 sm:$0x3f]  ;;  %12521 = vrot.lane.b32.xlu1 %v12520_v29, %s12798_s25 }
 0x55b   : > { %v11163_v40 = vmax.f32 %v11123_v57, %v11149_v20  ;;  %12267 = vmatpush3.bf16.msra.mxu1 %v12565_v41  ;;  %s17568_s25 = smov 112   ;;  %12376 = vmatpush3.bf16.msra.mxu0 %v12579_v42 }
 0x55c   : > { %12268 = vmatprep.subr.bf16.mxu1 %v12566_v14  ;;  %12377 = vmatprep.subr.bf16.mxu0 %v12796_v54 }
 0x55d   : > { %11176 = vst [vmem:[#allocation7 + $0x58] sm:$0x3f] %v11163_v40 }
 0x55f   : > { %12269 = vmatpush3.bf16.msra.mxu1 %v12567_v25  ;;  %12378 = vmatpush3.bf16.msra.mxu0 %v12580_v50 }
 0x560   : > { %12270 = vmatprep.subr.bf16.mxu1 %v12568_v59  ;;  %12379 = vmatprep.subr.bf16.mxu0 %v12796_v54 }
 0x563   : > { %12271 = vmatpush3.bf16.msra.mxu1 %v12569_v0  ;;  %12380 = vmatpush3.bf16.msra.mxu0 %v12581_v8 }
 0x564   : > { %v11190_v46 = vld [vmem:[#allocation7 + $0x58] sm:$0x3f]  ;;  %12272 = vmatprep.subr.bf16.mxu1 %v12570_v39  ;;  %12381 = vmatprep.subr.bf16.mxu0 %v12796_v54 }
 0x565   : > { %v11196_v60 = vmax.f32 %v11183_v38, %v11190_v46 }
 0x567   : > { %v11209_v26 = vadd.f32 %v12721_v36, %v11196_v60  ;;  %12273 = vmatpush3.bf16.msra.mxu1 %v12571_v55 }
 0x568   : > { %12357 = vmatprep.subr.bf16.mxu1 %v12796_v54 }
 0x569   : > { %v17260_v28 = vmax.f32 %v11209_v26, 0.0 }
 0x56b   : > { %v11346_v16 = vrot.slane %v17260_v28, 5  ;;  %v11342_v44 = vrot.slane %v17260_v28, 4  ;;  %v11368_v18 = vrot.slane %v17260_v28, 2  ;;  %v11364_v35 = vrot.slane %v17260_v28, 1 }
 0x56c   : > { %v11372_v58 = vrot.slane %v17260_v28, 3 }
 0x56d   : > { %v12530_v49 = vpack.i.bf16 %v11315_v56, %v11346_v16  ;;  %v12525_v3 = vpack.i.bf16 %v17183_v37, %v11342_v44  ;;  %v5192_v37 = vld [vmem:[#allocation5 + $0xca] sm:$0x1f] }
 0x56f   : > { %12531 = vrot.lane.b32.xlu1 %v12530_v49, %s17568_s25  ;;  %12526 = vrot.lane.b32.xlu0 %v12525_v3, %s17569_s0  ;;  %s17453_s25 = scalar_lea.hbm %s17506_s11, %s12216_s23 }
 0x573   : > { %11369 = vrot.lane.b32.xlu1 %v11368_v18, %s17555_s13  ;;  %11365 = vrot.lane.b32.xlu0 %v11364_v35, %s17564_s24  ;;  %v12572_v18 = vld [vmem:[%s17500_s5 + $0x100] sm:$0xff]  }
 0x577   : > { %5427 = vrot.lane.b32.xlu1 %v5166_v63, %s17558_s16  ;;  %11373 = vrot.lane.b32.xlu0 %v11372_v58, %s17563_s12  ;;  %v7481_v63 = vcombine.high %v16872_v2, %v16872_v2  ;;  %s12726_s16 = sshll.u32 %s12801_s28, 4  ;;  %s12727_s16 = int_to_ptr.vmem [resolvable:$false] %s12726_s16 }
 0x57b   : > { %5635 = vrot.lane.b32.xlu1 %v5219_v27, %s17556_s14  ;;  %5531 = vrot.lane.b32.xlu0 %v5192_v37, %s17564_s24  ;;  %v5140_v27 = vld [vmem:[#allocation5 + $0xc8] sm:$0x1f]  ;;  %s12728_s14 = scalar_lea.vmem %s12727_s16, 32 }
 0x57c   : > { %v12573_v37 = vld [vmem:[%s17500_s5 + $0x108] sm:$0xff]  }
 0x57f   : > { %5843 = vrot.lane.b32.xlu1 %v5271_v48, %s17557_s15  ;;  %5739 = vrot.lane.b32.xlu0 %v5245_v21, %s17555_s13 }
 0x583   : > { %6051 = vrot.lane.b32.xlu1 %v5324_v11, %s17561_s29  ;;  %5947 = vrot.lane.b32.xlu0 %v5298_v31, %s17563_s12  ;;  %s377_s12 = sand.u32 1, %s12776_s18  }
 0x584   : > { %s378_s22 = scalar_lea.vmem [#allocation8], %s377_s12  ;;  %s12021_s0 = scalar_lea.sflag [#allocation9], %s377_s12 }
 0x585   : > { %s12033_s26 = sshll.u32 %s378_s22, 4  ;;  %s17455_s26 = int_to_ptr.vmem [resolvable:$true] %s12033_s26 }
 0x586   : > { %s12722_s21 = scalar_lea.vmem %s17455_s26, 16  ;;  %p12729_p0 = scmp.lt.s32.totalorder %s17455_s26, %s12727_s16 }
 0x587   : > { %6155 = vrot.lane.b32.xlu0 %v5350_v23, %s17562_s30  ;;  %v7495_v23 = vrot.slane %v7481_v63, %v15739_v6  ;;  %v12586_v63 = vld [vmem:[%s17504_s9 + $0x10] sm:$0xff]   ;;  %p12723_p11 = scmp.ne.s32.totalorder %s17455_s26, %s12722_s21  ;;  %p12730_p1 = scmp.lt.s32.totalorder %s12728_s14, %s12722_s21 }
 0x589   : > { %p12724_p12 = pnand %p12723_p11, %p12900_p5  ;;  %p12731_p2 = por %p12730_p1, %p12729_p0 }
 0x58b   : > { %p12725_p13 = pneg %p12724_p12 }
 0x58d   : > { %p12732_p3 = pnand %p12731_p2, %p12725_p13 }
 0x5c4   : > { %v12502_v47 = vpop.permute.xlu1 %12501  ;;  %v12507_v19 = vpop.permute.xlu0 %12506 }
 0x5c5   : > { %v12504_v17 = vunpack.i.h.bf16 %v12502_v47  ;;  %v12503_v1 = vunpack.i.l.bf16 %v12502_v47  ;;  %v12509_v9 = vunpack.i.h.bf16 %v12507_v19  ;;  %v12508_v13 = vunpack.i.l.bf16 %v12507_v19  ;;  %v12575_v19 = vld [vmem:[%s17500_s5 + $0x118] sm:$0xff]  }
 0x5c6   : > { %v7497_v47 = vcombine.high %v7495_v23, %v7495_v23 }
 0x5c7   : > { %v11350_v53 = vsel %vm6210_vm1, %v17026_v62, %v12504_v17  ;;  %v11357_v7 = vsel %vm6210_vm1, %v11320_v32, %v12503_v1 }
 0x5c8   : > { %v12512_v4 = vpop.permute.xlu1 %12511  ;;  %v12517_v34 = vpop.permute.xlu0 %12516  ;;  %v11351_v10 = vsel %vm6264_vm3, %v11350_v53, %v12509_v9  ;;  %v11358_v5 = vsel %vm6264_vm3, %v11357_v7, %v12508_v13  ;;  %v7525_v13 = vrot.slane %v7497_v47, %v15739_v6  ;;  %v7511_v53 = vrot.slane %v7495_v23, %v15739_v6 }
 0x5c9   : > { %v12514_v52 = vunpack.i.h.bf16 %v12512_v4  ;;  %v12513_v15 = vunpack.i.l.bf16 %v12512_v4  ;;  %v12519_v61 = vunpack.i.h.bf16 %v12517_v34  ;;  %v12518_v43 = vunpack.i.l.bf16 %v12517_v34 }
 0x5cb   : > { %v11352_v29 = vsel %vm6318_vm5, %v11351_v10, %v12514_v52  ;;  %v11359_v24 = vsel %vm6318_vm5, %v11358_v5, %v12513_v15  ;;  %v12123_v10 = vcombine.high %v7511_v53, %v7525_v13 }
 0x5cc   : > { %v12522_v22 = vpop.permute.xlu1 %12521  ;;  %v11353_v62 = vsel %vm6372_vm7, %v11352_v29, %v12519_v61  ;;  %v11360_v20 = vsel %vm6372_vm7, %v11359_v24, %v12518_v43 }
 0x5cd   : > { %v12524_v12 = vunpack.i.h.bf16 %v12522_v22  ;;  %v12523_v57 = vunpack.i.l.bf16 %v12522_v22  ;;  %v8549_v22 = vcombine.low %v7511_v53, %v7525_v13 }
 0x5cf   : > { %v11354_v59 = vsel %vm11279_vm11, %v11353_v62, %v12524_v12  ;;  %v11361_v0 = vsel %vm11279_vm11, %v11360_v20, %v12523_v57  ;;  %v8559_v24 = vrot.slane %v8549_v22, %v15739_v6  ;;  %v8566_v12 = vrot.slane %v12123_v10, %v15739_v6 }
 0x5e1   : > { %v12532_v40 = vpop.permute.xlu1 %12531  ;;  %v12527_v41 = vpop.permute.xlu0 %12526 }
 0x5e2   : > { %v12534_v14 = vunpack.i.h.bf16 %v12532_v40  ;;  %v12533_v25 = vunpack.i.l.bf16 %v12532_v40  ;;  %v12529_v38 = vunpack.i.h.bf16 %v12527_v41  ;;  %v12528_v46 = vunpack.i.l.bf16 %v12527_v41 }
 0x5e4   : > { %v11355_v60 = vsel %vm11281_vm12, %v11354_v59, %v12529_v38  ;;  %v11362_v39 = vsel %vm11281_vm12, %v11361_v0, %v12528_v46  ;;  %v8581_v46 = vcombine.low %v8559_v24, %v8566_v12 }
 0x5e5   : > { %v11370_v36 = vpop.permute.xlu1 %11369  ;;  %v11366_v26 = vpop.permute.xlu0 %11365  ;;  %v11363_v55 = vsel %vm11283_vm13, %v11362_v39, %v12533_v25  ;;  %v11356_v56 = vsel %vm11283_vm13, %v11355_v60, %v12534_v14 }
 0x5e6   : > { %v11382_v16 = vrot.slane %v11363_v55, 4  ;;  %v11381_v44 = vrot.slane %v11356_v56, 4  ;;  %v11376_v31 = vsel %vm6210_vm1, %v17260_v28, %v11366_v26  ;;  %v8589_v55 = vrot.slane %v8581_v46, %v15739_v6 }
 0x5e7   : > { %v11377_v45 = vsel %vm6264_vm3, %v11376_v31, %v11370_v36 }
 0x5e8   : > { %v11391_v49 = vpack.c.bf16 %v11382_v16, %v11382_v16  ;;  %v11390_v3 = vpack.c.bf16 %v11381_v44, %v11381_v44 }
 0x5e9   : > { %v5428_v35 = vpop.permute.xlu1 %5427  ;;  %v11374_v58 = vpop.permute.xlu0 %11373 }
 0x5ea   : > { %11757 = vmatprep.mubr.bf16.mxu1 %v11391_v49  ;;  %v6209_v48 = vsel %vm6183_vm0, %v5140_v27, %v5428_v35  ;;  %v11378_v8 = vsel %vm6318_vm5, %v11377_v45, %v11374_v58  ;;  %v12584_v35 = vld [vmem:[%s17504_s9] sm:$0xff]   ;;  %v12585_v58 = vld [vmem:[%s17504_s9 + $0x8] sm:$0xff]   ;;  %v12587_v27 = vld [vmem:[%s17504_s9 + $0x18] sm:$0xff]  }
 0x5eb   : > { %11758 = vmatmul.mubr.bf16.vlgmr.msra.gmra.mrb[4].mxu1 %v11390_v3  ;;  %v11386_v17 = vrot.slane %v11378_v8, 2  ;;  %v12582_v3 = vld [vmem:[%s17502_s7 + $0x30] sm:$0xff]  }
 0x5ec   : > { %12358 = vmatpush3.bf16.msra.mxu1 %v12572_v18  ;;  %12365 = vmatprep.mubr.msk.bf16.mxu1 %vm12797_vm9, %v12796_v54  ;;  %v12583_v18 = vld [vmem:[%s17502_s7 + $0x38] sm:$0xff]  }
 0x5ed   : > { %v5636_v21 = vpop.permute.xlu1 %5635  ;;  %v5532_v11 = vpop.permute.xlu0 %5531  ;;  %12359 = vmatprep.subr.bf16.mxu1 %v12796_v54  ;;  %v11392_v7 = vpack.c.bf16 %v11386_v17, %v11386_v17  ;;  %12382 = vmatpush3.bf16.msra.mxu0 %v12582_v3 }
 0x5ee   : > { %v6236_v2 = vsel %vm6210_vm1, %v6209_v48, %v5532_v11  ;;  %12383 = vmatprep.subr.bf16.mxu0 %v12796_v54  ;;  %v12589_v48 = vld [vmem:[%s17504_s9 + $0x28] sm:$0xff]  }
 0x5ef   : > { %v6263_v42 = vsel %vm6237_vm2, %v6236_v2, %v5636_v21  ;;  %v11465_v21 = vld [vmem:[%s17501_s6] sm:$0x1] }
 0x5f0   : > { %12360 = vmatpush3.bf16.msra.mxu1 %v12573_v37  ;;  %v12588_v37 = vld [vmem:[%s17504_s9 + $0x20] sm:$0xff]  }
 0x5f1   : > { %v5844_v33 = vpop.permute.xlu1 %5843  ;;  %v5740_v50 = vpop.permute.xlu0 %5739  ;;  %12361 = vmatprep.subr.bf16.mxu1 %v12796_v54  ;;  %12384 = vmatpush3.bf16.msra.mxu0 %v12583_v18 }
 0x5f2   : > { %v6290_v28 = vsel %vm6264_vm3, %v6263_v42, %v5740_v50 }
 0x5f3   : > { %v6317_v1 = vsel %vm6291_vm4, %v6290_v28, %v5844_v33  ;;  %v9793_v28 = vcombine.high %v17165_v51, %v17165_v51 }
 0x5f4   : > { %12362 = vmatpush3.bf16.msra.mxu1 %v12574_v30 }
 0x5f5   : > { %v5948_v4 = vpop.permute.xlu0 %5947  ;;  %12363 = vmatprep.subr.bf16.mxu1 %v12796_v54  ;;  %v6052_v32 = vpop.permute.xlu1 %6051 }
 0x5f6   : > { %v6344_v9 = vsel %vm6318_vm5, %v6317_v1, %v5948_v4  ;;  %v9807_v4 = vrot.slane %v9793_v28, %v15739_v6 }
 0x5f7   : > { %v6371_v52 = vsel %vm6345_vm6, %v6344_v9, %v6052_v32 }
 0x5f8   : > { %12364 = vmatpush3.bf16.msra.mxu1 %v12575_v19  ;;  %v9809_v32 = vcombine.high %v9807_v4, %v9807_v4  ;;  %v9823_v13 = vrot.slane %v9807_v4, %v15739_v6 }
 0x5f9   : > { %v6156_v15 = vpop.permute.xlu0 %6155  ;;  %12389 = vmatprep.subr.bf16.mxu1 %v12796_v54 }
 0x5fa   : > { %v6398_v34 = vsel %vm6372_vm7, %v6371_v52, %v6156_v15  ;;  %v9837_v9 = vrot.slane %v9809_v32, %v15739_v6 }
 0x5fb   : > { %v7530_v5 = vcombine.high %v6398_v34, %v6398_v34  ;;  %v7537_v61 = vrot.slane %v6398_v34, %v15739_v6  ;;  %12366 = vmatmul.mubr.msk.bf16.vlgmr.msra.gmra.mrb[8].mxu1 %vm6372_vm7, %v11392_v7 }
 0x5fc   : > { %12405 = vmatprep.mubr.msk.bf16.mxu1 %vm12797_vm9, %v12796_v54  ;;  %12390 = vmatpush3.bf16.msra.mxu1 %v12584_v35  ;;  %v10961_v53 = vcombine.low %v9823_v13, %v9837_v9  ;;  %v12159_v7 = vcombine.high %v9823_v13, %v9837_v9 }
 0x5fd   : > { %v7544_v43 = vrot.slane %v7530_v5, %v15739_v6  ;;  %v7545_v29 = vcombine.high %v7537_v61, %v7537_v61  ;;  %v7552_v57 = vrot.slane %v7537_v61, %v15739_v6  ;;  %12391 = vmatprep.subr.bf16.mxu1 %v12796_v54 }
 0x5fe   : > { %v10978_v24 = vrot.slane %v12159_v7, %v15739_v6 }
 0x5ff   : > { %v7566_v62 = vrot.slane %v7545_v29, %v15739_v6  ;;  %v7559_v20 = vrot.slane %v7544_v43, %v15739_v6  ;;  %v10971_v29 = vrot.slane %v10961_v53, %v15739_v6 }
 0x600   : > { %12392 = vmatpush3.bf16.msra.mxu1 %v12585_v58  ;;  %v12590_v58 = vld [vmem:[%s17504_s9 + $0x30] sm:$0xff]  }
 0x601   : > { %v8551_v40 = vcombine.low %v7552_v57, %v7566_v62  ;;  %v12124_v41 = vcombine.high %v7552_v57, %v7566_v62  ;;  %v12252_v38 = vpop.f32.mrb[0].mxu1  ;;  %v8604_v60 = vrot.slane %v7559_v20, %v15739_v6  ;;  %12393 = vmatprep.subr.bf16.mxu1 %v12796_v54 }
 0x602   : > { %v12253_v59 = vpop.f32.mrb[1].mxu1 }
 0x603   : > { %v8573_v14 = vrot.slane %v8551_v40, %v15739_v6  ;;  %v8580_v25 = vrot.slane %v12124_v41, %v15739_v6  ;;  %v12254_v39 = vadd.f32 %v12253_v59, %v12252_v38  ;;  %v12255_v36 = vpop.f32.mrb[2].mxu1  ;;  %v8611_v44 = vrot.slane %v8604_v60, %v15739_v6 }
 0x604   : > { %v12256_v26 = vpop.f32.mrb[3].mxu1  ;;  %12394 = vmatpush3.bf16.msra.mxu1 %v12586_v63  ;;  %v10993_v38 = vcombine.low %v10971_v29, %v10978_v24  ;;  %v12591_v63 = vld [vmem:[%s17504_s9 + $0x38] sm:$0xff]  }
 0x605   : > { %v8582_v0 = vcombine.low %v8573_v14, %v8580_v25  ;;  %12395 = vmatprep.subr.bf16.mxu1 %v12796_v54  ;;  %v11720_v2 = vadd.f32 %v12254_v39, %v11465_v21 }
 0x607   : > { %v8596_v56 = vrot.slane %v8582_v0, %v15739_v6 }
 0x608   : > { %12396 = vmatpush3.bf16.msra.mxu1 %v12587_v27 }
 0x609   : > { %v8597_v16 = vcombine.low %v8589_v55, %v8596_v56  ;;  %12397 = vmatprep.subr.bf16.mxu1 %v12796_v54  ;;  %v11001_v56 = vrot.slane %v10993_v38, %v15739_v6 }
 0x60b   : > { %v8644_v49 = vpack.c.bf16 %v8611_v44, %v8597_v16 }
 0x60c   : > { %12398 = vmatpush3.bf16.msra.mxu1 %v12588_v37 }
 0x60d   : > { %12354 = vmatmul.mubr.msk.bf16.gmra.mrb[40].mxu0 %vm8681_vm10, %v8644_v49  ;;  %12399 = vmatprep.subr.bf16.mxu1 %v12796_v54 }
 0x60e   : > { %12385 = vmatprep.mubr.msk.bf16.mxu0 %vm12797_vm9, %v12796_v54 }
 0x610   : > { %12400 = vmatpush3.bf16.msra.mxu1 %v12589_v48 }
 0x611   : > { %12401 = vmatprep.subr.bf16.mxu1 %v12796_v54 }
 0x614   : > { %12402 = vmatpush3.bf16.msra.mxu1 %v12590_v58 }
 0x615   : > { %12403 = vmatprep.subr.bf16.mxu1 %v12796_v54 }
 0x618   : > { %12404 = vmatpush3.bf16.msra.mxu1 %v12591_v63 }
 0x6be   : > { %v12274_v11 = vpop.f32.mrb[4].mxu1 }
 0x6bf   : > { %v12275_v31 = vpop.f32.mrb[5].mxu1 }
 0x6c0   : > { %v12276_v23 = vadd.f32 %v12275_v31, %v12274_v11  ;;  %v12277_v30 = vpop.f32.mrb[6].mxu1 }
 0x6c1   : > { %v12278_v45 = vpop.f32.mrb[7].mxu1 }
 0x6c2   : > { %v11760_v33 = vadd.f32 %v12276_v23, %v11720_v2  ;;  %v11930_v23 = vld [vmem:[%s17505_s10] sm:$0x1] }
 0x6ce   : > { %v11799_v42 = vpop.f32.mrb[8].mxu1 }
 0x6cf   : > { %v11800_v50 = vadd.f32 %v11799_v42, %v11760_v33  ;;  %v12367_v8 = vpop.f32.mrb[9].mxu1 }
 0x6d0   : > { %v11802_v47 = vpop.f32.mrb[10].mxu1 }
 0x6d1   : > { %v11805_v19 = vmax.f32 %v11800_v50, 0.0  ;;  %v12368_v17 = vpop.f32.mrb[11].mxu1 }
 0x6d3   : > { %v11806_v1 = vpack.c.bf16 %v11805_v19, %v11805_v19 }
 0x6d5   : > { %12386 = vmatmul.mubr.bf16.vlgmr.msra.gmra.mrb[44].mxu0 %v11806_v1 }
 0x6e0   : > { %v8833_v52 = vpop.f32.mrb[40].mxu0 }
 0x6e1   : > { %v9842_v15 = vcombine.high %v8833_v52, %v8833_v52  ;;  %v9849_v34 = vrot.slane %v8833_v52, %v15739_v6  ;;  %v12355_v22 = vpop.f32.mrb[41].mxu0 }
 0x6e2   : > { %v8836_v51 = vpop.f32.mrb[42].mxu0 }
 0x6e3   : > { %v9856_v10 = vrot.slane %v9842_v15, %v15739_v6  ;;  %v9857_v5 = vcombine.high %v9849_v34, %v9849_v34  ;;  %v9897_v61 = vrot.slane %v8836_v51, %v15739_v6  ;;  %v12356_v43 = vpop.f32.mrb[43].mxu0  ;;  %v9865_v57 = vrot.slane %v9849_v34, %v15739_v6 }
 0x6e5   : > { %v9858_v12 = vcombine.high %v9856_v10, %v9856_v10  ;;  %v9879_v62 = vrot.slane %v9857_v5, %v15739_v6  ;;  %v9872_v20 = vrot.slane %v9856_v10, %v15739_v6  ;;  %v9904_v25 = vrot.slane %v9897_v61, %v15739_v6 }
 0x6e7   : > { %v9886_v40 = vrot.slane %v9858_v12, %v15739_v6  ;;  %v10963_v41 = vcombine.low %v9865_v57, %v9879_v62  ;;  %v12160_v14 = vcombine.high %v9865_v57, %v9879_v62  ;;  %v11032_v55 = vrot.slane %v9904_v25, %v15739_v6 }
 0x6e9   : > { %v10985_v46 = vrot.slane %v10963_v41, %v15739_v6  ;;  %v10992_v59 = vrot.slane %v12160_v14, %v15739_v6  ;;  %v11010_v0 = vcombine.low %v9872_v20, %v9886_v40  ;;  %v12161_v60 = vcombine.high %v9872_v20, %v9886_v40 }
 0x6ea   : > { %v11047_v18 = vrot.slane %v11032_v55, %v15739_v6 }
 0x6eb   : > { %v10994_v39 = vcombine.low %v10985_v46, %v10992_v59  ;;  %v11018_v36 = vrot.slane %v11010_v0, %v15739_v6  ;;  %v11025_v26 = vrot.slane %v12161_v60, %v15739_v6 }
 0x6ed   : > { %v11008_v16 = vrot.slane %v10994_v39, %v15739_v6  ;;  %v11033_v44 = vcombine.low %v11018_v36, %v11025_v26 }
 0x6ef   : > { %v11009_v49 = vcombine.low %v11001_v56, %v11008_v16  ;;  %v11040_v3 = vrot.slane %v11033_v44, %v15739_v6  ;;  %v11823_v6 = vld [vmem:[%s17503_s8] sm:$0x1] }
 0x6f1   : > { %11099 = vst [vmem:[#allocation6 + $0xc0] sm:$0xff] %v11009_v49  ;;  %v11048_v35 = vcombine.low %v11040_v3, %v11047_v18 }
 0x6f3   : > { %11100 = vst [vmem:[#allocation6 + $0xc8] sm:$0x1f] %v11048_v35 }
 0x7a8   : > { %v11906_v27 = vpop.f32.mrb[44].mxu0 }
 0x7a9   : > { %v11907_v37 = vadd.f32 %v11906_v27, %v11823_v6  ;;  %v12387_v48 = vpop.f32.mrb[45].mxu0 }
 0x7aa   : > { %v11909_v21 = vpop.f32.mrb[46].mxu0 }
 0x7ab   : > { %v11912_v11 = vmax.f32 %v11907_v37, 0.0  ;;  %v12388_v31 = vpop.f32.mrb[47].mxu0 }
 0x7ad   : > { %v11913_v2 = vpack.c.bf16 %v11912_v11, %v11912_v11 }
 0x7af   : > { %12406 = vmatmul.mubr.bf16.vlgmr.msra.gmra.mrb[12].mxu1 %v11913_v2 }
 0x882   : > { %v12013_v54 = vpop.f32.mrb[12].mxu1 }
 0x883   : > { %v12014_v30 = vadd.f32 %v12013_v54, %v11930_v23  ;;  %v12407_v45 = vpop.f32.mrb[13].mxu1 }
 0x884   : > { %v12016_v33 = vpop.f32.mrb[14].mxu1 }
 0x885   : > { %12019 = vst [vmem:[%s378_s22] sm:$0x1] %v12014_v30  ;;  %v12408_v42 = vpop.f32.mrb[15].mxu1 }
 0x886   : > { %12735 = shalt.err (!%p12732_p3)
}
 0x887   : > { %s12736_s24 = scalar_lea.hbm %s17453_s25, 16  ;;  %s12740_s29 = scalar_lea.hbm %s17506_s11, 32 }
 0x888   : > { %p12737_p4 = scmp.ne.s32.totalorder %s17453_s25, %s12736_s24  ;;  %p12741_p9 = scmp.lt.u32.totalorder %s17453_s25, %s17506_s11 }
 0x889   : > { %p12742_p10 = scmp.lt.u32.totalorder %s12740_s29, %s12736_s24  ;;  %p12744_p12 = scmp.lt.u32.totalorder %s12736_s24, %s17453_s25 }
 0x88a   : > { %p12738_p7 = pnand %p12737_p4, %p12900_p5 }
 0x88b   : > { %p12743_p11 = por %p12742_p10, %p12741_p9 }
 0x88c   : > { %p12739_p8 = pneg %p12738_p7 }
 0x88d   : > { %p12745_p13 = por %p12744_p12, %p12743_p11 }
 0x88f   : > { %p12746_p0 = pnand %p12745_p13, %p12739_p8 }
 0x891   : > { %12749 = shalt.err (!%p12746_p0)
}
 0x892   : > { %12409 = dma.vmem_to_hbm [thread:$0]  (%p12900_p5), %s17455_s26, 16, %s17453_s25, %s12021_s0  }
 0x893 PF: > { %p12415_p1 = scmp.ge.s32.totalorder %s12784_s20, 2  ;;  %s12045_s19 = sand.u32 1, %s12772_s17  }
 0x894   : > { %s12046_s23 = scalar_lea.sflag [#allocation9], %s12045_s19 }
 0x895   : > { %p12412_p2 = pnand %p12415_p1, %p12904_p6 }
 0x897   : > { %12767 = dma.done.wait (!%p12412_p2), %s12046_s23, 16  }
 0x898   : > { %12769 = vsyncadd (!%p12412_p2), %s12046_s23, 4294967280  ;;  %s17571_s20 = sld [smem:[#allocation12_spill]]  ;;  %s17572_s22 = sld [smem:[#allocation11_spill]] }
 0x899   : > { %s17573_s19 = sld [smem:[#allocation13_spill]]  ;;  %s17574_s17 = smov %s12776_s18 }
 0x89e   : > { %p21_p3 = scmp.ge.s32.totalorder %s17571_s20, 4   ;;  %s17575_s18 = smov %s17572_s22 }
 0x8a0   :  { %23 = sbr.rel (!%p21_p3) target bundleno = 8 (0x8), region = 249 }
 0x8a7   :  { %12050 = vsyncpa [#allocation9], 1 }
 0x8a8   :  { %12052 = vsyncpa [#allocation9 + $0x1], 1 }

</bundles_post_ra>
